<compile_context>
chip_gen: v6e
topology: v6e:2x2x1
jax: 0.10.0
libtpu: 0.0.40
codegen_flags: <defaults>
</compile_context>

<pallas_src>
import jax
import jax.numpy as jnp
from jax import lax
from jax.experimental import pallas as pl
from jax.experimental.pallas import tpu as pltpu

NUM_CLASSES = 10  # stand-in for len(train_dataset.classes); synthetic, deterministic


def _pool_selectors(n_out, n_in):
    """(n_out, n_in) 0/1 matrices selecting even / odd columns via a matmul."""
    r = lax.broadcasted_iota(jnp.int32, (n_out, n_in), 0)
    c = lax.broadcasted_iota(jnp.int32, (n_out, n_in), 1)
    return ((c == 2 * r).astype(jnp.float32),
            (c == 2 * r + 1).astype(jnp.float32))


def _make_yolo_kernel(H, W, C_IN, C1, C2, HID, NCLS):
    H1, W1 = H - 2, W - 2            # conv1 output spatial
    PH1, PW1 = H1 // 2, W1 // 2      # pool1 output spatial
    H2, W2 = PH1 - 2, PW1 - 2        # conv2 output spatial
    PH2, PW2 = H2 // 2, W2 // 2      # pool2 output spatial
    # Only the pool1 rows feeding the (floor-mode) pooled conv2 rows are needed.
    N_P1 = min(PH1, 2 * PH2 + 2)

    def kernel(x_ref, w1_ref, b1_ref, w2_ref, b2_ref,
               wf1_ref, bf1_ref, wf2_ref, bf2_ref,
               o_ref, p1_ref, p2_ref):
        f32 = jnp.float32
        b1 = b1_ref[...]                       # (1, C1)
        b2 = b2_ref[...]                       # (1, C2)
        se1, so1 = _pool_selectors(PW1, W1)    # even/odd column selectors
        se2, so2 = _pool_selectors(PW2, W2)

        def conv1_row(h):                      # -> (W1, C1)
            acc = jnp.zeros((W1, C1), f32)
            for dh in range(3):
                for dw in range(3):
                    lhs = x_ref[0, h + dh, pl.ds(dw, W1), :]       # (W1, C_IN)
                    acc = acc + jnp.dot(lhs, w1_ref[dh, dw],
                                        preferred_element_type=f32)
            return jnp.maximum(acc + b1, 0.0)

        # conv1 + ReLU + 2x2 maxpool (two conv rows at a time) -> p1 scratch.
        for i in range(N_P1):
            m = jnp.maximum(conv1_row(2 * i), conv1_row(2 * i + 1))  # (W1, C1)
            p1_ref[i] = jnp.maximum(
                jnp.dot(se1, m, preferred_element_type=f32),
                jnp.dot(so1, m, preferred_element_type=f32))

        def conv2_row(h):                      # -> (W2, C2)
            acc = jnp.zeros((W2, C2), f32)
            for dh in range(3):
                for dw in range(3):
                    lhs = p1_ref[h + dh, pl.ds(dw, W2), :]         # (W2, C1)
                    acc = acc + jnp.dot(lhs, w2_ref[dh, dw],
                                        preferred_element_type=f32)
            return jnp.maximum(acc + b2, 0.0)

        # conv2 + ReLU + 2x2 maxpool -> p2 scratch.
        for i in range(PH2):
            m = jnp.maximum(conv2_row(2 * i), conv2_row(2 * i + 1))  # (W2, C2)
            p2_ref[i] = jnp.maximum(
                jnp.dot(se2, m, preferred_element_type=f32),
                jnp.dot(so2, m, preferred_element_type=f32))

        # fc1 (NCHW-flatten order pre-folded into wf1 blocks) + ReLU, then fc2.
        acc = jnp.zeros((1, HID), f32)
        for h in range(PH2):
            for w in range(PW2):
                acc = acc + jnp.dot(p2_ref[h, pl.ds(w, 1), :],      # (1, C2)
                                    wf1_ref[h, w],                  # (C2, HID)
                                    preferred_element_type=f32)
        fc1 = jnp.maximum(acc + bf1_ref[...], 0.0)                  # (1, HID)
        logits = jnp.dot(fc1, wf2_ref[...],
                         preferred_element_type=f32) + bf2_ref[...]
        o_ref[0] = logits.astype(o_ref.dtype)

    dims = dict(H1=H1, W1=W1, PH1=PH1, PW1=PW1, H2=H2, W2=W2,
                PH2=PH2, PW2=PW2, N_P1=N_P1)
    return kernel, dims


def yolo_forward(x_nchw, params):
    """Forward pass of the YOLO module.  x_nchw: [B, 3, H, W] float32."""
    x_nchw = x_nchw.astype(jnp.float32)
    B, C_IN, H, W = x_nchw.shape
    w1 = params["w1"].astype(jnp.float32)      # (3, 3, C_IN, C1)
    w2 = params["w2"].astype(jnp.float32)      # (3, 3, C1, C2)
    wf1 = params["wf1"].astype(jnp.float32)    # (C2*PH2*PW2, HID), NCHW-flatten rows
    wf2 = params["wf2"].astype(jnp.float32)    # (HID, NCLS)
    C1, C2 = w1.shape[-1], w2.shape[-1]
    HID, NCLS = wf1.shape[-1], wf2.shape[-1]

    kernel, d = _make_yolo_kernel(H, W, C_IN, C1, C2, HID, NCLS)
    PW1, PH2, PW2, N_P1 = d["PW1"], d["PH2"], d["PW2"], d["N_P1"]
    assert wf1.shape[0] == C2 * PH2 * PW2

    x_nhwc = jnp.transpose(x_nchw, (0, 2, 3, 1))                    # NCHW -> NHWC

    # PyTorch flattens the pool2 activation in (C, H, W) order; regroup the fc1
    # weight into per-(h, w) blocks of shape (C2, HID) so the kernel never has
    # to reorder activation data (one-time, tiny XLA-side transform).
    wf1_blk = wf1.reshape(C2, PH2, PW2, HID).transpose(1, 2, 0, 3)  # (PH2,PW2,C2,HID)

    b1 = params["b1"].reshape(1, C1).astype(jnp.float32)
    b2 = params["b2"].reshape(1, C2).astype(jnp.float32)
    bf1 = params["bf1"].reshape(1, HID).astype(jnp.float32)
    bf2 = params["bf2"].reshape(1, NCLS).astype(jnp.float32)

    out = pl.pallas_call(
        kernel,
        out_shape=jax.ShapeDtypeStruct((B, 1, NCLS), jnp.float32),
        grid=(B,),
        in_specs=[
            pl.BlockSpec((1, H, W, C_IN), lambda b: (b, 0, 0, 0)),       # x
            pl.BlockSpec((3, 3, C_IN, C1), lambda b: (0, 0, 0, 0)),      # w1
            pl.BlockSpec((1, C1), lambda b: (0, 0)),                     # b1
            pl.BlockSpec((3, 3, C1, C2), lambda b: (0, 0, 0, 0)),        # w2
            pl.BlockSpec((1, C2), lambda b: (0, 0)),                     # b2
            pl.BlockSpec((PH2, PW2, C2, HID), lambda b: (0, 0, 0, 0)),   # fc1 weight blocks
            pl.BlockSpec((1, HID), lambda b: (0, 0)),                    # bf1
            pl.BlockSpec((HID, NCLS), lambda b: (0, 0)),                 # fc2 weight
            pl.BlockSpec((1, NCLS), lambda b: (0, 0)),                   # bf2
        ],
        out_specs=pl.BlockSpec((1, 1, NCLS), lambda b: (b, 0, 0)),
        scratch_shapes=[
            pltpu.VMEM((N_P1, PW1, C1), jnp.float32),   # pool1 activation (VMEM only)
            pltpu.VMEM((PH2, PW2, C2), jnp.float32),    # pool2 activation (VMEM only)
        ],
        compiler_params=pltpu.CompilerParams(
            dimension_semantics=("parallel",)),
    )(x_nhwc, w1, b1, w2, b2, wf1_blk, bf1, wf2, bf2)
    return out.reshape(B, NCLS)


def init_params(key, flattened_size):
    """Deterministic synthetic parameters (shapes from the module's __init__)."""
    ks = jax.random.split(key, 8)

    def uinit(k, shape, fan_in):
        bound = 1.0 / jnp.sqrt(fan_in)
        return jax.random.uniform(k, shape, jnp.float32, -bound, bound)

    return {
        "w1":  uinit(ks[0], (3, 3, 3, 32), 3 * 3 * 3),
        "b1":  uinit(ks[1], (32,),          3 * 3 * 3),
        "w2":  uinit(ks[2], (3, 3, 32, 64), 32 * 3 * 3),
        "b2":  uinit(ks[3], (64,),          32 * 3 * 3),
        "wf1": uinit(ks[4], (flattened_size, 128), flattened_size),
        "bf1": uinit(ks[5], (128,),                flattened_size),
        "wf2": uinit(ks[6], (128, NUM_CLASSES), 128),
        "bf2": uinit(ks[7], (NUM_CLASSES,),     128),
    }


if __name__ == "__main__":
    key = jax.random.PRNGKey(0)
    k_x, k_p = jax.random.split(key)

    # Small input consistent with the module: batch=2, 3 channels, 16x16 spatial.
    B, C, H, W = 2, 3, 16, 16
    x = jax.random.normal(k_x, (B, C, H, W), jnp.float32)

    # Shape bookkeeping (matches the lazy fc construction in the PyTorch module):
    # 16 -conv3-> 14 -pool-> 7 -conv3-> 5 -pool-> 2 ; flattened = 64 * 2 * 2 = 256
    oh = ((H - 2) // 2 - 2) // 2
    ow = ((W - 2) // 2 - 2) // 2
    flattened_size = 64 * oh * ow

    params = init_params(k_p, flattened_size)

    fwd = jax.jit(yolo_forward)
    out = fwd(x, params)
    out = jax.block_until_ready(out)
    assert out.shape == (B, NUM_CLASSES), out.shape
    print("KERNEL_OK")
</pallas_src>

<mosaic_0001>
module attributes {stable_mosaic.version = 11 : i64} {
  func.func @kernel(%arg0: i32, %arg1: memref<1x16x16x3xf32, #tpu.memory_space<vmem>>, %arg2: memref<3x3x3x32xf32, #tpu.memory_space<vmem>>, %arg3: memref<1x32xf32, #tpu.memory_space<vmem>>, %arg4: memref<3x3x32x64xf32, #tpu.memory_space<vmem>>, %arg5: memref<1x64xf32, #tpu.memory_space<vmem>>, %arg6: memref<2x2x64x128xf32, #tpu.memory_space<vmem>>, %arg7: memref<1x128xf32, #tpu.memory_space<vmem>>, %arg8: memref<128x10xf32, #tpu.memory_space<vmem>>, %arg9: memref<1x10xf32, #tpu.memory_space<vmem>>, %arg10: memref<1x1x10xf32, #tpu.memory_space<vmem>>, %arg11: memref<6x7x32xf32, #tpu.memory_space<vmem>>, %arg12: memref<2x2x64xf32, #tpu.memory_space<vmem>>) attributes {dimension_semantics = [#tpu.dimension_semantics<parallel>], iteration_bounds = array<i64: 2>, scalar_prefetch = 0 : i64, scratch_operands = 2 : i64, tpu.core_type = #tpu.core_type<tc>, window_params = [{transform_indices = @transform_0, window_bounds = array<i64: 1, 16, 16, 3>}, {pipeline_mode = #tpu.pipeline_mode<synchronous>, transform_indices = @transform_1, window_bounds = array<i64: 3, 3, 3, 32>}, {pipeline_mode = #tpu.pipeline_mode<synchronous>, transform_indices = @transform_2, window_bounds = array<i64: 1, 32>}, {pipeline_mode = #tpu.pipeline_mode<synchronous>, transform_indices = @transform_3, window_bounds = array<i64: 3, 3, 32, 64>}, {pipeline_mode = #tpu.pipeline_mode<synchronous>, transform_indices = @transform_4, window_bounds = array<i64: 1, 64>}, {pipeline_mode = #tpu.pipeline_mode<synchronous>, transform_indices = @transform_5, window_bounds = array<i64: 2, 2, 64, 128>}, {pipeline_mode = #tpu.pipeline_mode<synchronous>, transform_indices = @transform_6, window_bounds = array<i64: 1, 128>}, {pipeline_mode = #tpu.pipeline_mode<synchronous>, transform_indices = @transform_7, window_bounds = array<i64: 128, 10>}, {pipeline_mode = #tpu.pipeline_mode<synchronous>, transform_indices = @transform_8, window_bounds = array<i64: 1, 10>}, {transform_indices = @transform_9, window_bounds = array<i64: 1, 1, 10>}]} {
    %c0 = arith.constant 0 : index
    %c0_0 = arith.constant 0 : index
    %0 = vector.load %arg3[%c0, %c0_0] : memref<1x32xf32, #tpu.memory_space<vmem>>, vector<1x32xf32>
    %c0_1 = arith.constant 0 : index
    %c0_2 = arith.constant 0 : index
    %1 = vector.load %arg5[%c0_1, %c0_2] : memref<1x64xf32, #tpu.memory_space<vmem>>, vector<1x64xf32>
    %2 = tpu.iota {dimensions = array<i32: 0>} : vector<7x14xi32>
    %3 = tpu.iota {dimensions = array<i32: 1>} : vector<7x14xi32>
    %c2_i32 = arith.constant 2 : i32
    %4 = vector.broadcast %c2_i32 : i32 to vector<7x14xi32>
    %5 = arith.muli %4, %2 : vector<7x14xi32>
    %6 = arith.cmpi eq, %3, %5 : vector<7x14xi32>
    %7 = arith.extui %6 : vector<7x14xi1> to vector<7x14xi32>
    %8 = arith.sitofp %7 : vector<7x14xi32> to vector<7x14xf32>
    %c2_i32_3 = arith.constant 2 : i32
    %9 = vector.broadcast %c2_i32_3 : i32 to vector<7x14xi32>
    %10 = arith.muli %9, %2 : vector<7x14xi32>
    %c1_i32 = arith.constant 1 : i32
    %11 = vector.broadcast %c1_i32 : i32 to vector<7x14xi32>
    %12 = arith.addi %10, %11 : vector<7x14xi32>
    %13 = arith.cmpi eq, %3, %12 : vector<7x14xi32>
    %14 = arith.extui %13 : vector<7x14xi1> to vector<7x14xi32>
    %15 = arith.sitofp %14 : vector<7x14xi32> to vector<7x14xf32>
    %16 = tpu.iota {dimensions = array<i32: 0>} : vector<2x5xi32>
    %17 = tpu.iota {dimensions = array<i32: 1>} : vector<2x5xi32>
    %c2_i32_4 = arith.constant 2 : i32
    %18 = vector.broadcast %c2_i32_4 : i32 to vector<2x5xi32>
    %19 = arith.muli %18, %16 : vector<2x5xi32>
    %20 = arith.cmpi eq, %17, %19 : vector<2x5xi32>
    %21 = arith.extui %20 : vector<2x5xi1> to vector<2x5xi32>
    %22 = arith.sitofp %21 : vector<2x5xi32> to vector<2x5xf32>
    %c2_i32_5 = arith.constant 2 : i32
    %23 = vector.broadcast %c2_i32_5 : i32 to vector<2x5xi32>
    %24 = arith.muli %23, %16 : vector<2x5xi32>
    %c1_i32_6 = arith.constant 1 : i32
    %25 = vector.broadcast %c1_i32_6 : i32 to vector<2x5xi32>
    %26 = arith.addi %24, %25 : vector<2x5xi32>
    %27 = arith.cmpi eq, %17, %26 : vector<2x5xi32>
    %28 = arith.extui %27 : vector<2x5xi1> to vector<2x5xi32>
    %29 = arith.sitofp %28 : vector<2x5xi32> to vector<2x5xf32>
    %cst = arith.constant 0.000000e+00 : f32
    %30 = vector.broadcast %cst : f32 to vector<14x32xf32>
    %c0_7 = arith.constant 0 : index
    %c0_8 = arith.constant 0 : index
    %c0_9 = arith.constant 0 : index
    %c0_10 = arith.constant 0 : index
    %31 = vector.load %arg1[%c0_7, %c0_8, %c0_9, %c0_10] : memref<1x16x16x3xf32, #tpu.memory_space<vmem>>, vector<1x1x14x3xf32>
    %32 = vector.shape_cast %31 : vector<1x1x14x3xf32> to vector<14x3xf32>
    %c0_11 = arith.constant 0 : index
    %c0_12 = arith.constant 0 : index
    %c0_13 = arith.constant 0 : index
    %c0_14 = arith.constant 0 : index
    %33 = vector.load %arg2[%c0_11, %c0_12, %c0_13, %c0_14] : memref<3x3x3x32xf32, #tpu.memory_space<vmem>>, vector<1x1x3x32xf32>
    %34 = vector.shape_cast %33 : vector<1x1x3x32xf32> to vector<3x32xf32>
    %cst_15 = arith.constant dense<0.000000e+00> : vector<14x32xf32>
    %35 = tpu.matmul %32, %34, %cst_15 {dimension_numbers = #tpu.dot_dimension_numbers<[1], [0], [0], [1], [0, 0, 1, 1], [], []>} : vector<14x3xf32>, vector<3x32xf32>, vector<14x32xf32> -> vector<14x32xf32>
    %36 = arith.addf %30, %35 : vector<14x32xf32>
    %c0_16 = arith.constant 0 : index
    %c0_17 = arith.constant 0 : index
    %c1 = arith.constant 1 : index
    %c0_18 = arith.constant 0 : index
    %37 = vector.load %arg1[%c0_16, %c0_17, %c1, %c0_18] : memref<1x16x16x3xf32, #tpu.memory_space<vmem>>, vector<1x1x14x3xf32>
    %38 = vector.shape_cast %37 : vector<1x1x14x3xf32> to vector<14x3xf32>
    %c0_19 = arith.constant 0 : index
    %c1_20 = arith.constant 1 : index
    %c0_21 = arith.constant 0 : index
    %c0_22 = arith.constant 0 : index
    %39 = vector.load %arg2[%c0_19, %c1_20, %c0_21, %c0_22] : memref<3x3x3x32xf32, #tpu.memory_space<vmem>>, vector<1x1x3x32xf32>
    %40 = vector.shape_cast %39 : vector<1x1x3x32xf32> to vector<3x32xf32>
    %cst_23 = arith.constant dense<0.000000e+00> : vector<14x32xf32>
    %41 = tpu.matmul %38, %40, %cst_23 {dimension_numbers = #tpu.dot_dimension_numbers<[1], [0], [0], [1], [0, 0, 1, 1], [], []>} : vector<14x3xf32>, vector<3x32xf32>, vector<14x32xf32> -> vector<14x32xf32>
    %42 = arith.addf %36, %41 : vector<14x32xf32>
    %c0_24 = arith.constant 0 : index
    %c0_25 = arith.constant 0 : index
    %c2 = arith.constant 2 : index
    %c0_26 = arith.constant 0 : index
    %43 = vector.load %arg1[%c0_24, %c0_25, %c2, %c0_26] : memref<1x16x16x3xf32, #tpu.memory_space<vmem>>, vector<1x1x14x3xf32>
    %44 = vector.shape_cast %43 : vector<1x1x14x3xf32> to vector<14x3xf32>
    %c0_27 = arith.constant 0 : index
    %c2_28 = arith.constant 2 : index
    %c0_29 = arith.constant 0 : index
    %c0_30 = arith.constant 0 : index
    %45 = vector.load %arg2[%c0_27, %c2_28, %c0_29, %c0_30] : memref<3x3x3x32xf32, #tpu.memory_space<vmem>>, vector<1x1x3x32xf32>
    %46 = vector.shape_cast %45 : vector<1x1x3x32xf32> to vector<3x32xf32>
    %cst_31 = arith.constant dense<0.000000e+00> : vector<14x32xf32>
    %47 = tpu.matmul %44, %46, %cst_31 {dimension_numbers = #tpu.dot_dimension_numbers<[1], [0], [0], [1], [0, 0, 1, 1], [], []>} : vector<14x3xf32>, vector<3x32xf32>, vector<14x32xf32> -> vector<14x32xf32>
    %48 = arith.addf %42, %47 : vector<14x32xf32>
    %c0_32 = arith.constant 0 : index
    %c1_33 = arith.constant 1 : index
    %c0_34 = arith.constant 0 : index
    %c0_35 = arith.constant 0 : index
    %49 = vector.load %arg1[%c0_32, %c1_33, %c0_34, %c0_35] : memref<1x16x16x3xf32, #tpu.memory_space<vmem>>, vector<1x1x14x3xf32>
    %50 = vector.shape_cast %49 : vector<1x1x14x3xf32> to vector<14x3xf32>
    %c1_36 = arith.constant 1 : index
    %c0_37 = arith.constant 0 : index
    %c0_38 = arith.constant 0 : index
    %c0_39 = arith.constant 0 : index
    %51 = vector.load %arg2[%c1_36, %c0_37, %c0_38, %c0_39] : memref<3x3x3x32xf32, #tpu.memory_space<vmem>>, vector<1x1x3x32xf32>
    %52 = vector.shape_cast %51 : vector<1x1x3x32xf32> to vector<3x32xf32>
    %cst_40 = arith.constant dense<0.000000e+00> : vector<14x32xf32>
    %53 = tpu.matmul %50, %52, %cst_40 {dimension_numbers = #tpu.dot_dimension_numbers<[1], [0], [0], [1], [0, 0, 1, 1], [], []>} : vector<14x3xf32>, vector<3x32xf32>, vector<14x32xf32> -> vector<14x32xf32>
    %54 = arith.addf %48, %53 : vector<14x32xf32>
    %c0_41 = arith.constant 0 : index
    %c1_42 = arith.constant 1 : index
    %c1_43 = arith.constant 1 : index
    %c0_44 = arith.constant 0 : index
    %55 = vector.load %arg1[%c0_41, %c1_42, %c1_43, %c0_44] : memref<1x16x16x3xf32, #tpu.memory_space<vmem>>, vector<1x1x14x3xf32>
    %56 = vector.shape_cast %55 : vector<1x1x14x3xf32> to vector<14x3xf32>
    %c1_45 = arith.constant 1 : index
    %c1_46 = arith.constant 1 : index
    %c0_47 = arith.constant 0 : index
    %c0_48 = arith.constant 0 : index
    %57 = vector.load %arg2[%c1_45, %c1_46, %c0_47, %c0_48] : memref<3x3x3x32xf32, #tpu.memory_space<vmem>>, vector<1x1x3x32xf32>
    %58 = vector.shape_cast %57 : vector<1x1x3x32xf32> to vector<3x32xf32>
    %cst_49 = arith.constant dense<0.000000e+00> : vector<14x32xf32>
    %59 = tpu.matmul %56, %58, %cst_49 {dimension_numbers = #tpu.dot_dimension_numbers<[1], [0], [0], [1], [0, 0, 1, 1], [], []>} : vector<14x3xf32>, vector<3x32xf32>, vector<14x32xf32> -> vector<14x32xf32>
    %60 = arith.addf %54, %59 : vector<14x32xf32>
    %c0_50 = arith.constant 0 : index
    %c1_51 = arith.constant 1 : index
    %c2_52 = arith.constant 2 : index
    %c0_53 = arith.constant 0 : index
    %61 = vector.load %arg1[%c0_50, %c1_51, %c2_52, %c0_53] : memref<1x16x16x3xf32, #tpu.memory_space<vmem>>, vector<1x1x14x3xf32>
    %62 = vector.shape_cast %61 : vector<1x1x14x3xf32> to vector<14x3xf32>
    %c1_54 = arith.constant 1 : index
    %c2_55 = arith.constant 2 : index
    %c0_56 = arith.constant 0 : index
    %c0_57 = arith.constant 0 : index
    %63 = vector.load %arg2[%c1_54, %c2_55, %c0_56, %c0_57] : memref<3x3x3x32xf32, #tpu.memory_space<vmem>>, vector<1x1x3x32xf32>
    %64 = vector.shape_cast %63 : vector<1x1x3x32xf32> to vector<3x32xf32>
    %cst_58 = arith.constant dense<0.000000e+00> : vector<14x32xf32>
    %65 = tpu.matmul %62, %64, %cst_58 {dimension_numbers = #tpu.dot_dimension_numbers<[1], [0], [0], [1], [0, 0, 1, 1], [], []>} : vector<14x3xf32>, vector<3x32xf32>, vector<14x32xf32> -> vector<14x32xf32>
    %66 = arith.addf %60, %65 : vector<14x32xf32>
    %c0_59 = arith.constant 0 : index
    %c2_60 = arith.constant 2 : index
    %c0_61 = arith.constant 0 : index
    %c0_62 = arith.constant 0 : index
    %67 = vector.load %arg1[%c0_59, %c2_60, %c0_61, %c0_62] : memref<1x16x16x3xf32, #tpu.memory_space<vmem>>, vector<1x1x14x3xf32>
    %68 = vector.shape_cast %67 : vector<1x1x14x3xf32> to vector<14x3xf32>
    %c2_63 = arith.constant 2 : index
    %c0_64 = arith.constant 0 : index
    %c0_65 = arith.constant 0 : index
    %c0_66 = arith.constant 0 : index
    %69 = vector.load %arg2[%c2_63, %c0_64, %c0_65, %c0_66] : memref<3x3x3x32xf32, #tpu.memory_space<vmem>>, vector<1x1x3x32xf32>
    %70 = vector.shape_cast %69 : vector<1x1x3x32xf32> to vector<3x32xf32>
    %cst_67 = arith.constant dense<0.000000e+00> : vector<14x32xf32>
    %71 = tpu.matmul %68, %70, %cst_67 {dimension_numbers = #tpu.dot_dimension_numbers<[1], [0], [0], [1], [0, 0, 1, 1], [], []>} : vector<14x3xf32>, vector<3x32xf32>, vector<14x32xf32> -> vector<14x32xf32>
    %72 = arith.addf %66, %71 : vector<14x32xf32>
    %c0_68 = arith.constant 0 : index
    %c2_69 = arith.constant 2 : index
    %c1_70 = arith.constant 1 : index
    %c0_71 = arith.constant 0 : index
    %73 = vector.load %arg1[%c0_68, %c2_69, %c1_70, %c0_71] : memref<1x16x16x3xf32, #tpu.memory_space<vmem>>, vector<1x1x14x3xf32>
    %74 = vector.shape_cast %73 : vector<1x1x14x3xf32> to vector<14x3xf32>
    %c2_72 = arith.constant 2 : index
    %c1_73 = arith.constant 1 : index
    %c0_74 = arith.constant 0 : index
    %c0_75 = arith.constant 0 : index
    %75 = vector.load %arg2[%c2_72, %c1_73, %c0_74, %c0_75] : memref<3x3x3x32xf32, #tpu.memory_space<vmem>>, vector<1x1x3x32xf32>
    %76 = vector.shape_cast %75 : vector<1x1x3x32xf32> to vector<3x32xf32>
    %cst_76 = arith.constant dense<0.000000e+00> : vector<14x32xf32>
    %77 = tpu.matmul %74, %76, %cst_76 {dimension_numbers = #tpu.dot_dimension_numbers<[1], [0], [0], [1], [0, 0, 1, 1], [], []>} : vector<14x3xf32>, vector<3x32xf32>, vector<14x32xf32> -> vector<14x32xf32>
    %78 = arith.addf %72, %77 : vector<14x32xf32>
    %c0_77 = arith.constant 0 : index
    %c2_78 = arith.constant 2 : index
    %c2_79 = arith.constant 2 : index
    %c0_80 = arith.constant 0 : index
    %79 = vector.load %arg1[%c0_77, %c2_78, %c2_79, %c0_80] : memref<1x16x16x3xf32, #tpu.memory_space<vmem>>, vector<1x1x14x3xf32>
    %80 = vector.shape_cast %79 : vector<1x1x14x3xf32> to vector<14x3xf32>
    %c2_81 = arith.constant 2 : index
    %c2_82 = arith.constant 2 : index
    %c0_83 = arith.constant 0 : index
    %c0_84 = arith.constant 0 : index
    %81 = vector.load %arg2[%c2_81, %c2_82, %c0_83, %c0_84] : memref<3x3x3x32xf32, #tpu.memory_space<vmem>>, vector<1x1x3x32xf32>
    %82 = vector.shape_cast %81 : vector<1x1x3x32xf32> to vector<3x32xf32>
    %cst_85 = arith.constant dense<0.000000e+00> : vector<14x32xf32>
    %83 = tpu.matmul %80, %82, %cst_85 {dimension_numbers = #tpu.dot_dimension_numbers<[1], [0], [0], [1], [0, 0, 1, 1], [], []>} : vector<14x3xf32>, vector<3x32xf32>, vector<14x32xf32> -> vector<14x32xf32>
    %84 = arith.addf %78, %83 : vector<14x32xf32>
    %85 = vector.broadcast %0 : vector<1x32xf32> to vector<14x32xf32>
    %86 = arith.addf %84, %85 : vector<14x32xf32>
    %cst_86 = arith.constant 0.000000e+00 : f32
    %87 = vector.broadcast %cst_86 : f32 to vector<14x32xf32>
    %88 = arith.maximumf %86, %87 : vector<14x32xf32>
    %cst_87 = arith.constant 0.000000e+00 : f32
    %89 = vector.broadcast %cst_87 : f32 to vector<14x32xf32>
    %c0_88 = arith.constant 0 : index
    %c1_89 = arith.constant 1 : index
    %c0_90 = arith.constant 0 : index
    %c0_91 = arith.constant 0 : index
    %90 = vector.load %arg1[%c0_88, %c1_89, %c0_90, %c0_91] : memref<1x16x16x3xf32, #tpu.memory_space<vmem>>, vector<1x1x14x3xf32>
    %91 = vector.shape_cast %90 : vector<1x1x14x3xf32> to vector<14x3xf32>
    %c0_92 = arith.constant 0 : index
    %c0_93 = arith.constant 0 : index
    %c0_94 = arith.constant 0 : index
    %c0_95 = arith.constant 0 : index
    %92 = vector.load %arg2[%c0_92, %c0_93, %c0_94, %c0_95] : memref<3x3x3x32xf32, #tpu.memory_space<vmem>>, vector<1x1x3x32xf32>
    %93 = vector.shape_cast %92 : vector<1x1x3x32xf32> to vector<3x32xf32>
    %cst_96 = arith.constant dense<0.000000e+00> : vector<14x32xf32>
    %94 = tpu.matmul %91, %93, %cst_96 {dimension_numbers = #tpu.dot_dimension_numbers<[1], [0], [0], [1], [0, 0, 1, 1], [], []>} : vector<14x3xf32>, vector<3x32xf32>, vector<14x32xf32> -> vector<14x32xf32>
    %95 = arith.addf %89, %94 : vector<14x32xf32>
    %c0_97 = arith.constant 0 : index
    %c1_98 = arith.constant 1 : index
    %c1_99 = arith.constant 1 : index
    %c0_100 = arith.constant 0 : index
    %96 = vector.load %arg1[%c0_97, %c1_98, %c1_99, %c0_100] : memref<1x16x16x3xf32, #tpu.memory_space<vmem>>, vector<1x1x14x3xf32>
    %97 = vector.shape_cast %96 : vector<1x1x14x3xf32> to vector<14x3xf32>
    %c0_101 = arith.constant 0 : index
    %c1_102 = arith.constant 1 : index
    %c0_103 = arith.constant 0 : index
    %c0_104 = arith.constant 0 : index
    %98 = vector.load %arg2[%c0_101, %c1_102, %c0_103, %c0_104] : memref<3x3x3x32xf32, #tpu.memory_space<vmem>>, vector<1x1x3x32xf32>
    %99 = vector.shape_cast %98 : vector<1x1x3x32xf32> to vector<3x32xf32>
    %cst_105 = arith.constant dense<0.000000e+00> : vector<14x32xf32>
    %100 = tpu.matmul %97, %99, %cst_105 {dimension_numbers = #tpu.dot_dimension_numbers<[1], [0], [0], [1], [0, 0, 1, 1], [], []>} : vector<14x3xf32>, vector<3x32xf32>, vector<14x32xf32> -> vector<14x32xf32>
    %101 = arith.addf %95, %100 : vector<14x32xf32>
    %c0_106 = arith.constant 0 : index
    %c1_107 = arith.constant 1 : index
    %c2_108 = arith.constant 2 : index
    %c0_109 = arith.constant 0 : index
    %102 = vector.load %arg1[%c0_106, %c1_107, %c2_108, %c0_109] : memref<1x16x16x3xf32, #tpu.memory_space<vmem>>, vector<1x1x14x3xf32>
    %103 = vector.shape_cast %102 : vector<1x1x14x3xf32> to vector<14x3xf32>
    %c0_110 = arith.constant 0 : index
    %c2_111 = arith.constant 2 : index
    %c0_112 = arith.constant 0 : index
    %c0_113 = arith.constant 0 : index
    %104 = vector.load %arg2[%c0_110, %c2_111, %c0_112, %c0_113] : memref<3x3x3x32xf32, #tpu.memory_space<vmem>>, vector<1x1x3x32xf32>
    %105 = vector.shape_cast %104 : vector<1x1x3x32xf32> to vector<3x32xf32>
    %cst_114 = arith.constant dense<0.000000e+00> : vector<14x32xf32>
    %106 = tpu.matmul %103, %105, %cst_114 {dimension_numbers = #tpu.dot_dimension_numbers<[1], [0], [0], [1], [0, 0, 1, 1], [], []>} : vector<14x3xf32>, vector<3x32xf32>, vector<14x32xf32> -> vector<14x32xf32>
    %107 = arith.addf %101, %106 : vector<14x32xf32>
    %c0_115 = arith.constant 0 : index
    %c2_116 = arith.constant 2 : index
    %c0_117 = arith.constant 0 : index
    %c0_118 = arith.constant 0 : index
    %108 = vector.load %arg1[%c0_115, %c2_116, %c0_117, %c0_118] : memref<1x16x16x3xf32, #tpu.memory_space<vmem>>, vector<1x1x14x3xf32>
    %109 = vector.shape_cast %108 : vector<1x1x14x3xf32> to vector<14x3xf32>
    %c1_119 = arith.constant 1 : index
    %c0_120 = arith.constant 0 : index
    %c0_121 = arith.constant 0 : index
    %c0_122 = arith.constant 0 : index
    %110 = vector.load %arg2[%c1_119, %c0_120, %c0_121, %c0_122] : memref<3x3x3x32xf32, #tpu.memory_space<vmem>>, vector<1x1x3x32xf32>
    %111 = vector.shape_cast %110 : vector<1x1x3x32xf32> to vector<3x32xf32>
    %cst_123 = arith.constant dense<0.000000e+00> : vector<14x32xf32>
    %112 = tpu.matmul %109, %111, %cst_123 {dimension_numbers = #tpu.dot_dimension_numbers<[1], [0], [0], [1], [0, 0, 1, 1], [], []>} : vector<14x3xf32>, vector<3x32xf32>, vector<14x32xf32> -> vector<14x32xf32>
    %113 = arith.addf %107, %112 : vector<14x32xf32>
    %c0_124 = arith.constant 0 : index
    %c2_125 = arith.constant 2 : index
    %c1_126 = arith.constant 1 : index
    %c0_127 = arith.constant 0 : index
    %114 = vector.load %arg1[%c0_124, %c2_125, %c1_126, %c0_127] : memref<1x16x16x3xf32, #tpu.memory_space<vmem>>, vector<1x1x14x3xf32>
    %115 = vector.shape_cast %114 : vector<1x1x14x3xf32> to vector<14x3xf32>
    %c1_128 = arith.constant 1 : index
    %c1_129 = arith.constant 1 : index
    %c0_130 = arith.constant 0 : index
    %c0_131 = arith.constant 0 : index
    %116 = vector.load %arg2[%c1_128, %c1_129, %c0_130, %c0_131] : memref<3x3x3x32xf32, #tpu.memory_space<vmem>>, vector<1x1x3x32xf32>
    %117 = vector.shape_cast %116 : vector<1x1x3x32xf32> to vector<3x32xf32>
    %cst_132 = arith.constant dense<0.000000e+00> : vector<14x32xf32>
    %118 = tpu.matmul %115, %117, %cst_132 {dimension_numbers = #tpu.dot_dimension_numbers<[1], [0], [0], [1], [0, 0, 1, 1], [], []>} : vector<14x3xf32>, vector<3x32xf32>, vector<14x32xf32> -> vector<14x32xf32>
    %119 = arith.addf %113, %118 : vector<14x32xf32>
    %c0_133 = arith.constant 0 : index
    %c2_134 = arith.constant 2 : index
    %c2_135 = arith.constant 2 : index
    %c0_136 = arith.constant 0 : index
    %120 = vector.load %arg1[%c0_133, %c2_134, %c2_135, %c0_136] : memref<1x16x16x3xf32, #tpu.memory_space<vmem>>, vector<1x1x14x3xf32>
    %121 = vector.shape_cast %120 : vector<1x1x14x3xf32> to vector<14x3xf32>
    %c1_137 = arith.constant 1 : index
    %c2_138 = arith.constant 2 : index
    %c0_139 = arith.constant 0 : index
    %c0_140 = arith.constant 0 : index
    %122 = vector.load %arg2[%c1_137, %c2_138, %c0_139, %c0_140] : memref<3x3x3x32xf32, #tpu.memory_space<vmem>>, vector<1x1x3x32xf32>
    %123 = vector.shape_cast %122 : vector<1x1x3x32xf32> to vector<3x32xf32>
    %cst_141 = arith.constant dense<0.000000e+00> : vector<14x32xf32>
    %124 = tpu.matmul %121, %123, %cst_141 {dimension_numbers = #tpu.dot_dimension_numbers<[1], [0], [0], [1], [0, 0, 1, 1], [], []>} : vector<14x3xf32>, vector<3x32xf32>, vector<14x32xf32> -> vector<14x32xf32>
    %125 = arith.addf %119, %124 : vector<14x32xf32>
    %c0_142 = arith.constant 0 : index
    %c3 = arith.constant 3 : index
    %c0_143 = arith.constant 0 : index
    %c0_144 = arith.constant 0 : index
    %126 = vector.load %arg1[%c0_142, %c3, %c0_143, %c0_144] : memref<1x16x16x3xf32, #tpu.memory_space<vmem>>, vector<1x1x14x3xf32>
    %127 = vector.shape_cast %126 : vector<1x1x14x3xf32> to vector<14x3xf32>
    %c2_145 = arith.constant 2 : index
    %c0_146 = arith.constant 0 : index
    %c0_147 = arith.constant 0 : index
    %c0_148 = arith.constant 0 : index
    %128 = vector.load %arg2[%c2_145, %c0_146, %c0_147, %c0_148] : memref<3x3x3x32xf32, #tpu.memory_space<vmem>>, vector<1x1x3x32xf32>
    %129 = vector.shape_cast %128 : vector<1x1x3x32xf32> to vector<3x32xf32>
    %cst_149 = arith.constant dense<0.000000e+00> : vector<14x32xf32>
    %130 = tpu.matmul %127, %129, %cst_149 {dimension_numbers = #tpu.dot_dimension_numbers<[1], [0], [0], [1], [0, 0, 1, 1], [], []>} : vector<14x3xf32>, vector<3x32xf32>, vector<14x32xf32> -> vector<14x32xf32>
    %131 = arith.addf %125, %130 : vector<14x32xf32>
    %c0_150 = arith.constant 0 : index
    %c3_151 = arith.constant 3 : index
    %c1_152 = arith.constant 1 : index
    %c0_153 = arith.constant 0 : index
    %132 = vector.load %arg1[%c0_150, %c3_151, %c1_152, %c0_153] : memref<1x16x16x3xf32, #tpu.memory_space<vmem>>, vector<1x1x14x3xf32>
    %133 = vector.shape_cast %132 : vector<1x1x14x3xf32> to vector<14x3xf32>
    %c2_154 = arith.constant 2 : index
    %c1_155 = arith.constant 1 : index
    %c0_156 = arith.constant 0 : index
    %c0_157 = arith.constant 0 : index
    %134 = vector.load %arg2[%c2_154, %c1_155, %c0_156, %c0_157] : memref<3x3x3x32xf32, #tpu.memory_space<vmem>>, vector<1x1x3x32xf32>
    %135 = vector.shape_cast %134 : vector<1x1x3x32xf32> to vector<3x32xf32>
    %cst_158 = arith.constant dense<0.000000e+00> : vector<14x32xf32>
    %136 = tpu.matmul %133, %135, %cst_158 {dimension_numbers = #tpu.dot_dimension_numbers<[1], [0], [0], [1], [0, 0, 1, 1], [], []>} : vector<14x3xf32>, vector<3x32xf32>, vector<14x32xf32> -> vector<14x32xf32>
    %137 = arith.addf %131, %136 : vector<14x32xf32>
    %c0_159 = arith.constant 0 : index
    %c3_160 = arith.constant 3 : index
    %c2_161 = arith.constant 2 : index
    %c0_162 = arith.constant 0 : index
    %138 = vector.load %arg1[%c0_159, %c3_160, %c2_161, %c0_162] : memref<1x16x16x3xf32, #tpu.memory_space<vmem>>, vector<1x1x14x3xf32>
    %139 = vector.shape_cast %138 : vector<1x1x14x3xf32> to vector<14x3xf32>
    %c2_163 = arith.constant 2 : index
    %c2_164 = arith.constant 2 : index
    %c0_165 = arith.constant 0 : index
    %c0_166 = arith.constant 0 : index
    %140 = vector.load %arg2[%c2_163, %c2_164, %c0_165, %c0_166] : memref<3x3x3x32xf32, #tpu.memory_space<vmem>>, vector<1x1x3x32xf32>
    %141 = vector.shape_cast %140 : vector<1x1x3x32xf32> to vector<3x32xf32>
    %cst_167 = arith.constant dense<0.000000e+00> : vector<14x32xf32>
    %142 = tpu.matmul %139, %141, %cst_167 {dimension_numbers = #tpu.dot_dimension_numbers<[1], [0], [0], [1], [0, 0, 1, 1], [], []>} : vector<14x3xf32>, vector<3x32xf32>, vector<14x32xf32> -> vector<14x32xf32>
    %143 = arith.addf %137, %142 : vector<14x32xf32>
    %144 = vector.broadcast %0 : vector<1x32xf32> to vector<14x32xf32>
    %145 = arith.addf %143, %144 : vector<14x32xf32>
    %cst_168 = arith.constant 0.000000e+00 : f32
    %146 = vector.broadcast %cst_168 : f32 to vector<14x32xf32>
    %147 = arith.maximumf %145, %146 : vector<14x32xf32>
    %148 = arith.maximumf %88, %147 : vector<14x32xf32>
    %cst_169 = arith.constant dense<0.000000e+00> : vector<7x32xf32>
    %149 = tpu.matmul %8, %148, %cst_169 {dimension_numbers = #tpu.dot_dimension_numbers<[1], [0], [0], [1], [0, 0, 1, 1], [], []>} : vector<7x14xf32>, vector<14x32xf32>, vector<7x32xf32> -> vector<7x32xf32>
    %cst_170 = arith.constant dense<0.000000e+00> : vector<7x32xf32>
    %150 = tpu.matmul %15, %148, %cst_170 {dimension_numbers = #tpu.dot_dimension_numbers<[1], [0], [0], [1], [0, 0, 1, 1], [], []>} : vector<7x14xf32>, vector<14x32xf32>, vector<7x32xf32> -> vector<7x32xf32>
    %151 = arith.maximumf %149, %150 : vector<7x32xf32>
    %c0_171 = arith.constant 0 : index
    %c0_172 = arith.constant 0 : index
    %c0_173 = arith.constant 0 : index
    %152 = vector.load %arg11[%c0_171, %c0_172, %c0_173] : memref<6x7x32xf32, #tpu.memory_space<vmem>>, vector<1x7x32xf32>
    %153 = vector.shape_cast %152 : vector<1x7x32xf32> to vector<7x32xf32>
    %154 = vector.shape_cast %151 : vector<7x32xf32> to vector<1x7x32xf32>
    tpu.vector_store %arg11[%c0_171, %c0_172, %c0_173], %154 {strides = array<i32>} : memref<6x7x32xf32, #tpu.memory_space<vmem>>, vector<1x7x32xf32>,
    %cst_174 = arith.constant 0.000000e+00 : f32
    %155 = vector.broadcast %cst_174 : f32 to vector<14x32xf32>
    %c0_175 = arith.constant 0 : index
    %c2_176 = arith.constant 2 : index
    %c0_177 = arith.constant 0 : index
    %c0_178 = arith.constant 0 : index
    %156 = vector.load %arg1[%c0_175, %c2_176, %c0_177, %c0_178] : memref<1x16x16x3xf32, #tpu.memory_space<vmem>>, vector<1x1x14x3xf32>
    %157 = vector.shape_cast %156 : vector<1x1x14x3xf32> to vector<14x3xf32>
    %c0_179 = arith.constant 0 : index
    %c0_180 = arith.constant 0 : index
    %c0_181 = arith.constant 0 : index
    %c0_182 = arith.constant 0 : index
    %158 = vector.load %arg2[%c0_179, %c0_180, %c0_181, %c0_182] : memref<3x3x3x32xf32, #tpu.memory_space<vmem>>, vector<1x1x3x32xf32>
    %159 = vector.shape_cast %158 : vector<1x1x3x32xf32> to vector<3x32xf32>
    %cst_183 = arith.constant dense<0.000000e+00> : vector<14x32xf32>
    %160 = tpu.matmul %157, %159, %cst_183 {dimension_numbers = #tpu.dot_dimension_numbers<[1], [0], [0], [1], [0, 0, 1, 1], [], []>} : vector<14x3xf32>, vector<3x32xf32>, vector<14x32xf32> -> vector<14x32xf32>
    %161 = arith.addf %155, %160 : vector<14x32xf32>
    %c0_184 = arith.constant 0 : index
    %c2_185 = arith.constant 2 : index
    %c1_186 = arith.constant 1 : index
    %c0_187 = arith.constant 0 : index
    %162 = vector.load %arg1[%c0_184, %c2_185, %c1_186, %c0_187] : memref<1x16x16x3xf32, #tpu.memory_space<vmem>>, vector<1x1x14x3xf32>
    %163 = vector.shape_cast %162 : vector<1x1x14x3xf32> to vector<14x3xf32>
    %c0_188 = arith.constant 0 : index
    %c1_189 = arith.constant 1 : index
    %c0_190 = arith.constant 0 : index
    %c0_191 = arith.constant 0 : index
    %164 = vector.load %arg2[%c0_188, %c1_189, %c0_190, %c0_191] : memref<3x3x3x32xf32, #tpu.memory_space<vmem>>, vector<1x1x3x32xf32>
    %165 = vector.shape_cast %164 : vector<1x1x3x32xf32> to vector<3x32xf32>
    %cst_192 = arith.constant dense<0.000000e+00> : vector<14x32xf32>
    %166 = tpu.matmul %163, %165, %cst_192 {dimension_numbers = #tpu.dot_dimension_numbers<[1], [0], [0], [1], [0, 0, 1, 1], [], []>} : vector<14x3xf32>, vector<3x32xf32>, vector<14x32xf32> -> vector<14x32xf32>
    %167 = arith.addf %161, %166 : vector<14x32xf32>
    %c0_193 = arith.constant 0 : index
    %c2_194 = arith.constant 2 : index
    %c2_195 = arith.constant 2 : index
    %c0_196 = arith.constant 0 : index
    %168 = vector.load %arg1[%c0_193, %c2_194, %c2_195, %c0_196] : memref<1x16x16x3xf32, #tpu.memory_space<vmem>>, vector<1x1x14x3xf32>
    %169 = vector.shape_cast %168 : vector<1x1x14x3xf32> to vector<14x3xf32>
    %c0_197 = arith.constant 0 : index
    %c2_198 = arith.constant 2 : index
    %c0_199 = arith.constant 0 : index
    %c0_200 = arith.constant 0 : index
    %170 = vector.load %arg2[%c0_197, %c2_198, %c0_199, %c0_200] : memref<3x3x3x32xf32, #tpu.memory_space<vmem>>, vector<1x1x3x32xf32>
    %171 = vector.shape_cast %170 : vector<1x1x3x32xf32> to vector<3x32xf32>
    %cst_201 = arith.constant dense<0.000000e+00> : vector<14x32xf32>
    %172 = tpu.matmul %169, %171, %cst_201 {dimension_numbers = #tpu.dot_dimension_numbers<[1], [0], [0], [1], [0, 0, 1, 1], [], []>} : vector<14x3xf32>, vector<3x32xf32>, vector<14x32xf32> -> vector<14x32xf32>
    %173 = arith.addf %167, %172 : vector<14x32xf32>
    %c0_202 = arith.constant 0 : index
    %c3_203 = arith.constant 3 : index
    %c0_204 = arith.constant 0 : index
    %c0_205 = arith.constant 0 : index
    %174 = vector.load %arg1[%c0_202, %c3_203, %c0_204, %c0_205] : memref<1x16x16x3xf32, #tpu.memory_space<vmem>>, vector<1x1x14x3xf32>
    %175 = vector.shape_cast %174 : vector<1x1x14x3xf32> to vector<14x3xf32>
    %c1_206 = arith.constant 1 : index
    %c0_207 = arith.constant 0 : index
    %c0_208 = arith.constant 0 : index
    %c0_209 = arith.constant 0 : index
    %176 = vector.load %arg2[%c1_206, %c0_207, %c0_208, %c0_209] : memref<3x3x3x32xf32, #tpu.memory_space<vmem>>, vector<1x1x3x32xf32>
    %177 = vector.shape_cast %176 : vector<1x1x3x32xf32> to vector<3x32xf32>
    %cst_210 = arith.constant dense<0.000000e+00> : vector<14x32xf32>
    %178 = tpu.matmul %175, %177, %cst_210 {dimension_numbers = #tpu.dot_dimension_numbers<[1], [0], [0], [1], [0, 0, 1, 1], [], []>} : vector<14x3xf32>, vector<3x32xf32>, vector<14x32xf32> -> vector<14x32xf32>
    %179 = arith.addf %173, %178 : vector<14x32xf32>
    %c0_211 = arith.constant 0 : index
    %c3_212 = arith.constant 3 : index
    %c1_213 = arith.constant 1 : index
    %c0_214 = arith.constant 0 : index
    %180 = vector.load %arg1[%c0_211, %c3_212, %c1_213, %c0_214] : memref<1x16x16x3xf32, #tpu.memory_space<vmem>>, vector<1x1x14x3xf32>
    %181 = vector.shape_cast %180 : vector<1x1x14x3xf32> to vector<14x3xf32>
    %c1_215 = arith.constant 1 : index
    %c1_216 = arith.constant 1 : index
    %c0_217 = arith.constant 0 : index
    %c0_218 = arith.constant 0 : index
    %182 = vector.load %arg2[%c1_215, %c1_216, %c0_217, %c0_218] : memref<3x3x3x32xf32, #tpu.memory_space<vmem>>, vector<1x1x3x32xf32>
    %183 = vector.shape_cast %182 : vector<1x1x3x32xf32> to vector<3x32xf32>
    %cst_219 = arith.constant dense<0.000000e+00> : vector<14x32xf32>
    %184 = tpu.matmul %181, %183, %cst_219 {dimension_numbers = #tpu.dot_dimension_numbers<[1], [0], [0], [1], [0, 0, 1, 1], [], []>} : vector<14x3xf32>, vector<3x32xf32>, vector<14x32xf32> -> vector<14x32xf32>
    %185 = arith.addf %179, %184 : vector<14x32xf32>
    %c0_220 = arith.constant 0 : index
    %c3_221 = arith.constant 3 : index
    %c2_222 = arith.constant 2 : index
    %c0_223 = arith.constant 0 : index
    %186 = vector.load %arg1[%c0_220, %c3_221, %c2_222, %c0_223] : memref<1x16x16x3xf32, #tpu.memory_space<vmem>>, vector<1x1x14x3xf32>
    %187 = vector.shape_cast %186 : vector<1x1x14x3xf32> to vector<14x3xf32>
    %c1_224 = arith.constant 1 : index
    %c2_225 = arith.constant 2 : index
    %c0_226 = arith.constant 0 : index
    %c0_227 = arith.constant 0 : index
    %188 = vector.load %arg2[%c1_224, %c2_225, %c0_226, %c0_227] : memref<3x3x3x32xf32, #tpu.memory_space<vmem>>, vector<1x1x3x32xf32>
    %189 = vector.shape_cast %188 : vector<1x1x3x32xf32> to vector<3x32xf32>
    %cst_228 = arith.constant dense<0.000000e+00> : vector<14x32xf32>
    %190 = tpu.matmul %187, %189, %cst_228 {dimension_numbers = #tpu.dot_dimension_numbers<[1], [0], [0], [1], [0, 0, 1, 1], [], []>} : vector<14x3xf32>, vector<3x32xf32>, vector<14x32xf32> -> vector<14x32xf32>
    %191 = arith.addf %185, %190 : vector<14x32xf32>
    %c0_229 = arith.constant 0 : index
    %c4 = arith.constant 4 : index
    %c0_230 = arith.constant 0 : index
    %c0_231 = arith.constant 0 : index
    %192 = vector.load %arg1[%c0_229, %c4, %c0_230, %c0_231] : memref<1x16x16x3xf32, #tpu.memory_space<vmem>>, vector<1x1x14x3xf32>
    %193 = vector.shape_cast %192 : vector<1x1x14x3xf32> to vector<14x3xf32>
    %c2_232 = arith.constant 2 : index
    %c0_233 = arith.constant 0 : index
    %c0_234 = arith.constant 0 : index
    %c0_235 = arith.constant 0 : index
    %194 = vector.load %arg2[%c2_232, %c0_233, %c0_234, %c0_235] : memref<3x3x3x32xf32, #tpu.memory_space<vmem>>, vector<1x1x3x32xf32>
    %195 = vector.shape_cast %194 : vector<1x1x3x32xf32> to vector<3x32xf32>
    %cst_236 = arith.constant dense<0.000000e+00> : vector<14x32xf32>
    %196 = tpu.matmul %193, %195, %cst_236 {dimension_numbers = #tpu.dot_dimension_numbers<[1], [0], [0], [1], [0, 0, 1, 1], [], []>} : vector<14x3xf32>, vector<3x32xf32>, vector<14x32xf32> -> vector<14x32xf32>
    %197 = arith.addf %191, %196 : vector<14x32xf32>
    %c0_237 = arith.constant 0 : index
    %c4_238 = arith.constant 4 : index
    %c1_239 = arith.constant 1 : index
    %c0_240 = arith.constant 0 : index
    %198 = vector.load %arg1[%c0_237, %c4_238, %c1_239, %c0_240] : memref<1x16x16x3xf32, #tpu.memory_space<vmem>>, vector<1x1x14x3xf32>
    %199 = vector.shape_cast %198 : vector<1x1x14x3xf32> to vector<14x3xf32>
    %c2_241 = arith.constant 2 : index
    %c1_242 = arith.constant 1 : index
    %c0_243 = arith.constant 0 : index
    %c0_244 = arith.constant 0 : index
    %200 = vector.load %arg2[%c2_241, %c1_242, %c0_243, %c0_244] : memref<3x3x3x32xf32, #tpu.memory_space<vmem>>, vector<1x1x3x32xf32>
    %201 = vector.shape_cast %200 : vector<1x1x3x32xf32> to vector<3x32xf32>
    %cst_245 = arith.constant dense<0.000000e+00> : vector<14x32xf32>
    %202 = tpu.matmul %199, %201, %cst_245 {dimension_numbers = #tpu.dot_dimension_numbers<[1], [0], [0], [1], [0, 0, 1, 1], [], []>} : vector<14x3xf32>, vector<3x32xf32>, vector<14x32xf32> -> vector<14x32xf32>
    %203 = arith.addf %197, %202 : vector<14x32xf32>
    %c0_246 = arith.constant 0 : index
    %c4_247 = arith.constant 4 : index
    %c2_248 = arith.constant 2 : index
    %c0_249 = arith.constant 0 : index
    %204 = vector.load %arg1[%c0_246, %c4_247, %c2_248, %c0_249] : memref<1x16x16x3xf32, #tpu.memory_space<vmem>>, vector<1x1x14x3xf32>
    %205 = vector.shape_cast %204 : vector<1x1x14x3xf32> to vector<14x3xf32>
    %c2_250 = arith.constant 2 : index
    %c2_251 = arith.constant 2 : index
    %c0_252 = arith.constant 0 : index
    %c0_253 = arith.constant 0 : index
    %206 = vector.load %arg2[%c2_250, %c2_251, %c0_252, %c0_253] : memref<3x3x3x32xf32, #tpu.memory_space<vmem>>, vector<1x1x3x32xf32>
    %207 = vector.shape_cast %206 : vector<1x1x3x32xf32> to vector<3x32xf32>
    %cst_254 = arith.constant dense<0.000000e+00> : vector<14x32xf32>
    %208 = tpu.matmul %205, %207, %cst_254 {dimension_numbers = #tpu.dot_dimension_numbers<[1], [0], [0], [1], [0, 0, 1, 1], [], []>} : vector<14x3xf32>, vector<3x32xf32>, vector<14x32xf32> -> vector<14x32xf32>
    %209 = arith.addf %203, %208 : vector<14x32xf32>
    %210 = vector.broadcast %0 : vector<1x32xf32> to vector<14x32xf32>
    %211 = arith.addf %209, %210 : vector<14x32xf32>
    %cst_255 = arith.constant 0.000000e+00 : f32
    %212 = vector.broadcast %cst_255 : f32 to vector<14x32xf32>
    %213 = arith.maximumf %211, %212 : vector<14x32xf32>
    %cst_256 = arith.constant 0.000000e+00 : f32
    %214 = vector.broadcast %cst_256 : f32 to vector<14x32xf32>
    %c0_257 = arith.constant 0 : index
    %c3_258 = arith.constant 3 : index
    %c0_259 = arith.constant 0 : index
    %c0_260 = arith.constant 0 : index
    %215 = vector.load %arg1[%c0_257, %c3_258, %c0_259, %c0_260] : memref<1x16x16x3xf32, #tpu.memory_space<vmem>>, vector<1x1x14x3xf32>
    %216 = vector.shape_cast %215 : vector<1x1x14x3xf32> to vector<14x3xf32>
    %c0_261 = arith.constant 0 : index
    %c0_262 = arith.constant 0 : index
    %c0_263 = arith.constant 0 : index
    %c0_264 = arith.constant 0 : index
    %217 = vector.load %arg2[%c0_261, %c0_262, %c0_263, %c0_264] : memref<3x3x3x32xf32, #tpu.memory_space<vmem>>, vector<1x1x3x32xf32>
    %218 = vector.shape_cast %217 : vector<1x1x3x32xf32> to vector<3x32xf32>
    %cst_265 = arith.constant dense<0.000000e+00> : vector<14x32xf32>
    %219 = tpu.matmul %216, %218, %cst_265 {dimension_numbers = #tpu.dot_dimension_numbers<[1], [0], [0], [1], [0, 0, 1, 1], [], []>} : vector<14x3xf32>, vector<3x32xf32>, vector<14x32xf32> -> vector<14x32xf32>
    %220 = arith.addf %214, %219 : vector<14x32xf32>
    %c0_266 = arith.constant 0 : index
    %c3_267 = arith.constant 3 : index
    %c1_268 = arith.constant 1 : index
    %c0_269 = arith.constant 0 : index
    %221 = vector.load %arg1[%c0_266, %c3_267, %c1_268, %c0_269] : memref<1x16x16x3xf32, #tpu.memory_space<vmem>>, vector<1x1x14x3xf32>
    %222 = vector.shape_cast %221 : vector<1x1x14x3xf32> to vector<14x3xf32>
    %c0_270 = arith.constant 0 : index
    %c1_271 = arith.constant 1 : index
    %c0_272 = arith.constant 0 : index
    %c0_273 = arith.constant 0 : index
    %223 = vector.load %arg2[%c0_270, %c1_271, %c0_272, %c0_273] : memref<3x3x3x32xf32, #tpu.memory_space<vmem>>, vector<1x1x3x32xf32>
    %224 = vector.shape_cast %223 : vector<1x1x3x32xf32> to vector<3x32xf32>
    %cst_274 = arith.constant dense<0.000000e+00> : vector<14x32xf32>
    %225 = tpu.matmul %222, %224, %cst_274 {dimension_numbers = #tpu.dot_dimension_numbers<[1], [0], [0], [1], [0, 0, 1, 1], [], []>} : vector<14x3xf32>, vector<3x32xf32>, vector<14x32xf32> -> vector<14x32xf32>
    %226 = arith.addf %220, %225 : vector<14x32xf32>
    %c0_275 = arith.constant 0 : index
    %c3_276 = arith.constant 3 : index
    %c2_277 = arith.constant 2 : index
    %c0_278 = arith.constant 0 : index
    %227 = vector.load %arg1[%c0_275, %c3_276, %c2_277, %c0_278] : memref<1x16x16x3xf32, #tpu.memory_space<vmem>>, vector<1x1x14x3xf32>
    %228 = vector.shape_cast %227 : vector<1x1x14x3xf32> to vector<14x3xf32>
    %c0_279 = arith.constant 0 : index
    %c2_280 = arith.constant 2 : index
    %c0_281 = arith.constant 0 : index
    %c0_282 = arith.constant 0 : index
    %229 = vector.load %arg2[%c0_279, %c2_280, %c0_281, %c0_282] : memref<3x3x3x32xf32, #tpu.memory_space<vmem>>, vector<1x1x3x32xf32>
    %230 = vector.shape_cast %229 : vector<1x1x3x32xf32> to vector<3x32xf32>
    %cst_283 = arith.constant dense<0.000000e+00> : vector<14x32xf32>
    %231 = tpu.matmul %228, %230, %cst_283 {dimension_numbers = #tpu.dot_dimension_numbers<[1], [0], [0], [1], [0, 0, 1, 1], [], []>} : vector<14x3xf32>, vector<3x32xf32>, vector<14x32xf32> -> vector<14x32xf32>
    %232 = arith.addf %226, %231 : vector<14x32xf32>
    %c0_284 = arith.constant 0 : index
    %c4_285 = arith.constant 4 : index
    %c0_286 = arith.constant 0 : index
    %c0_287 = arith.constant 0 : index
    %233 = vector.load %arg1[%c0_284, %c4_285, %c0_286, %c0_287] : memref<1x16x16x3xf32, #tpu.memory_space<vmem>>, vector<1x1x14x3xf32>
    %234 = vector.shape_cast %233 : vector<1x1x14x3xf32> to vector<14x3xf32>
    %c1_288 = arith.constant 1 : index
    %c0_289 = arith.constant 0 : index
    %c0_290 = arith.constant 0 : index
    %c0_291 = arith.constant 0 : index
    %235 = vector.load %arg2[%c1_288, %c0_289, %c0_290, %c0_291] : memref<3x3x3x32xf32, #tpu.memory_space<vmem>>, vector<1x1x3x32xf32>
    %236 = vector.shape_cast %235 : vector<1x1x3x32xf32> to vector<3x32xf32>
    %cst_292 = arith.constant dense<0.000000e+00> : vector<14x32xf32>
    %237 = tpu.matmul %234, %236, %cst_292 {dimension_numbers = #tpu.dot_dimension_numbers<[1], [0], [0], [1], [0, 0, 1, 1], [], []>} : vector<14x3xf32>, vector<3x32xf32>, vector<14x32xf32> -> vector<14x32xf32>
    %238 = arith.addf %232, %237 : vector<14x32xf32>
    %c0_293 = arith.constant 0 : index
    %c4_294 = arith.constant 4 : index
    %c1_295 = arith.constant 1 : index
    %c0_296 = arith.constant 0 : index
    %239 = vector.load %arg1[%c0_293, %c4_294, %c1_295, %c0_296] : memref<1x16x16x3xf32, #tpu.memory_space<vmem>>, vector<1x1x14x3xf32>
    %240 = vector.shape_cast %239 : vector<1x1x14x3xf32> to vector<14x3xf32>
    %c1_297 = arith.constant 1 : index
    %c1_298 = arith.constant 1 : index
    %c0_299 = arith.constant 0 : index
    %c0_300 = arith.constant 0 : index
    %241 = vector.load %arg2[%c1_297, %c1_298, %c0_299, %c0_300] : memref<3x3x3x32xf32, #tpu.memory_space<vmem>>, vector<1x1x3x32xf32>
    %242 = vector.shape_cast %241 : vector<1x1x3x32xf32> to vector<3x32xf32>
    %cst_301 = arith.constant dense<0.000000e+00> : vector<14x32xf32>
    %243 = tpu.matmul %240, %242, %cst_301 {dimension_numbers = #tpu.dot_dimension_numbers<[1], [0], [0], [1], [0, 0, 1, 1], [], []>} : vector<14x3xf32>, vector<3x32xf32>, vector<14x32xf32> -> vector<14x32xf32>
    %244 = arith.addf %238, %243 : vector<14x32xf32>
    %c0_302 = arith.constant 0 : index
    %c4_303 = arith.constant 4 : index
    %c2_304 = arith.constant 2 : index
    %c0_305 = arith.constant 0 : index
    %245 = vector.load %arg1[%c0_302, %c4_303, %c2_304, %c0_305] : memref<1x16x16x3xf32, #tpu.memory_space<vmem>>, vector<1x1x14x3xf32>
    %246 = vector.shape_cast %245 : vector<1x1x14x3xf32> to vector<14x3xf32>
    %c1_306 = arith.constant 1 : index
    %c2_307 = arith.constant 2 : index
    %c0_308 = arith.constant 0 : index
    %c0_309 = arith.constant 0 : index
    %247 = vector.load %arg2[%c1_306, %c2_307, %c0_308, %c0_309] : memref<3x3x3x32xf32, #tpu.memory_space<vmem>>, vector<1x1x3x32xf32>
    %248 = vector.shape_cast %247 : vector<1x1x3x32xf32> to vector<3x32xf32>
    %cst_310 = arith.constant dense<0.000000e+00> : vector<14x32xf32>
    %249 = tpu.matmul %246, %248, %cst_310 {dimension_numbers = #tpu.dot_dimension_numbers<[1], [0], [0], [1], [0, 0, 1, 1], [], []>} : vector<14x3xf32>, vector<3x32xf32>, vector<14x32xf32> -> vector<14x32xf32>
    %250 = arith.addf %244, %249 : vector<14x32xf32>
    %c0_311 = arith.constant 0 : index
    %c5 = arith.constant 5 : index
    %c0_312 = arith.constant 0 : index
    %c0_313 = arith.constant 0 : index
    %251 = vector.load %arg1[%c0_311, %c5, %c0_312, %c0_313] : memref<1x16x16x3xf32, #tpu.memory_space<vmem>>, vector<1x1x14x3xf32>
    %252 = vector.shape_cast %251 : vector<1x1x14x3xf32> to vector<14x3xf32>
    %c2_314 = arith.constant 2 : index
    %c0_315 = arith.constant 0 : index
    %c0_316 = arith.constant 0 : index
    %c0_317 = arith.constant 0 : index
    %253 = vector.load %arg2[%c2_314, %c0_315, %c0_316, %c0_317] : memref<3x3x3x32xf32, #tpu.memory_space<vmem>>, vector<1x1x3x32xf32>
    %254 = vector.shape_cast %253 : vector<1x1x3x32xf32> to vector<3x32xf32>
    %cst_318 = arith.constant dense<0.000000e+00> : vector<14x32xf32>
    %255 = tpu.matmul %252, %254, %cst_318 {dimension_numbers = #tpu.dot_dimension_numbers<[1], [0], [0], [1], [0, 0, 1, 1], [], []>} : vector<14x3xf32>, vector<3x32xf32>, vector<14x32xf32> -> vector<14x32xf32>
    %256 = arith.addf %250, %255 : vector<14x32xf32>
    %c0_319 = arith.constant 0 : index
    %c5_320 = arith.constant 5 : index
    %c1_321 = arith.constant 1 : index
    %c0_322 = arith.constant 0 : index
    %257 = vector.load %arg1[%c0_319, %c5_320, %c1_321, %c0_322] : memref<1x16x16x3xf32, #tpu.memory_space<vmem>>, vector<1x1x14x3xf32>
    %258 = vector.shape_cast %257 : vector<1x1x14x3xf32> to vector<14x3xf32>
    %c2_323 = arith.constant 2 : index
    %c1_324 = arith.constant 1 : index
    %c0_325 = arith.constant 0 : index
    %c0_326 = arith.constant 0 : index
    %259 = vector.load %arg2[%c2_323, %c1_324, %c0_325, %c0_326] : memref<3x3x3x32xf32, #tpu.memory_space<vmem>>, vector<1x1x3x32xf32>
    %260 = vector.shape_cast %259 : vector<1x1x3x32xf32> to vector<3x32xf32>
    %cst_327 = arith.constant dense<0.000000e+00> : vector<14x32xf32>
    %261 = tpu.matmul %258, %260, %cst_327 {dimension_numbers = #tpu.dot_dimension_numbers<[1], [0], [0], [1], [0, 0, 1, 1], [], []>} : vector<14x3xf32>, vector<3x32xf32>, vector<14x32xf32> -> vector<14x32xf32>
    %262 = arith.addf %256, %261 : vector<14x32xf32>
    %c0_328 = arith.constant 0 : index
    %c5_329 = arith.constant 5 : index
    %c2_330 = arith.constant 2 : index
    %c0_331 = arith.constant 0 : index
    %263 = vector.load %arg1[%c0_328, %c5_329, %c2_330, %c0_331] : memref<1x16x16x3xf32, #tpu.memory_space<vmem>>, vector<1x1x14x3xf32>
    %264 = vector.shape_cast %263 : vector<1x1x14x3xf32> to vector<14x3xf32>
    %c2_332 = arith.constant 2 : index
    %c2_333 = arith.constant 2 : index
    %c0_334 = arith.constant 0 : index
    %c0_335 = arith.constant 0 : index
    %265 = vector.load %arg2[%c2_332, %c2_333, %c0_334, %c0_335] : memref<3x3x3x32xf32, #tpu.memory_space<vmem>>, vector<1x1x3x32xf32>
    %266 = vector.shape_cast %265 : vector<1x1x3x32xf32> to vector<3x32xf32>
    %cst_336 = arith.constant dense<0.000000e+00> : vector<14x32xf32>
    %267 = tpu.matmul %264, %266, %cst_336 {dimension_numbers = #tpu.dot_dimension_numbers<[1], [0], [0], [1], [0, 0, 1, 1], [], []>} : vector<14x3xf32>, vector<3x32xf32>, vector<14x32xf32> -> vector<14x32xf32>
    %268 = arith.addf %262, %267 : vector<14x32xf32>
    %269 = vector.broadcast %0 : vector<1x32xf32> to vector<14x32xf32>
    %270 = arith.addf %268, %269 : vector<14x32xf32>
    %cst_337 = arith.constant 0.000000e+00 : f32
    %271 = vector.broadcast %cst_337 : f32 to vector<14x32xf32>
    %272 = arith.maximumf %270, %271 : vector<14x32xf32>
    %273 = arith.maximumf %213, %272 : vector<14x32xf32>
    %cst_338 = arith.constant dense<0.000000e+00> : vector<7x32xf32>
    %274 = tpu.matmul %8, %273, %cst_338 {dimension_numbers = #tpu.dot_dimension_numbers<[1], [0], [0], [1], [0, 0, 1, 1], [], []>} : vector<7x14xf32>, vector<14x32xf32>, vector<7x32xf32> -> vector<7x32xf32>
    %cst_339 = arith.constant dense<0.000000e+00> : vector<7x32xf32>
    %275 = tpu.matmul %15, %273, %cst_339 {dimension_numbers = #tpu.dot_dimension_numbers<[1], [0], [0], [1], [0, 0, 1, 1], [], []>} : vector<7x14xf32>, vector<14x32xf32>, vector<7x32xf32> -> vector<7x32xf32>
    %276 = arith.maximumf %274, %275 : vector<7x32xf32>
    %c1_340 = arith.constant 1 : index
    %c0_341 = arith.constant 0 : index
    %c0_342 = arith.constant 0 : index
    %277 = vector.load %arg11[%c1_340, %c0_341, %c0_342] : memref<6x7x32xf32, #tpu.memory_space<vmem>>, vector<1x7x32xf32>
    %278 = vector.shape_cast %277 : vector<1x7x32xf32> to vector<7x32xf32>
    %279 = vector.shape_cast %276 : vector<7x32xf32> to vector<1x7x32xf32>
    tpu.vector_store %arg11[%c1_340, %c0_341, %c0_342], %279 {strides = array<i32>} : memref<6x7x32xf32, #tpu.memory_space<vmem>>, vector<1x7x32xf32>,
    %cst_343 = arith.constant 0.000000e+00 : f32
    %280 = vector.broadcast %cst_343 : f32 to vector<14x32xf32>
    %c0_344 = arith.constant 0 : index
    %c4_345 = arith.constant 4 : index
    %c0_346 = arith.constant 0 : index
    %c0_347 = arith.constant 0 : index
    %281 = vector.load %arg1[%c0_344, %c4_345, %c0_346, %c0_347] : memref<1x16x16x3xf32, #tpu.memory_space<vmem>>, vector<1x1x14x3xf32>
    %282 = vector.shape_cast %281 : vector<1x1x14x3xf32> to vector<14x3xf32>
    %c0_348 = arith.constant 0 : index
    %c0_349 = arith.constant 0 : index
    %c0_350 = arith.constant 0 : index
    %c0_351 = arith.constant 0 : index
    %283 = vector.load %arg2[%c0_348, %c0_349, %c0_350, %c0_351] : memref<3x3x3x32xf32, #tpu.memory_space<vmem>>, vector<1x1x3x32xf32>
    %284 = vector.shape_cast %283 : vector<1x1x3x32xf32> to vector<3x32xf32>
    %cst_352 = arith.constant dense<0.000000e+00> : vector<14x32xf32>
    %285 = tpu.matmul %282, %284, %cst_352 {dimension_numbers = #tpu.dot_dimension_numbers<[1], [0], [0], [1], [0, 0, 1, 1], [], []>} : vector<14x3xf32>, vector<3x32xf32>, vector<14x32xf32> -> vector<14x32xf32>
    %286 = arith.addf %280, %285 : vector<14x32xf32>
    %c0_353 = arith.constant 0 : index
    %c4_354 = arith.constant 4 : index
    %c1_355 = arith.constant 1 : index
    %c0_356 = arith.constant 0 : index
    %287 = vector.load %arg1[%c0_353, %c4_354, %c1_355, %c0_356] : memref<1x16x16x3xf32, #tpu.memory_space<vmem>>, vector<1x1x14x3xf32>
    %288 = vector.shape_cast %287 : vector<1x1x14x3xf32> to vector<14x3xf32>
    %c0_357 = arith.constant 0 : index
    %c1_358 = arith.constant 1 : index
    %c0_359 = arith.constant 0 : index
    %c0_360 = arith.constant 0 : index
    %289 = vector.load %arg2[%c0_357, %c1_358, %c0_359, %c0_360] : memref<3x3x3x32xf32, #tpu.memory_space<vmem>>, vector<1x1x3x32xf32>
    %290 = vector.shape_cast %289 : vector<1x1x3x32xf32> to vector<3x32xf32>
    %cst_361 = arith.constant dense<0.000000e+00> : vector<14x32xf32>
    %291 = tpu.matmul %288, %290, %cst_361 {dimension_numbers = #tpu.dot_dimension_numbers<[1], [0], [0], [1], [0, 0, 1, 1], [], []>} : vector<14x3xf32>, vector<3x32xf32>, vector<14x32xf32> -> vector<14x32xf32>
    %292 = arith.addf %286, %291 : vector<14x32xf32>
    %c0_362 = arith.constant 0 : index
    %c4_363 = arith.constant 4 : index
    %c2_364 = arith.constant 2 : index
    %c0_365 = arith.constant 0 : index
    %293 = vector.load %arg1[%c0_362, %c4_363, %c2_364, %c0_365] : memref<1x16x16x3xf32, #tpu.memory_space<vmem>>, vector<1x1x14x3xf32>
    %294 = vector.shape_cast %293 : vector<1x1x14x3xf32> to vector<14x3xf32>
    %c0_366 = arith.constant 0 : index
    %c2_367 = arith.constant 2 : index
    %c0_368 = arith.constant 0 : index
    %c0_369 = arith.constant 0 : index
    %295 = vector.load %arg2[%c0_366, %c2_367, %c0_368, %c0_369] : memref<3x3x3x32xf32, #tpu.memory_space<vmem>>, vector<1x1x3x32xf32>
    %296 = vector.shape_cast %295 : vector<1x1x3x32xf32> to vector<3x32xf32>
    %cst_370 = arith.constant dense<0.000000e+00> : vector<14x32xf32>
    %297 = tpu.matmul %294, %296, %cst_370 {dimension_numbers = #tpu.dot_dimension_numbers<[1], [0], [0], [1], [0, 0, 1, 1], [], []>} : vector<14x3xf32>, vector<3x32xf32>, vector<14x32xf32> -> vector<14x32xf32>
    %298 = arith.addf %292, %297 : vector<14x32xf32>
    %c0_371 = arith.constant 0 : index
    %c5_372 = arith.constant 5 : index
    %c0_373 = arith.constant 0 : index
    %c0_374 = arith.constant 0 : index
    %299 = vector.load %arg1[%c0_371, %c5_372, %c0_373, %c0_374] : memref<1x16x16x3xf32, #tpu.memory_space<vmem>>, vector<1x1x14x3xf32>
    %300 = vector.shape_cast %299 : vector<1x1x14x3xf32> to vector<14x3xf32>
    %c1_375 = arith.constant 1 : index
    %c0_376 = arith.constant 0 : index
    %c0_377 = arith.constant 0 : index
    %c0_378 = arith.constant 0 : index
    %301 = vector.load %arg2[%c1_375, %c0_376, %c0_377, %c0_378] : memref<3x3x3x32xf32, #tpu.memory_space<vmem>>, vector<1x1x3x32xf32>
    %302 = vector.shape_cast %301 : vector<1x1x3x32xf32> to vector<3x32xf32>
    %cst_379 = arith.constant dense<0.000000e+00> : vector<14x32xf32>
    %303 = tpu.matmul %300, %302, %cst_379 {dimension_numbers = #tpu.dot_dimension_numbers<[1], [0], [0], [1], [0, 0, 1, 1], [], []>} : vector<14x3xf32>, vector<3x32xf32>, vector<14x32xf32> -> vector<14x32xf32>
    %304 = arith.addf %298, %303 : vector<14x32xf32>
    %c0_380 = arith.constant 0 : index
    %c5_381 = arith.constant 5 : index
    %c1_382 = arith.constant 1 : index
    %c0_383 = arith.constant 0 : index
    %305 = vector.load %arg1[%c0_380, %c5_381, %c1_382, %c0_383] : memref<1x16x16x3xf32, #tpu.memory_space<vmem>>, vector<1x1x14x3xf32>
    %306 = vector.shape_cast %305 : vector<1x1x14x3xf32> to vector<14x3xf32>
    %c1_384 = arith.constant 1 : index
    %c1_385 = arith.constant 1 : index
    %c0_386 = arith.constant 0 : index
    %c0_387 = arith.constant 0 : index
    %307 = vector.load %arg2[%c1_384, %c1_385, %c0_386, %c0_387] : memref<3x3x3x32xf32, #tpu.memory_space<vmem>>, vector<1x1x3x32xf32>
    %308 = vector.shape_cast %307 : vector<1x1x3x32xf32> to vector<3x32xf32>
    %cst_388 = arith.constant dense<0.000000e+00> : vector<14x32xf32>
    %309 = tpu.matmul %306, %308, %cst_388 {dimension_numbers = #tpu.dot_dimension_numbers<[1], [0], [0], [1], [0, 0, 1, 1], [], []>} : vector<14x3xf32>, vector<3x32xf32>, vector<14x32xf32> -> vector<14x32xf32>
    %310 = arith.addf %304, %309 : vector<14x32xf32>
    %c0_389 = arith.constant 0 : index
    %c5_390 = arith.constant 5 : index
    %c2_391 = arith.constant 2 : index
    %c0_392 = arith.constant 0 : index
    %311 = vector.load %arg1[%c0_389, %c5_390, %c2_391, %c0_392] : memref<1x16x16x3xf32, #tpu.memory_space<vmem>>, vector<1x1x14x3xf32>
    %312 = vector.shape_cast %311 : vector<1x1x14x3xf32> to vector<14x3xf32>
    %c1_393 = arith.constant 1 : index
    %c2_394 = arith.constant 2 : index
    %c0_395 = arith.constant 0 : index
    %c0_396 = arith.constant 0 : index
    %313 = vector.load %arg2[%c1_393, %c2_394, %c0_395, %c0_396] : memref<3x3x3x32xf32, #tpu.memory_space<vmem>>, vector<1x1x3x32xf32>
    %314 = vector.shape_cast %313 : vector<1x1x3x32xf32> to vector<3x32xf32>
    %cst_397 = arith.constant dense<0.000000e+00> : vector<14x32xf32>
    %315 = tpu.matmul %312, %314, %cst_397 {dimension_numbers = #tpu.dot_dimension_numbers<[1], [0], [0], [1], [0, 0, 1, 1], [], []>} : vector<14x3xf32>, vector<3x32xf32>, vector<14x32xf32> -> vector<14x32xf32>
    %316 = arith.addf %310, %315 : vector<14x32xf32>
    %c0_398 = arith.constant 0 : index
    %c6 = arith.constant 6 : index
    %c0_399 = arith.constant 0 : index
    %c0_400 = arith.constant 0 : index
    %317 = vector.load %arg1[%c0_398, %c6, %c0_399, %c0_400] : memref<1x16x16x3xf32, #tpu.memory_space<vmem>>, vector<1x1x14x3xf32>
    %318 = vector.shape_cast %317 : vector<1x1x14x3xf32> to vector<14x3xf32>
    %c2_401 = arith.constant 2 : index
    %c0_402 = arith.constant 0 : index
    %c0_403 = arith.constant 0 : index
    %c0_404 = arith.constant 0 : index
    %319 = vector.load %arg2[%c2_401, %c0_402, %c0_403, %c0_404] : memref<3x3x3x32xf32, #tpu.memory_space<vmem>>, vector<1x1x3x32xf32>
    %320 = vector.shape_cast %319 : vector<1x1x3x32xf32> to vector<3x32xf32>
    %cst_405 = arith.constant dense<0.000000e+00> : vector<14x32xf32>
    %321 = tpu.matmul %318, %320, %cst_405 {dimension_numbers = #tpu.dot_dimension_numbers<[1], [0], [0], [1], [0, 0, 1, 1], [], []>} : vector<14x3xf32>, vector<3x32xf32>, vector<14x32xf32> -> vector<14x32xf32>
    %322 = arith.addf %316, %321 : vector<14x32xf32>
    %c0_406 = arith.constant 0 : index
    %c6_407 = arith.constant 6 : index
    %c1_408 = arith.constant 1 : index
    %c0_409 = arith.constant 0 : index
    %323 = vector.load %arg1[%c0_406, %c6_407, %c1_408, %c0_409] : memref<1x16x16x3xf32, #tpu.memory_space<vmem>>, vector<1x1x14x3xf32>
    %324 = vector.shape_cast %323 : vector<1x1x14x3xf32> to vector<14x3xf32>
    %c2_410 = arith.constant 2 : index
    %c1_411 = arith.constant 1 : index
    %c0_412 = arith.constant 0 : index
    %c0_413 = arith.constant 0 : index
    %325 = vector.load %arg2[%c2_410, %c1_411, %c0_412, %c0_413] : memref<3x3x3x32xf32, #tpu.memory_space<vmem>>, vector<1x1x3x32xf32>
    %326 = vector.shape_cast %325 : vector<1x1x3x32xf32> to vector<3x32xf32>
    %cst_414 = arith.constant dense<0.000000e+00> : vector<14x32xf32>
    %327 = tpu.matmul %324, %326, %cst_414 {dimension_numbers = #tpu.dot_dimension_numbers<[1], [0], [0], [1], [0, 0, 1, 1], [], []>} : vector<14x3xf32>, vector<3x32xf32>, vector<14x32xf32> -> vector<14x32xf32>
    %328 = arith.addf %322, %327 : vector<14x32xf32>
    %c0_415 = arith.constant 0 : index
    %c6_416 = arith.constant 6 : index
    %c2_417 = arith.constant 2 : index
    %c0_418 = arith.constant 0 : index
    %329 = vector.load %arg1[%c0_415, %c6_416, %c2_417, %c0_418] : memref<1x16x16x3xf32, #tpu.memory_space<vmem>>, vector<1x1x14x3xf32>
    %330 = vector.shape_cast %329 : vector<1x1x14x3xf32> to vector<14x3xf32>
    %c2_419 = arith.constant 2 : index
    %c2_420 = arith.constant 2 : index
    %c0_421 = arith.constant 0 : index
    %c0_422 = arith.constant 0 : index
    %331 = vector.load %arg2[%c2_419, %c2_420, %c0_421, %c0_422] : memref<3x3x3x32xf32, #tpu.memory_space<vmem>>, vector<1x1x3x32xf32>
    %332 = vector.shape_cast %331 : vector<1x1x3x32xf32> to vector<3x32xf32>
    %cst_423 = arith.constant dense<0.000000e+00> : vector<14x32xf32>
    %333 = tpu.matmul %330, %332, %cst_423 {dimension_numbers = #tpu.dot_dimension_numbers<[1], [0], [0], [1], [0, 0, 1, 1], [], []>} : vector<14x3xf32>, vector<3x32xf32>, vector<14x32xf32> -> vector<14x32xf32>
    %334 = arith.addf %328, %333 : vector<14x32xf32>
    %335 = vector.broadcast %0 : vector<1x32xf32> to vector<14x32xf32>
    %336 = arith.addf %334, %335 : vector<14x32xf32>
    %cst_424 = arith.constant 0.000000e+00 : f32
    %337 = vector.broadcast %cst_424 : f32 to vector<14x32xf32>
    %338 = arith.maximumf %336, %337 : vector<14x32xf32>
    %cst_425 = arith.constant 0.000000e+00 : f32
    %339 = vector.broadcast %cst_425 : f32 to vector<14x32xf32>
    %c0_426 = arith.constant 0 : index
    %c5_427 = arith.constant 5 : index
    %c0_428 = arith.constant 0 : index
    %c0_429 = arith.constant 0 : index
    %340 = vector.load %arg1[%c0_426, %c5_427, %c0_428, %c0_429] : memref<1x16x16x3xf32, #tpu.memory_space<vmem>>, vector<1x1x14x3xf32>
    %341 = vector.shape_cast %340 : vector<1x1x14x3xf32> to vector<14x3xf32>
    %c0_430 = arith.constant 0 : index
    %c0_431 = arith.constant 0 : index
    %c0_432 = arith.constant 0 : index
    %c0_433 = arith.constant 0 : index
    %342 = vector.load %arg2[%c0_430, %c0_431, %c0_432, %c0_433] : memref<3x3x3x32xf32, #tpu.memory_space<vmem>>, vector<1x1x3x32xf32>
    %343 = vector.shape_cast %342 : vector<1x1x3x32xf32> to vector<3x32xf32>
    %cst_434 = arith.constant dense<0.000000e+00> : vector<14x32xf32>
    %344 = tpu.matmul %341, %343, %cst_434 {dimension_numbers = #tpu.dot_dimension_numbers<[1], [0], [0], [1], [0, 0, 1, 1], [], []>} : vector<14x3xf32>, vector<3x32xf32>, vector<14x32xf32> -> vector<14x32xf32>
    %345 = arith.addf %339, %344 : vector<14x32xf32>
    %c0_435 = arith.constant 0 : index
    %c5_436 = arith.constant 5 : index
    %c1_437 = arith.constant 1 : index
    %c0_438 = arith.constant 0 : index
    %346 = vector.load %arg1[%c0_435, %c5_436, %c1_437, %c0_438] : memref<1x16x16x3xf32, #tpu.memory_space<vmem>>, vector<1x1x14x3xf32>
    %347 = vector.shape_cast %346 : vector<1x1x14x3xf32> to vector<14x3xf32>
    %c0_439 = arith.constant 0 : index
    %c1_440 = arith.constant 1 : index
    %c0_441 = arith.constant 0 : index
    %c0_442 = arith.constant 0 : index
    %348 = vector.load %arg2[%c0_439, %c1_440, %c0_441, %c0_442] : memref<3x3x3x32xf32, #tpu.memory_space<vmem>>, vector<1x1x3x32xf32>
    %349 = vector.shape_cast %348 : vector<1x1x3x32xf32> to vector<3x32xf32>
    %cst_443 = arith.constant dense<0.000000e+00> : vector<14x32xf32>
    %350 = tpu.matmul %347, %349, %cst_443 {dimension_numbers = #tpu.dot_dimension_numbers<[1], [0], [0], [1], [0, 0, 1, 1], [], []>} : vector<14x3xf32>, vector<3x32xf32>, vector<14x32xf32> -> vector<14x32xf32>
    %351 = arith.addf %345, %350 : vector<14x32xf32>
    %c0_444 = arith.constant 0 : index
    %c5_445 = arith.constant 5 : index
    %c2_446 = arith.constant 2 : index
    %c0_447 = arith.constant 0 : index
    %352 = vector.load %arg1[%c0_444, %c5_445, %c2_446, %c0_447] : memref<1x16x16x3xf32, #tpu.memory_space<vmem>>, vector<1x1x14x3xf32>
    %353 = vector.shape_cast %352 : vector<1x1x14x3xf32> to vector<14x3xf32>
    %c0_448 = arith.constant 0 : index
    %c2_449 = arith.constant 2 : index
    %c0_450 = arith.constant 0 : index
    %c0_451 = arith.constant 0 : index
    %354 = vector.load %arg2[%c0_448, %c2_449, %c0_450, %c0_451] : memref<3x3x3x32xf32, #tpu.memory_space<vmem>>, vector<1x1x3x32xf32>
    %355 = vector.shape_cast %354 : vector<1x1x3x32xf32> to vector<3x32xf32>
    %cst_452 = arith.constant dense<0.000000e+00> : vector<14x32xf32>
    %356 = tpu.matmul %353, %355, %cst_452 {dimension_numbers = #tpu.dot_dimension_numbers<[1], [0], [0], [1], [0, 0, 1, 1], [], []>} : vector<14x3xf32>, vector<3x32xf32>, vector<14x32xf32> -> vector<14x32xf32>
    %357 = arith.addf %351, %356 : vector<14x32xf32>
    %c0_453 = arith.constant 0 : index
    %c6_454 = arith.constant 6 : index
    %c0_455 = arith.constant 0 : index
    %c0_456 = arith.constant 0 : index
    %358 = vector.load %arg1[%c0_453, %c6_454, %c0_455, %c0_456] : memref<1x16x16x3xf32, #tpu.memory_space<vmem>>, vector<1x1x14x3xf32>
    %359 = vector.shape_cast %358 : vector<1x1x14x3xf32> to vector<14x3xf32>
    %c1_457 = arith.constant 1 : index
    %c0_458 = arith.constant 0 : index
    %c0_459 = arith.constant 0 : index
    %c0_460 = arith.constant 0 : index
    %360 = vector.load %arg2[%c1_457, %c0_458, %c0_459, %c0_460] : memref<3x3x3x32xf32, #tpu.memory_space<vmem>>, vector<1x1x3x32xf32>
    %361 = vector.shape_cast %360 : vector<1x1x3x32xf32> to vector<3x32xf32>
    %cst_461 = arith.constant dense<0.000000e+00> : vector<14x32xf32>
    %362 = tpu.matmul %359, %361, %cst_461 {dimension_numbers = #tpu.dot_dimension_numbers<[1], [0], [0], [1], [0, 0, 1, 1], [], []>} : vector<14x3xf32>, vector<3x32xf32>, vector<14x32xf32> -> vector<14x32xf32>
    %363 = arith.addf %357, %362 : vector<14x32xf32>
    %c0_462 = arith.constant 0 : index
    %c6_463 = arith.constant 6 : index
    %c1_464 = arith.constant 1 : index
    %c0_465 = arith.constant 0 : index
    %364 = vector.load %arg1[%c0_462, %c6_463, %c1_464, %c0_465] : memref<1x16x16x3xf32, #tpu.memory_space<vmem>>, vector<1x1x14x3xf32>
    %365 = vector.shape_cast %364 : vector<1x1x14x3xf32> to vector<14x3xf32>
    %c1_466 = arith.constant 1 : index
    %c1_467 = arith.constant 1 : index
    %c0_468 = arith.constant 0 : index
    %c0_469 = arith.constant 0 : index
    %366 = vector.load %arg2[%c1_466, %c1_467, %c0_468, %c0_469] : memref<3x3x3x32xf32, #tpu.memory_space<vmem>>, vector<1x1x3x32xf32>
    %367 = vector.shape_cast %366 : vector<1x1x3x32xf32> to vector<3x32xf32>
    %cst_470 = arith.constant dense<0.000000e+00> : vector<14x32xf32>
    %368 = tpu.matmul %365, %367, %cst_470 {dimension_numbers = #tpu.dot_dimension_numbers<[1], [0], [0], [1], [0, 0, 1, 1], [], []>} : vector<14x3xf32>, vector<3x32xf32>, vector<14x32xf32> -> vector<14x32xf32>
    %369 = arith.addf %363, %368 : vector<14x32xf32>
    %c0_471 = arith.constant 0 : index
    %c6_472 = arith.constant 6 : index
    %c2_473 = arith.constant 2 : index
    %c0_474 = arith.constant 0 : index
    %370 = vector.load %arg1[%c0_471, %c6_472, %c2_473, %c0_474] : memref<1x16x16x3xf32, #tpu.memory_space<vmem>>, vector<1x1x14x3xf32>
    %371 = vector.shape_cast %370 : vector<1x1x14x3xf32> to vector<14x3xf32>
    %c1_475 = arith.constant 1 : index
    %c2_476 = arith.constant 2 : index
    %c0_477 = arith.constant 0 : index
    %c0_478 = arith.constant 0 : index
    %372 = vector.load %arg2[%c1_475, %c2_476, %c0_477, %c0_478] : memref<3x3x3x32xf32, #tpu.memory_space<vmem>>, vector<1x1x3x32xf32>
    %373 = vector.shape_cast %372 : vector<1x1x3x32xf32> to vector<3x32xf32>
    %cst_479 = arith.constant dense<0.000000e+00> : vector<14x32xf32>
    %374 = tpu.matmul %371, %373, %cst_479 {dimension_numbers = #tpu.dot_dimension_numbers<[1], [0], [0], [1], [0, 0, 1, 1], [], []>} : vector<14x3xf32>, vector<3x32xf32>, vector<14x32xf32> -> vector<14x32xf32>
    %375 = arith.addf %369, %374 : vector<14x32xf32>
    %c0_480 = arith.constant 0 : index
    %c7 = arith.constant 7 : index
    %c0_481 = arith.constant 0 : index
    %c0_482 = arith.constant 0 : index
    %376 = vector.load %arg1[%c0_480, %c7, %c0_481, %c0_482] : memref<1x16x16x3xf32, #tpu.memory_space<vmem>>, vector<1x1x14x3xf32>
    %377 = vector.shape_cast %376 : vector<1x1x14x3xf32> to vector<14x3xf32>
    %c2_483 = arith.constant 2 : index
    %c0_484 = arith.constant 0 : index
    %c0_485 = arith.constant 0 : index
    %c0_486 = arith.constant 0 : index
    %378 = vector.load %arg2[%c2_483, %c0_484, %c0_485, %c0_486] : memref<3x3x3x32xf32, #tpu.memory_space<vmem>>, vector<1x1x3x32xf32>
    %379 = vector.shape_cast %378 : vector<1x1x3x32xf32> to vector<3x32xf32>
    %cst_487 = arith.constant dense<0.000000e+00> : vector<14x32xf32>
    %380 = tpu.matmul %377, %379, %cst_487 {dimension_numbers = #tpu.dot_dimension_numbers<[1], [0], [0], [1], [0, 0, 1, 1], [], []>} : vector<14x3xf32>, vector<3x32xf32>, vector<14x32xf32> -> vector<14x32xf32>
    %381 = arith.addf %375, %380 : vector<14x32xf32>
    %c0_488 = arith.constant 0 : index
    %c7_489 = arith.constant 7 : index
    %c1_490 = arith.constant 1 : index
    %c0_491 = arith.constant 0 : index
    %382 = vector.load %arg1[%c0_488, %c7_489, %c1_490, %c0_491] : memref<1x16x16x3xf32, #tpu.memory_space<vmem>>, vector<1x1x14x3xf32>
    %383 = vector.shape_cast %382 : vector<1x1x14x3xf32> to vector<14x3xf32>
    %c2_492 = arith.constant 2 : index
    %c1_493 = arith.constant 1 : index
    %c0_494 = arith.constant 0 : index
    %c0_495 = arith.constant 0 : index
    %384 = vector.load %arg2[%c2_492, %c1_493, %c0_494, %c0_495] : memref<3x3x3x32xf32, #tpu.memory_space<vmem>>, vector<1x1x3x32xf32>
    %385 = vector.shape_cast %384 : vector<1x1x3x32xf32> to vector<3x32xf32>
    %cst_496 = arith.constant dense<0.000000e+00> : vector<14x32xf32>
    %386 = tpu.matmul %383, %385, %cst_496 {dimension_numbers = #tpu.dot_dimension_numbers<[1], [0], [0], [1], [0, 0, 1, 1], [], []>} : vector<14x3xf32>, vector<3x32xf32>, vector<14x32xf32> -> vector<14x32xf32>
    %387 = arith.addf %381, %386 : vector<14x32xf32>
    %c0_497 = arith.constant 0 : index
    %c7_498 = arith.constant 7 : index
    %c2_499 = arith.constant 2 : index
    %c0_500 = arith.constant 0 : index
    %388 = vector.load %arg1[%c0_497, %c7_498, %c2_499, %c0_500] : memref<1x16x16x3xf32, #tpu.memory_space<vmem>>, vector<1x1x14x3xf32>
    %389 = vector.shape_cast %388 : vector<1x1x14x3xf32> to vector<14x3xf32>
    %c2_501 = arith.constant 2 : index
    %c2_502 = arith.constant 2 : index
    %c0_503 = arith.constant 0 : index
    %c0_504 = arith.constant 0 : index
    %390 = vector.load %arg2[%c2_501, %c2_502, %c0_503, %c0_504] : memref<3x3x3x32xf32, #tpu.memory_space<vmem>>, vector<1x1x3x32xf32>
    %391 = vector.shape_cast %390 : vector<1x1x3x32xf32> to vector<3x32xf32>
    %cst_505 = arith.constant dense<0.000000e+00> : vector<14x32xf32>
    %392 = tpu.matmul %389, %391, %cst_505 {dimension_numbers = #tpu.dot_dimension_numbers<[1], [0], [0], [1], [0, 0, 1, 1], [], []>} : vector<14x3xf32>, vector<3x32xf32>, vector<14x32xf32> -> vector<14x32xf32>
    %393 = arith.addf %387, %392 : vector<14x32xf32>
    %394 = vector.broadcast %0 : vector<1x32xf32> to vector<14x32xf32>
    %395 = arith.addf %393, %394 : vector<14x32xf32>
    %cst_506 = arith.constant 0.000000e+00 : f32
    %396 = vector.broadcast %cst_506 : f32 to vector<14x32xf32>
    %397 = arith.maximumf %395, %396 : vector<14x32xf32>
    %398 = arith.maximumf %338, %397 : vector<14x32xf32>
    %cst_507 = arith.constant dense<0.000000e+00> : vector<7x32xf32>
    %399 = tpu.matmul %8, %398, %cst_507 {dimension_numbers = #tpu.dot_dimension_numbers<[1], [0], [0], [1], [0, 0, 1, 1], [], []>} : vector<7x14xf32>, vector<14x32xf32>, vector<7x32xf32> -> vector<7x32xf32>
    %cst_508 = arith.constant dense<0.000000e+00> : vector<7x32xf32>
    %400 = tpu.matmul %15, %398, %cst_508 {dimension_numbers = #tpu.dot_dimension_numbers<[1], [0], [0], [1], [0, 0, 1, 1], [], []>} : vector<7x14xf32>, vector<14x32xf32>, vector<7x32xf32> -> vector<7x32xf32>
    %401 = arith.maximumf %399, %400 : vector<7x32xf32>
    %c2_509 = arith.constant 2 : index
    %c0_510 = arith.constant 0 : index
    %c0_511 = arith.constant 0 : index
    %402 = vector.load %arg11[%c2_509, %c0_510, %c0_511] : memref<6x7x32xf32, #tpu.memory_space<vmem>>, vector<1x7x32xf32>
    %403 = vector.shape_cast %402 : vector<1x7x32xf32> to vector<7x32xf32>
    %404 = vector.shape_cast %401 : vector<7x32xf32> to vector<1x7x32xf32>
    tpu.vector_store %arg11[%c2_509, %c0_510, %c0_511], %404 {strides = array<i32>} : memref<6x7x32xf32, #tpu.memory_space<vmem>>, vector<1x7x32xf32>,
    %cst_512 = arith.constant 0.000000e+00 : f32
    %405 = vector.broadcast %cst_512 : f32 to vector<14x32xf32>
    %c0_513 = arith.constant 0 : index
    %c6_514 = arith.constant 6 : index
    %c0_515 = arith.constant 0 : index
    %c0_516 = arith.constant 0 : index
    %406 = vector.load %arg1[%c0_513, %c6_514, %c0_515, %c0_516] : memref<1x16x16x3xf32, #tpu.memory_space<vmem>>, vector<1x1x14x3xf32>
    %407 = vector.shape_cast %406 : vector<1x1x14x3xf32> to vector<14x3xf32>
    %c0_517 = arith.constant 0 : index
    %c0_518 = arith.constant 0 : index
    %c0_519 = arith.constant 0 : index
    %c0_520 = arith.constant 0 : index
    %408 = vector.load %arg2[%c0_517, %c0_518, %c0_519, %c0_520] : memref<3x3x3x32xf32, #tpu.memory_space<vmem>>, vector<1x1x3x32xf32>
    %409 = vector.shape_cast %408 : vector<1x1x3x32xf32> to vector<3x32xf32>
    %cst_521 = arith.constant dense<0.000000e+00> : vector<14x32xf32>
    %410 = tpu.matmul %407, %409, %cst_521 {dimension_numbers = #tpu.dot_dimension_numbers<[1], [0], [0], [1], [0, 0, 1, 1], [], []>} : vector<14x3xf32>, vector<3x32xf32>, vector<14x32xf32> -> vector<14x32xf32>
    %411 = arith.addf %405, %410 : vector<14x32xf32>
    %c0_522 = arith.constant 0 : index
    %c6_523 = arith.constant 6 : index
    %c1_524 = arith.constant 1 : index
    %c0_525 = arith.constant 0 : index
    %412 = vector.load %arg1[%c0_522, %c6_523, %c1_524, %c0_525] : memref<1x16x16x3xf32, #tpu.memory_space<vmem>>, vector<1x1x14x3xf32>
    %413 = vector.shape_cast %412 : vector<1x1x14x3xf32> to vector<14x3xf32>
    %c0_526 = arith.constant 0 : index
    %c1_527 = arith.constant 1 : index
    %c0_528 = arith.constant 0 : index
    %c0_529 = arith.constant 0 : index
    %414 = vector.load %arg2[%c0_526, %c1_527, %c0_528, %c0_529] : memref<3x3x3x32xf32, #tpu.memory_space<vmem>>, vector<1x1x3x32xf32>
    %415 = vector.shape_cast %414 : vector<1x1x3x32xf32> to vector<3x32xf32>
    %cst_530 = arith.constant dense<0.000000e+00> : vector<14x32xf32>
    %416 = tpu.matmul %413, %415, %cst_530 {dimension_numbers = #tpu.dot_dimension_numbers<[1], [0], [0], [1], [0, 0, 1, 1], [], []>} : vector<14x3xf32>, vector<3x32xf32>, vector<14x32xf32> -> vector<14x32xf32>
    %417 = arith.addf %411, %416 : vector<14x32xf32>
    %c0_531 = arith.constant 0 : index
    %c6_532 = arith.constant 6 : index
    %c2_533 = arith.constant 2 : index
    %c0_534 = arith.constant 0 : index
    %418 = vector.load %arg1[%c0_531, %c6_532, %c2_533, %c0_534] : memref<1x16x16x3xf32, #tpu.memory_space<vmem>>, vector<1x1x14x3xf32>
    %419 = vector.shape_cast %418 : vector<1x1x14x3xf32> to vector<14x3xf32>
    %c0_535 = arith.constant 0 : index
    %c2_536 = arith.constant 2 : index
    %c0_537 = arith.constant 0 : index
    %c0_538 = arith.constant 0 : index
    %420 = vector.load %arg2[%c0_535, %c2_536, %c0_537, %c0_538] : memref<3x3x3x32xf32, #tpu.memory_space<vmem>>, vector<1x1x3x32xf32>
    %421 = vector.shape_cast %420 : vector<1x1x3x32xf32> to vector<3x32xf32>
    %cst_539 = arith.constant dense<0.000000e+00> : vector<14x32xf32>
    %422 = tpu.matmul %419, %421, %cst_539 {dimension_numbers = #tpu.dot_dimension_numbers<[1], [0], [0], [1], [0, 0, 1, 1], [], []>} : vector<14x3xf32>, vector<3x32xf32>, vector<14x32xf32> -> vector<14x32xf32>
    %423 = arith.addf %417, %422 : vector<14x32xf32>
    %c0_540 = arith.constant 0 : index
    %c7_541 = arith.constant 7 : index
    %c0_542 = arith.constant 0 : index
    %c0_543 = arith.constant 0 : index
    %424 = vector.load %arg1[%c0_540, %c7_541, %c0_542, %c0_543] : memref<1x16x16x3xf32, #tpu.memory_space<vmem>>, vector<1x1x14x3xf32>
    %425 = vector.shape_cast %424 : vector<1x1x14x3xf32> to vector<14x3xf32>
    %c1_544 = arith.constant 1 : index
    %c0_545 = arith.constant 0 : index
    %c0_546 = arith.constant 0 : index
    %c0_547 = arith.constant 0 : index
    %426 = vector.load %arg2[%c1_544, %c0_545, %c0_546, %c0_547] : memref<3x3x3x32xf32, #tpu.memory_space<vmem>>, vector<1x1x3x32xf32>
    %427 = vector.shape_cast %426 : vector<1x1x3x32xf32> to vector<3x32xf32>
    %cst_548 = arith.constant dense<0.000000e+00> : vector<14x32xf32>
    %428 = tpu.matmul %425, %427, %cst_548 {dimension_numbers = #tpu.dot_dimension_numbers<[1], [0], [0], [1], [0, 0, 1, 1], [], []>} : vector<14x3xf32>, vector<3x32xf32>, vector<14x32xf32> -> vector<14x32xf32>
    %429 = arith.addf %423, %428 : vector<14x32xf32>
    %c0_549 = arith.constant 0 : index
    %c7_550 = arith.constant 7 : index
    %c1_551 = arith.constant 1 : index
    %c0_552 = arith.constant 0 : index
    %430 = vector.load %arg1[%c0_549, %c7_550, %c1_551, %c0_552] : memref<1x16x16x3xf32, #tpu.memory_space<vmem>>, vector<1x1x14x3xf32>
    %431 = vector.shape_cast %430 : vector<1x1x14x3xf32> to vector<14x3xf32>
    %c1_553 = arith.constant 1 : index
    %c1_554 = arith.constant 1 : index
    %c0_555 = arith.constant 0 : index
    %c0_556 = arith.constant 0 : index
    %432 = vector.load %arg2[%c1_553, %c1_554, %c0_555, %c0_556] : memref<3x3x3x32xf32, #tpu.memory_space<vmem>>, vector<1x1x3x32xf32>
    %433 = vector.shape_cast %432 : vector<1x1x3x32xf32> to vector<3x32xf32>
    %cst_557 = arith.constant dense<0.000000e+00> : vector<14x32xf32>
    %434 = tpu.matmul %431, %433, %cst_557 {dimension_numbers = #tpu.dot_dimension_numbers<[1], [0], [0], [1], [0, 0, 1, 1], [], []>} : vector<14x3xf32>, vector<3x32xf32>, vector<14x32xf32> -> vector<14x32xf32>
    %435 = arith.addf %429, %434 : vector<14x32xf32>
    %c0_558 = arith.constant 0 : index
    %c7_559 = arith.constant 7 : index
    %c2_560 = arith.constant 2 : index
    %c0_561 = arith.constant 0 : index
    %436 = vector.load %arg1[%c0_558, %c7_559, %c2_560, %c0_561] : memref<1x16x16x3xf32, #tpu.memory_space<vmem>>, vector<1x1x14x3xf32>
    %437 = vector.shape_cast %436 : vector<1x1x14x3xf32> to vector<14x3xf32>
    %c1_562 = arith.constant 1 : index
    %c2_563 = arith.constant 2 : index
    %c0_564 = arith.constant 0 : index
    %c0_565 = arith.constant 0 : index
    %438 = vector.load %arg2[%c1_562, %c2_563, %c0_564, %c0_565] : memref<3x3x3x32xf32, #tpu.memory_space<vmem>>, vector<1x1x3x32xf32>
    %439 = vector.shape_cast %438 : vector<1x1x3x32xf32> to vector<3x32xf32>
    %cst_566 = arith.constant dense<0.000000e+00> : vector<14x32xf32>
    %440 = tpu.matmul %437, %439, %cst_566 {dimension_numbers = #tpu.dot_dimension_numbers<[1], [0], [0], [1], [0, 0, 1, 1], [], []>} : vector<14x3xf32>, vector<3x32xf32>, vector<14x32xf32> -> vector<14x32xf32>
    %441 = arith.addf %435, %440 : vector<14x32xf32>
    %c0_567 = arith.constant 0 : index
    %c8 = arith.constant 8 : index
    %c0_568 = arith.constant 0 : index
    %c0_569 = arith.constant 0 : index
    %442 = vector.load %arg1[%c0_567, %c8, %c0_568, %c0_569] : memref<1x16x16x3xf32, #tpu.memory_space<vmem>>, vector<1x1x14x3xf32>
    %443 = vector.shape_cast %442 : vector<1x1x14x3xf32> to vector<14x3xf32>
    %c2_570 = arith.constant 2 : index
    %c0_571 = arith.constant 0 : index
    %c0_572 = arith.constant 0 : index
    %c0_573 = arith.constant 0 : index
    %444 = vector.load %arg2[%c2_570, %c0_571, %c0_572, %c0_573] : memref<3x3x3x32xf32, #tpu.memory_space<vmem>>, vector<1x1x3x32xf32>
    %445 = vector.shape_cast %444 : vector<1x1x3x32xf32> to vector<3x32xf32>
    %cst_574 = arith.constant dense<0.000000e+00> : vector<14x32xf32>
    %446 = tpu.matmul %443, %445, %cst_574 {dimension_numbers = #tpu.dot_dimension_numbers<[1], [0], [0], [1], [0, 0, 1, 1], [], []>} : vector<14x3xf32>, vector<3x32xf32>, vector<14x32xf32> -> vector<14x32xf32>
    %447 = arith.addf %441, %446 : vector<14x32xf32>
    %c0_575 = arith.constant 0 : index
    %c8_576 = arith.constant 8 : index
    %c1_577 = arith.constant 1 : index
    %c0_578 = arith.constant 0 : index
    %448 = vector.load %arg1[%c0_575, %c8_576, %c1_577, %c0_578] : memref<1x16x16x3xf32, #tpu.memory_space<vmem>>, vector<1x1x14x3xf32>
    %449 = vector.shape_cast %448 : vector<1x1x14x3xf32> to vector<14x3xf32>
    %c2_579 = arith.constant 2 : index
    %c1_580 = arith.constant 1 : index
    %c0_581 = arith.constant 0 : index
    %c0_582 = arith.constant 0 : index
    %450 = vector.load %arg2[%c2_579, %c1_580, %c0_581, %c0_582] : memref<3x3x3x32xf32, #tpu.memory_space<vmem>>, vector<1x1x3x32xf32>
    %451 = vector.shape_cast %450 : vector<1x1x3x32xf32> to vector<3x32xf32>
    %cst_583 = arith.constant dense<0.000000e+00> : vector<14x32xf32>
    %452 = tpu.matmul %449, %451, %cst_583 {dimension_numbers = #tpu.dot_dimension_numbers<[1], [0], [0], [1], [0, 0, 1, 1], [], []>} : vector<14x3xf32>, vector<3x32xf32>, vector<14x32xf32> -> vector<14x32xf32>
    %453 = arith.addf %447, %452 : vector<14x32xf32>
    %c0_584 = arith.constant 0 : index
    %c8_585 = arith.constant 8 : index
    %c2_586 = arith.constant 2 : index
    %c0_587 = arith.constant 0 : index
    %454 = vector.load %arg1[%c0_584, %c8_585, %c2_586, %c0_587] : memref<1x16x16x3xf32, #tpu.memory_space<vmem>>, vector<1x1x14x3xf32>
    %455 = vector.shape_cast %454 : vector<1x1x14x3xf32> to vector<14x3xf32>
    %c2_588 = arith.constant 2 : index
    %c2_589 = arith.constant 2 : index
    %c0_590 = arith.constant 0 : index
    %c0_591 = arith.constant 0 : index
    %456 = vector.load %arg2[%c2_588, %c2_589, %c0_590, %c0_591] : memref<3x3x3x32xf32, #tpu.memory_space<vmem>>, vector<1x1x3x32xf32>
    %457 = vector.shape_cast %456 : vector<1x1x3x32xf32> to vector<3x32xf32>
    %cst_592 = arith.constant dense<0.000000e+00> : vector<14x32xf32>
    %458 = tpu.matmul %455, %457, %cst_592 {dimension_numbers = #tpu.dot_dimension_numbers<[1], [0], [0], [1], [0, 0, 1, 1], [], []>} : vector<14x3xf32>, vector<3x32xf32>, vector<14x32xf32> -> vector<14x32xf32>
    %459 = arith.addf %453, %458 : vector<14x32xf32>
    %460 = vector.broadcast %0 : vector<1x32xf32> to vector<14x32xf32>
    %461 = arith.addf %459, %460 : vector<14x32xf32>
    %cst_593 = arith.constant 0.000000e+00 : f32
    %462 = vector.broadcast %cst_593 : f32 to vector<14x32xf32>
    %463 = arith.maximumf %461, %462 : vector<14x32xf32>
    %cst_594 = arith.constant 0.000000e+00 : f32
    %464 = vector.broadcast %cst_594 : f32 to vector<14x32xf32>
    %c0_595 = arith.constant 0 : index
    %c7_596 = arith.constant 7 : index
    %c0_597 = arith.constant 0 : index
    %c0_598 = arith.constant 0 : index
    %465 = vector.load %arg1[%c0_595, %c7_596, %c0_597, %c0_598] : memref<1x16x16x3xf32, #tpu.memory_space<vmem>>, vector<1x1x14x3xf32>
    %466 = vector.shape_cast %465 : vector<1x1x14x3xf32> to vector<14x3xf32>
    %c0_599 = arith.constant 0 : index
    %c0_600 = arith.constant 0 : index
    %c0_601 = arith.constant 0 : index
    %c0_602 = arith.constant 0 : index
    %467 = vector.load %arg2[%c0_599, %c0_600, %c0_601, %c0_602] : memref<3x3x3x32xf32, #tpu.memory_space<vmem>>, vector<1x1x3x32xf32>
    %468 = vector.shape_cast %467 : vector<1x1x3x32xf32> to vector<3x32xf32>
    %cst_603 = arith.constant dense<0.000000e+00> : vector<14x32xf32>
    %469 = tpu.matmul %466, %468, %cst_603 {dimension_numbers = #tpu.dot_dimension_numbers<[1], [0], [0], [1], [0, 0, 1, 1], [], []>} : vector<14x3xf32>, vector<3x32xf32>, vector<14x32xf32> -> vector<14x32xf32>
    %470 = arith.addf %464, %469 : vector<14x32xf32>
    %c0_604 = arith.constant 0 : index
    %c7_605 = arith.constant 7 : index
    %c1_606 = arith.constant 1 : index
    %c0_607 = arith.constant 0 : index
    %471 = vector.load %arg1[%c0_604, %c7_605, %c1_606, %c0_607] : memref<1x16x16x3xf32, #tpu.memory_space<vmem>>, vector<1x1x14x3xf32>
    %472 = vector.shape_cast %471 : vector<1x1x14x3xf32> to vector<14x3xf32>
    %c0_608 = arith.constant 0 : index
    %c1_609 = arith.constant 1 : index
    %c0_610 = arith.constant 0 : index
    %c0_611 = arith.constant 0 : index
    %473 = vector.load %arg2[%c0_608, %c1_609, %c0_610, %c0_611] : memref<3x3x3x32xf32, #tpu.memory_space<vmem>>, vector<1x1x3x32xf32>
    %474 = vector.shape_cast %473 : vector<1x1x3x32xf32> to vector<3x32xf32>
    %cst_612 = arith.constant dense<0.000000e+00> : vector<14x32xf32>
    %475 = tpu.matmul %472, %474, %cst_612 {dimension_numbers = #tpu.dot_dimension_numbers<[1], [0], [0], [1], [0, 0, 1, 1], [], []>} : vector<14x3xf32>, vector<3x32xf32>, vector<14x32xf32> -> vector<14x32xf32>
    %476 = arith.addf %470, %475 : vector<14x32xf32>
    %c0_613 = arith.constant 0 : index
    %c7_614 = arith.constant 7 : index
    %c2_615 = arith.constant 2 : index
    %c0_616 = arith.constant 0 : index
    %477 = vector.load %arg1[%c0_613, %c7_614, %c2_615, %c0_616] : memref<1x16x16x3xf32, #tpu.memory_space<vmem>>, vector<1x1x14x3xf32>
    %478 = vector.shape_cast %477 : vector<1x1x14x3xf32> to vector<14x3xf32>
    %c0_617 = arith.constant 0 : index
    %c2_618 = arith.constant 2 : index
    %c0_619 = arith.constant 0 : index
    %c0_620 = arith.constant 0 : index
    %479 = vector.load %arg2[%c0_617, %c2_618, %c0_619, %c0_620] : memref<3x3x3x32xf32, #tpu.memory_space<vmem>>, vector<1x1x3x32xf32>
    %480 = vector.shape_cast %479 : vector<1x1x3x32xf32> to vector<3x32xf32>
    %cst_621 = arith.constant dense<0.000000e+00> : vector<14x32xf32>
    %481 = tpu.matmul %478, %480, %cst_621 {dimension_numbers = #tpu.dot_dimension_numbers<[1], [0], [0], [1], [0, 0, 1, 1], [], []>} : vector<14x3xf32>, vector<3x32xf32>, vector<14x32xf32> -> vector<14x32xf32>
    %482 = arith.addf %476, %481 : vector<14x32xf32>
    %c0_622 = arith.constant 0 : index
    %c8_623 = arith.constant 8 : index
    %c0_624 = arith.constant 0 : index
    %c0_625 = arith.constant 0 : index
    %483 = vector.load %arg1[%c0_622, %c8_623, %c0_624, %c0_625] : memref<1x16x16x3xf32, #tpu.memory_space<vmem>>, vector<1x1x14x3xf32>
    %484 = vector.shape_cast %483 : vector<1x1x14x3xf32> to vector<14x3xf32>
    %c1_626 = arith.constant 1 : index
    %c0_627 = arith.constant 0 : index
    %c0_628 = arith.constant 0 : index
    %c0_629 = arith.constant 0 : index
    %485 = vector.load %arg2[%c1_626, %c0_627, %c0_628, %c0_629] : memref<3x3x3x32xf32, #tpu.memory_space<vmem>>, vector<1x1x3x32xf32>
    %486 = vector.shape_cast %485 : vector<1x1x3x32xf32> to vector<3x32xf32>
    %cst_630 = arith.constant dense<0.000000e+00> : vector<14x32xf32>
    %487 = tpu.matmul %484, %486, %cst_630 {dimension_numbers = #tpu.dot_dimension_numbers<[1], [0], [0], [1], [0, 0, 1, 1], [], []>} : vector<14x3xf32>, vector<3x32xf32>, vector<14x32xf32> -> vector<14x32xf32>
    %488 = arith.addf %482, %487 : vector<14x32xf32>
    %c0_631 = arith.constant 0 : index
    %c8_632 = arith.constant 8 : index
    %c1_633 = arith.constant 1 : index
    %c0_634 = arith.constant 0 : index
    %489 = vector.load %arg1[%c0_631, %c8_632, %c1_633, %c0_634] : memref<1x16x16x3xf32, #tpu.memory_space<vmem>>, vector<1x1x14x3xf32>
    %490 = vector.shape_cast %489 : vector<1x1x14x3xf32> to vector<14x3xf32>
    %c1_635 = arith.constant 1 : index
    %c1_636 = arith.constant 1 : index
    %c0_637 = arith.constant 0 : index
    %c0_638 = arith.constant 0 : index
    %491 = vector.load %arg2[%c1_635, %c1_636, %c0_637, %c0_638] : memref<3x3x3x32xf32, #tpu.memory_space<vmem>>, vector<1x1x3x32xf32>
    %492 = vector.shape_cast %491 : vector<1x1x3x32xf32> to vector<3x32xf32>
    %cst_639 = arith.constant dense<0.000000e+00> : vector<14x32xf32>
    %493 = tpu.matmul %490, %492, %cst_639 {dimension_numbers = #tpu.dot_dimension_numbers<[1], [0], [0], [1], [0, 0, 1, 1], [], []>} : vector<14x3xf32>, vector<3x32xf32>, vector<14x32xf32> -> vector<14x32xf32>
    %494 = arith.addf %488, %493 : vector<14x32xf32>
    %c0_640 = arith.constant 0 : index
    %c8_641 = arith.constant 8 : index
    %c2_642 = arith.constant 2 : index
    %c0_643 = arith.constant 0 : index
    %495 = vector.load %arg1[%c0_640, %c8_641, %c2_642, %c0_643] : memref<1x16x16x3xf32, #tpu.memory_space<vmem>>, vector<1x1x14x3xf32>
    %496 = vector.shape_cast %495 : vector<1x1x14x3xf32> to vector<14x3xf32>
    %c1_644 = arith.constant 1 : index
    %c2_645 = arith.constant 2 : index
    %c0_646 = arith.constant 0 : index
    %c0_647 = arith.constant 0 : index
    %497 = vector.load %arg2[%c1_644, %c2_645, %c0_646, %c0_647] : memref<3x3x3x32xf32, #tpu.memory_space<vmem>>, vector<1x1x3x32xf32>
    %498 = vector.shape_cast %497 : vector<1x1x3x32xf32> to vector<3x32xf32>
    %cst_648 = arith.constant dense<0.000000e+00> : vector<14x32xf32>
    %499 = tpu.matmul %496, %498, %cst_648 {dimension_numbers = #tpu.dot_dimension_numbers<[1], [0], [0], [1], [0, 0, 1, 1], [], []>} : vector<14x3xf32>, vector<3x32xf32>, vector<14x32xf32> -> vector<14x32xf32>
    %500 = arith.addf %494, %499 : vector<14x32xf32>
    %c0_649 = arith.constant 0 : index
    %c9 = arith.constant 9 : index
    %c0_650 = arith.constant 0 : index
    %c0_651 = arith.constant 0 : index
    %501 = vector.load %arg1[%c0_649, %c9, %c0_650, %c0_651] : memref<1x16x16x3xf32, #tpu.memory_space<vmem>>, vector<1x1x14x3xf32>
    %502 = vector.shape_cast %501 : vector<1x1x14x3xf32> to vector<14x3xf32>
    %c2_652 = arith.constant 2 : index
    %c0_653 = arith.constant 0 : index
    %c0_654 = arith.constant 0 : index
    %c0_655 = arith.constant 0 : index
    %503 = vector.load %arg2[%c2_652, %c0_653, %c0_654, %c0_655] : memref<3x3x3x32xf32, #tpu.memory_space<vmem>>, vector<1x1x3x32xf32>
    %504 = vector.shape_cast %503 : vector<1x1x3x32xf32> to vector<3x32xf32>
    %cst_656 = arith.constant dense<0.000000e+00> : vector<14x32xf32>
    %505 = tpu.matmul %502, %504, %cst_656 {dimension_numbers = #tpu.dot_dimension_numbers<[1], [0], [0], [1], [0, 0, 1, 1], [], []>} : vector<14x3xf32>, vector<3x32xf32>, vector<14x32xf32> -> vector<14x32xf32>
    %506 = arith.addf %500, %505 : vector<14x32xf32>
    %c0_657 = arith.constant 0 : index
    %c9_658 = arith.constant 9 : index
    %c1_659 = arith.constant 1 : index
    %c0_660 = arith.constant 0 : index
    %507 = vector.load %arg1[%c0_657, %c9_658, %c1_659, %c0_660] : memref<1x16x16x3xf32, #tpu.memory_space<vmem>>, vector<1x1x14x3xf32>
    %508 = vector.shape_cast %507 : vector<1x1x14x3xf32> to vector<14x3xf32>
    %c2_661 = arith.constant 2 : index
    %c1_662 = arith.constant 1 : index
    %c0_663 = arith.constant 0 : index
    %c0_664 = arith.constant 0 : index
    %509 = vector.load %arg2[%c2_661, %c1_662, %c0_663, %c0_664] : memref<3x3x3x32xf32, #tpu.memory_space<vmem>>, vector<1x1x3x32xf32>
    %510 = vector.shape_cast %509 : vector<1x1x3x32xf32> to vector<3x32xf32>
    %cst_665 = arith.constant dense<0.000000e+00> : vector<14x32xf32>
    %511 = tpu.matmul %508, %510, %cst_665 {dimension_numbers = #tpu.dot_dimension_numbers<[1], [0], [0], [1], [0, 0, 1, 1], [], []>} : vector<14x3xf32>, vector<3x32xf32>, vector<14x32xf32> -> vector<14x32xf32>
    %512 = arith.addf %506, %511 : vector<14x32xf32>
    %c0_666 = arith.constant 0 : index
    %c9_667 = arith.constant 9 : index
    %c2_668 = arith.constant 2 : index
    %c0_669 = arith.constant 0 : index
    %513 = vector.load %arg1[%c0_666, %c9_667, %c2_668, %c0_669] : memref<1x16x16x3xf32, #tpu.memory_space<vmem>>, vector<1x1x14x3xf32>
    %514 = vector.shape_cast %513 : vector<1x1x14x3xf32> to vector<14x3xf32>
    %c2_670 = arith.constant 2 : index
    %c2_671 = arith.constant 2 : index
    %c0_672 = arith.constant 0 : index
    %c0_673 = arith.constant 0 : index
    %515 = vector.load %arg2[%c2_670, %c2_671, %c0_672, %c0_673] : memref<3x3x3x32xf32, #tpu.memory_space<vmem>>, vector<1x1x3x32xf32>
    %516 = vector.shape_cast %515 : vector<1x1x3x32xf32> to vector<3x32xf32>
    %cst_674 = arith.constant dense<0.000000e+00> : vector<14x32xf32>
    %517 = tpu.matmul %514, %516, %cst_674 {dimension_numbers = #tpu.dot_dimension_numbers<[1], [0], [0], [1], [0, 0, 1, 1], [], []>} : vector<14x3xf32>, vector<3x32xf32>, vector<14x32xf32> -> vector<14x32xf32>
    %518 = arith.addf %512, %517 : vector<14x32xf32>
    %519 = vector.broadcast %0 : vector<1x32xf32> to vector<14x32xf32>
    %520 = arith.addf %518, %519 : vector<14x32xf32>
    %cst_675 = arith.constant 0.000000e+00 : f32
    %521 = vector.broadcast %cst_675 : f32 to vector<14x32xf32>
    %522 = arith.maximumf %520, %521 : vector<14x32xf32>
    %523 = arith.maximumf %463, %522 : vector<14x32xf32>
    %cst_676 = arith.constant dense<0.000000e+00> : vector<7x32xf32>
    %524 = tpu.matmul %8, %523, %cst_676 {dimension_numbers = #tpu.dot_dimension_numbers<[1], [0], [0], [1], [0, 0, 1, 1], [], []>} : vector<7x14xf32>, vector<14x32xf32>, vector<7x32xf32> -> vector<7x32xf32>
    %cst_677 = arith.constant dense<0.000000e+00> : vector<7x32xf32>
    %525 = tpu.matmul %15, %523, %cst_677 {dimension_numbers = #tpu.dot_dimension_numbers<[1], [0], [0], [1], [0, 0, 1, 1], [], []>} : vector<7x14xf32>, vector<14x32xf32>, vector<7x32xf32> -> vector<7x32xf32>
    %526 = arith.maximumf %524, %525 : vector<7x32xf32>
    %c3_678 = arith.constant 3 : index
    %c0_679 = arith.constant 0 : index
    %c0_680 = arith.constant 0 : index
    %527 = vector.load %arg11[%c3_678, %c0_679, %c0_680] : memref<6x7x32xf32, #tpu.memory_space<vmem>>, vector<1x7x32xf32>
    %528 = vector.shape_cast %527 : vector<1x7x32xf32> to vector<7x32xf32>
    %529 = vector.shape_cast %526 : vector<7x32xf32> to vector<1x7x32xf32>
    tpu.vector_store %arg11[%c3_678, %c0_679, %c0_680], %529 {strides = array<i32>} : memref<6x7x32xf32, #tpu.memory_space<vmem>>, vector<1x7x32xf32>,
    %cst_681 = arith.constant 0.000000e+00 : f32
    %530 = vector.broadcast %cst_681 : f32 to vector<14x32xf32>
    %c0_682 = arith.constant 0 : index
    %c8_683 = arith.constant 8 : index
    %c0_684 = arith.constant 0 : index
    %c0_685 = arith.constant 0 : index
    %531 = vector.load %arg1[%c0_682, %c8_683, %c0_684, %c0_685] : memref<1x16x16x3xf32, #tpu.memory_space<vmem>>, vector<1x1x14x3xf32>
    %532 = vector.shape_cast %531 : vector<1x1x14x3xf32> to vector<14x3xf32>
    %c0_686 = arith.constant 0 : index
    %c0_687 = arith.constant 0 : index
    %c0_688 = arith.constant 0 : index
    %c0_689 = arith.constant 0 : index
    %533 = vector.load %arg2[%c0_686, %c0_687, %c0_688, %c0_689] : memref<3x3x3x32xf32, #tpu.memory_space<vmem>>, vector<1x1x3x32xf32>
    %534 = vector.shape_cast %533 : vector<1x1x3x32xf32> to vector<3x32xf32>
    %cst_690 = arith.constant dense<0.000000e+00> : vector<14x32xf32>
    %535 = tpu.matmul %532, %534, %cst_690 {dimension_numbers = #tpu.dot_dimension_numbers<[1], [0], [0], [1], [0, 0, 1, 1], [], []>} : vector<14x3xf32>, vector<3x32xf32>, vector<14x32xf32> -> vector<14x32xf32>
    %536 = arith.addf %530, %535 : vector<14x32xf32>
    %c0_691 = arith.constant 0 : index
    %c8_692 = arith.constant 8 : index
    %c1_693 = arith.constant 1 : index
    %c0_694 = arith.constant 0 : index
    %537 = vector.load %arg1[%c0_691, %c8_692, %c1_693, %c0_694] : memref<1x16x16x3xf32, #tpu.memory_space<vmem>>, vector<1x1x14x3xf32>
    %538 = vector.shape_cast %537 : vector<1x1x14x3xf32> to vector<14x3xf32>
    %c0_695 = arith.constant 0 : index
    %c1_696 = arith.constant 1 : index
    %c0_697 = arith.constant 0 : index
    %c0_698 = arith.constant 0 : index
    %539 = vector.load %arg2[%c0_695, %c1_696, %c0_697, %c0_698] : memref<3x3x3x32xf32, #tpu.memory_space<vmem>>, vector<1x1x3x32xf32>
    %540 = vector.shape_cast %539 : vector<1x1x3x32xf32> to vector<3x32xf32>
    %cst_699 = arith.constant dense<0.000000e+00> : vector<14x32xf32>
    %541 = tpu.matmul %538, %540, %cst_699 {dimension_numbers = #tpu.dot_dimension_numbers<[1], [0], [0], [1], [0, 0, 1, 1], [], []>} : vector<14x3xf32>, vector<3x32xf32>, vector<14x32xf32> -> vector<14x32xf32>
    %542 = arith.addf %536, %541 : vector<14x32xf32>
    %c0_700 = arith.constant 0 : index
    %c8_701 = arith.constant 8 : index
    %c2_702 = arith.constant 2 : index
    %c0_703 = arith.constant 0 : index
    %543 = vector.load %arg1[%c0_700, %c8_701, %c2_702, %c0_703] : memref<1x16x16x3xf32, #tpu.memory_space<vmem>>, vector<1x1x14x3xf32>
    %544 = vector.shape_cast %543 : vector<1x1x14x3xf32> to vector<14x3xf32>
    %c0_704 = arith.constant 0 : index
    %c2_705 = arith.constant 2 : index
    %c0_706 = arith.constant 0 : index
    %c0_707 = arith.constant 0 : index
    %545 = vector.load %arg2[%c0_704, %c2_705, %c0_706, %c0_707] : memref<3x3x3x32xf32, #tpu.memory_space<vmem>>, vector<1x1x3x32xf32>
    %546 = vector.shape_cast %545 : vector<1x1x3x32xf32> to vector<3x32xf32>
    %cst_708 = arith.constant dense<0.000000e+00> : vector<14x32xf32>
    %547 = tpu.matmul %544, %546, %cst_708 {dimension_numbers = #tpu.dot_dimension_numbers<[1], [0], [0], [1], [0, 0, 1, 1], [], []>} : vector<14x3xf32>, vector<3x32xf32>, vector<14x32xf32> -> vector<14x32xf32>
    %548 = arith.addf %542, %547 : vector<14x32xf32>
    %c0_709 = arith.constant 0 : index
    %c9_710 = arith.constant 9 : index
    %c0_711 = arith.constant 0 : index
    %c0_712 = arith.constant 0 : index
    %549 = vector.load %arg1[%c0_709, %c9_710, %c0_711, %c0_712] : memref<1x16x16x3xf32, #tpu.memory_space<vmem>>, vector<1x1x14x3xf32>
    %550 = vector.shape_cast %549 : vector<1x1x14x3xf32> to vector<14x3xf32>
    %c1_713 = arith.constant 1 : index
    %c0_714 = arith.constant 0 : index
    %c0_715 = arith.constant 0 : index
    %c0_716 = arith.constant 0 : index
    %551 = vector.load %arg2[%c1_713, %c0_714, %c0_715, %c0_716] : memref<3x3x3x32xf32, #tpu.memory_space<vmem>>, vector<1x1x3x32xf32>
    %552 = vector.shape_cast %551 : vector<1x1x3x32xf32> to vector<3x32xf32>
    %cst_717 = arith.constant dense<0.000000e+00> : vector<14x32xf32>
    %553 = tpu.matmul %550, %552, %cst_717 {dimension_numbers = #tpu.dot_dimension_numbers<[1], [0], [0], [1], [0, 0, 1, 1], [], []>} : vector<14x3xf32>, vector<3x32xf32>, vector<14x32xf32> -> vector<14x32xf32>
    %554 = arith.addf %548, %553 : vector<14x32xf32>
    %c0_718 = arith.constant 0 : index
    %c9_719 = arith.constant 9 : index
    %c1_720 = arith.constant 1 : index
    %c0_721 = arith.constant 0 : index
    %555 = vector.load %arg1[%c0_718, %c9_719, %c1_720, %c0_721] : memref<1x16x16x3xf32, #tpu.memory_space<vmem>>, vector<1x1x14x3xf32>
    %556 = vector.shape_cast %555 : vector<1x1x14x3xf32> to vector<14x3xf32>
    %c1_722 = arith.constant 1 : index
    %c1_723 = arith.constant 1 : index
    %c0_724 = arith.constant 0 : index
    %c0_725 = arith.constant 0 : index
    %557 = vector.load %arg2[%c1_722, %c1_723, %c0_724, %c0_725] : memref<3x3x3x32xf32, #tpu.memory_space<vmem>>, vector<1x1x3x32xf32>
    %558 = vector.shape_cast %557 : vector<1x1x3x32xf32> to vector<3x32xf32>
    %cst_726 = arith.constant dense<0.000000e+00> : vector<14x32xf32>
    %559 = tpu.matmul %556, %558, %cst_726 {dimension_numbers = #tpu.dot_dimension_numbers<[1], [0], [0], [1], [0, 0, 1, 1], [], []>} : vector<14x3xf32>, vector<3x32xf32>, vector<14x32xf32> -> vector<14x32xf32>
    %560 = arith.addf %554, %559 : vector<14x32xf32>
    %c0_727 = arith.constant 0 : index
    %c9_728 = arith.constant 9 : index
    %c2_729 = arith.constant 2 : index
    %c0_730 = arith.constant 0 : index
    %561 = vector.load %arg1[%c0_727, %c9_728, %c2_729, %c0_730] : memref<1x16x16x3xf32, #tpu.memory_space<vmem>>, vector<1x1x14x3xf32>
    %562 = vector.shape_cast %561 : vector<1x1x14x3xf32> to vector<14x3xf32>
    %c1_731 = arith.constant 1 : index
    %c2_732 = arith.constant 2 : index
    %c0_733 = arith.constant 0 : index
    %c0_734 = arith.constant 0 : index
    %563 = vector.load %arg2[%c1_731, %c2_732, %c0_733, %c0_734] : memref<3x3x3x32xf32, #tpu.memory_space<vmem>>, vector<1x1x3x32xf32>
    %564 = vector.shape_cast %563 : vector<1x1x3x32xf32> to vector<3x32xf32>
    %cst_735 = arith.constant dense<0.000000e+00> : vector<14x32xf32>
    %565 = tpu.matmul %562, %564, %cst_735 {dimension_numbers = #tpu.dot_dimension_numbers<[1], [0], [0], [1], [0, 0, 1, 1], [], []>} : vector<14x3xf32>, vector<3x32xf32>, vector<14x32xf32> -> vector<14x32xf32>
    %566 = arith.addf %560, %565 : vector<14x32xf32>
    %c0_736 = arith.constant 0 : index
    %c10 = arith.constant 10 : index
    %c0_737 = arith.constant 0 : index
    %c0_738 = arith.constant 0 : index
    %567 = vector.load %arg1[%c0_736, %c10, %c0_737, %c0_738] : memref<1x16x16x3xf32, #tpu.memory_space<vmem>>, vector<1x1x14x3xf32>
    %568 = vector.shape_cast %567 : vector<1x1x14x3xf32> to vector<14x3xf32>
    %c2_739 = arith.constant 2 : index
    %c0_740 = arith.constant 0 : index
    %c0_741 = arith.constant 0 : index
    %c0_742 = arith.constant 0 : index
    %569 = vector.load %arg2[%c2_739, %c0_740, %c0_741, %c0_742] : memref<3x3x3x32xf32, #tpu.memory_space<vmem>>, vector<1x1x3x32xf32>
    %570 = vector.shape_cast %569 : vector<1x1x3x32xf32> to vector<3x32xf32>
    %cst_743 = arith.constant dense<0.000000e+00> : vector<14x32xf32>
    %571 = tpu.matmul %568, %570, %cst_743 {dimension_numbers = #tpu.dot_dimension_numbers<[1], [0], [0], [1], [0, 0, 1, 1], [], []>} : vector<14x3xf32>, vector<3x32xf32>, vector<14x32xf32> -> vector<14x32xf32>
    %572 = arith.addf %566, %571 : vector<14x32xf32>
    %c0_744 = arith.constant 0 : index
    %c10_745 = arith.constant 10 : index
    %c1_746 = arith.constant 1 : index
    %c0_747 = arith.constant 0 : index
    %573 = vector.load %arg1[%c0_744, %c10_745, %c1_746, %c0_747] : memref<1x16x16x3xf32, #tpu.memory_space<vmem>>, vector<1x1x14x3xf32>
    %574 = vector.shape_cast %573 : vector<1x1x14x3xf32> to vector<14x3xf32>
    %c2_748 = arith.constant 2 : index
    %c1_749 = arith.constant 1 : index
    %c0_750 = arith.constant 0 : index
    %c0_751 = arith.constant 0 : index
    %575 = vector.load %arg2[%c2_748, %c1_749, %c0_750, %c0_751] : memref<3x3x3x32xf32, #tpu.memory_space<vmem>>, vector<1x1x3x32xf32>
    %576 = vector.shape_cast %575 : vector<1x1x3x32xf32> to vector<3x32xf32>
    %cst_752 = arith.constant dense<0.000000e+00> : vector<14x32xf32>
    %577 = tpu.matmul %574, %576, %cst_752 {dimension_numbers = #tpu.dot_dimension_numbers<[1], [0], [0], [1], [0, 0, 1, 1], [], []>} : vector<14x3xf32>, vector<3x32xf32>, vector<14x32xf32> -> vector<14x32xf32>
    %578 = arith.addf %572, %577 : vector<14x32xf32>
    %c0_753 = arith.constant 0 : index
    %c10_754 = arith.constant 10 : index
    %c2_755 = arith.constant 2 : index
    %c0_756 = arith.constant 0 : index
    %579 = vector.load %arg1[%c0_753, %c10_754, %c2_755, %c0_756] : memref<1x16x16x3xf32, #tpu.memory_space<vmem>>, vector<1x1x14x3xf32>
    %580 = vector.shape_cast %579 : vector<1x1x14x3xf32> to vector<14x3xf32>
    %c2_757 = arith.constant 2 : index
    %c2_758 = arith.constant 2 : index
    %c0_759 = arith.constant 0 : index
    %c0_760 = arith.constant 0 : index
    %581 = vector.load %arg2[%c2_757, %c2_758, %c0_759, %c0_760] : memref<3x3x3x32xf32, #tpu.memory_space<vmem>>, vector<1x1x3x32xf32>
    %582 = vector.shape_cast %581 : vector<1x1x3x32xf32> to vector<3x32xf32>
    %cst_761 = arith.constant dense<0.000000e+00> : vector<14x32xf32>
    %583 = tpu.matmul %580, %582, %cst_761 {dimension_numbers = #tpu.dot_dimension_numbers<[1], [0], [0], [1], [0, 0, 1, 1], [], []>} : vector<14x3xf32>, vector<3x32xf32>, vector<14x32xf32> -> vector<14x32xf32>
    %584 = arith.addf %578, %583 : vector<14x32xf32>
    %585 = vector.broadcast %0 : vector<1x32xf32> to vector<14x32xf32>
    %586 = arith.addf %584, %585 : vector<14x32xf32>
    %cst_762 = arith.constant 0.000000e+00 : f32
    %587 = vector.broadcast %cst_762 : f32 to vector<14x32xf32>
    %588 = arith.maximumf %586, %587 : vector<14x32xf32>
    %cst_763 = arith.constant 0.000000e+00 : f32
    %589 = vector.broadcast %cst_763 : f32 to vector<14x32xf32>
    %c0_764 = arith.constant 0 : index
    %c9_765 = arith.constant 9 : index
    %c0_766 = arith.constant 0 : index
    %c0_767 = arith.constant 0 : index
    %590 = vector.load %arg1[%c0_764, %c9_765, %c0_766, %c0_767] : memref<1x16x16x3xf32, #tpu.memory_space<vmem>>, vector<1x1x14x3xf32>
    %591 = vector.shape_cast %590 : vector<1x1x14x3xf32> to vector<14x3xf32>
    %c0_768 = arith.constant 0 : index
    %c0_769 = arith.constant 0 : index
    %c0_770 = arith.constant 0 : index
    %c0_771 = arith.constant 0 : index
    %592 = vector.load %arg2[%c0_768, %c0_769, %c0_770, %c0_771] : memref<3x3x3x32xf32, #tpu.memory_space<vmem>>, vector<1x1x3x32xf32>
    %593 = vector.shape_cast %592 : vector<1x1x3x32xf32> to vector<3x32xf32>
    %cst_772 = arith.constant dense<0.000000e+00> : vector<14x32xf32>
    %594 = tpu.matmul %591, %593, %cst_772 {dimension_numbers = #tpu.dot_dimension_numbers<[1], [0], [0], [1], [0, 0, 1, 1], [], []>} : vector<14x3xf32>, vector<3x32xf32>, vector<14x32xf32> -> vector<14x32xf32>
    %595 = arith.addf %589, %594 : vector<14x32xf32>
    %c0_773 = arith.constant 0 : index
    %c9_774 = arith.constant 9 : index
    %c1_775 = arith.constant 1 : index
    %c0_776 = arith.constant 0 : index
    %596 = vector.load %arg1[%c0_773, %c9_774, %c1_775, %c0_776] : memref<1x16x16x3xf32, #tpu.memory_space<vmem>>, vector<1x1x14x3xf32>
    %597 = vector.shape_cast %596 : vector<1x1x14x3xf32> to vector<14x3xf32>
    %c0_777 = arith.constant 0 : index
    %c1_778 = arith.constant 1 : index
    %c0_779 = arith.constant 0 : index
    %c0_780 = arith.constant 0 : index
    %598 = vector.load %arg2[%c0_777, %c1_778, %c0_779, %c0_780] : memref<3x3x3x32xf32, #tpu.memory_space<vmem>>, vector<1x1x3x32xf32>
    %599 = vector.shape_cast %598 : vector<1x1x3x32xf32> to vector<3x32xf32>
    %cst_781 = arith.constant dense<0.000000e+00> : vector<14x32xf32>
    %600 = tpu.matmul %597, %599, %cst_781 {dimension_numbers = #tpu.dot_dimension_numbers<[1], [0], [0], [1], [0, 0, 1, 1], [], []>} : vector<14x3xf32>, vector<3x32xf32>, vector<14x32xf32> -> vector<14x32xf32>
    %601 = arith.addf %595, %600 : vector<14x32xf32>
    %c0_782 = arith.constant 0 : index
    %c9_783 = arith.constant 9 : index
    %c2_784 = arith.constant 2 : index
    %c0_785 = arith.constant 0 : index
    %602 = vector.load %arg1[%c0_782, %c9_783, %c2_784, %c0_785] : memref<1x16x16x3xf32, #tpu.memory_space<vmem>>, vector<1x1x14x3xf32>
    %603 = vector.shape_cast %602 : vector<1x1x14x3xf32> to vector<14x3xf32>
    %c0_786 = arith.constant 0 : index
    %c2_787 = arith.constant 2 : index
    %c0_788 = arith.constant 0 : index
    %c0_789 = arith.constant 0 : index
    %604 = vector.load %arg2[%c0_786, %c2_787, %c0_788, %c0_789] : memref<3x3x3x32xf32, #tpu.memory_space<vmem>>, vector<1x1x3x32xf32>
    %605 = vector.shape_cast %604 : vector<1x1x3x32xf32> to vector<3x32xf32>
    %cst_790 = arith.constant dense<0.000000e+00> : vector<14x32xf32>
    %606 = tpu.matmul %603, %605, %cst_790 {dimension_numbers = #tpu.dot_dimension_numbers<[1], [0], [0], [1], [0, 0, 1, 1], [], []>} : vector<14x3xf32>, vector<3x32xf32>, vector<14x32xf32> -> vector<14x32xf32>
    %607 = arith.addf %601, %606 : vector<14x32xf32>
    %c0_791 = arith.constant 0 : index
    %c10_792 = arith.constant 10 : index
    %c0_793 = arith.constant 0 : index
    %c0_794 = arith.constant 0 : index
    %608 = vector.load %arg1[%c0_791, %c10_792, %c0_793, %c0_794] : memref<1x16x16x3xf32, #tpu.memory_space<vmem>>, vector<1x1x14x3xf32>
    %609 = vector.shape_cast %608 : vector<1x1x14x3xf32> to vector<14x3xf32>
    %c1_795 = arith.constant 1 : index
    %c0_796 = arith.constant 0 : index
    %c0_797 = arith.constant 0 : index
    %c0_798 = arith.constant 0 : index
    %610 = vector.load %arg2[%c1_795, %c0_796, %c0_797, %c0_798] : memref<3x3x3x32xf32, #tpu.memory_space<vmem>>, vector<1x1x3x32xf32>
    %611 = vector.shape_cast %610 : vector<1x1x3x32xf32> to vector<3x32xf32>
    %cst_799 = arith.constant dense<0.000000e+00> : vector<14x32xf32>
    %612 = tpu.matmul %609, %611, %cst_799 {dimension_numbers = #tpu.dot_dimension_numbers<[1], [0], [0], [1], [0, 0, 1, 1], [], []>} : vector<14x3xf32>, vector<3x32xf32>, vector<14x32xf32> -> vector<14x32xf32>
    %613 = arith.addf %607, %612 : vector<14x32xf32>
    %c0_800 = arith.constant 0 : index
    %c10_801 = arith.constant 10 : index
    %c1_802 = arith.constant 1 : index
    %c0_803 = arith.constant 0 : index
    %614 = vector.load %arg1[%c0_800, %c10_801, %c1_802, %c0_803] : memref<1x16x16x3xf32, #tpu.memory_space<vmem>>, vector<1x1x14x3xf32>
    %615 = vector.shape_cast %614 : vector<1x1x14x3xf32> to vector<14x3xf32>
    %c1_804 = arith.constant 1 : index
    %c1_805 = arith.constant 1 : index
    %c0_806 = arith.constant 0 : index
    %c0_807 = arith.constant 0 : index
    %616 = vector.load %arg2[%c1_804, %c1_805, %c0_806, %c0_807] : memref<3x3x3x32xf32, #tpu.memory_space<vmem>>, vector<1x1x3x32xf32>
    %617 = vector.shape_cast %616 : vector<1x1x3x32xf32> to vector<3x32xf32>
    %cst_808 = arith.constant dense<0.000000e+00> : vector<14x32xf32>
    %618 = tpu.matmul %615, %617, %cst_808 {dimension_numbers = #tpu.dot_dimension_numbers<[1], [0], [0], [1], [0, 0, 1, 1], [], []>} : vector<14x3xf32>, vector<3x32xf32>, vector<14x32xf32> -> vector<14x32xf32>
    %619 = arith.addf %613, %618 : vector<14x32xf32>
    %c0_809 = arith.constant 0 : index
    %c10_810 = arith.constant 10 : index
    %c2_811 = arith.constant 2 : index
    %c0_812 = arith.constant 0 : index
    %620 = vector.load %arg1[%c0_809, %c10_810, %c2_811, %c0_812] : memref<1x16x16x3xf32, #tpu.memory_space<vmem>>, vector<1x1x14x3xf32>
    %621 = vector.shape_cast %620 : vector<1x1x14x3xf32> to vector<14x3xf32>
    %c1_813 = arith.constant 1 : index
    %c2_814 = arith.constant 2 : index
    %c0_815 = arith.constant 0 : index
    %c0_816 = arith.constant 0 : index
    %622 = vector.load %arg2[%c1_813, %c2_814, %c0_815, %c0_816] : memref<3x3x3x32xf32, #tpu.memory_space<vmem>>, vector<1x1x3x32xf32>
    %623 = vector.shape_cast %622 : vector<1x1x3x32xf32> to vector<3x32xf32>
    %cst_817 = arith.constant dense<0.000000e+00> : vector<14x32xf32>
    %624 = tpu.matmul %621, %623, %cst_817 {dimension_numbers = #tpu.dot_dimension_numbers<[1], [0], [0], [1], [0, 0, 1, 1], [], []>} : vector<14x3xf32>, vector<3x32xf32>, vector<14x32xf32> -> vector<14x32xf32>
    %625 = arith.addf %619, %624 : vector<14x32xf32>
    %c0_818 = arith.constant 0 : index
    %c11 = arith.constant 11 : index
    %c0_819 = arith.constant 0 : index
    %c0_820 = arith.constant 0 : index
    %626 = vector.load %arg1[%c0_818, %c11, %c0_819, %c0_820] : memref<1x16x16x3xf32, #tpu.memory_space<vmem>>, vector<1x1x14x3xf32>
    %627 = vector.shape_cast %626 : vector<1x1x14x3xf32> to vector<14x3xf32>
    %c2_821 = arith.constant 2 : index
    %c0_822 = arith.constant 0 : index
    %c0_823 = arith.constant 0 : index
    %c0_824 = arith.constant 0 : index
    %628 = vector.load %arg2[%c2_821, %c0_822, %c0_823, %c0_824] : memref<3x3x3x32xf32, #tpu.memory_space<vmem>>, vector<1x1x3x32xf32>
    %629 = vector.shape_cast %628 : vector<1x1x3x32xf32> to vector<3x32xf32>
    %cst_825 = arith.constant dense<0.000000e+00> : vector<14x32xf32>
    %630 = tpu.matmul %627, %629, %cst_825 {dimension_numbers = #tpu.dot_dimension_numbers<[1], [0], [0], [1], [0, 0, 1, 1], [], []>} : vector<14x3xf32>, vector<3x32xf32>, vector<14x32xf32> -> vector<14x32xf32>
    %631 = arith.addf %625, %630 : vector<14x32xf32>
    %c0_826 = arith.constant 0 : index
    %c11_827 = arith.constant 11 : index
    %c1_828 = arith.constant 1 : index
    %c0_829 = arith.constant 0 : index
    %632 = vector.load %arg1[%c0_826, %c11_827, %c1_828, %c0_829] : memref<1x16x16x3xf32, #tpu.memory_space<vmem>>, vector<1x1x14x3xf32>
    %633 = vector.shape_cast %632 : vector<1x1x14x3xf32> to vector<14x3xf32>
    %c2_830 = arith.constant 2 : index
    %c1_831 = arith.constant 1 : index
    %c0_832 = arith.constant 0 : index
    %c0_833 = arith.constant 0 : index
    %634 = vector.load %arg2[%c2_830, %c1_831, %c0_832, %c0_833] : memref<3x3x3x32xf32, #tpu.memory_space<vmem>>, vector<1x1x3x32xf32>
    %635 = vector.shape_cast %634 : vector<1x1x3x32xf32> to vector<3x32xf32>
    %cst_834 = arith.constant dense<0.000000e+00> : vector<14x32xf32>
    %636 = tpu.matmul %633, %635, %cst_834 {dimension_numbers = #tpu.dot_dimension_numbers<[1], [0], [0], [1], [0, 0, 1, 1], [], []>} : vector<14x3xf32>, vector<3x32xf32>, vector<14x32xf32> -> vector<14x32xf32>
    %637 = arith.addf %631, %636 : vector<14x32xf32>
    %c0_835 = arith.constant 0 : index
    %c11_836 = arith.constant 11 : index
    %c2_837 = arith.constant 2 : index
    %c0_838 = arith.constant 0 : index
    %638 = vector.load %arg1[%c0_835, %c11_836, %c2_837, %c0_838] : memref<1x16x16x3xf32, #tpu.memory_space<vmem>>, vector<1x1x14x3xf32>
    %639 = vector.shape_cast %638 : vector<1x1x14x3xf32> to vector<14x3xf32>
    %c2_839 = arith.constant 2 : index
    %c2_840 = arith.constant 2 : index
    %c0_841 = arith.constant 0 : index
    %c0_842 = arith.constant 0 : index
    %640 = vector.load %arg2[%c2_839, %c2_840, %c0_841, %c0_842] : memref<3x3x3x32xf32, #tpu.memory_space<vmem>>, vector<1x1x3x32xf32>
    %641 = vector.shape_cast %640 : vector<1x1x3x32xf32> to vector<3x32xf32>
    %cst_843 = arith.constant dense<0.000000e+00> : vector<14x32xf32>
    %642 = tpu.matmul %639, %641, %cst_843 {dimension_numbers = #tpu.dot_dimension_numbers<[1], [0], [0], [1], [0, 0, 1, 1], [], []>} : vector<14x3xf32>, vector<3x32xf32>, vector<14x32xf32> -> vector<14x32xf32>
    %643 = arith.addf %637, %642 : vector<14x32xf32>
    %644 = vector.broadcast %0 : vector<1x32xf32> to vector<14x32xf32>
    %645 = arith.addf %643, %644 : vector<14x32xf32>
    %cst_844 = arith.constant 0.000000e+00 : f32
    %646 = vector.broadcast %cst_844 : f32 to vector<14x32xf32>
    %647 = arith.maximumf %645, %646 : vector<14x32xf32>
    %648 = arith.maximumf %588, %647 : vector<14x32xf32>
    %cst_845 = arith.constant dense<0.000000e+00> : vector<7x32xf32>
    %649 = tpu.matmul %8, %648, %cst_845 {dimension_numbers = #tpu.dot_dimension_numbers<[1], [0], [0], [1], [0, 0, 1, 1], [], []>} : vector<7x14xf32>, vector<14x32xf32>, vector<7x32xf32> -> vector<7x32xf32>
    %cst_846 = arith.constant dense<0.000000e+00> : vector<7x32xf32>
    %650 = tpu.matmul %15, %648, %cst_846 {dimension_numbers = #tpu.dot_dimension_numbers<[1], [0], [0], [1], [0, 0, 1, 1], [], []>} : vector<7x14xf32>, vector<14x32xf32>, vector<7x32xf32> -> vector<7x32xf32>
    %651 = arith.maximumf %649, %650 : vector<7x32xf32>
    %c4_847 = arith.constant 4 : index
    %c0_848 = arith.constant 0 : index
    %c0_849 = arith.constant 0 : index
    %652 = vector.load %arg11[%c4_847, %c0_848, %c0_849] : memref<6x7x32xf32, #tpu.memory_space<vmem>>, vector<1x7x32xf32>
    %653 = vector.shape_cast %652 : vector<1x7x32xf32> to vector<7x32xf32>
    %654 = vector.shape_cast %651 : vector<7x32xf32> to vector<1x7x32xf32>
    tpu.vector_store %arg11[%c4_847, %c0_848, %c0_849], %654 {strides = array<i32>} : memref<6x7x32xf32, #tpu.memory_space<vmem>>, vector<1x7x32xf32>,
    %cst_850 = arith.constant 0.000000e+00 : f32
    %655 = vector.broadcast %cst_850 : f32 to vector<14x32xf32>
    %c0_851 = arith.constant 0 : index
    %c10_852 = arith.constant 10 : index
    %c0_853 = arith.constant 0 : index
    %c0_854 = arith.constant 0 : index
    %656 = vector.load %arg1[%c0_851, %c10_852, %c0_853, %c0_854] : memref<1x16x16x3xf32, #tpu.memory_space<vmem>>, vector<1x1x14x3xf32>
    %657 = vector.shape_cast %656 : vector<1x1x14x3xf32> to vector<14x3xf32>
    %c0_855 = arith.constant 0 : index
    %c0_856 = arith.constant 0 : index
    %c0_857 = arith.constant 0 : index
    %c0_858 = arith.constant 0 : index
    %658 = vector.load %arg2[%c0_855, %c0_856, %c0_857, %c0_858] : memref<3x3x3x32xf32, #tpu.memory_space<vmem>>, vector<1x1x3x32xf32>
    %659 = vector.shape_cast %658 : vector<1x1x3x32xf32> to vector<3x32xf32>
    %cst_859 = arith.constant dense<0.000000e+00> : vector<14x32xf32>
    %660 = tpu.matmul %657, %659, %cst_859 {dimension_numbers = #tpu.dot_dimension_numbers<[1], [0], [0], [1], [0, 0, 1, 1], [], []>} : vector<14x3xf32>, vector<3x32xf32>, vector<14x32xf32> -> vector<14x32xf32>
    %661 = arith.addf %655, %660 : vector<14x32xf32>
    %c0_860 = arith.constant 0 : index
    %c10_861 = arith.constant 10 : index
    %c1_862 = arith.constant 1 : index
    %c0_863 = arith.constant 0 : index
    %662 = vector.load %arg1[%c0_860, %c10_861, %c1_862, %c0_863] : memref<1x16x16x3xf32, #tpu.memory_space<vmem>>, vector<1x1x14x3xf32>
    %663 = vector.shape_cast %662 : vector<1x1x14x3xf32> to vector<14x3xf32>
    %c0_864 = arith.constant 0 : index
    %c1_865 = arith.constant 1 : index
    %c0_866 = arith.constant 0 : index
    %c0_867 = arith.constant 0 : index
    %664 = vector.load %arg2[%c0_864, %c1_865, %c0_866, %c0_867] : memref<3x3x3x32xf32, #tpu.memory_space<vmem>>, vector<1x1x3x32xf32>
    %665 = vector.shape_cast %664 : vector<1x1x3x32xf32> to vector<3x32xf32>
    %cst_868 = arith.constant dense<0.000000e+00> : vector<14x32xf32>
    %666 = tpu.matmul %663, %665, %cst_868 {dimension_numbers = #tpu.dot_dimension_numbers<[1], [0], [0], [1], [0, 0, 1, 1], [], []>} : vector<14x3xf32>, vector<3x32xf32>, vector<14x32xf32> -> vector<14x32xf32>
    %667 = arith.addf %661, %666 : vector<14x32xf32>
    %c0_869 = arith.constant 0 : index
    %c10_870 = arith.constant 10 : index
    %c2_871 = arith.constant 2 : index
    %c0_872 = arith.constant 0 : index
    %668 = vector.load %arg1[%c0_869, %c10_870, %c2_871, %c0_872] : memref<1x16x16x3xf32, #tpu.memory_space<vmem>>, vector<1x1x14x3xf32>
    %669 = vector.shape_cast %668 : vector<1x1x14x3xf32> to vector<14x3xf32>
    %c0_873 = arith.constant 0 : index
    %c2_874 = arith.constant 2 : index
    %c0_875 = arith.constant 0 : index
    %c0_876 = arith.constant 0 : index
    %670 = vector.load %arg2[%c0_873, %c2_874, %c0_875, %c0_876] : memref<3x3x3x32xf32, #tpu.memory_space<vmem>>, vector<1x1x3x32xf32>
    %671 = vector.shape_cast %670 : vector<1x1x3x32xf32> to vector<3x32xf32>
    %cst_877 = arith.constant dense<0.000000e+00> : vector<14x32xf32>
    %672 = tpu.matmul %669, %671, %cst_877 {dimension_numbers = #tpu.dot_dimension_numbers<[1], [0], [0], [1], [0, 0, 1, 1], [], []>} : vector<14x3xf32>, vector<3x32xf32>, vector<14x32xf32> -> vector<14x32xf32>
    %673 = arith.addf %667, %672 : vector<14x32xf32>
    %c0_878 = arith.constant 0 : index
    %c11_879 = arith.constant 11 : index
    %c0_880 = arith.constant 0 : index
    %c0_881 = arith.constant 0 : index
    %674 = vector.load %arg1[%c0_878, %c11_879, %c0_880, %c0_881] : memref<1x16x16x3xf32, #tpu.memory_space<vmem>>, vector<1x1x14x3xf32>
    %675 = vector.shape_cast %674 : vector<1x1x14x3xf32> to vector<14x3xf32>
    %c1_882 = arith.constant 1 : index
    %c0_883 = arith.constant 0 : index
    %c0_884 = arith.constant 0 : index
    %c0_885 = arith.constant 0 : index
    %676 = vector.load %arg2[%c1_882, %c0_883, %c0_884, %c0_885] : memref<3x3x3x32xf32, #tpu.memory_space<vmem>>, vector<1x1x3x32xf32>
    %677 = vector.shape_cast %676 : vector<1x1x3x32xf32> to vector<3x32xf32>
    %cst_886 = arith.constant dense<0.000000e+00> : vector<14x32xf32>
    %678 = tpu.matmul %675, %677, %cst_886 {dimension_numbers = #tpu.dot_dimension_numbers<[1], [0], [0], [1], [0, 0, 1, 1], [], []>} : vector<14x3xf32>, vector<3x32xf32>, vector<14x32xf32> -> vector<14x32xf32>
    %679 = arith.addf %673, %678 : vector<14x32xf32>
    %c0_887 = arith.constant 0 : index
    %c11_888 = arith.constant 11 : index
    %c1_889 = arith.constant 1 : index
    %c0_890 = arith.constant 0 : index
    %680 = vector.load %arg1[%c0_887, %c11_888, %c1_889, %c0_890] : memref<1x16x16x3xf32, #tpu.memory_space<vmem>>, vector<1x1x14x3xf32>
    %681 = vector.shape_cast %680 : vector<1x1x14x3xf32> to vector<14x3xf32>
    %c1_891 = arith.constant 1 : index
    %c1_892 = arith.constant 1 : index
    %c0_893 = arith.constant 0 : index
    %c0_894 = arith.constant 0 : index
    %682 = vector.load %arg2[%c1_891, %c1_892, %c0_893, %c0_894] : memref<3x3x3x32xf32, #tpu.memory_space<vmem>>, vector<1x1x3x32xf32>
    %683 = vector.shape_cast %682 : vector<1x1x3x32xf32> to vector<3x32xf32>
    %cst_895 = arith.constant dense<0.000000e+00> : vector<14x32xf32>
    %684 = tpu.matmul %681, %683, %cst_895 {dimension_numbers = #tpu.dot_dimension_numbers<[1], [0], [0], [1], [0, 0, 1, 1], [], []>} : vector<14x3xf32>, vector<3x32xf32>, vector<14x32xf32> -> vector<14x32xf32>
    %685 = arith.addf %679, %684 : vector<14x32xf32>
    %c0_896 = arith.constant 0 : index
    %c11_897 = arith.constant 11 : index
    %c2_898 = arith.constant 2 : index
    %c0_899 = arith.constant 0 : index
    %686 = vector.load %arg1[%c0_896, %c11_897, %c2_898, %c0_899] : memref<1x16x16x3xf32, #tpu.memory_space<vmem>>, vector<1x1x14x3xf32>
    %687 = vector.shape_cast %686 : vector<1x1x14x3xf32> to vector<14x3xf32>
    %c1_900 = arith.constant 1 : index
    %c2_901 = arith.constant 2 : index
    %c0_902 = arith.constant 0 : index
    %c0_903 = arith.constant 0 : index
    %688 = vector.load %arg2[%c1_900, %c2_901, %c0_902, %c0_903] : memref<3x3x3x32xf32, #tpu.memory_space<vmem>>, vector<1x1x3x32xf32>
    %689 = vector.shape_cast %688 : vector<1x1x3x32xf32> to vector<3x32xf32>
    %cst_904 = arith.constant dense<0.000000e+00> : vector<14x32xf32>
    %690 = tpu.matmul %687, %689, %cst_904 {dimension_numbers = #tpu.dot_dimension_numbers<[1], [0], [0], [1], [0, 0, 1, 1], [], []>} : vector<14x3xf32>, vector<3x32xf32>, vector<14x32xf32> -> vector<14x32xf32>
    %691 = arith.addf %685, %690 : vector<14x32xf32>
    %c0_905 = arith.constant 0 : index
    %c12 = arith.constant 12 : index
    %c0_906 = arith.constant 0 : index
    %c0_907 = arith.constant 0 : index
    %692 = vector.load %arg1[%c0_905, %c12, %c0_906, %c0_907] : memref<1x16x16x3xf32, #tpu.memory_space<vmem>>, vector<1x1x14x3xf32>
    %693 = vector.shape_cast %692 : vector<1x1x14x3xf32> to vector<14x3xf32>
    %c2_908 = arith.constant 2 : index
    %c0_909 = arith.constant 0 : index
    %c0_910 = arith.constant 0 : index
    %c0_911 = arith.constant 0 : index
    %694 = vector.load %arg2[%c2_908, %c0_909, %c0_910, %c0_911] : memref<3x3x3x32xf32, #tpu.memory_space<vmem>>, vector<1x1x3x32xf32>
    %695 = vector.shape_cast %694 : vector<1x1x3x32xf32> to vector<3x32xf32>
    %cst_912 = arith.constant dense<0.000000e+00> : vector<14x32xf32>
    %696 = tpu.matmul %693, %695, %cst_912 {dimension_numbers = #tpu.dot_dimension_numbers<[1], [0], [0], [1], [0, 0, 1, 1], [], []>} : vector<14x3xf32>, vector<3x32xf32>, vector<14x32xf32> -> vector<14x32xf32>
    %697 = arith.addf %691, %696 : vector<14x32xf32>
    %c0_913 = arith.constant 0 : index
    %c12_914 = arith.constant 12 : index
    %c1_915 = arith.constant 1 : index
    %c0_916 = arith.constant 0 : index
    %698 = vector.load %arg1[%c0_913, %c12_914, %c1_915, %c0_916] : memref<1x16x16x3xf32, #tpu.memory_space<vmem>>, vector<1x1x14x3xf32>
    %699 = vector.shape_cast %698 : vector<1x1x14x3xf32> to vector<14x3xf32>
    %c2_917 = arith.constant 2 : index
    %c1_918 = arith.constant 1 : index
    %c0_919 = arith.constant 0 : index
    %c0_920 = arith.constant 0 : index
    %700 = vector.load %arg2[%c2_917, %c1_918, %c0_919, %c0_920] : memref<3x3x3x32xf32, #tpu.memory_space<vmem>>, vector<1x1x3x32xf32>
    %701 = vector.shape_cast %700 : vector<1x1x3x32xf32> to vector<3x32xf32>
    %cst_921 = arith.constant dense<0.000000e+00> : vector<14x32xf32>
    %702 = tpu.matmul %699, %701, %cst_921 {dimension_numbers = #tpu.dot_dimension_numbers<[1], [0], [0], [1], [0, 0, 1, 1], [], []>} : vector<14x3xf32>, vector<3x32xf32>, vector<14x32xf32> -> vector<14x32xf32>
    %703 = arith.addf %697, %702 : vector<14x32xf32>
    %c0_922 = arith.constant 0 : index
    %c12_923 = arith.constant 12 : index
    %c2_924 = arith.constant 2 : index
    %c0_925 = arith.constant 0 : index
    %704 = vector.load %arg1[%c0_922, %c12_923, %c2_924, %c0_925] : memref<1x16x16x3xf32, #tpu.memory_space<vmem>>, vector<1x1x14x3xf32>
    %705 = vector.shape_cast %704 : vector<1x1x14x3xf32> to vector<14x3xf32>
    %c2_926 = arith.constant 2 : index
    %c2_927 = arith.constant 2 : index
    %c0_928 = arith.constant 0 : index
    %c0_929 = arith.constant 0 : index
    %706 = vector.load %arg2[%c2_926, %c2_927, %c0_928, %c0_929] : memref<3x3x3x32xf32, #tpu.memory_space<vmem>>, vector<1x1x3x32xf32>
    %707 = vector.shape_cast %706 : vector<1x1x3x32xf32> to vector<3x32xf32>
    %cst_930 = arith.constant dense<0.000000e+00> : vector<14x32xf32>
    %708 = tpu.matmul %705, %707, %cst_930 {dimension_numbers = #tpu.dot_dimension_numbers<[1], [0], [0], [1], [0, 0, 1, 1], [], []>} : vector<14x3xf32>, vector<3x32xf32>, vector<14x32xf32> -> vector<14x32xf32>
    %709 = arith.addf %703, %708 : vector<14x32xf32>
    %710 = vector.broadcast %0 : vector<1x32xf32> to vector<14x32xf32>
    %711 = arith.addf %709, %710 : vector<14x32xf32>
    %cst_931 = arith.constant 0.000000e+00 : f32
    %712 = vector.broadcast %cst_931 : f32 to vector<14x32xf32>
    %713 = arith.maximumf %711, %712 : vector<14x32xf32>
    %cst_932 = arith.constant 0.000000e+00 : f32
    %714 = vector.broadcast %cst_932 : f32 to vector<14x32xf32>
    %c0_933 = arith.constant 0 : index
    %c11_934 = arith.constant 11 : index
    %c0_935 = arith.constant 0 : index
    %c0_936 = arith.constant 0 : index
    %715 = vector.load %arg1[%c0_933, %c11_934, %c0_935, %c0_936] : memref<1x16x16x3xf32, #tpu.memory_space<vmem>>, vector<1x1x14x3xf32>
    %716 = vector.shape_cast %715 : vector<1x1x14x3xf32> to vector<14x3xf32>
    %c0_937 = arith.constant 0 : index
    %c0_938 = arith.constant 0 : index
    %c0_939 = arith.constant 0 : index
    %c0_940 = arith.constant 0 : index
    %717 = vector.load %arg2[%c0_937, %c0_938, %c0_939, %c0_940] : memref<3x3x3x32xf32, #tpu.memory_space<vmem>>, vector<1x1x3x32xf32>
    %718 = vector.shape_cast %717 : vector<1x1x3x32xf32> to vector<3x32xf32>
    %cst_941 = arith.constant dense<0.000000e+00> : vector<14x32xf32>
    %719 = tpu.matmul %716, %718, %cst_941 {dimension_numbers = #tpu.dot_dimension_numbers<[1], [0], [0], [1], [0, 0, 1, 1], [], []>} : vector<14x3xf32>, vector<3x32xf32>, vector<14x32xf32> -> vector<14x32xf32>
    %720 = arith.addf %714, %719 : vector<14x32xf32>
    %c0_942 = arith.constant 0 : index
    %c11_943 = arith.constant 11 : index
    %c1_944 = arith.constant 1 : index
    %c0_945 = arith.constant 0 : index
    %721 = vector.load %arg1[%c0_942, %c11_943, %c1_944, %c0_945] : memref<1x16x16x3xf32, #tpu.memory_space<vmem>>, vector<1x1x14x3xf32>
    %722 = vector.shape_cast %721 : vector<1x1x14x3xf32> to vector<14x3xf32>
    %c0_946 = arith.constant 0 : index
    %c1_947 = arith.constant 1 : index
    %c0_948 = arith.constant 0 : index
    %c0_949 = arith.constant 0 : index
    %723 = vector.load %arg2[%c0_946, %c1_947, %c0_948, %c0_949] : memref<3x3x3x32xf32, #tpu.memory_space<vmem>>, vector<1x1x3x32xf32>
    %724 = vector.shape_cast %723 : vector<1x1x3x32xf32> to vector<3x32xf32>
    %cst_950 = arith.constant dense<0.000000e+00> : vector<14x32xf32>
    %725 = tpu.matmul %722, %724, %cst_950 {dimension_numbers = #tpu.dot_dimension_numbers<[1], [0], [0], [1], [0, 0, 1, 1], [], []>} : vector<14x3xf32>, vector<3x32xf32>, vector<14x32xf32> -> vector<14x32xf32>
    %726 = arith.addf %720, %725 : vector<14x32xf32>
    %c0_951 = arith.constant 0 : index
    %c11_952 = arith.constant 11 : index
    %c2_953 = arith.constant 2 : index
    %c0_954 = arith.constant 0 : index
    %727 = vector.load %arg1[%c0_951, %c11_952, %c2_953, %c0_954] : memref<1x16x16x3xf32, #tpu.memory_space<vmem>>, vector<1x1x14x3xf32>
    %728 = vector.shape_cast %727 : vector<1x1x14x3xf32> to vector<14x3xf32>
    %c0_955 = arith.constant 0 : index
    %c2_956 = arith.constant 2 : index
    %c0_957 = arith.constant 0 : index
    %c0_958 = arith.constant 0 : index
    %729 = vector.load %arg2[%c0_955, %c2_956, %c0_957, %c0_958] : memref<3x3x3x32xf32, #tpu.memory_space<vmem>>, vector<1x1x3x32xf32>
    %730 = vector.shape_cast %729 : vector<1x1x3x32xf32> to vector<3x32xf32>
    %cst_959 = arith.constant dense<0.000000e+00> : vector<14x32xf32>
    %731 = tpu.matmul %728, %730, %cst_959 {dimension_numbers = #tpu.dot_dimension_numbers<[1], [0], [0], [1], [0, 0, 1, 1], [], []>} : vector<14x3xf32>, vector<3x32xf32>, vector<14x32xf32> -> vector<14x32xf32>
    %732 = arith.addf %726, %731 : vector<14x32xf32>
    %c0_960 = arith.constant 0 : index
    %c12_961 = arith.constant 12 : index
    %c0_962 = arith.constant 0 : index
    %c0_963 = arith.constant 0 : index
    %733 = vector.load %arg1[%c0_960, %c12_961, %c0_962, %c0_963] : memref<1x16x16x3xf32, #tpu.memory_space<vmem>>, vector<1x1x14x3xf32>
    %734 = vector.shape_cast %733 : vector<1x1x14x3xf32> to vector<14x3xf32>
    %c1_964 = arith.constant 1 : index
    %c0_965 = arith.constant 0 : index
    %c0_966 = arith.constant 0 : index
    %c0_967 = arith.constant 0 : index
    %735 = vector.load %arg2[%c1_964, %c0_965, %c0_966, %c0_967] : memref<3x3x3x32xf32, #tpu.memory_space<vmem>>, vector<1x1x3x32xf32>
    %736 = vector.shape_cast %735 : vector<1x1x3x32xf32> to vector<3x32xf32>
    %cst_968 = arith.constant dense<0.000000e+00> : vector<14x32xf32>
    %737 = tpu.matmul %734, %736, %cst_968 {dimension_numbers = #tpu.dot_dimension_numbers<[1], [0], [0], [1], [0, 0, 1, 1], [], []>} : vector<14x3xf32>, vector<3x32xf32>, vector<14x32xf32> -> vector<14x32xf32>
    %738 = arith.addf %732, %737 : vector<14x32xf32>
    %c0_969 = arith.constant 0 : index
    %c12_970 = arith.constant 12 : index
    %c1_971 = arith.constant 1 : index
    %c0_972 = arith.constant 0 : index
    %739 = vector.load %arg1[%c0_969, %c12_970, %c1_971, %c0_972] : memref<1x16x16x3xf32, #tpu.memory_space<vmem>>, vector<1x1x14x3xf32>
    %740 = vector.shape_cast %739 : vector<1x1x14x3xf32> to vector<14x3xf32>
    %c1_973 = arith.constant 1 : index
    %c1_974 = arith.constant 1 : index
    %c0_975 = arith.constant 0 : index
    %c0_976 = arith.constant 0 : index
    %741 = vector.load %arg2[%c1_973, %c1_974, %c0_975, %c0_976] : memref<3x3x3x32xf32, #tpu.memory_space<vmem>>, vector<1x1x3x32xf32>
    %742 = vector.shape_cast %741 : vector<1x1x3x32xf32> to vector<3x32xf32>
    %cst_977 = arith.constant dense<0.000000e+00> : vector<14x32xf32>
    %743 = tpu.matmul %740, %742, %cst_977 {dimension_numbers = #tpu.dot_dimension_numbers<[1], [0], [0], [1], [0, 0, 1, 1], [], []>} : vector<14x3xf32>, vector<3x32xf32>, vector<14x32xf32> -> vector<14x32xf32>
    %744 = arith.addf %738, %743 : vector<14x32xf32>
    %c0_978 = arith.constant 0 : index
    %c12_979 = arith.constant 12 : index
    %c2_980 = arith.constant 2 : index
    %c0_981 = arith.constant 0 : index
    %745 = vector.load %arg1[%c0_978, %c12_979, %c2_980, %c0_981] : memref<1x16x16x3xf32, #tpu.memory_space<vmem>>, vector<1x1x14x3xf32>
    %746 = vector.shape_cast %745 : vector<1x1x14x3xf32> to vector<14x3xf32>
    %c1_982 = arith.constant 1 : index
    %c2_983 = arith.constant 2 : index
    %c0_984 = arith.constant 0 : index
    %c0_985 = arith.constant 0 : index
    %747 = vector.load %arg2[%c1_982, %c2_983, %c0_984, %c0_985] : memref<3x3x3x32xf32, #tpu.memory_space<vmem>>, vector<1x1x3x32xf32>
    %748 = vector.shape_cast %747 : vector<1x1x3x32xf32> to vector<3x32xf32>
    %cst_986 = arith.constant dense<0.000000e+00> : vector<14x32xf32>
    %749 = tpu.matmul %746, %748, %cst_986 {dimension_numbers = #tpu.dot_dimension_numbers<[1], [0], [0], [1], [0, 0, 1, 1], [], []>} : vector<14x3xf32>, vector<3x32xf32>, vector<14x32xf32> -> vector<14x32xf32>
    %750 = arith.addf %744, %749 : vector<14x32xf32>
    %c0_987 = arith.constant 0 : index
    %c13 = arith.constant 13 : index
    %c0_988 = arith.constant 0 : index
    %c0_989 = arith.constant 0 : index
    %751 = vector.load %arg1[%c0_987, %c13, %c0_988, %c0_989] : memref<1x16x16x3xf32, #tpu.memory_space<vmem>>, vector<1x1x14x3xf32>
    %752 = vector.shape_cast %751 : vector<1x1x14x3xf32> to vector<14x3xf32>
    %c2_990 = arith.constant 2 : index
    %c0_991 = arith.constant 0 : index
    %c0_992 = arith.constant 0 : index
    %c0_993 = arith.constant 0 : index
    %753 = vector.load %arg2[%c2_990, %c0_991, %c0_992, %c0_993] : memref<3x3x3x32xf32, #tpu.memory_space<vmem>>, vector<1x1x3x32xf32>
    %754 = vector.shape_cast %753 : vector<1x1x3x32xf32> to vector<3x32xf32>
    %cst_994 = arith.constant dense<0.000000e+00> : vector<14x32xf32>
    %755 = tpu.matmul %752, %754, %cst_994 {dimension_numbers = #tpu.dot_dimension_numbers<[1], [0], [0], [1], [0, 0, 1, 1], [], []>} : vector<14x3xf32>, vector<3x32xf32>, vector<14x32xf32> -> vector<14x32xf32>
    %756 = arith.addf %750, %755 : vector<14x32xf32>
    %c0_995 = arith.constant 0 : index
    %c13_996 = arith.constant 13 : index
    %c1_997 = arith.constant 1 : index
    %c0_998 = arith.constant 0 : index
    %757 = vector.load %arg1[%c0_995, %c13_996, %c1_997, %c0_998] : memref<1x16x16x3xf32, #tpu.memory_space<vmem>>, vector<1x1x14x3xf32>
    %758 = vector.shape_cast %757 : vector<1x1x14x3xf32> to vector<14x3xf32>
    %c2_999 = arith.constant 2 : index
    %c1_1000 = arith.constant 1 : index
    %c0_1001 = arith.constant 0 : index
    %c0_1002 = arith.constant 0 : index
    %759 = vector.load %arg2[%c2_999, %c1_1000, %c0_1001, %c0_1002] : memref<3x3x3x32xf32, #tpu.memory_space<vmem>>, vector<1x1x3x32xf32>
    %760 = vector.shape_cast %759 : vector<1x1x3x32xf32> to vector<3x32xf32>
    %cst_1003 = arith.constant dense<0.000000e+00> : vector<14x32xf32>
    %761 = tpu.matmul %758, %760, %cst_1003 {dimension_numbers = #tpu.dot_dimension_numbers<[1], [0], [0], [1], [0, 0, 1, 1], [], []>} : vector<14x3xf32>, vector<3x32xf32>, vector<14x32xf32> -> vector<14x32xf32>
    %762 = arith.addf %756, %761 : vector<14x32xf32>
    %c0_1004 = arith.constant 0 : index
    %c13_1005 = arith.constant 13 : index
    %c2_1006 = arith.constant 2 : index
    %c0_1007 = arith.constant 0 : index
    %763 = vector.load %arg1[%c0_1004, %c13_1005, %c2_1006, %c0_1007] : memref<1x16x16x3xf32, #tpu.memory_space<vmem>>, vector<1x1x14x3xf32>
    %764 = vector.shape_cast %763 : vector<1x1x14x3xf32> to vector<14x3xf32>
    %c2_1008 = arith.constant 2 : index
    %c2_1009 = arith.constant 2 : index
    %c0_1010 = arith.constant 0 : index
    %c0_1011 = arith.constant 0 : index
    %765 = vector.load %arg2[%c2_1008, %c2_1009, %c0_1010, %c0_1011] : memref<3x3x3x32xf32, #tpu.memory_space<vmem>>, vector<1x1x3x32xf32>
    %766 = vector.shape_cast %765 : vector<1x1x3x32xf32> to vector<3x32xf32>
    %cst_1012 = arith.constant dense<0.000000e+00> : vector<14x32xf32>
    %767 = tpu.matmul %764, %766, %cst_1012 {dimension_numbers = #tpu.dot_dimension_numbers<[1], [0], [0], [1], [0, 0, 1, 1], [], []>} : vector<14x3xf32>, vector<3x32xf32>, vector<14x32xf32> -> vector<14x32xf32>
    %768 = arith.addf %762, %767 : vector<14x32xf32>
    %769 = vector.broadcast %0 : vector<1x32xf32> to vector<14x32xf32>
    %770 = arith.addf %768, %769 : vector<14x32xf32>
    %cst_1013 = arith.constant 0.000000e+00 : f32
    %771 = vector.broadcast %cst_1013 : f32 to vector<14x32xf32>
    %772 = arith.maximumf %770, %771 : vector<14x32xf32>
    %773 = arith.maximumf %713, %772 : vector<14x32xf32>
    %cst_1014 = arith.constant dense<0.000000e+00> : vector<7x32xf32>
    %774 = tpu.matmul %8, %773, %cst_1014 {dimension_numbers = #tpu.dot_dimension_numbers<[1], [0], [0], [1], [0, 0, 1, 1], [], []>} : vector<7x14xf32>, vector<14x32xf32>, vector<7x32xf32> -> vector<7x32xf32>
    %cst_1015 = arith.constant dense<0.000000e+00> : vector<7x32xf32>
    %775 = tpu.matmul %15, %773, %cst_1015 {dimension_numbers = #tpu.dot_dimension_numbers<[1], [0], [0], [1], [0, 0, 1, 1], [], []>} : vector<7x14xf32>, vector<14x32xf32>, vector<7x32xf32> -> vector<7x32xf32>
    %776 = arith.maximumf %774, %775 : vector<7x32xf32>
    %c5_1016 = arith.constant 5 : index
    %c0_1017 = arith.constant 0 : index
    %c0_1018 = arith.constant 0 : index
    %777 = vector.load %arg11[%c5_1016, %c0_1017, %c0_1018] : memref<6x7x32xf32, #tpu.memory_space<vmem>>, vector<1x7x32xf32>
    %778 = vector.shape_cast %777 : vector<1x7x32xf32> to vector<7x32xf32>
    %779 = vector.shape_cast %776 : vector<7x32xf32> to vector<1x7x32xf32>
    tpu.vector_store %arg11[%c5_1016, %c0_1017, %c0_1018], %779 {strides = array<i32>} : memref<6x7x32xf32, #tpu.memory_space<vmem>>, vector<1x7x32xf32>,
    %cst_1019 = arith.constant 0.000000e+00 : f32
    %780 = vector.broadcast %cst_1019 : f32 to vector<5x64xf32>
    %c0_1020 = arith.constant 0 : index
    %c0_1021 = arith.constant 0 : index
    %c0_1022 = arith.constant 0 : index
    %781 = vector.load %arg11[%c0_1020, %c0_1021, %c0_1022] : memref<6x7x32xf32, #tpu.memory_space<vmem>>, vector<1x5x32xf32>
    %782 = vector.shape_cast %781 : vector<1x5x32xf32> to vector<5x32xf32>
    %c0_1023 = arith.constant 0 : index
    %c0_1024 = arith.constant 0 : index
    %c0_1025 = arith.constant 0 : index
    %c0_1026 = arith.constant 0 : index
    %783 = vector.load %arg4[%c0_1023, %c0_1024, %c0_1025, %c0_1026] : memref<3x3x32x64xf32, #tpu.memory_space<vmem>>, vector<1x1x32x64xf32>
    %784 = vector.shape_cast %783 : vector<1x1x32x64xf32> to vector<32x64xf32>
    %cst_1027 = arith.constant dense<0.000000e+00> : vector<5x64xf32>
    %785 = tpu.matmul %782, %784, %cst_1027 {dimension_numbers = #tpu.dot_dimension_numbers<[1], [0], [0], [1], [0, 0, 1, 1], [], []>} : vector<5x32xf32>, vector<32x64xf32>, vector<5x64xf32> -> vector<5x64xf32>
    %786 = arith.addf %780, %785 : vector<5x64xf32>
    %c0_1028 = arith.constant 0 : index
    %c1_1029 = arith.constant 1 : index
    %c0_1030 = arith.constant 0 : index
    %787 = vector.load %arg11[%c0_1028, %c1_1029, %c0_1030] : memref<6x7x32xf32, #tpu.memory_space<vmem>>, vector<1x5x32xf32>
    %788 = vector.shape_cast %787 : vector<1x5x32xf32> to vector<5x32xf32>
    %c0_1031 = arith.constant 0 : index
    %c1_1032 = arith.constant 1 : index
    %c0_1033 = arith.constant 0 : index
    %c0_1034 = arith.constant 0 : index
    %789 = vector.load %arg4[%c0_1031, %c1_1032, %c0_1033, %c0_1034] : memref<3x3x32x64xf32, #tpu.memory_space<vmem>>, vector<1x1x32x64xf32>
    %790 = vector.shape_cast %789 : vector<1x1x32x64xf32> to vector<32x64xf32>
    %cst_1035 = arith.constant dense<0.000000e+00> : vector<5x64xf32>
    %791 = tpu.matmul %788, %790, %cst_1035 {dimension_numbers = #tpu.dot_dimension_numbers<[1], [0], [0], [1], [0, 0, 1, 1], [], []>} : vector<5x32xf32>, vector<32x64xf32>, vector<5x64xf32> -> vector<5x64xf32>
    %792 = arith.addf %786, %791 : vector<5x64xf32>
    %c0_1036 = arith.constant 0 : index
    %c2_1037 = arith.constant 2 : index
    %c0_1038 = arith.constant 0 : index
    %793 = vector.load %arg11[%c0_1036, %c2_1037, %c0_1038] : memref<6x7x32xf32, #tpu.memory_space<vmem>>, vector<1x5x32xf32>
    %794 = vector.shape_cast %793 : vector<1x5x32xf32> to vector<5x32xf32>
    %c0_1039 = arith.constant 0 : index
    %c2_1040 = arith.constant 2 : index
    %c0_1041 = arith.constant 0 : index
    %c0_1042 = arith.constant 0 : index
    %795 = vector.load %arg4[%c0_1039, %c2_1040, %c0_1041, %c0_1042] : memref<3x3x32x64xf32, #tpu.memory_space<vmem>>, vector<1x1x32x64xf32>
    %796 = vector.shape_cast %795 : vector<1x1x32x64xf32> to vector<32x64xf32>
    %cst_1043 = arith.constant dense<0.000000e+00> : vector<5x64xf32>
    %797 = tpu.matmul %794, %796, %cst_1043 {dimension_numbers = #tpu.dot_dimension_numbers<[1], [0], [0], [1], [0, 0, 1, 1], [], []>} : vector<5x32xf32>, vector<32x64xf32>, vector<5x64xf32> -> vector<5x64xf32>
    %798 = arith.addf %792, %797 : vector<5x64xf32>
    %c1_1044 = arith.constant 1 : index
    %c0_1045 = arith.constant 0 : index
    %c0_1046 = arith.constant 0 : index
    %799 = vector.load %arg11[%c1_1044, %c0_1045, %c0_1046] : memref<6x7x32xf32, #tpu.memory_space<vmem>>, vector<1x5x32xf32>
    %800 = vector.shape_cast %799 : vector<1x5x32xf32> to vector<5x32xf32>
    %c1_1047 = arith.constant 1 : index
    %c0_1048 = arith.constant 0 : index
    %c0_1049 = arith.constant 0 : index
    %c0_1050 = arith.constant 0 : index
    %801 = vector.load %arg4[%c1_1047, %c0_1048, %c0_1049, %c0_1050] : memref<3x3x32x64xf32, #tpu.memory_space<vmem>>, vector<1x1x32x64xf32>
    %802 = vector.shape_cast %801 : vector<1x1x32x64xf32> to vector<32x64xf32>
    %cst_1051 = arith.constant dense<0.000000e+00> : vector<5x64xf32>
    %803 = tpu.matmul %800, %802, %cst_1051 {dimension_numbers = #tpu.dot_dimension_numbers<[1], [0], [0], [1], [0, 0, 1, 1], [], []>} : vector<5x32xf32>, vector<32x64xf32>, vector<5x64xf32> -> vector<5x64xf32>
    %804 = arith.addf %798, %803 : vector<5x64xf32>
    %c1_1052 = arith.constant 1 : index
    %c1_1053 = arith.constant 1 : index
    %c0_1054 = arith.constant 0 : index
    %805 = vector.load %arg11[%c1_1052, %c1_1053, %c0_1054] : memref<6x7x32xf32, #tpu.memory_space<vmem>>, vector<1x5x32xf32>
    %806 = vector.shape_cast %805 : vector<1x5x32xf32> to vector<5x32xf32>
    %c1_1055 = arith.constant 1 : index
    %c1_1056 = arith.constant 1 : index
    %c0_1057 = arith.constant 0 : index
    %c0_1058 = arith.constant 0 : index
    %807 = vector.load %arg4[%c1_1055, %c1_1056, %c0_1057, %c0_1058] : memref<3x3x32x64xf32, #tpu.memory_space<vmem>>, vector<1x1x32x64xf32>
    %808 = vector.shape_cast %807 : vector<1x1x32x64xf32> to vector<32x64xf32>
    %cst_1059 = arith.constant dense<0.000000e+00> : vector<5x64xf32>
    %809 = tpu.matmul %806, %808, %cst_1059 {dimension_numbers = #tpu.dot_dimension_numbers<[1], [0], [0], [1], [0, 0, 1, 1], [], []>} : vector<5x32xf32>, vector<32x64xf32>, vector<5x64xf32> -> vector<5x64xf32>
    %810 = arith.addf %804, %809 : vector<5x64xf32>
    %c1_1060 = arith.constant 1 : index
    %c2_1061 = arith.constant 2 : index
    %c0_1062 = arith.constant 0 : index
    %811 = vector.load %arg11[%c1_1060, %c2_1061, %c0_1062] : memref<6x7x32xf32, #tpu.memory_space<vmem>>, vector<1x5x32xf32>
    %812 = vector.shape_cast %811 : vector<1x5x32xf32> to vector<5x32xf32>
    %c1_1063 = arith.constant 1 : index
    %c2_1064 = arith.constant 2 : index
    %c0_1065 = arith.constant 0 : index
    %c0_1066 = arith.constant 0 : index
    %813 = vector.load %arg4[%c1_1063, %c2_1064, %c0_1065, %c0_1066] : memref<3x3x32x64xf32, #tpu.memory_space<vmem>>, vector<1x1x32x64xf32>
    %814 = vector.shape_cast %813 : vector<1x1x32x64xf32> to vector<32x64xf32>
    %cst_1067 = arith.constant dense<0.000000e+00> : vector<5x64xf32>
    %815 = tpu.matmul %812, %814, %cst_1067 {dimension_numbers = #tpu.dot_dimension_numbers<[1], [0], [0], [1], [0, 0, 1, 1], [], []>} : vector<5x32xf32>, vector<32x64xf32>, vector<5x64xf32> -> vector<5x64xf32>
    %816 = arith.addf %810, %815 : vector<5x64xf32>
    %c2_1068 = arith.constant 2 : index
    %c0_1069 = arith.constant 0 : index
    %c0_1070 = arith.constant 0 : index
    %817 = vector.load %arg11[%c2_1068, %c0_1069, %c0_1070] : memref<6x7x32xf32, #tpu.memory_space<vmem>>, vector<1x5x32xf32>
    %818 = vector.shape_cast %817 : vector<1x5x32xf32> to vector<5x32xf32>
    %c2_1071 = arith.constant 2 : index
    %c0_1072 = arith.constant 0 : index
    %c0_1073 = arith.constant 0 : index
    %c0_1074 = arith.constant 0 : index
    %819 = vector.load %arg4[%c2_1071, %c0_1072, %c0_1073, %c0_1074] : memref<3x3x32x64xf32, #tpu.memory_space<vmem>>, vector<1x1x32x64xf32>
    %820 = vector.shape_cast %819 : vector<1x1x32x64xf32> to vector<32x64xf32>
    %cst_1075 = arith.constant dense<0.000000e+00> : vector<5x64xf32>
    %821 = tpu.matmul %818, %820, %cst_1075 {dimension_numbers = #tpu.dot_dimension_numbers<[1], [0], [0], [1], [0, 0, 1, 1], [], []>} : vector<5x32xf32>, vector<32x64xf32>, vector<5x64xf32> -> vector<5x64xf32>
    %822 = arith.addf %816, %821 : vector<5x64xf32>
    %c2_1076 = arith.constant 2 : index
    %c1_1077 = arith.constant 1 : index
    %c0_1078 = arith.constant 0 : index
    %823 = vector.load %arg11[%c2_1076, %c1_1077, %c0_1078] : memref<6x7x32xf32, #tpu.memory_space<vmem>>, vector<1x5x32xf32>
    %824 = vector.shape_cast %823 : vector<1x5x32xf32> to vector<5x32xf32>
    %c2_1079 = arith.constant 2 : index
    %c1_1080 = arith.constant 1 : index
    %c0_1081 = arith.constant 0 : index
    %c0_1082 = arith.constant 0 : index
    %825 = vector.load %arg4[%c2_1079, %c1_1080, %c0_1081, %c0_1082] : memref<3x3x32x64xf32, #tpu.memory_space<vmem>>, vector<1x1x32x64xf32>
    %826 = vector.shape_cast %825 : vector<1x1x32x64xf32> to vector<32x64xf32>
    %cst_1083 = arith.constant dense<0.000000e+00> : vector<5x64xf32>
    %827 = tpu.matmul %824, %826, %cst_1083 {dimension_numbers = #tpu.dot_dimension_numbers<[1], [0], [0], [1], [0, 0, 1, 1], [], []>} : vector<5x32xf32>, vector<32x64xf32>, vector<5x64xf32> -> vector<5x64xf32>
    %828 = arith.addf %822, %827 : vector<5x64xf32>
    %c2_1084 = arith.constant 2 : index
    %c2_1085 = arith.constant 2 : index
    %c0_1086 = arith.constant 0 : index
    %829 = vector.load %arg11[%c2_1084, %c2_1085, %c0_1086] : memref<6x7x32xf32, #tpu.memory_space<vmem>>, vector<1x5x32xf32>
    %830 = vector.shape_cast %829 : vector<1x5x32xf32> to vector<5x32xf32>
    %c2_1087 = arith.constant 2 : index
    %c2_1088 = arith.constant 2 : index
    %c0_1089 = arith.constant 0 : index
    %c0_1090 = arith.constant 0 : index
    %831 = vector.load %arg4[%c2_1087, %c2_1088, %c0_1089, %c0_1090] : memref<3x3x32x64xf32, #tpu.memory_space<vmem>>, vector<1x1x32x64xf32>
    %832 = vector.shape_cast %831 : vector<1x1x32x64xf32> to vector<32x64xf32>
    %cst_1091 = arith.constant dense<0.000000e+00> : vector<5x64xf32>
    %833 = tpu.matmul %830, %832, %cst_1091 {dimension_numbers = #tpu.dot_dimension_numbers<[1], [0], [0], [1], [0, 0, 1, 1], [], []>} : vector<5x32xf32>, vector<32x64xf32>, vector<5x64xf32> -> vector<5x64xf32>
    %834 = arith.addf %828, %833 : vector<5x64xf32>
    %835 = vector.broadcast %1 : vector<1x64xf32> to vector<5x64xf32>
    %836 = arith.addf %834, %835 : vector<5x64xf32>
    %cst_1092 = arith.constant 0.000000e+00 : f32
    %837 = vector.broadcast %cst_1092 : f32 to vector<5x64xf32>
    %838 = arith.maximumf %836, %837 : vector<5x64xf32>
    %cst_1093 = arith.constant 0.000000e+00 : f32
    %839 = vector.broadcast %cst_1093 : f32 to vector<5x64xf32>
    %c1_1094 = arith.constant 1 : index
    %c0_1095 = arith.constant 0 : index
    %c0_1096 = arith.constant 0 : index
    %840 = vector.load %arg11[%c1_1094, %c0_1095, %c0_1096] : memref<6x7x32xf32, #tpu.memory_space<vmem>>, vector<1x5x32xf32>
    %841 = vector.shape_cast %840 : vector<1x5x32xf32> to vector<5x32xf32>
    %c0_1097 = arith.constant 0 : index
    %c0_1098 = arith.constant 0 : index
    %c0_1099 = arith.constant 0 : index
    %c0_1100 = arith.constant 0 : index
    %842 = vector.load %arg4[%c0_1097, %c0_1098, %c0_1099, %c0_1100] : memref<3x3x32x64xf32, #tpu.memory_space<vmem>>, vector<1x1x32x64xf32>
    %843 = vector.shape_cast %842 : vector<1x1x32x64xf32> to vector<32x64xf32>
    %cst_1101 = arith.constant dense<0.000000e+00> : vector<5x64xf32>
    %844 = tpu.matmul %841, %843, %cst_1101 {dimension_numbers = #tpu.dot_dimension_numbers<[1], [0], [0], [1], [0, 0, 1, 1], [], []>} : vector<5x32xf32>, vector<32x64xf32>, vector<5x64xf32> -> vector<5x64xf32>
    %845 = arith.addf %839, %844 : vector<5x64xf32>
    %c1_1102 = arith.constant 1 : index
    %c1_1103 = arith.constant 1 : index
    %c0_1104 = arith.constant 0 : index
    %846 = vector.load %arg11[%c1_1102, %c1_1103, %c0_1104] : memref<6x7x32xf32, #tpu.memory_space<vmem>>, vector<1x5x32xf32>
    %847 = vector.shape_cast %846 : vector<1x5x32xf32> to vector<5x32xf32>
    %c0_1105 = arith.constant 0 : index
    %c1_1106 = arith.constant 1 : index
    %c0_1107 = arith.constant 0 : index
    %c0_1108 = arith.constant 0 : index
    %848 = vector.load %arg4[%c0_1105, %c1_1106, %c0_1107, %c0_1108] : memref<3x3x32x64xf32, #tpu.memory_space<vmem>>, vector<1x1x32x64xf32>
    %849 = vector.shape_cast %848 : vector<1x1x32x64xf32> to vector<32x64xf32>
    %cst_1109 = arith.constant dense<0.000000e+00> : vector<5x64xf32>
    %850 = tpu.matmul %847, %849, %cst_1109 {dimension_numbers = #tpu.dot_dimension_numbers<[1], [0], [0], [1], [0, 0, 1, 1], [], []>} : vector<5x32xf32>, vector<32x64xf32>, vector<5x64xf32> -> vector<5x64xf32>
    %851 = arith.addf %845, %850 : vector<5x64xf32>
    %c1_1110 = arith.constant 1 : index
    %c2_1111 = arith.constant 2 : index
    %c0_1112 = arith.constant 0 : index
    %852 = vector.load %arg11[%c1_1110, %c2_1111, %c0_1112] : memref<6x7x32xf32, #tpu.memory_space<vmem>>, vector<1x5x32xf32>
    %853 = vector.shape_cast %852 : vector<1x5x32xf32> to vector<5x32xf32>
    %c0_1113 = arith.constant 0 : index
    %c2_1114 = arith.constant 2 : index
    %c0_1115 = arith.constant 0 : index
    %c0_1116 = arith.constant 0 : index
    %854 = vector.load %arg4[%c0_1113, %c2_1114, %c0_1115, %c0_1116] : memref<3x3x32x64xf32, #tpu.memory_space<vmem>>, vector<1x1x32x64xf32>
    %855 = vector.shape_cast %854 : vector<1x1x32x64xf32> to vector<32x64xf32>
    %cst_1117 = arith.constant dense<0.000000e+00> : vector<5x64xf32>
    %856 = tpu.matmul %853, %855, %cst_1117 {dimension_numbers = #tpu.dot_dimension_numbers<[1], [0], [0], [1], [0, 0, 1, 1], [], []>} : vector<5x32xf32>, vector<32x64xf32>, vector<5x64xf32> -> vector<5x64xf32>
    %857 = arith.addf %851, %856 : vector<5x64xf32>
    %c2_1118 = arith.constant 2 : index
    %c0_1119 = arith.constant 0 : index
    %c0_1120 = arith.constant 0 : index
    %858 = vector.load %arg11[%c2_1118, %c0_1119, %c0_1120] : memref<6x7x32xf32, #tpu.memory_space<vmem>>, vector<1x5x32xf32>
    %859 = vector.shape_cast %858 : vector<1x5x32xf32> to vector<5x32xf32>
    %c1_1121 = arith.constant 1 : index
    %c0_1122 = arith.constant 0 : index
    %c0_1123 = arith.constant 0 : index
    %c0_1124 = arith.constant 0 : index
    %860 = vector.load %arg4[%c1_1121, %c0_1122, %c0_1123, %c0_1124] : memref<3x3x32x64xf32, #tpu.memory_space<vmem>>, vector<1x1x32x64xf32>
    %861 = vector.shape_cast %860 : vector<1x1x32x64xf32> to vector<32x64xf32>
    %cst_1125 = arith.constant dense<0.000000e+00> : vector<5x64xf32>
    %862 = tpu.matmul %859, %861, %cst_1125 {dimension_numbers = #tpu.dot_dimension_numbers<[1], [0], [0], [1], [0, 0, 1, 1], [], []>} : vector<5x32xf32>, vector<32x64xf32>, vector<5x64xf32> -> vector<5x64xf32>
    %863 = arith.addf %857, %862 : vector<5x64xf32>
    %c2_1126 = arith.constant 2 : index
    %c1_1127 = arith.constant 1 : index
    %c0_1128 = arith.constant 0 : index
    %864 = vector.load %arg11[%c2_1126, %c1_1127, %c0_1128] : memref<6x7x32xf32, #tpu.memory_space<vmem>>, vector<1x5x32xf32>
    %865 = vector.shape_cast %864 : vector<1x5x32xf32> to vector<5x32xf32>
    %c1_1129 = arith.constant 1 : index
    %c1_1130 = arith.constant 1 : index
    %c0_1131 = arith.constant 0 : index
    %c0_1132 = arith.constant 0 : index
    %866 = vector.load %arg4[%c1_1129, %c1_1130, %c0_1131, %c0_1132] : memref<3x3x32x64xf32, #tpu.memory_space<vmem>>, vector<1x1x32x64xf32>
    %867 = vector.shape_cast %866 : vector<1x1x32x64xf32> to vector<32x64xf32>
    %cst_1133 = arith.constant dense<0.000000e+00> : vector<5x64xf32>
    %868 = tpu.matmul %865, %867, %cst_1133 {dimension_numbers = #tpu.dot_dimension_numbers<[1], [0], [0], [1], [0, 0, 1, 1], [], []>} : vector<5x32xf32>, vector<32x64xf32>, vector<5x64xf32> -> vector<5x64xf32>
    %869 = arith.addf %863, %868 : vector<5x64xf32>
    %c2_1134 = arith.constant 2 : index
    %c2_1135 = arith.constant 2 : index
    %c0_1136 = arith.constant 0 : index
    %870 = vector.load %arg11[%c2_1134, %c2_1135, %c0_1136] : memref<6x7x32xf32, #tpu.memory_space<vmem>>, vector<1x5x32xf32>
    %871 = vector.shape_cast %870 : vector<1x5x32xf32> to vector<5x32xf32>
    %c1_1137 = arith.constant 1 : index
    %c2_1138 = arith.constant 2 : index
    %c0_1139 = arith.constant 0 : index
    %c0_1140 = arith.constant 0 : index
    %872 = vector.load %arg4[%c1_1137, %c2_1138, %c0_1139, %c0_1140] : memref<3x3x32x64xf32, #tpu.memory_space<vmem>>, vector<1x1x32x64xf32>
    %873 = vector.shape_cast %872 : vector<1x1x32x64xf32> to vector<32x64xf32>
    %cst_1141 = arith.constant dense<0.000000e+00> : vector<5x64xf32>
    %874 = tpu.matmul %871, %873, %cst_1141 {dimension_numbers = #tpu.dot_dimension_numbers<[1], [0], [0], [1], [0, 0, 1, 1], [], []>} : vector<5x32xf32>, vector<32x64xf32>, vector<5x64xf32> -> vector<5x64xf32>
    %875 = arith.addf %869, %874 : vector<5x64xf32>
    %c3_1142 = arith.constant 3 : index
    %c0_1143 = arith.constant 0 : index
    %c0_1144 = arith.constant 0 : index
    %876 = vector.load %arg11[%c3_1142, %c0_1143, %c0_1144] : memref<6x7x32xf32, #tpu.memory_space<vmem>>, vector<1x5x32xf32>
    %877 = vector.shape_cast %876 : vector<1x5x32xf32> to vector<5x32xf32>
    %c2_1145 = arith.constant 2 : index
    %c0_1146 = arith.constant 0 : index
    %c0_1147 = arith.constant 0 : index
    %c0_1148 = arith.constant 0 : index
    %878 = vector.load %arg4[%c2_1145, %c0_1146, %c0_1147, %c0_1148] : memref<3x3x32x64xf32, #tpu.memory_space<vmem>>, vector<1x1x32x64xf32>
    %879 = vector.shape_cast %878 : vector<1x1x32x64xf32> to vector<32x64xf32>
    %cst_1149 = arith.constant dense<0.000000e+00> : vector<5x64xf32>
    %880 = tpu.matmul %877, %879, %cst_1149 {dimension_numbers = #tpu.dot_dimension_numbers<[1], [0], [0], [1], [0, 0, 1, 1], [], []>} : vector<5x32xf32>, vector<32x64xf32>, vector<5x64xf32> -> vector<5x64xf32>
    %881 = arith.addf %875, %880 : vector<5x64xf32>
    %c3_1150 = arith.constant 3 : index
    %c1_1151 = arith.constant 1 : index
    %c0_1152 = arith.constant 0 : index
    %882 = vector.load %arg11[%c3_1150, %c1_1151, %c0_1152] : memref<6x7x32xf32, #tpu.memory_space<vmem>>, vector<1x5x32xf32>
    %883 = vector.shape_cast %882 : vector<1x5x32xf32> to vector<5x32xf32>
    %c2_1153 = arith.constant 2 : index
    %c1_1154 = arith.constant 1 : index
    %c0_1155 = arith.constant 0 : index
    %c0_1156 = arith.constant 0 : index
    %884 = vector.load %arg4[%c2_1153, %c1_1154, %c0_1155, %c0_1156] : memref<3x3x32x64xf32, #tpu.memory_space<vmem>>, vector<1x1x32x64xf32>
    %885 = vector.shape_cast %884 : vector<1x1x32x64xf32> to vector<32x64xf32>
    %cst_1157 = arith.constant dense<0.000000e+00> : vector<5x64xf32>
    %886 = tpu.matmul %883, %885, %cst_1157 {dimension_numbers = #tpu.dot_dimension_numbers<[1], [0], [0], [1], [0, 0, 1, 1], [], []>} : vector<5x32xf32>, vector<32x64xf32>, vector<5x64xf32> -> vector<5x64xf32>
    %887 = arith.addf %881, %886 : vector<5x64xf32>
    %c3_1158 = arith.constant 3 : index
    %c2_1159 = arith.constant 2 : index
    %c0_1160 = arith.constant 0 : index
    %888 = vector.load %arg11[%c3_1158, %c2_1159, %c0_1160] : memref<6x7x32xf32, #tpu.memory_space<vmem>>, vector<1x5x32xf32>
    %889 = vector.shape_cast %888 : vector<1x5x32xf32> to vector<5x32xf32>
    %c2_1161 = arith.constant 2 : index
    %c2_1162 = arith.constant 2 : index
    %c0_1163 = arith.constant 0 : index
    %c0_1164 = arith.constant 0 : index
    %890 = vector.load %arg4[%c2_1161, %c2_1162, %c0_1163, %c0_1164] : memref<3x3x32x64xf32, #tpu.memory_space<vmem>>, vector<1x1x32x64xf32>
    %891 = vector.shape_cast %890 : vector<1x1x32x64xf32> to vector<32x64xf32>
    %cst_1165 = arith.constant dense<0.000000e+00> : vector<5x64xf32>
    %892 = tpu.matmul %889, %891, %cst_1165 {dimension_numbers = #tpu.dot_dimension_numbers<[1], [0], [0], [1], [0, 0, 1, 1], [], []>} : vector<5x32xf32>, vector<32x64xf32>, vector<5x64xf32> -> vector<5x64xf32>
    %893 = arith.addf %887, %892 : vector<5x64xf32>
    %894 = vector.broadcast %1 : vector<1x64xf32> to vector<5x64xf32>
    %895 = arith.addf %893, %894 : vector<5x64xf32>
    %cst_1166 = arith.constant 0.000000e+00 : f32
    %896 = vector.broadcast %cst_1166 : f32 to vector<5x64xf32>
    %897 = arith.maximumf %895, %896 : vector<5x64xf32>
    %898 = arith.maximumf %838, %897 : vector<5x64xf32>
    %cst_1167 = arith.constant dense<0.000000e+00> : vector<2x64xf32>
    %899 = tpu.matmul %22, %898, %cst_1167 {dimension_numbers = #tpu.dot_dimension_numbers<[1], [0], [0], [1], [0, 0, 1, 1], [], []>} : vector<2x5xf32>, vector<5x64xf32>, vector<2x64xf32> -> vector<2x64xf32>
    %cst_1168 = arith.constant dense<0.000000e+00> : vector<2x64xf32>
    %900 = tpu.matmul %29, %898, %cst_1168 {dimension_numbers = #tpu.dot_dimension_numbers<[1], [0], [0], [1], [0, 0, 1, 1], [], []>} : vector<2x5xf32>, vector<5x64xf32>, vector<2x64xf32> -> vector<2x64xf32>
    %901 = arith.maximumf %899, %900 : vector<2x64xf32>
    %c0_1169 = arith.constant 0 : index
    %c0_1170 = arith.constant 0 : index
    %c0_1171 = arith.constant 0 : index
    %902 = vector.load %arg12[%c0_1169, %c0_1170, %c0_1171] : memref<2x2x64xf32, #tpu.memory_space<vmem>>, vector<1x2x64xf32>
    %903 = vector.shape_cast %902 : vector<1x2x64xf32> to vector<2x64xf32>
    %904 = vector.shape_cast %901 : vector<2x64xf32> to vector<1x2x64xf32>
    tpu.vector_store %arg12[%c0_1169, %c0_1170, %c0_1171], %904 {strides = array<i32>} : memref<2x2x64xf32, #tpu.memory_space<vmem>>, vector<1x2x64xf32>,
    %cst_1172 = arith.constant 0.000000e+00 : f32
    %905 = vector.broadcast %cst_1172 : f32 to vector<5x64xf32>
    %c2_1173 = arith.constant 2 : index
    %c0_1174 = arith.constant 0 : index
    %c0_1175 = arith.constant 0 : index
    %906 = vector.load %arg11[%c2_1173, %c0_1174, %c0_1175] : memref<6x7x32xf32, #tpu.memory_space<vmem>>, vector<1x5x32xf32>
    %907 = vector.shape_cast %906 : vector<1x5x32xf32> to vector<5x32xf32>
    %c0_1176 = arith.constant 0 : index
    %c0_1177 = arith.constant 0 : index
    %c0_1178 = arith.constant 0 : index
    %c0_1179 = arith.constant 0 : index
    %908 = vector.load %arg4[%c0_1176, %c0_1177, %c0_1178, %c0_1179] : memref<3x3x32x64xf32, #tpu.memory_space<vmem>>, vector<1x1x32x64xf32>
    %909 = vector.shape_cast %908 : vector<1x1x32x64xf32> to vector<32x64xf32>
    %cst_1180 = arith.constant dense<0.000000e+00> : vector<5x64xf32>
    %910 = tpu.matmul %907, %909, %cst_1180 {dimension_numbers = #tpu.dot_dimension_numbers<[1], [0], [0], [1], [0, 0, 1, 1], [], []>} : vector<5x32xf32>, vector<32x64xf32>, vector<5x64xf32> -> vector<5x64xf32>
    %911 = arith.addf %905, %910 : vector<5x64xf32>
    %c2_1181 = arith.constant 2 : index
    %c1_1182 = arith.constant 1 : index
    %c0_1183 = arith.constant 0 : index
    %912 = vector.load %arg11[%c2_1181, %c1_1182, %c0_1183] : memref<6x7x32xf32, #tpu.memory_space<vmem>>, vector<1x5x32xf32>
    %913 = vector.shape_cast %912 : vector<1x5x32xf32> to vector<5x32xf32>
    %c0_1184 = arith.constant 0 : index
    %c1_1185 = arith.constant 1 : index
    %c0_1186 = arith.constant 0 : index
    %c0_1187 = arith.constant 0 : index
    %914 = vector.load %arg4[%c0_1184, %c1_1185, %c0_1186, %c0_1187] : memref<3x3x32x64xf32, #tpu.memory_space<vmem>>, vector<1x1x32x64xf32>
    %915 = vector.shape_cast %914 : vector<1x1x32x64xf32> to vector<32x64xf32>
    %cst_1188 = arith.constant dense<0.000000e+00> : vector<5x64xf32>
    %916 = tpu.matmul %913, %915, %cst_1188 {dimension_numbers = #tpu.dot_dimension_numbers<[1], [0], [0], [1], [0, 0, 1, 1], [], []>} : vector<5x32xf32>, vector<32x64xf32>, vector<5x64xf32> -> vector<5x64xf32>
    %917 = arith.addf %911, %916 : vector<5x64xf32>
    %c2_1189 = arith.constant 2 : index
    %c2_1190 = arith.constant 2 : index
    %c0_1191 = arith.constant 0 : index
    %918 = vector.load %arg11[%c2_1189, %c2_1190, %c0_1191] : memref<6x7x32xf32, #tpu.memory_space<vmem>>, vector<1x5x32xf32>
    %919 = vector.shape_cast %918 : vector<1x5x32xf32> to vector<5x32xf32>
    %c0_1192 = arith.constant 0 : index
    %c2_1193 = arith.constant 2 : index
    %c0_1194 = arith.constant 0 : index
    %c0_1195 = arith.constant 0 : index
    %920 = vector.load %arg4[%c0_1192, %c2_1193, %c0_1194, %c0_1195] : memref<3x3x32x64xf32, #tpu.memory_space<vmem>>, vector<1x1x32x64xf32>
    %921 = vector.shape_cast %920 : vector<1x1x32x64xf32> to vector<32x64xf32>
    %cst_1196 = arith.constant dense<0.000000e+00> : vector<5x64xf32>
    %922 = tpu.matmul %919, %921, %cst_1196 {dimension_numbers = #tpu.dot_dimension_numbers<[1], [0], [0], [1], [0, 0, 1, 1], [], []>} : vector<5x32xf32>, vector<32x64xf32>, vector<5x64xf32> -> vector<5x64xf32>
    %923 = arith.addf %917, %922 : vector<5x64xf32>
    %c3_1197 = arith.constant 3 : index
    %c0_1198 = arith.constant 0 : index
    %c0_1199 = arith.constant 0 : index
    %924 = vector.load %arg11[%c3_1197, %c0_1198, %c0_1199] : memref<6x7x32xf32, #tpu.memory_space<vmem>>, vector<1x5x32xf32>
    %925 = vector.shape_cast %924 : vector<1x5x32xf32> to vector<5x32xf32>
    %c1_1200 = arith.constant 1 : index
    %c0_1201 = arith.constant 0 : index
    %c0_1202 = arith.constant 0 : index
    %c0_1203 = arith.constant 0 : index
    %926 = vector.load %arg4[%c1_1200, %c0_1201, %c0_1202, %c0_1203] : memref<3x3x32x64xf32, #tpu.memory_space<vmem>>, vector<1x1x32x64xf32>
    %927 = vector.shape_cast %926 : vector<1x1x32x64xf32> to vector<32x64xf32>
    %cst_1204 = arith.constant dense<0.000000e+00> : vector<5x64xf32>
    %928 = tpu.matmul %925, %927, %cst_1204 {dimension_numbers = #tpu.dot_dimension_numbers<[1], [0], [0], [1], [0, 0, 1, 1], [], []>} : vector<5x32xf32>, vector<32x64xf32>, vector<5x64xf32> -> vector<5x64xf32>
    %929 = arith.addf %923, %928 : vector<5x64xf32>
    %c3_1205 = arith.constant 3 : index
    %c1_1206 = arith.constant 1 : index
    %c0_1207 = arith.constant 0 : index
    %930 = vector.load %arg11[%c3_1205, %c1_1206, %c0_1207] : memref<6x7x32xf32, #tpu.memory_space<vmem>>, vector<1x5x32xf32>
    %931 = vector.shape_cast %930 : vector<1x5x32xf32> to vector<5x32xf32>
    %c1_1208 = arith.constant 1 : index
    %c1_1209 = arith.constant 1 : index
    %c0_1210 = arith.constant 0 : index
    %c0_1211 = arith.constant 0 : index
    %932 = vector.load %arg4[%c1_1208, %c1_1209, %c0_1210, %c0_1211] : memref<3x3x32x64xf32, #tpu.memory_space<vmem>>, vector<1x1x32x64xf32>
    %933 = vector.shape_cast %932 : vector<1x1x32x64xf32> to vector<32x64xf32>
    %cst_1212 = arith.constant dense<0.000000e+00> : vector<5x64xf32>
    %934 = tpu.matmul %931, %933, %cst_1212 {dimension_numbers = #tpu.dot_dimension_numbers<[1], [0], [0], [1], [0, 0, 1, 1], [], []>} : vector<5x32xf32>, vector<32x64xf32>, vector<5x64xf32> -> vector<5x64xf32>
    %935 = arith.addf %929, %934 : vector<5x64xf32>
    %c3_1213 = arith.constant 3 : index
    %c2_1214 = arith.constant 2 : index
    %c0_1215 = arith.constant 0 : index
    %936 = vector.load %arg11[%c3_1213, %c2_1214, %c0_1215] : memref<6x7x32xf32, #tpu.memory_space<vmem>>, vector<1x5x32xf32>
    %937 = vector.shape_cast %936 : vector<1x5x32xf32> to vector<5x32xf32>
    %c1_1216 = arith.constant 1 : index
    %c2_1217 = arith.constant 2 : index
    %c0_1218 = arith.constant 0 : index
    %c0_1219 = arith.constant 0 : index
    %938 = vector.load %arg4[%c1_1216, %c2_1217, %c0_1218, %c0_1219] : memref<3x3x32x64xf32, #tpu.memory_space<vmem>>, vector<1x1x32x64xf32>
    %939 = vector.shape_cast %938 : vector<1x1x32x64xf32> to vector<32x64xf32>
    %cst_1220 = arith.constant dense<0.000000e+00> : vector<5x64xf32>
    %940 = tpu.matmul %937, %939, %cst_1220 {dimension_numbers = #tpu.dot_dimension_numbers<[1], [0], [0], [1], [0, 0, 1, 1], [], []>} : vector<5x32xf32>, vector<32x64xf32>, vector<5x64xf32> -> vector<5x64xf32>
    %941 = arith.addf %935, %940 : vector<5x64xf32>
    %c4_1221 = arith.constant 4 : index
    %c0_1222 = arith.constant 0 : index
    %c0_1223 = arith.constant 0 : index
    %942 = vector.load %arg11[%c4_1221, %c0_1222, %c0_1223] : memref<6x7x32xf32, #tpu.memory_space<vmem>>, vector<1x5x32xf32>
    %943 = vector.shape_cast %942 : vector<1x5x32xf32> to vector<5x32xf32>
    %c2_1224 = arith.constant 2 : index
    %c0_1225 = arith.constant 0 : index
    %c0_1226 = arith.constant 0 : index
    %c0_1227 = arith.constant 0 : index
    %944 = vector.load %arg4[%c2_1224, %c0_1225, %c0_1226, %c0_1227] : memref<3x3x32x64xf32, #tpu.memory_space<vmem>>, vector<1x1x32x64xf32>
    %945 = vector.shape_cast %944 : vector<1x1x32x64xf32> to vector<32x64xf32>
    %cst_1228 = arith.constant dense<0.000000e+00> : vector<5x64xf32>
    %946 = tpu.matmul %943, %945, %cst_1228 {dimension_numbers = #tpu.dot_dimension_numbers<[1], [0], [0], [1], [0, 0, 1, 1], [], []>} : vector<5x32xf32>, vector<32x64xf32>, vector<5x64xf32> -> vector<5x64xf32>
    %947 = arith.addf %941, %946 : vector<5x64xf32>
    %c4_1229 = arith.constant 4 : index
    %c1_1230 = arith.constant 1 : index
    %c0_1231 = arith.constant 0 : index
    %948 = vector.load %arg11[%c4_1229, %c1_1230, %c0_1231] : memref<6x7x32xf32, #tpu.memory_space<vmem>>, vector<1x5x32xf32>
    %949 = vector.shape_cast %948 : vector<1x5x32xf32> to vector<5x32xf32>
    %c2_1232 = arith.constant 2 : index
    %c1_1233 = arith.constant 1 : index
    %c0_1234 = arith.constant 0 : index
    %c0_1235 = arith.constant 0 : index
    %950 = vector.load %arg4[%c2_1232, %c1_1233, %c0_1234, %c0_1235] : memref<3x3x32x64xf32, #tpu.memory_space<vmem>>, vector<1x1x32x64xf32>
    %951 = vector.shape_cast %950 : vector<1x1x32x64xf32> to vector<32x64xf32>
    %cst_1236 = arith.constant dense<0.000000e+00> : vector<5x64xf32>
    %952 = tpu.matmul %949, %951, %cst_1236 {dimension_numbers = #tpu.dot_dimension_numbers<[1], [0], [0], [1], [0, 0, 1, 1], [], []>} : vector<5x32xf32>, vector<32x64xf32>, vector<5x64xf32> -> vector<5x64xf32>
    %953 = arith.addf %947, %952 : vector<5x64xf32>
    %c4_1237 = arith.constant 4 : index
    %c2_1238 = arith.constant 2 : index
    %c0_1239 = arith.constant 0 : index
    %954 = vector.load %arg11[%c4_1237, %c2_1238, %c0_1239] : memref<6x7x32xf32, #tpu.memory_space<vmem>>, vector<1x5x32xf32>
    %955 = vector.shape_cast %954 : vector<1x5x32xf32> to vector<5x32xf32>
    %c2_1240 = arith.constant 2 : index
    %c2_1241 = arith.constant 2 : index
    %c0_1242 = arith.constant 0 : index
    %c0_1243 = arith.constant 0 : index
    %956 = vector.load %arg4[%c2_1240, %c2_1241, %c0_1242, %c0_1243] : memref<3x3x32x64xf32, #tpu.memory_space<vmem>>, vector<1x1x32x64xf32>
    %957 = vector.shape_cast %956 : vector<1x1x32x64xf32> to vector<32x64xf32>
    %cst_1244 = arith.constant dense<0.000000e+00> : vector<5x64xf32>
    %958 = tpu.matmul %955, %957, %cst_1244 {dimension_numbers = #tpu.dot_dimension_numbers<[1], [0], [0], [1], [0, 0, 1, 1], [], []>} : vector<5x32xf32>, vector<32x64xf32>, vector<5x64xf32> -> vector<5x64xf32>
    %959 = arith.addf %953, %958 : vector<5x64xf32>
    %960 = vector.broadcast %1 : vector<1x64xf32> to vector<5x64xf32>
    %961 = arith.addf %959, %960 : vector<5x64xf32>
    %cst_1245 = arith.constant 0.000000e+00 : f32
    %962 = vector.broadcast %cst_1245 : f32 to vector<5x64xf32>
    %963 = arith.maximumf %961, %962 : vector<5x64xf32>
    %cst_1246 = arith.constant 0.000000e+00 : f32
    %964 = vector.broadcast %cst_1246 : f32 to vector<5x64xf32>
    %c3_1247 = arith.constant 3 : index
    %c0_1248 = arith.constant 0 : index
    %c0_1249 = arith.constant 0 : index
    %965 = vector.load %arg11[%c3_1247, %c0_1248, %c0_1249] : memref<6x7x32xf32, #tpu.memory_space<vmem>>, vector<1x5x32xf32>
    %966 = vector.shape_cast %965 : vector<1x5x32xf32> to vector<5x32xf32>
    %c0_1250 = arith.constant 0 : index
    %c0_1251 = arith.constant 0 : index
    %c0_1252 = arith.constant 0 : index
    %c0_1253 = arith.constant 0 : index
    %967 = vector.load %arg4[%c0_1250, %c0_1251, %c0_1252, %c0_1253] : memref<3x3x32x64xf32, #tpu.memory_space<vmem>>, vector<1x1x32x64xf32>
    %968 = vector.shape_cast %967 : vector<1x1x32x64xf32> to vector<32x64xf32>
    %cst_1254 = arith.constant dense<0.000000e+00> : vector<5x64xf32>
    %969 = tpu.matmul %966, %968, %cst_1254 {dimension_numbers = #tpu.dot_dimension_numbers<[1], [0], [0], [1], [0, 0, 1, 1], [], []>} : vector<5x32xf32>, vector<32x64xf32>, vector<5x64xf32> -> vector<5x64xf32>
    %970 = arith.addf %964, %969 : vector<5x64xf32>
    %c3_1255 = arith.constant 3 : index
    %c1_1256 = arith.constant 1 : index
    %c0_1257 = arith.constant 0 : index
    %971 = vector.load %arg11[%c3_1255, %c1_1256, %c0_1257] : memref<6x7x32xf32, #tpu.memory_space<vmem>>, vector<1x5x32xf32>
    %972 = vector.shape_cast %971 : vector<1x5x32xf32> to vector<5x32xf32>
    %c0_1258 = arith.constant 0 : index
    %c1_1259 = arith.constant 1 : index
    %c0_1260 = arith.constant 0 : index
    %c0_1261 = arith.constant 0 : index
    %973 = vector.load %arg4[%c0_1258, %c1_1259, %c0_1260, %c0_1261] : memref<3x3x32x64xf32, #tpu.memory_space<vmem>>, vector<1x1x32x64xf32>
    %974 = vector.shape_cast %973 : vector<1x1x32x64xf32> to vector<32x64xf32>
    %cst_1262 = arith.constant dense<0.000000e+00> : vector<5x64xf32>
    %975 = tpu.matmul %972, %974, %cst_1262 {dimension_numbers = #tpu.dot_dimension_numbers<[1], [0], [0], [1], [0, 0, 1, 1], [], []>} : vector<5x32xf32>, vector<32x64xf32>, vector<5x64xf32> -> vector<5x64xf32>
    %976 = arith.addf %970, %975 : vector<5x64xf32>
    %c3_1263 = arith.constant 3 : index
    %c2_1264 = arith.constant 2 : index
    %c0_1265 = arith.constant 0 : index
    %977 = vector.load %arg11[%c3_1263, %c2_1264, %c0_1265] : memref<6x7x32xf32, #tpu.memory_space<vmem>>, vector<1x5x32xf32>
    %978 = vector.shape_cast %977 : vector<1x5x32xf32> to vector<5x32xf32>
    %c0_1266 = arith.constant 0 : index
    %c2_1267 = arith.constant 2 : index
    %c0_1268 = arith.constant 0 : index
    %c0_1269 = arith.constant 0 : index
    %979 = vector.load %arg4[%c0_1266, %c2_1267, %c0_1268, %c0_1269] : memref<3x3x32x64xf32, #tpu.memory_space<vmem>>, vector<1x1x32x64xf32>
    %980 = vector.shape_cast %979 : vector<1x1x32x64xf32> to vector<32x64xf32>
    %cst_1270 = arith.constant dense<0.000000e+00> : vector<5x64xf32>
    %981 = tpu.matmul %978, %980, %cst_1270 {dimension_numbers = #tpu.dot_dimension_numbers<[1], [0], [0], [1], [0, 0, 1, 1], [], []>} : vector<5x32xf32>, vector<32x64xf32>, vector<5x64xf32> -> vector<5x64xf32>
    %982 = arith.addf %976, %981 : vector<5x64xf32>
    %c4_1271 = arith.constant 4 : index
    %c0_1272 = arith.constant 0 : index
    %c0_1273 = arith.constant 0 : index
    %983 = vector.load %arg11[%c4_1271, %c0_1272, %c0_1273] : memref<6x7x32xf32, #tpu.memory_space<vmem>>, vector<1x5x32xf32>
    %984 = vector.shape_cast %983 : vector<1x5x32xf32> to vector<5x32xf32>
    %c1_1274 = arith.constant 1 : index
    %c0_1275 = arith.constant 0 : index
    %c0_1276 = arith.constant 0 : index
    %c0_1277 = arith.constant 0 : index
    %985 = vector.load %arg4[%c1_1274, %c0_1275, %c0_1276, %c0_1277] : memref<3x3x32x64xf32, #tpu.memory_space<vmem>>, vector<1x1x32x64xf32>
    %986 = vector.shape_cast %985 : vector<1x1x32x64xf32> to vector<32x64xf32>
    %cst_1278 = arith.constant dense<0.000000e+00> : vector<5x64xf32>
    %987 = tpu.matmul %984, %986, %cst_1278 {dimension_numbers = #tpu.dot_dimension_numbers<[1], [0], [0], [1], [0, 0, 1, 1], [], []>} : vector<5x32xf32>, vector<32x64xf32>, vector<5x64xf32> -> vector<5x64xf32>
    %988 = arith.addf %982, %987 : vector<5x64xf32>
    %c4_1279 = arith.constant 4 : index
    %c1_1280 = arith.constant 1 : index
    %c0_1281 = arith.constant 0 : index
    %989 = vector.load %arg11[%c4_1279, %c1_1280, %c0_1281] : memref<6x7x32xf32, #tpu.memory_space<vmem>>, vector<1x5x32xf32>
    %990 = vector.shape_cast %989 : vector<1x5x32xf32> to vector<5x32xf32>
    %c1_1282 = arith.constant 1 : index
    %c1_1283 = arith.constant 1 : index
    %c0_1284 = arith.constant 0 : index
    %c0_1285 = arith.constant 0 : index
    %991 = vector.load %arg4[%c1_1282, %c1_1283, %c0_1284, %c0_1285] : memref<3x3x32x64xf32, #tpu.memory_space<vmem>>, vector<1x1x32x64xf32>
    %992 = vector.shape_cast %991 : vector<1x1x32x64xf32> to vector<32x64xf32>
    %cst_1286 = arith.constant dense<0.000000e+00> : vector<5x64xf32>
    %993 = tpu.matmul %990, %992, %cst_1286 {dimension_numbers = #tpu.dot_dimension_numbers<[1], [0], [0], [1], [0, 0, 1, 1], [], []>} : vector<5x32xf32>, vector<32x64xf32>, vector<5x64xf32> -> vector<5x64xf32>
    %994 = arith.addf %988, %993 : vector<5x64xf32>
    %c4_1287 = arith.constant 4 : index
    %c2_1288 = arith.constant 2 : index
    %c0_1289 = arith.constant 0 : index
    %995 = vector.load %arg11[%c4_1287, %c2_1288, %c0_1289] : memref<6x7x32xf32, #tpu.memory_space<vmem>>, vector<1x5x32xf32>
    %996 = vector.shape_cast %995 : vector<1x5x32xf32> to vector<5x32xf32>
    %c1_1290 = arith.constant 1 : index
    %c2_1291 = arith.constant 2 : index
    %c0_1292 = arith.constant 0 : index
    %c0_1293 = arith.constant 0 : index
    %997 = vector.load %arg4[%c1_1290, %c2_1291, %c0_1292, %c0_1293] : memref<3x3x32x64xf32, #tpu.memory_space<vmem>>, vector<1x1x32x64xf32>
    %998 = vector.shape_cast %997 : vector<1x1x32x64xf32> to vector<32x64xf32>
    %cst_1294 = arith.constant dense<0.000000e+00> : vector<5x64xf32>
    %999 = tpu.matmul %996, %998, %cst_1294 {dimension_numbers = #tpu.dot_dimension_numbers<[1], [0], [0], [1], [0, 0, 1, 1], [], []>} : vector<5x32xf32>, vector<32x64xf32>, vector<5x64xf32> -> vector<5x64xf32>
    %1000 = arith.addf %994, %999 : vector<5x64xf32>
    %c5_1295 = arith.constant 5 : index
    %c0_1296 = arith.constant 0 : index
    %c0_1297 = arith.constant 0 : index
    %1001 = vector.load %arg11[%c5_1295, %c0_1296, %c0_1297] : memref<6x7x32xf32, #tpu.memory_space<vmem>>, vector<1x5x32xf32>
    %1002 = vector.shape_cast %1001 : vector<1x5x32xf32> to vector<5x32xf32>
    %c2_1298 = arith.constant 2 : index
    %c0_1299 = arith.constant 0 : index
    %c0_1300 = arith.constant 0 : index
    %c0_1301 = arith.constant 0 : index
    %1003 = vector.load %arg4[%c2_1298, %c0_1299, %c0_1300, %c0_1301] : memref<3x3x32x64xf32, #tpu.memory_space<vmem>>, vector<1x1x32x64xf32>
    %1004 = vector.shape_cast %1003 : vector<1x1x32x64xf32> to vector<32x64xf32>
    %cst_1302 = arith.constant dense<0.000000e+00> : vector<5x64xf32>
    %1005 = tpu.matmul %1002, %1004, %cst_1302 {dimension_numbers = #tpu.dot_dimension_numbers<[1], [0], [0], [1], [0, 0, 1, 1], [], []>} : vector<5x32xf32>, vector<32x64xf32>, vector<5x64xf32> -> vector<5x64xf32>
    %1006 = arith.addf %1000, %1005 : vector<5x64xf32>
    %c5_1303 = arith.constant 5 : index
    %c1_1304 = arith.constant 1 : index
    %c0_1305 = arith.constant 0 : index
    %1007 = vector.load %arg11[%c5_1303, %c1_1304, %c0_1305] : memref<6x7x32xf32, #tpu.memory_space<vmem>>, vector<1x5x32xf32>
    %1008 = vector.shape_cast %1007 : vector<1x5x32xf32> to vector<5x32xf32>
    %c2_1306 = arith.constant 2 : index
    %c1_1307 = arith.constant 1 : index
    %c0_1308 = arith.constant 0 : index
    %c0_1309 = arith.constant 0 : index
    %1009 = vector.load %arg4[%c2_1306, %c1_1307, %c0_1308, %c0_1309] : memref<3x3x32x64xf32, #tpu.memory_space<vmem>>, vector<1x1x32x64xf32>
    %1010 = vector.shape_cast %1009 : vector<1x1x32x64xf32> to vector<32x64xf32>
    %cst_1310 = arith.constant dense<0.000000e+00> : vector<5x64xf32>
    %1011 = tpu.matmul %1008, %1010, %cst_1310 {dimension_numbers = #tpu.dot_dimension_numbers<[1], [0], [0], [1], [0, 0, 1, 1], [], []>} : vector<5x32xf32>, vector<32x64xf32>, vector<5x64xf32> -> vector<5x64xf32>
    %1012 = arith.addf %1006, %1011 : vector<5x64xf32>
    %c5_1311 = arith.constant 5 : index
    %c2_1312 = arith.constant 2 : index
    %c0_1313 = arith.constant 0 : index
    %1013 = vector.load %arg11[%c5_1311, %c2_1312, %c0_1313] : memref<6x7x32xf32, #tpu.memory_space<vmem>>, vector<1x5x32xf32>
    %1014 = vector.shape_cast %1013 : vector<1x5x32xf32> to vector<5x32xf32>
    %c2_1314 = arith.constant 2 : index
    %c2_1315 = arith.constant 2 : index
    %c0_1316 = arith.constant 0 : index
    %c0_1317 = arith.constant 0 : index
    %1015 = vector.load %arg4[%c2_1314, %c2_1315, %c0_1316, %c0_1317] : memref<3x3x32x64xf32, #tpu.memory_space<vmem>>, vector<1x1x32x64xf32>
    %1016 = vector.shape_cast %1015 : vector<1x1x32x64xf32> to vector<32x64xf32>
    %cst_1318 = arith.constant dense<0.000000e+00> : vector<5x64xf32>
    %1017 = tpu.matmul %1014, %1016, %cst_1318 {dimension_numbers = #tpu.dot_dimension_numbers<[1], [0], [0], [1], [0, 0, 1, 1], [], []>} : vector<5x32xf32>, vector<32x64xf32>, vector<5x64xf32> -> vector<5x64xf32>
    %1018 = arith.addf %1012, %1017 : vector<5x64xf32>
    %1019 = vector.broadcast %1 : vector<1x64xf32> to vector<5x64xf32>
    %1020 = arith.addf %1018, %1019 : vector<5x64xf32>
    %cst_1319 = arith.constant 0.000000e+00 : f32
    %1021 = vector.broadcast %cst_1319 : f32 to vector<5x64xf32>
    %1022 = arith.maximumf %1020, %1021 : vector<5x64xf32>
    %1023 = arith.maximumf %963, %1022 : vector<5x64xf32>
    %cst_1320 = arith.constant dense<0.000000e+00> : vector<2x64xf32>
    %1024 = tpu.matmul %22, %1023, %cst_1320 {dimension_numbers = #tpu.dot_dimension_numbers<[1], [0], [0], [1], [0, 0, 1, 1], [], []>} : vector<2x5xf32>, vector<5x64xf32>, vector<2x64xf32> -> vector<2x64xf32>
    %cst_1321 = arith.constant dense<0.000000e+00> : vector<2x64xf32>
    %1025 = tpu.matmul %29, %1023, %cst_1321 {dimension_numbers = #tpu.dot_dimension_numbers<[1], [0], [0], [1], [0, 0, 1, 1], [], []>} : vector<2x5xf32>, vector<5x64xf32>, vector<2x64xf32> -> vector<2x64xf32>
    %1026 = arith.maximumf %1024, %1025 : vector<2x64xf32>
    %c1_1322 = arith.constant 1 : index
    %c0_1323 = arith.constant 0 : index
    %c0_1324 = arith.constant 0 : index
    %1027 = vector.load %arg12[%c1_1322, %c0_1323, %c0_1324] : memref<2x2x64xf32, #tpu.memory_space<vmem>>, vector<1x2x64xf32>
    %1028 = vector.shape_cast %1027 : vector<1x2x64xf32> to vector<2x64xf32>
    %1029 = vector.shape_cast %1026 : vector<2x64xf32> to vector<1x2x64xf32>
    tpu.vector_store %arg12[%c1_1322, %c0_1323, %c0_1324], %1029 {strides = array<i32>} : memref<2x2x64xf32, #tpu.memory_space<vmem>>, vector<1x2x64xf32>,
    %cst_1325 = arith.constant 0.000000e+00 : f32
    %1030 = vector.broadcast %cst_1325 : f32 to vector<1x128xf32>
    %c0_1326 = arith.constant 0 : index
    %c0_1327 = arith.constant 0 : index
    %c0_1328 = arith.constant 0 : index
    %1031 = vector.load %arg12[%c0_1326, %c0_1327, %c0_1328] : memref<2x2x64xf32, #tpu.memory_space<vmem>>, vector<1x1x64xf32>
    %1032 = vector.shape_cast %1031 : vector<1x1x64xf32> to vector<1x64xf32>
    %c0_1329 = arith.constant 0 : index
    %c0_1330 = arith.constant 0 : index
    %c0_1331 = arith.constant 0 : index
    %c0_1332 = arith.constant 0 : index
    %1033 = vector.load %arg6[%c0_1329, %c0_1330, %c0_1331, %c0_1332] : memref<2x2x64x128xf32, #tpu.memory_space<vmem>>, vector<1x1x64x128xf32>
    %1034 = vector.shape_cast %1033 : vector<1x1x64x128xf32> to vector<64x128xf32>
    %cst_1333 = arith.constant dense<0.000000e+00> : vector<1x128xf32>
    %1035 = tpu.matmul %1032, %1034, %cst_1333 {dimension_numbers = #tpu.dot_dimension_numbers<[1], [0], [0], [1], [0, 0, 1, 1], [], []>} : vector<1x64xf32>, vector<64x128xf32>, vector<1x128xf32> -> vector<1x128xf32>
    %1036 = arith.addf %1030, %1035 : vector<1x128xf32>
    %c0_1334 = arith.constant 0 : index
    %c1_1335 = arith.constant 1 : index
    %c0_1336 = arith.constant 0 : index
    %1037 = vector.load %arg12[%c0_1334, %c1_1335, %c0_1336] : memref<2x2x64xf32, #tpu.memory_space<vmem>>, vector<1x1x64xf32>
    %1038 = vector.shape_cast %1037 : vector<1x1x64xf32> to vector<1x64xf32>
    %c0_1337 = arith.constant 0 : index
    %c1_1338 = arith.constant 1 : index
    %c0_1339 = arith.constant 0 : index
    %c0_1340 = arith.constant 0 : index
    %1039 = vector.load %arg6[%c0_1337, %c1_1338, %c0_1339, %c0_1340] : memref<2x2x64x128xf32, #tpu.memory_space<vmem>>, vector<1x1x64x128xf32>
    %1040 = vector.shape_cast %1039 : vector<1x1x64x128xf32> to vector<64x128xf32>
    %cst_1341 = arith.constant dense<0.000000e+00> : vector<1x128xf32>
    %1041 = tpu.matmul %1038, %1040, %cst_1341 {dimension_numbers = #tpu.dot_dimension_numbers<[1], [0], [0], [1], [0, 0, 1, 1], [], []>} : vector<1x64xf32>, vector<64x128xf32>, vector<1x128xf32> -> vector<1x128xf32>
    %1042 = arith.addf %1036, %1041 : vector<1x128xf32>
    %c1_1342 = arith.constant 1 : index
    %c0_1343 = arith.constant 0 : index
    %c0_1344 = arith.constant 0 : index
    %1043 = vector.load %arg12[%c1_1342, %c0_1343, %c0_1344] : memref<2x2x64xf32, #tpu.memory_space<vmem>>, vector<1x1x64xf32>
    %1044 = vector.shape_cast %1043 : vector<1x1x64xf32> to vector<1x64xf32>
    %c1_1345 = arith.constant 1 : index
    %c0_1346 = arith.constant 0 : index
    %c0_1347 = arith.constant 0 : index
    %c0_1348 = arith.constant 0 : index
    %1045 = vector.load %arg6[%c1_1345, %c0_1346, %c0_1347, %c0_1348] : memref<2x2x64x128xf32, #tpu.memory_space<vmem>>, vector<1x1x64x128xf32>
    %1046 = vector.shape_cast %1045 : vector<1x1x64x128xf32> to vector<64x128xf32>
    %cst_1349 = arith.constant dense<0.000000e+00> : vector<1x128xf32>
    %1047 = tpu.matmul %1044, %1046, %cst_1349 {dimension_numbers = #tpu.dot_dimension_numbers<[1], [0], [0], [1], [0, 0, 1, 1], [], []>} : vector<1x64xf32>, vector<64x128xf32>, vector<1x128xf32> -> vector<1x128xf32>
    %1048 = arith.addf %1042, %1047 : vector<1x128xf32>
    %c1_1350 = arith.constant 1 : index
    %c1_1351 = arith.constant 1 : index
    %c0_1352 = arith.constant 0 : index
    %1049 = vector.load %arg12[%c1_1350, %c1_1351, %c0_1352] : memref<2x2x64xf32, #tpu.memory_space<vmem>>, vector<1x1x64xf32>
    %1050 = vector.shape_cast %1049 : vector<1x1x64xf32> to vector<1x64xf32>
    %c1_1353 = arith.constant 1 : index
    %c1_1354 = arith.constant 1 : index
    %c0_1355 = arith.constant 0 : index
    %c0_1356 = arith.constant 0 : index
    %1051 = vector.load %arg6[%c1_1353, %c1_1354, %c0_1355, %c0_1356] : memref<2x2x64x128xf32, #tpu.memory_space<vmem>>, vector<1x1x64x128xf32>
    %1052 = vector.shape_cast %1051 : vector<1x1x64x128xf32> to vector<64x128xf32>
    %cst_1357 = arith.constant dense<0.000000e+00> : vector<1x128xf32>
    %1053 = tpu.matmul %1050, %1052, %cst_1357 {dimension_numbers = #tpu.dot_dimension_numbers<[1], [0], [0], [1], [0, 0, 1, 1], [], []>} : vector<1x64xf32>, vector<64x128xf32>, vector<1x128xf32> -> vector<1x128xf32>
    %1054 = arith.addf %1048, %1053 : vector<1x128xf32>
    %c0_1358 = arith.constant 0 : index
    %c0_1359 = arith.constant 0 : index
    %1055 = vector.load %arg7[%c0_1358, %c0_1359] : memref<1x128xf32, #tpu.memory_space<vmem>>, vector<1x128xf32>
    %1056 = arith.addf %1054, %1055 : vector<1x128xf32>
    %cst_1360 = arith.constant 0.000000e+00 : f32
    %1057 = vector.broadcast %cst_1360 : f32 to vector<1x128xf32>
    %1058 = arith.maximumf %1056, %1057 : vector<1x128xf32>
    %c0_1361 = arith.constant 0 : index
    %c0_1362 = arith.constant 0 : index
    %1059 = vector.load %arg8[%c0_1361, %c0_1362] : memref<128x10xf32, #tpu.memory_space<vmem>>, vector<128x10xf32>
    %cst_1363 = arith.constant dense<0.000000e+00> : vector<1x10xf32>
    %1060 = tpu.matmul %1058, %1059, %cst_1363 {dimension_numbers = #tpu.dot_dimension_numbers<[1], [0], [0], [1], [0, 0, 1, 1], [], []>} : vector<1x128xf32>, vector<128x10xf32>, vector<1x10xf32> -> vector<1x10xf32>
    %c0_1364 = arith.constant 0 : index
    %c0_1365 = arith.constant 0 : index
    %1061 = vector.load %arg9[%c0_1364, %c0_1365] : memref<1x10xf32, #tpu.memory_space<vmem>>, vector<1x10xf32>
    %1062 = arith.addf %1060, %1061 : vector<1x10xf32>
    %c0_1366 = arith.constant 0 : index
    %c0_1367 = arith.constant 0 : index
    %c0_1368 = arith.constant 0 : index
    %1063 = vector.load %arg10[%c0_1366, %c0_1367, %c0_1368] : memref<1x1x10xf32, #tpu.memory_space<vmem>>, vector<1x1x10xf32>
    %1064 = vector.shape_cast %1063 : vector<1x1x10xf32> to vector<1x10xf32>
    %1065 = vector.shape_cast %1062 : vector<1x10xf32> to vector<1x1x10xf32>
    tpu.vector_store %arg10[%c0_1366, %c0_1367, %c0_1368], %1065 {strides = array<i32>} : memref<1x1x10xf32, #tpu.memory_space<vmem>>, vector<1x1x10xf32>,
    return
  }
  func.func @transform_0(%arg0: i32) -> (i32, i32, i32, i32) {
    %c0_i32 = arith.constant 0 : i32
    %c0_i32_0 = arith.constant 0 : i32
    %c0_i32_1 = arith.constant 0 : i32
    %c0_i32_2 = arith.constant 0 : i32
    return %arg0, %c0_i32, %c0_i32_0, %c0_i32_1 : i32, i32, i32, i32
  }
  func.func @transform_1(%arg0: i32) -> (i32, i32, i32, i32) {
    %c0_i32 = arith.constant 0 : i32
    %c0_i32_0 = arith.constant 0 : i32
    %c0_i32_1 = arith.constant 0 : i32
    %c0_i32_2 = arith.constant 0 : i32
    %c0_i32_3 = arith.constant 0 : i32
    return %c0_i32, %c0_i32_0, %c0_i32_1, %c0_i32_2 : i32, i32, i32, i32
  }
  func.func @transform_2(%arg0: i32) -> (i32, i32) {
    %c0_i32 = arith.constant 0 : i32
    %c0_i32_0 = arith.constant 0 : i32
    %c0_i32_1 = arith.constant 0 : i32
    return %c0_i32, %c0_i32_0 : i32, i32
  }
  func.func @transform_3(%arg0: i32) -> (i32, i32, i32, i32) {
    %c0_i32 = arith.constant 0 : i32
    %c0_i32_0 = arith.constant 0 : i32
    %c0_i32_1 = arith.constant 0 : i32
    %c0_i32_2 = arith.constant 0 : i32
    %c0_i32_3 = arith.constant 0 : i32
    return %c0_i32, %c0_i32_0, %c0_i32_1, %c0_i32_2 : i32, i32, i32, i32
  }
  func.func @transform_4(%arg0: i32) -> (i32, i32) {
    %c0_i32 = arith.constant 0 : i32
    %c0_i32_0 = arith.constant 0 : i32
    %c0_i32_1 = arith.constant 0 : i32
    return %c0_i32, %c0_i32_0 : i32, i32
  }
  func.func @transform_5(%arg0: i32) -> (i32, i32, i32, i32) {
    %c0_i32 = arith.constant 0 : i32
    %c0_i32_0 = arith.constant 0 : i32
    %c0_i32_1 = arith.constant 0 : i32
    %c0_i32_2 = arith.constant 0 : i32
    %c0_i32_3 = arith.constant 0 : i32
    return %c0_i32, %c0_i32_0, %c0_i32_1, %c0_i32_2 : i32, i32, i32, i32
  }
  func.func @transform_6(%arg0: i32) -> (i32, i32) {
    %c0_i32 = arith.constant 0 : i32
    %c0_i32_0 = arith.constant 0 : i32
    %c0_i32_1 = arith.constant 0 : i32
    return %c0_i32, %c0_i32_0 : i32, i32
  }
  func.func @transform_7(%arg0: i32) -> (i32, i32) {
    %c0_i32 = arith.constant 0 : i32
    %c0_i32_0 = arith.constant 0 : i32
    %c0_i32_1 = arith.constant 0 : i32
    return %c0_i32, %c0_i32_0 : i32, i32
  }
  func.func @transform_8(%arg0: i32) -> (i32, i32) {
    %c0_i32 = arith.constant 0 : i32
    %c0_i32_0 = arith.constant 0 : i32
    %c0_i32_1 = arith.constant 0 : i32
    return %c0_i32, %c0_i32_0 : i32, i32
  }
  func.func @transform_9(%arg0: i32) -> (i32, i32, i32) {
    %c0_i32 = arith.constant 0 : i32
    %c0_i32_0 = arith.constant 0 : i32
    %c0_i32_1 = arith.constant 0 : i32
    return %arg0, %c0_i32, %c0_i32_0 : i32, i32, i32
  }
}

</mosaic_0001>

<bundles_post_ra>
// kernel: yolo_forward.1
= control target key start
LH: loop header
LB: loop body
LE: loop exit
PB: predicated region body
PF: predicated region fallthrough
CT: control target
= control target key end

     0   :  { %14 = vsyncpa [#allocation5], 0  ;;  %s18501_s0 = inlined_call_operand.vmem [shape: f32[2,16,16,3], index: 0, kind: input, shape index: {}]   ;;  %s18502_s1 = inlined_call_operand.vmem [shape: f32[3,3,3,32], index: 1, kind: input, shape index: {}]   ;;  %s18503_s2 = inlined_call_operand.vmem [shape: f32[1,32], index: 2, kind: input, shape index: {}]   ;;  %s18504_s3 = inlined_call_operand.vmem [shape: f32[3,3,32,64], index: 3, kind: input, shape index: {}]   ;;  %s18505_s4 = inlined_call_operand.vmem [shape: f32[1,64], index: 4, kind: input, shape index: {}]   ;;  %s18506_s5 = inlined_call_operand.vmem [shape: f32[2,2,64,128], index: 5, kind: input, shape index: {}]   ;;  %s18507_s6 = inlined_call_operand.vmem [shape: f32[1,128], index: 6, kind: input, shape index: {}]   ;;  %s18508_s7 = inlined_call_operand.vmem [shape: f32[128,10], index: 7, kind: input, shape index: {}]   ;;  %s18509_s8 = inlined_call_operand.vmem [shape: f32[1,10], index: 8, kind: input, shape index: {}]   ;;  %s18510_s9 = inlined_call_operand.hbm [shape: f32[2,1,10], index: 9, kind: output, shape index: {}]  }
   0x1   :  { %16 = vsyncpa [#allocation5 + $0x1], 0  ;;  %s16503_s30 = smov 0   ;;  %s16505_s10 = smov 0  }
   0x2   :  { %s16507_s11 = smov 0   ;;  %s16509_s12 = smov 0  }
   0x3 LB: > { %s16524_s13 = sadd.s32 4294967295, %s16448_s12   ;;  %s13910_s14 = sadd.s32 4294967294, %s16448_s12   ;;  %s16448_s12 = sphi %s16509_s12, %s18543_s12   ;;  %s16444_s11 = sphi %s16507_s11, %s18542_s11   ;;  %s16440_s10 = sphi %s16505_s10, %s18541_s10   ;;  %s16436_s30 = sphi %s16503_s30, %s18540_s30  }
   0x4   : > { %s16528_s15 = sadd.s32 1, %s16448_s12   ;;  %s223_s16 = sadd.s32 1, %s16444_s11 }
   0x5   : > { %s220_s17 = ssub.s32 %s16448_s12, %s16528_s15  ;;  %p233_p0 = scmp.ne.s32.totalorder %s16444_s11, %s16440_s10 }
   0x6   : > { %p221_p1 = scmp.eq.s32.totalorder %s220_s17, 0  ;;  %p234_p2 = scmp.eq.s32.totalorder %s16524_s13, 1 }
   0x7   : > { %p239_p3 = scmp.ne.s32.totalorder %s16440_s10, %s16436_s30  ;;  %p240_p4 = scmp.eq.s32.totalorder %s13910_s14, 1 }
   0x8   : > { %s16539_s18 = scalar_select %p221_p1, %s16444_s11, %s223_s16  }
   0x9   : > { %p16541_p5 = por %p234_p2, %p233_p0  ;;  %p16545_p6 = por %p240_p4, %p239_p3 }
   0xa   : > { %p13913_p7 = scmp.ge.s32.totalorder %s16448_s12, 1  ;;  %p290_p8 = scmp.lt.s32.totalorder %s16448_s12, 3 }
   0xc   : > { %p291_p9 = pnand %p13913_p7, %p290_p8 }
   0xe   : > { %294 = sbr.rel (%p291_p9) target bundleno = 2675 (0xa73), region = 56 }
  0x13   : > { %v16554_v0 = vld [vmem:[%s18502_s1 + $0x4] sm:$0x7]  ;;  %vm358_vm0 = vcmask 1042432   ;;  %v16559_v1 = vld [vmem:[%s18502_s1] sm:$0x7]  ;;  %p325_p10 = scmp.lt.s32.totalorder %s16524_s13, 1 }
  0x14   : > { %15195 = vmatprep.subr.msk.mxu0 %vm358_vm0, %v16554_v0  ;;  %15200 = vmatprep.subr.msk.mxu1 %vm358_vm0, %v16559_v1  ;;  %v16569_v2 = vld [vmem:[%s18502_s1 + $0x8] sm:$0x7]  ;;  %v16574_v3 = vld [vmem:[%s18502_s1 + $0xc] sm:$0x7]  ;;  %vm351_vm1 = vcmask 23552   ;;  %v18511_v33 = vmov 0.0  }
  0x15   : > { %15196 = vmatpush3.msk.msra.mxu0 %vm358_vm0, %v16554_v0  ;;  %s326_s29 = scalar_select %p325_p10, %s16524_s13, 1  ;;  %15201 = vmatpush3.msk.msra.mxu1 %vm358_vm0, %v16559_v1  ;;  %v13937_v10 = vld [vmem:[%s18502_s1 + $0x10] sm:$0x7]  ;;  %v16606_v11 = vld [vmem:[%s18502_s1 + $0x14] sm:$0x7]  ;;  %vm16451_vm2 = vmmov 0  }
  0x16   : > { %15205 = vmatprep.subr.msk.mxu0 %vm358_vm0, %v16569_v2  ;;  %15210 = vmatprep.subr.msk.mxu1 %vm358_vm0, %v16574_v3  ;;  %v13949_v16 = vld [vmem:[%s18502_s1 + $0x18] sm:$0x7]  ;;  %v13955_v17 = vld [vmem:[%s18502_s1 + $0x1c] sm:$0x7]  ;;  %v13961_v22 = vld [vmem:[%s18502_s1 + $0x20] sm:$0x7] }
  0x17   : > { %s14593_s14 = sshll.u32 %s326_s29, 8  ;;  %vm1887_vm3 = vcmask 1045504   ;;  %vm1883_vm6 = vcmask 113664   ;;  %vm2035_vm7 = vcmask 260096   ;;  %vm10388_vm8 = vcmask 261120   ;;  %s14590_s22 = sshll.u32 %s16524_s13, 4 }
  0x18   : > { %s16588_s21 = scalar_lea.vmem %s18501_s0, %s14593_s14  ;;  %vm11758_vm9 = vcmask 1044480   ;;  %vm11755_vm10 = vcmask 39936   ;;  %vm11905_vm11 = vcmask 517120   ;;  %vm13435_vm12 = vcmask 523264   ;;  %s323_s14 = sand.u32 1, %s16440_s10  }
  0x19   : > { %v347_v4 = vld [vmem:[%s16588_s21 + $0x1] sm:$0xff]  ;;  %v348_v6 = vld [vmem:[%s16588_s21 + $0x9] sm:$0x3f]  ;;  %v13929_v9 = vld [vmem:[%s16588_s21 + $0x10] sm:$0xff]  ;;  %s324_s23 = scalar_lea.vmem [#allocation4], %s323_s14  ;;  %vm13840_vm13 = vcmask 73728  }
  0x1a   : > { %v344_v5 = vld [vmem:[%s16588_s21] sm:$0xff]  ;;  %15197 = vmatprep.mubr.msk.f32.mxu0 %vm351_vm1, %v347_v4  ;;  %v345_v7 = vld [vmem:[%s16588_s21 + $0x8] sm:$0x3f]  ;;  %v13930_v13 = vld [vmem:[%s16588_s21 + $0x18] sm:$0x3f]  ;;  %s13855_s24 = sshll.u32 %s324_s23, 4  ;;  %s13856_s24 = int_to_ptr.vmem [resolvable:$true] %s13855_s24 }
  0x1b   : > { %15202 = vmatprep.mubr.msk.f32.mxu1 %vm351_vm1, %v344_v5  ;;  %v521_v8 = vld [vmem:[%s16588_s21 + $0x2] sm:$0xff]  ;;  %15198 = vmatmul.mubr.msk.f32.vlgmr.msra.gmra.mxu0 %vm351_vm1, %v348_v6  ;;  %v522_v12 = vld [vmem:[%s16588_s21 + $0xa] sm:$0x3f]  ;;  %v13935_v14 = vld [vmem:[%s16588_s21 + $0x11] sm:$0xff]  ;;  %s13843_s27 = scalar_lea.sflag [#allocation5], %s323_s14  ;;  %s16388_s28 = scalar_lea.vmem %s13856_s24, 16 }
  0x1c   : > { %15203 = vmatmul.mubr.msk.f32.vlgmr.msra.gmra.mxu1 %vm351_vm1, %v345_v7  ;;  %15206 = vmatpush3.msk.msra.mxu0 %vm358_vm0, %v16569_v2  ;;  %v13941_v15 = vld [vmem:[%s16588_s21 + $0x12] sm:$0xff]  ;;  %v13942_v19 = vld [vmem:[%s16588_s21 + $0x1a] sm:$0x3f]  ;;  %v16637_v20 = vld [vmem:[%s16588_s21 + $0x20] sm:$0xff]  ;;  %p16389_p11 = scmp.ne.s32.totalorder %s13856_s24, %s16388_s28  ;;  %s16452_s13 = smov [#allocation4]  }
  0x1d   : > { %15207 = vmatprep.mubr.msk.f32.mxu0 %vm351_vm1, %v521_v8  ;;  %15211 = vmatpush3.msk.msra.mxu1 %vm358_vm0, %v16574_v3  ;;  %v13936_v18 = vld [vmem:[%s16588_s21 + $0x19] sm:$0x3f]  ;;  %v16642_v21 = vld [vmem:[%s16588_s21 + $0x21] sm:$0xff]  ;;  %v13954_v24 = vld [vmem:[%s16588_s21 + $0x29] sm:$0x3f]  ;;  %s16392_s29 = sshll.u32 %s16452_s13, 4  ;;  %s16393_s29 = int_to_ptr.vmem [resolvable:$false] %s16392_s29 }
  0x1e   : > { %15212 = vmatprep.mubr.msk.f32.mxu1 %vm351_vm1, %v13929_v9  ;;  %15215 = vmatprep.subr.msk.mxu0 %vm358_vm0, %v13937_v10  ;;  %v13948_v23 = vld [vmem:[%s16588_s21 + $0x28] sm:$0x3f]  ;;  %v16700_v27 = vld [vmem:[%s16588_s21 + $0x30] sm:$0xff]  ;;  %v13985_v28 = vld [vmem:[%s16588_s21 + $0x38] sm:$0x3f]  ;;  %p16390_p12 = pnand %p16389_p11, %p16541_p5  ;;  %s16394_s16 = scalar_lea.vmem %s16393_s29, 32 }
  0x1f   : > { %15220 = vmatprep.subr.msk.mxu1 %vm358_vm0, %v16606_v11  ;;  %15208 = vmatmul.mubr.msk.f32.vlgmr.msra.gmra.mxu0 %vm351_vm1, %v522_v12  ;;  %v16658_v25 = vld [vmem:[%s16588_s21 + $0x22] sm:$0xff]  ;;  %v13960_v26 = vld [vmem:[%s16588_s21 + $0x2a] sm:$0x3f]  ;;  %v16713_v29 = vld [vmem:[%s16588_s21 + $0x31] sm:$0xff]  ;;  %p16395_p0 = scmp.lt.s32.totalorder %s13856_s24, %s16393_s29  ;;  %p16396_p1 = scmp.lt.s32.totalorder %s16394_s16, %s16388_s28 }
  0x20   : > { %15213 = vmatmul.mubr.msk.f32.vlgmr.msra.gmra.mxu1 %vm351_vm1, %v13930_v13  ;;  %15216 = vmatpush3.msk.msra.mxu0 %vm358_vm0, %v13937_v10  ;;  %v16718_v30 = vld [vmem:[%s16588_s21 + $0x32] sm:$0xff]  ;;  %v13995_v32 = vld [vmem:[%s16588_s21 + $0x3a] sm:$0x3f]  ;;  %p16391_p13 = pneg %p16390_p12 }
  0x21   : > { %15217 = vmatprep.mubr.msk.f32.mxu0 %vm351_vm1, %v13935_v14  ;;  %15221 = vmatpush3.msk.msra.mxu1 %vm358_vm0, %v16606_v11  ;;  %v13990_v31 = vld [vmem:[%s16588_s21 + $0x39] sm:$0x3f]  ;;  %p16397_p2 = por %p16396_p1, %p16395_p0 }
  0x22   : > { %15222 = vmatprep.mubr.msk.f32.mxu1 %vm351_vm1, %v13941_v15  ;;  %15225 = vmatprep.subr.msk.mxu0 %vm358_vm0, %v13949_v16 }
  0x23   : > { %15230 = vmatprep.subr.msk.mxu1 %vm358_vm0, %v13955_v17  ;;  %15218 = vmatmul.mubr.msk.f32.vlgmr.msra.gmra.mxu0 %vm351_vm1, %v13936_v18  ;;  %p16398_p3 = pnand %p16397_p2, %p16391_p13 }
  0x24   : > { %15223 = vmatmul.mubr.msk.f32.vlgmr.msra.gmra.mxu1 %vm351_vm1, %v13942_v19  ;;  %15226 = vmatpush3.msk.msra.mxu0 %vm358_vm0, %v13949_v16 }
  0x25   : > { %15227 = vmatprep.mubr.msk.f32.mxu0 %vm351_vm1, %v16637_v20  ;;  %15231 = vmatpush3.msk.msra.mxu1 %vm358_vm0, %v13955_v17 }
  0x26   : > { %15232 = vmatprep.mubr.msk.f32.mxu1 %vm351_vm1, %v16642_v21  ;;  %15235 = vmatprep.subr.msk.mxu0 %vm358_vm0, %v13961_v22 }
  0x27   : > { %15240 = vmatprep.subr.msk.mxu1 %vm358_vm0, %v16554_v0  ;;  %15228 = vmatmul.mubr.msk.f32.vlgmr.msra.gmra.mxu0 %vm351_vm1, %v13948_v23 }
  0x28   : > { %15233 = vmatmul.mubr.msk.f32.vlgmr.msra.gmra.mxu1 %vm351_vm1, %v13954_v24  ;;  %15236 = vmatpush3.msk.msra.mxu0 %vm358_vm0, %v13961_v22 }
  0x29   : > { %15237 = vmatprep.mubr.msk.f32.mxu0 %vm351_vm1, %v16658_v25  ;;  %15241 = vmatpush3.msk.msra.mxu1 %vm358_vm0, %v16554_v0 }
  0x2a   : > { %15242 = vmatprep.mubr.msk.f32.mxu1 %vm351_vm1, %v13935_v14  ;;  %15245 = vmatprep.subr.msk.mxu0 %vm358_vm0, %v16559_v1 }
  0x2b   : > { %15250 = vmatprep.subr.msk.mxu1 %vm358_vm0, %v16569_v2  ;;  %15238 = vmatmul.mubr.msk.f32.vlgmr.msra.gmra.mxu0 %vm351_vm1, %v13960_v26 }
  0x2c   : > { %15243 = vmatmul.mubr.msk.f32.vlgmr.msra.gmra.mxu1 %vm351_vm1, %v13936_v18  ;;  %15246 = vmatpush3.msk.msra.mxu0 %vm358_vm0, %v16559_v1 }
  0x2d   : > { %15247 = vmatprep.mubr.msk.f32.mxu0 %vm351_vm1, %v13929_v9  ;;  %15251 = vmatpush3.msk.msra.mxu1 %vm358_vm0, %v16569_v2 }
  0x2e   : > { %15252 = vmatprep.mubr.msk.f32.mxu1 %vm351_vm1, %v13941_v15  ;;  %15255 = vmatprep.subr.msk.mxu0 %vm358_vm0, %v16574_v3 }
  0x2f   : > { %15260 = vmatprep.subr.msk.mxu1 %vm358_vm0, %v13937_v10  ;;  %15248 = vmatmul.mubr.msk.f32.vlgmr.msra.gmra.mxu0 %vm351_vm1, %v13930_v13 }
  0x30   : > { %15253 = vmatmul.mubr.msk.f32.vlgmr.msra.gmra.mxu1 %vm351_vm1, %v13942_v19  ;;  %15256 = vmatpush3.msk.msra.mxu0 %vm358_vm0, %v16574_v3 }
  0x31   : > { %15257 = vmatprep.mubr.msk.f32.mxu0 %vm351_vm1, %v16637_v20  ;;  %15261 = vmatpush3.msk.msra.mxu1 %vm358_vm0, %v13937_v10  ;;  %v332_v10 = vlaneseq }
  0x32   : > { %15262 = vmatprep.mubr.msk.f32.mxu1 %vm351_vm1, %v16642_v21  ;;  %15265 = vmatprep.subr.msk.mxu0 %vm358_vm0, %v16606_v11 }
  0x33   : > { %15270 = vmatprep.subr.msk.mxu1 %vm358_vm0, %v13949_v16  ;;  %15258 = vmatmul.mubr.msk.f32.vlgmr.msra.gmra.mxu0 %vm351_vm1, %v13948_v23  ;;  %v333_v23 = vshrl.u32 %v332_v10, 7 }
  0x34   : > { %15263 = vmatmul.mubr.msk.f32.vlgmr.msra.gmra.mxu1 %vm351_vm1, %v13954_v24  ;;  %15266 = vmatpush3.msk.msra.mxu0 %vm358_vm0, %v16606_v11 }
  0x35   : > { %15267 = vmatprep.mubr.msk.f32.mxu0 %vm351_vm1, %v16658_v25  ;;  %15271 = vmatpush3.msk.msra.mxu1 %vm358_vm0, %v13949_v16 }
  0x36   : > { %15272 = vmatprep.mubr.msk.f32.mxu1 %vm351_vm1, %v16700_v27  ;;  %15275 = vmatprep.subr.msk.mxu0 %vm358_vm0, %v13955_v17 }
  0x37   : > { %15280 = vmatprep.subr.msk.mxu1 %vm358_vm0, %v13961_v22  ;;  %15268 = vmatmul.mubr.msk.f32.vlgmr.msra.gmra.mxu0 %vm351_vm1, %v13960_v26 }
  0x38   : > { %15273 = vmatmul.mubr.msk.f32.vlgmr.msra.gmra.mxu1 %vm351_vm1, %v13985_v28  ;;  %15276 = vmatpush3.msk.msra.mxu0 %vm358_vm0, %v13955_v17 }
  0x39   : > { %15277 = vmatprep.mubr.msk.f32.mxu0 %vm351_vm1, %v16713_v29  ;;  %15281 = vmatpush3.msk.msra.mxu1 %vm358_vm0, %v13961_v22 }
  0x3a   : > { %15282 = vmatprep.mubr.msk.f32.mxu1 %vm351_vm1, %v16718_v30  ;;  %15285 = vmatprep.subr.mxu0 %v18511_v33 }
  0x3b   : > { %15278 = vmatmul.mubr.msk.f32.vlgmr.msra.gmra.mxu0 %vm351_vm1, %v13990_v31  ;;  %15292 = vmatprep.subr.mxu1 %v18511_v33 }
  0x3c   : > { %15283 = vmatmul.mubr.msk.f32.vlgmr.msra.gmra.mxu1 %vm351_vm1, %v13995_v32  ;;  %15289 = vmatprep.mubr.msk.f32.mxu0 %vm16451_vm2, %v18511_v33 }
  0x3d   : > { %15296 = vmatprep.mubr.msk.f32.mxu1 %vm16451_vm2, %v18511_v33 }
  0xdb   : > { %v15199_v34 = vpop.f32.mrf.mxu0 }
  0xdc   : > { %v15204_v35 = vpop.f32.mrf.mxu1 }
  0xdd   : > { %v428_v36 = vpop.f32.mrf.mxu0  ;;  %v518_v40 = vadd.f32 %v15204_v35, %v15199_v34 }
  0xde   : > { %v512_v37 = vpop.f32.mrf.mxu1 }
  0xdf   : > { %v15209_v38 = vpop.f32.mrf.mxu0  ;;  %v513_v43 = vadd.f32 %v512_v37, %v428_v36  ;;  %v16741_v37 = vld [vmem:[%s18503_s2] ss:$0 sm:$0xff] }
  0xe0   : > { %v15214_v39 = vpop.f32.mrf.mxu1  ;;  %v610_v44 = vadd.f32 %v15209_v38, %v518_v40  ;;  %v336_v40 = vmul.u32 2, %v333_v23 }
  0xe1   : > { %v600_v41 = vpop.f32.mrf.mxu0 }
  0xe2   : > { %v691_v42 = vpop.f32.mrf.mxu1  ;;  %v609_v47 = vadd.f32 %v600_v41, %v513_v43  ;;  %v701_v50 = vadd.f32 %v15214_v39, %v610_v44 }
  0xe3   : > { %v15219_v45 = vpop.f32.mrf.mxu0 }
  0xe4   : > { %v15224_v46 = vpop.f32.mrf.mxu1  ;;  %v700_v53 = vadd.f32 %v691_v42, %v609_v47  ;;  %v791_v56 = vadd.f32 %v15219_v45, %v701_v50  ;;  %v340_v50 = vadd.s32 1, %v336_v40 }
  0xe5   : > { %v781_v48 = vpop.f32.mrf.mxu0 }
  0xe6   : > { %v871_v49 = vpop.f32.mrf.mxu1  ;;  %v790_v59 = vadd.f32 %v781_v48, %v700_v53  ;;  %v881_v62 = vadd.f32 %v15224_v46, %v791_v56 }
  0xe7   : > { %v15229_v51 = vpop.f32.mrf.mxu0 }
  0xe8   : > { %v15234_v52 = vpop.f32.mrf.mxu1  ;;  %v880_v1 = vadd.f32 %v871_v49, %v790_v59  ;;  %v972_v5 = vadd.f32 %v15229_v51, %v881_v62  ;;  %v335_v49 = vand.u32 127, %v332_v10  ;;  %v16824_v10 = vld [vmem:[%s16588_s21 + $0x40] sm:$0xff] }
  0xe9   : > { %v962_v54 = vpop.f32.mrf.mxu0 }
  0xea   : > { %v1052_v55 = vpop.f32.mrf.mxu1  ;;  %v971_v11 = vadd.f32 %v962_v54, %v880_v1  ;;  %v1062_v16 = vadd.f32 %v15234_v52, %v972_v5  ;;  %vm337_vm4 = vcmp.eq.s32.totalorder %v335_v49, %v336_v40  ;;  %vm341_vm5 = vcmp.eq.s32.totalorder %v335_v49, %v340_v50  ;;  %v14006_v1 = vld [vmem:[%s16588_s21 + $0x29] sm:$0x3f]  ;;  %v14021_v5 = vld [vmem:[%s16588_s21 + $0x38] sm:$0x3f] }
  0xeb   : > { %v15239_v57 = vpop.f32.mrf.mxu0  ;;  %v16753_v62 = vsel %vm341_vm5, 1.0, %v18511_v33 }
  0xec   : > { %v15244_v58 = vpop.f32.mrf.mxu1  ;;  %v1061_v24 = vadd.f32 %v1052_v55, %v971_v11  ;;  %v1152_v34 = vadd.f32 %v15239_v57, %v1062_v16  ;;  %v16829_v11 = vld [vmem:[%s16588_s21 + $0x41] sm:$0xff]  ;;  %v14051_v16 = vld [vmem:[%s16588_s21 + $0x4a] sm:$0x3f] }
  0xed   : > { %v1142_v60 = vpop.f32.mrf.mxu0 }
  0xee   : > { %v1229_v61 = vpop.f32.mrf.mxu1  ;;  %v1151_v41 = vadd.f32 %v1142_v60, %v1061_v24  ;;  %v1160_v45 = vadd.f32 %v16741_v37, %v1152_v34 }
  0xef   : > { %v15249_v63 = vpop.f32.mrf.mxu0 }
  0xf0   : > { %v15254_v0 = vpop.f32.mrf.mxu1  ;;  %v1310_v2 = vadd.f32 %v15249_v63, %v15244_v58  ;;  %v1159_v51 = vadd.f32 %v16741_v37, %v1151_v41  ;;  %v1162_v54 = vmax.f32 %v1160_v45, 0.0  ;;  %v14007_v63 = vld [vmem:[%s18502_s1 + $0x4] sm:$0x7] }
  0xf1   : > { %v1304_v3 = vpop.f32.mrf.mxu0 }
  0xf2   : > { %v1379_v4 = vpop.f32.mrf.mxu1  ;;  %v1389_v6 = vadd.f32 %v15254_v0, %v1310_v2  ;;  %v1305_v7 = vadd.f32 %v1304_v3, %v1229_v61  ;;  %v1161_v57 = vmax.f32 %v1159_v51, 0.0  ;;  %v16750_v61 = vsel %vm337_vm4, 1.0, %v18511_v33  ;;  %v16763_v0 = vld [vmem:[%s18502_s1] sm:$0x7]  ;;  %v14004_v2 = vld [vmem:[%s16588_s21 + $0x28] sm:$0x3f] }
  0xf3   : > { %v15259_v8 = vpop.f32.mrf.mxu0  ;;  %v14016_v3 = vld [vmem:[%s18502_s1 + $0x8] sm:$0x7] }
  0xf4   : > { %v15264_v9 = vpop.f32.mrf.mxu1  ;;  %v1388_v12 = vadd.f32 %v1379_v4, %v1305_v7  ;;  %v1466_v13 = vadd.f32 %v15259_v8, %v1389_v6  ;;  %v14022_v4 = vld [vmem:[%s18502_s1 + $0xc] sm:$0x7]  ;;  %v14034_v6 = vld [vmem:[%s18502_s1 + $0x14] sm:$0x7]  ;;  %v14033_v7 = vld [vmem:[%s16588_s21 + $0x3a] sm:$0x3f] }
  0xf5   : > { %v1456_v14 = vpop.f32.mrf.mxu0  ;;  %v14040_v8 = vld [vmem:[%s18502_s1 + $0x18] sm:$0x7] }
  0xf6   : > { %v1533_v15 = vpop.f32.mrf.mxu1  ;;  %v1543_v17 = vadd.f32 %v15264_v9, %v1466_v13  ;;  %v1465_v18 = vadd.f32 %v1456_v14, %v1388_v12  ;;  %v14046_v9 = vld [vmem:[%s18502_s1 + $0x1c] sm:$0x7]  ;;  %v14039_v12 = vld [vmem:[%s16588_s21 + $0x48] sm:$0x3f]  ;;  %v14052_v14 = vld [vmem:[%s18502_s1 + $0x20] sm:$0x7] }
  0xf7   : > { %v15269_v19 = vpop.f32.mrf.mxu0  ;;  %v14045_v13 = vld [vmem:[%s16588_s21 + $0x49] sm:$0x3f] }
  0xf8   : > { %v15274_v22 = vpop.f32.mrf.mxu1  ;;  %v1542_v26 = vadd.f32 %v1533_v15, %v1465_v18  ;;  %v1620_v28 = vadd.f32 %v15269_v19, %v1543_v17  ;;  %v16845_v15 = vld [vmem:[%s16588_s21 + $0x42] sm:$0xff]  ;;  %v16900_v17 = vld [vmem:[%s16588_s21 + $0x52] sm:$0xff]  ;;  %v14085_v19 = vld [vmem:[%s16588_s21 + $0x5a] sm:$0x3f] }
  0xf9   : > { %v1610_v31 = vpop.f32.mrf.mxu0  ;;  %v14080_v18 = vld [vmem:[%s16588_s21 + $0x59] sm:$0x3f] }
  0xfa   : > { %v1696_v32 = vpop.f32.mrf.mxu1  ;;  %v1706_v35 = vadd.f32 %v15274_v22, %v1620_v28  ;;  %v1619_v36 = vadd.f32 %v1610_v31, %v1542_v26 }
  0xfb   : > { %v15279_v38 = vpop.f32.mrf.mxu0 }
  0xfc   : > { %v15284_v39 = vpop.f32.mrf.mxu1  ;;  %v1705_v42 = vadd.f32 %v1696_v32, %v1619_v36  ;;  %v1791_v43 = vadd.f32 %v15279_v38, %v1706_v35 }
  0xfd   : > { %v1781_v44 = vpop.f32.mrf.mxu0 }
  0xfe   : > { %v1876_v46 = vadd.f32 %v15284_v39, %v1791_v43  ;;  %v1790_v47 = vadd.f32 %v1781_v44, %v1705_v42  ;;  %v1866_v48 = vpop.f32.mrf.mxu1 }
 0x100   : > { %v1878_v52 = vadd.f32 %v16741_v37, %v1876_v46  ;;  %v1875_v53 = vadd.f32 %v1866_v48, %v1790_v47 }
 0x102   : > { %v1880_v55 = vmax.f32 %v1878_v52, 0.0  ;;  %v1877_v56 = vadd.f32 %v16741_v37, %v1875_v53 }
 0x104   : > { %v1882_v58 = vmax.f32 %v1162_v54, %v1880_v55  ;;  %v1879_v59 = vmax.f32 %v1877_v56, 0.0 }
 0x106   : > { %v1881_v60 = vmax.f32 %v1161_v57, %v1879_v59  ;;  %15286 = vmatpush3.msk.msra.mxu0 %vm1887_vm3, %v1882_v58  ;;  %15293 = vmatpush3.msk.msra.mxu1 %vm1887_vm3, %v1882_v58 }
 0x107   : > { %15287 = vmatprep.subr.mxu0 %v18511_v33  ;;  %15294 = vmatprep.subr.mxu1 %v18511_v33 }
 0x108   : > { %15288 = vmatpush3.msra.mxu0 %v1881_v60  ;;  %15295 = vmatpush3.msra.mxu1 %v1881_v60 }
 0x109   : > { %15290 = vmatmul.mubr.msk.f32.vlgmr.msra.gmra.mxu0 %vm1883_vm6, %v16750_v61  ;;  %15297 = vmatmul.mubr.msk.f32.vlgmr.msra.gmra.mxu1 %vm1883_vm6, %v16753_v62 }
 0x10a   : > { %15299 = vmatprep.subr.msk.mxu0 %vm358_vm0, %v14007_v63  ;;  %15304 = vmatprep.subr.msk.mxu1 %vm358_vm0, %v16763_v0 }
 0x10b   : > { %15300 = vmatpush3.msk.msra.mxu0 %vm358_vm0, %v14007_v63  ;;  %15301 = vmatprep.mubr.msk.f32.mxu0 %vm351_vm1, %v16642_v21  ;;  %v14015_v21 = vld [vmem:[%s16588_s21 + $0x2a] sm:$0x3f] }
 0x10c   : > { %15305 = vmatpush3.msk.msra.mxu1 %vm358_vm0, %v16763_v0  ;;  %15306 = vmatprep.mubr.msk.f32.mxu1 %vm351_vm1, %v16637_v20  ;;  %v14028_v20 = vld [vmem:[%s18502_s1 + $0x10] sm:$0x7] }
 0x10d   : > { %15302 = vmatmul.mubr.msk.f32.vlgmr.msra.gmra.mxu0 %vm351_vm1, %v14006_v1  ;;  %15307 = vmatmul.mubr.msk.f32.vlgmr.msra.gmra.mxu1 %vm351_vm1, %v14004_v2 }
 0x10e   : > { %15309 = vmatprep.subr.msk.mxu0 %vm358_vm0, %v14016_v3  ;;  %15314 = vmatprep.subr.msk.mxu1 %vm358_vm0, %v14022_v4 }
 0x10f   : > { %15310 = vmatpush3.msk.msra.mxu0 %vm358_vm0, %v14016_v3  ;;  %15311 = vmatprep.mubr.msk.f32.mxu0 %vm351_vm1, %v16658_v25  ;;  %v14027_v25 = vld [vmem:[%s16588_s21 + $0x39] sm:$0x3f] }
 0x110   : > { %15315 = vmatpush3.msk.msra.mxu1 %vm358_vm0, %v14022_v4  ;;  %15316 = vmatprep.mubr.msk.f32.mxu1 %vm351_vm1, %v16700_v27 }
 0x111   : > { %15312 = vmatmul.mubr.msk.f32.vlgmr.msra.gmra.mxu0 %vm351_vm1, %v14015_v21  ;;  %15317 = vmatmul.mubr.msk.f32.vlgmr.msra.gmra.mxu1 %vm351_vm1, %v14021_v5 }
 0x112   : > { %15319 = vmatprep.subr.msk.mxu0 %vm358_vm0, %v14028_v20  ;;  %15324 = vmatprep.subr.msk.mxu1 %vm358_vm0, %v14034_v6 }
 0x113   : > { %15320 = vmatpush3.msk.msra.mxu0 %vm358_vm0, %v14028_v20  ;;  %15321 = vmatprep.mubr.msk.f32.mxu0 %vm351_vm1, %v16713_v29 }
 0x114   : > { %15325 = vmatpush3.msk.msra.mxu1 %vm358_vm0, %v14034_v6  ;;  %15326 = vmatprep.mubr.msk.f32.mxu1 %vm351_vm1, %v16718_v30 }
 0x115   : > { %15322 = vmatmul.mubr.msk.f32.vlgmr.msra.gmra.mxu0 %vm351_vm1, %v14027_v25  ;;  %15327 = vmatmul.mubr.msk.f32.vlgmr.msra.gmra.mxu1 %vm351_vm1, %v14033_v7 }
 0x116   : > { %15329 = vmatprep.subr.msk.mxu0 %vm358_vm0, %v14040_v8  ;;  %15334 = vmatprep.subr.msk.mxu1 %vm358_vm0, %v14046_v9 }
 0x117   : > { %15330 = vmatpush3.msk.msra.mxu0 %vm358_vm0, %v14040_v8  ;;  %15331 = vmatprep.mubr.msk.f32.mxu0 %vm351_vm1, %v16824_v10 }
 0x118   : > { %15335 = vmatpush3.msk.msra.mxu1 %vm358_vm0, %v14046_v9  ;;  %15336 = vmatprep.mubr.msk.f32.mxu1 %vm351_vm1, %v16829_v11 }
 0x119   : > { %15332 = vmatmul.mubr.msk.f32.vlgmr.msra.gmra.mxu0 %vm351_vm1, %v14039_v12  ;;  %15337 = vmatmul.mubr.msk.f32.vlgmr.msra.gmra.mxu1 %vm351_vm1, %v14045_v13 }
 0x11a   : > { %15339 = vmatprep.subr.msk.mxu0 %vm358_vm0, %v14052_v14  ;;  %15344 = vmatprep.subr.msk.mxu1 %vm358_vm0, %v14007_v63 }
 0x11b   : > { %15340 = vmatpush3.msk.msra.mxu0 %vm358_vm0, %v14052_v14  ;;  %15341 = vmatprep.mubr.msk.f32.mxu0 %vm351_vm1, %v16845_v15 }
 0x11c   : > { %15345 = vmatpush3.msk.msra.mxu1 %vm358_vm0, %v14007_v63  ;;  %15346 = vmatprep.mubr.msk.f32.mxu1 %vm351_vm1, %v16713_v29  ;;  %v14075_v29 = vld [vmem:[%s16588_s21 + $0x58] sm:$0x3f] }
 0x11d   : > { %15342 = vmatmul.mubr.msk.f32.vlgmr.msra.gmra.mxu0 %vm351_vm1, %v14051_v16  ;;  %15347 = vmatmul.mubr.msk.f32.vlgmr.msra.gmra.mxu1 %vm351_vm1, %v14027_v25 }
 0x11e   : > { %15349 = vmatprep.subr.msk.mxu0 %vm358_vm0, %v16763_v0  ;;  %15354 = vmatprep.subr.msk.mxu1 %vm358_vm0, %v14016_v3 }
 0x11f   : > { %15350 = vmatpush3.msk.msra.mxu0 %vm358_vm0, %v16763_v0  ;;  %15351 = vmatprep.mubr.msk.f32.mxu0 %vm351_vm1, %v16700_v27  ;;  %v16883_v27 = vld [vmem:[%s16588_s21 + $0x50] sm:$0xff] }
 0x120   : > { %15355 = vmatpush3.msk.msra.mxu1 %vm358_vm0, %v14016_v3  ;;  %15356 = vmatprep.mubr.msk.f32.mxu1 %vm351_vm1, %v16718_v30  ;;  %v16895_v30 = vld [vmem:[%s16588_s21 + $0x51] sm:$0xff] }
 0x121   : > { %15352 = vmatmul.mubr.msk.f32.vlgmr.msra.gmra.mxu0 %vm351_vm1, %v14021_v5  ;;  %15357 = vmatmul.mubr.msk.f32.vlgmr.msra.gmra.mxu1 %vm351_vm1, %v14033_v7 }
 0x122   : > { %15359 = vmatprep.subr.msk.mxu0 %vm358_vm0, %v14022_v4  ;;  %15364 = vmatprep.subr.msk.mxu1 %vm358_vm0, %v14028_v20 }
 0x123   : > { %15360 = vmatpush3.msk.msra.mxu0 %vm358_vm0, %v14022_v4  ;;  %15361 = vmatprep.mubr.msk.f32.mxu0 %vm351_vm1, %v16824_v10 }
 0x124   : > { %15365 = vmatpush3.msk.msra.mxu1 %vm358_vm0, %v14028_v20  ;;  %15366 = vmatprep.mubr.msk.f32.mxu1 %vm351_vm1, %v16829_v11 }
 0x125   : > { %15362 = vmatmul.mubr.msk.f32.vlgmr.msra.gmra.mxu0 %vm351_vm1, %v14039_v12  ;;  %15367 = vmatmul.mubr.msk.f32.vlgmr.msra.gmra.mxu1 %vm351_vm1, %v14045_v13 }
 0x126   : > { %15369 = vmatprep.subr.msk.mxu0 %vm358_vm0, %v14034_v6  ;;  %15374 = vmatprep.subr.msk.mxu1 %vm358_vm0, %v14040_v8 }
 0x127   : > { %15370 = vmatpush3.msk.msra.mxu0 %vm358_vm0, %v14034_v6  ;;  %15371 = vmatprep.mubr.msk.f32.mxu0 %vm351_vm1, %v16845_v15 }
 0x128   : > { %15375 = vmatpush3.msk.msra.mxu1 %vm358_vm0, %v14040_v8  ;;  %15376 = vmatprep.mubr.msk.f32.mxu1 %vm351_vm1, %v16883_v27 }
 0x129   : > { %15372 = vmatmul.mubr.msk.f32.vlgmr.msra.gmra.mxu0 %vm351_vm1, %v14051_v16  ;;  %15377 = vmatmul.mubr.msk.f32.vlgmr.msra.gmra.mxu1 %vm351_vm1, %v14075_v29 }
 0x12a   : > { %15379 = vmatprep.subr.msk.mxu0 %vm358_vm0, %v14046_v9  ;;  %15384 = vmatprep.subr.msk.mxu1 %vm358_vm0, %v14052_v14 }
 0x12b   : > { %15380 = vmatpush3.msk.msra.mxu0 %vm358_vm0, %v14046_v9  ;;  %15381 = vmatprep.mubr.msk.f32.mxu0 %vm351_vm1, %v16895_v30 }
 0x12c   : > { %15385 = vmatpush3.msk.msra.mxu1 %vm358_vm0, %v14052_v14  ;;  %15386 = vmatprep.mubr.msk.f32.mxu1 %vm351_vm1, %v16900_v17 }
 0x12d   : > { %15382 = vmatmul.mubr.msk.f32.vlgmr.msra.gmra.mxu0 %vm351_vm1, %v14080_v18  ;;  %15387 = vmatmul.mubr.msk.f32.vlgmr.msra.gmra.mxu1 %vm351_vm1, %v14085_v19 }
 0x12e   : > { %15389 = vmatprep.subr.mxu0 %v18511_v33  ;;  %15396 = vmatprep.subr.mxu1 %v18511_v33 }
 0x12f   : > { %15393 = vmatprep.mubr.msk.f32.mxu0 %vm16451_vm2, %v18511_v33  ;;  %15400 = vmatprep.mubr.msk.f32.mxu1 %vm16451_vm2, %v18511_v33 }
 0x1c9   : > { %v1957_v22 = vpop.f32.mrf.mxu0  ;;  %v2030_v23 = vpop.f32.mrf.mxu1 }
 0x1ca   : > { %v2034_v24 = vmax.f32 %v1957_v22, %v2030_v23 }
 0x1cb   : > { %v15291_v26 = vpop.f32.mrf.mxu0  ;;  %v15298_v28 = vpop.f32.mrf.mxu1 }
 0x1cc   : > { %2036 = vst.msk [vmem:[#allocation2] sm:$0x7f] %vm2035_vm7, %v2034_v24 }
 0x1cd   : > { %v15303_v31 = vpop.f32.mrf.mxu0  ;;  %v15308_v32 = vpop.f32.mrf.mxu1 }
 0x1ce   : > { %v2208_v39 = vadd.f32 %v15308_v32, %v15303_v31 }
 0x1cf   : > { %v2118_v34 = vpop.f32.mrf.mxu0  ;;  %v2202_v35 = vpop.f32.mrf.mxu1 }
 0x1d0   : > { %v2203_v42 = vadd.f32 %v2202_v35, %v2118_v34 }
 0x1d1   : > { %v15313_v36 = vpop.f32.mrf.mxu0  ;;  %v15318_v38 = vpop.f32.mrf.mxu1 }
 0x1d2   : > { %v2299_v43 = vadd.f32 %v15313_v36, %v2208_v39 }
 0x1d3   : > { %v2289_v40 = vpop.f32.mrf.mxu0  ;;  %v2378_v41 = vpop.f32.mrf.mxu1 }
 0x1d4   : > { %v2298_v46 = vadd.f32 %v2289_v40, %v2203_v42  ;;  %v2388_v49 = vadd.f32 %v15318_v38, %v2299_v43 }
 0x1d5   : > { %v15323_v44 = vpop.f32.mrf.mxu0  ;;  %v15328_v45 = vpop.f32.mrf.mxu1 }
 0x1d6   : > { %v2387_v52 = vadd.f32 %v2378_v41, %v2298_v46  ;;  %v2477_v55 = vadd.f32 %v15323_v44, %v2388_v49 }
 0x1d7   : > { %v2467_v47 = vpop.f32.mrf.mxu0  ;;  %v2556_v48 = vpop.f32.mrf.mxu1 }
 0x1d8   : > { %v2476_v58 = vadd.f32 %v2467_v47, %v2387_v52  ;;  %v2566_v63 = vadd.f32 %v15328_v45, %v2477_v55 }
 0x1d9   : > { %v15333_v50 = vpop.f32.mrf.mxu0  ;;  %v15338_v51 = vpop.f32.mrf.mxu1 }
 0x1da   : > { %v2565_v2 = vadd.f32 %v2556_v48, %v2476_v58  ;;  %v2656_v5 = vadd.f32 %v15333_v50, %v2566_v63  ;;  %v16935_v58 = vld [vmem:[%s18502_s1] sm:$0x7]  ;;  %v14106_v63 = vld [vmem:[%s18502_s1 + $0x8] sm:$0x7] }
 0x1db   : > { %v2646_v53 = vpop.f32.mrf.mxu0  ;;  %v2735_v54 = vpop.f32.mrf.mxu1 }
 0x1dc   : > { %v2655_v8 = vadd.f32 %v2646_v53, %v2565_v2  ;;  %v2745_v16 = vadd.f32 %v15338_v51, %v2656_v5  ;;  %v14124_v2 = vld [vmem:[%s18502_s1 + $0x14] sm:$0x7]  ;;  %v16996_v5 = vld [vmem:[%s16588_s21 + $0x60] sm:$0xff] }
 0x1dd   : > { %v15343_v56 = vpop.f32.mrf.mxu0  ;;  %v15348_v57 = vpop.f32.mrf.mxu1 }
 0x1de   : > { %v2744_v23 = vadd.f32 %v2735_v54, %v2655_v8  ;;  %v2834_v32 = vadd.f32 %v15343_v56, %v2745_v16  ;;  %v17017_v8 = vld [vmem:[%s16588_s21 + $0x62] sm:$0xff] }
 0x1df   : > { %v2824_v59 = vpop.f32.mrf.mxu0  ;;  %v2905_v60 = vpop.f32.mrf.mxu1 }
 0x1e0   : > { %v2833_v39 = vadd.f32 %v2824_v59, %v2744_v23  ;;  %v2836_v43 = vadd.f32 %v16741_v37, %v2834_v32  ;;  %v14096_v59 = vld [vmem:[%s16588_s21 + $0x49] sm:$0x3f] }
 0x1e1   : > { %v15353_v0 = vpop.f32.mrf.mxu0  ;;  %v15358_v1 = vpop.f32.mrf.mxu1 }
 0x1e2   : > { %v2986_v3 = vadd.f32 %v15353_v0, %v15348_v57  ;;  %v2835_v47 = vadd.f32 %v16741_v37, %v2833_v39  ;;  %v2838_v50 = vmax.f32 %v2836_v43, 0.0  ;;  %v14097_v57 = vld [vmem:[%s18502_s1 + $0x4] sm:$0x7]  ;;  %v14112_v0 = vld [vmem:[%s18502_s1 + $0xc] sm:$0x7] }
 0x1e3   : > { %v2980_v4 = vpop.f32.mrf.mxu0  ;;  %v3055_v21 = vpop.f32.mrf.mxu1 }
 0x1e4   : > { %v3065_v20 = vadd.f32 %v15358_v1, %v2986_v3  ;;  %v2981_v6 = vadd.f32 %v2980_v4, %v2905_v60  ;;  %v2837_v53 = vmax.f32 %v2835_v47, 0.0  ;;  %v14094_v60 = vld [vmem:[%s16588_s21 + $0x48] sm:$0x3f]  ;;  %v14111_v1 = vld [vmem:[%s16588_s21 + $0x58] sm:$0x3f] }
 0x1e5   : > { %v15363_v25 = vpop.f32.mrf.mxu0  ;;  %v15368_v7 = vpop.f32.mrf.mxu1  ;;  %v14123_v3 = vld [vmem:[%s16588_s21 + $0x5a] sm:$0x3f] }
 0x1e6   : > { %v3064_v9 = vadd.f32 %v3055_v21, %v2981_v6  ;;  %v3142_v12 = vadd.f32 %v15363_v25, %v3065_v20  ;;  %v14130_v4 = vld [vmem:[%s18502_s1 + $0x18] sm:$0x7]  ;;  %v14136_v21 = vld [vmem:[%s18502_s1 + $0x1c] sm:$0x7]  ;;  %v17001_v20 = vld [vmem:[%s16588_s21 + $0x61] sm:$0xff] }
 0x1e7   : > { %v3132_v13 = vpop.f32.mrf.mxu0  ;;  %v3209_v14 = vpop.f32.mrf.mxu1  ;;  %v14129_v6 = vld [vmem:[%s16588_s21 + $0x68] sm:$0x3f] }
 0x1e8   : > { %v3219_v29 = vadd.f32 %v15368_v7, %v3142_v12  ;;  %v3141_v18 = vadd.f32 %v3132_v13, %v3064_v9  ;;  %v14135_v25 = vld [vmem:[%s16588_s21 + $0x69] sm:$0x3f]  ;;  %v14142_v7 = vld [vmem:[%s18502_s1 + $0x20] sm:$0x7]  ;;  %v17072_v12 = vld [vmem:[%s16588_s21 + $0x72] sm:$0xff] }
 0x1e9   : > { %v15373_v19 = vpop.f32.mrf.mxu0  ;;  %v15378_v22 = vpop.f32.mrf.mxu1  ;;  %v14141_v9 = vld [vmem:[%s16588_s21 + $0x6a] sm:$0x3f]  ;;  %v14170_v13 = vld [vmem:[%s16588_s21 + $0x79] sm:$0x3f] }
 0x1ea   : > { %v3218_v24 = vadd.f32 %v3209_v14, %v3141_v18  ;;  %v3296_v26 = vadd.f32 %v15373_v19, %v3219_v29  ;;  %v14175_v14 = vld [vmem:[%s16588_s21 + $0x7a] sm:$0x3f] }
 0x1eb   : > { %v3286_v28 = vpop.f32.mrf.mxu0  ;;  %v3372_v31 = vpop.f32.mrf.mxu1 }
 0x1ec   : > { %v3382_v34 = vadd.f32 %v15378_v22, %v3296_v26  ;;  %v3295_v35 = vadd.f32 %v3286_v28, %v3218_v24 }
 0x1ed   : > { %v15383_v36 = vpop.f32.mrf.mxu0  ;;  %v15388_v38 = vpop.f32.mrf.mxu1 }
 0x1ee   : > { %v3381_v40 = vadd.f32 %v3372_v31, %v3295_v35  ;;  %v3467_v41 = vadd.f32 %v15383_v36, %v3382_v34 }
 0x1ef   : > { %v3457_v42 = vpop.f32.mrf.mxu0  ;;  %v3542_v46 = vpop.f32.mrf.mxu1 }
 0x1f0   : > { %v3552_v44 = vadd.f32 %v15388_v38, %v3467_v41  ;;  %v3466_v45 = vadd.f32 %v3457_v42, %v3381_v40 }
 0x1f2   : > { %v3554_v48 = vadd.f32 %v16741_v37, %v3552_v44  ;;  %v3551_v49 = vadd.f32 %v3542_v46, %v3466_v45 }
 0x1f4   : > { %v3556_v51 = vmax.f32 %v3554_v48, 0.0  ;;  %v3553_v52 = vadd.f32 %v16741_v37, %v3551_v49 }
 0x1f6   : > { %v3558_v54 = vmax.f32 %v2838_v50, %v3556_v51  ;;  %v3555_v55 = vmax.f32 %v3553_v52, 0.0 }
 0x1f8   : > { %v3557_v56 = vmax.f32 %v2837_v53, %v3555_v55  ;;  %15390 = vmatpush3.msk.msra.mxu0 %vm1887_vm3, %v3558_v54  ;;  %15397 = vmatpush3.msk.msra.mxu1 %vm1887_vm3, %v3558_v54 }
 0x1f9   : > { %15391 = vmatprep.subr.mxu0 %v18511_v33  ;;  %15398 = vmatprep.subr.mxu1 %v18511_v33 }
 0x1fa   : > { %15392 = vmatpush3.msra.mxu0 %v3557_v56  ;;  %15399 = vmatpush3.msra.mxu1 %v3557_v56 }
 0x1fb   : > { %15394 = vmatmul.mubr.msk.f32.vlgmr.msra.gmra.mxu0 %vm1883_vm6, %v16750_v61  ;;  %15401 = vmatmul.mubr.msk.f32.vlgmr.msra.gmra.mxu1 %vm1883_vm6, %v16753_v62 }
 0x1fc   : > { %15403 = vmatprep.subr.msk.mxu0 %vm358_vm0, %v14097_v57  ;;  %15408 = vmatprep.subr.msk.mxu1 %vm358_vm0, %v16935_v58 }
 0x1fd   : > { %15404 = vmatpush3.msk.msra.mxu0 %vm358_vm0, %v14097_v57  ;;  %15405 = vmatprep.mubr.msk.f32.mxu0 %vm351_vm1, %v16829_v11  ;;  %v14105_v11 = vld [vmem:[%s16588_s21 + $0x4a] sm:$0x3f] }
 0x1fe   : > { %15409 = vmatpush3.msk.msra.mxu1 %vm358_vm0, %v16935_v58  ;;  %15410 = vmatprep.mubr.msk.f32.mxu1 %vm351_vm1, %v16824_v10  ;;  %v14118_v10 = vld [vmem:[%s18502_s1 + $0x10] sm:$0x7] }
 0x1ff   : > { %15406 = vmatmul.mubr.msk.f32.vlgmr.msra.gmra.mxu0 %vm351_vm1, %v14096_v59  ;;  %15411 = vmatmul.mubr.msk.f32.vlgmr.msra.gmra.mxu1 %vm351_vm1, %v14094_v60 }
 0x200   : > { %15413 = vmatprep.subr.msk.mxu0 %vm358_vm0, %v14106_v63  ;;  %15418 = vmatprep.subr.msk.mxu1 %vm358_vm0, %v14112_v0 }
 0x201   : > { %15414 = vmatpush3.msk.msra.mxu0 %vm358_vm0, %v14106_v63  ;;  %15415 = vmatprep.mubr.msk.f32.mxu0 %vm351_vm1, %v16845_v15  ;;  %v14117_v15 = vld [vmem:[%s16588_s21 + $0x59] sm:$0x3f] }
 0x202   : > { %15419 = vmatpush3.msk.msra.mxu1 %vm358_vm0, %v14112_v0  ;;  %15420 = vmatprep.mubr.msk.f32.mxu1 %vm351_vm1, %v16883_v27 }
 0x203   : > { %15416 = vmatmul.mubr.msk.f32.vlgmr.msra.gmra.mxu0 %vm351_vm1, %v14105_v11  ;;  %15421 = vmatmul.mubr.msk.f32.vlgmr.msra.gmra.mxu1 %vm351_vm1, %v14111_v1 }
 0x204   : > { %15423 = vmatprep.subr.msk.mxu0 %vm358_vm0, %v14118_v10  ;;  %15428 = vmatprep.subr.msk.mxu1 %vm358_vm0, %v14124_v2 }
 0x205   : > { %15424 = vmatpush3.msk.msra.mxu0 %vm358_vm0, %v14118_v10  ;;  %15425 = vmatprep.mubr.msk.f32.mxu0 %vm351_vm1, %v16895_v30 }
 0x206   : > { %15429 = vmatpush3.msk.msra.mxu1 %vm358_vm0, %v14124_v2  ;;  %15430 = vmatprep.mubr.msk.f32.mxu1 %vm351_vm1, %v16900_v17 }
 0x207   : > { %15426 = vmatmul.mubr.msk.f32.vlgmr.msra.gmra.mxu0 %vm351_vm1, %v14117_v15  ;;  %15431 = vmatmul.mubr.msk.f32.vlgmr.msra.gmra.mxu1 %vm351_vm1, %v14123_v3 }
 0x208   : > { %15433 = vmatprep.subr.msk.mxu0 %vm358_vm0, %v14130_v4  ;;  %15438 = vmatprep.subr.msk.mxu1 %vm358_vm0, %v14136_v21 }
 0x209   : > { %15434 = vmatpush3.msk.msra.mxu0 %vm358_vm0, %v14130_v4  ;;  %15435 = vmatprep.mubr.msk.f32.mxu0 %vm351_vm1, %v16996_v5 }
 0x20a   : > { %15439 = vmatpush3.msk.msra.mxu1 %vm358_vm0, %v14136_v21  ;;  %15440 = vmatprep.mubr.msk.f32.mxu1 %vm351_vm1, %v17001_v20 }
 0x20b   : > { %15436 = vmatmul.mubr.msk.f32.vlgmr.msra.gmra.mxu0 %vm351_vm1, %v14129_v6  ;;  %15441 = vmatmul.mubr.msk.f32.vlgmr.msra.gmra.mxu1 %vm351_vm1, %v14135_v25 }
 0x20c   : > { %15443 = vmatprep.subr.msk.mxu0 %vm358_vm0, %v14142_v7  ;;  %15448 = vmatprep.subr.msk.mxu1 %vm358_vm0, %v14097_v57 }
 0x20d   : > { %15444 = vmatpush3.msk.msra.mxu0 %vm358_vm0, %v14142_v7  ;;  %15445 = vmatprep.mubr.msk.f32.mxu0 %vm351_vm1, %v17017_v8 }
 0x20e   : > { %15449 = vmatpush3.msk.msra.mxu1 %vm358_vm0, %v14097_v57  ;;  %15450 = vmatprep.mubr.msk.f32.mxu1 %vm351_vm1, %v16895_v30  ;;  %v14165_v30 = vld [vmem:[%s16588_s21 + $0x78] sm:$0x3f] }
 0x20f   : > { %15446 = vmatmul.mubr.msk.f32.vlgmr.msra.gmra.mxu0 %vm351_vm1, %v14141_v9  ;;  %15451 = vmatmul.mubr.msk.f32.vlgmr.msra.gmra.mxu1 %vm351_vm1, %v14117_v15 }
 0x210   : > { %15453 = vmatprep.subr.msk.mxu0 %vm358_vm0, %v16935_v58  ;;  %15458 = vmatprep.subr.msk.mxu1 %vm358_vm0, %v14106_v63 }
 0x211   : > { %15454 = vmatpush3.msk.msra.mxu0 %vm358_vm0, %v16935_v58  ;;  %15455 = vmatprep.mubr.msk.f32.mxu0 %vm351_vm1, %v16883_v27  ;;  %v17055_v27 = vld [vmem:[%s16588_s21 + $0x70] sm:$0xff] }
 0x212   : > { %15459 = vmatpush3.msk.msra.mxu1 %vm358_vm0, %v14106_v63  ;;  %15460 = vmatprep.mubr.msk.f32.mxu1 %vm351_vm1, %v16900_v17  ;;  %v17067_v17 = vld [vmem:[%s16588_s21 + $0x71] sm:$0xff] }
 0x213   : > { %15456 = vmatmul.mubr.msk.f32.vlgmr.msra.gmra.mxu0 %vm351_vm1, %v14111_v1  ;;  %15461 = vmatmul.mubr.msk.f32.vlgmr.msra.gmra.mxu1 %vm351_vm1, %v14123_v3 }
 0x214   : > { %15463 = vmatprep.subr.msk.mxu0 %vm358_vm0, %v14112_v0  ;;  %15468 = vmatprep.subr.msk.mxu1 %vm358_vm0, %v14118_v10 }
 0x215   : > { %15464 = vmatpush3.msk.msra.mxu0 %vm358_vm0, %v14112_v0  ;;  %15465 = vmatprep.mubr.msk.f32.mxu0 %vm351_vm1, %v16996_v5 }
 0x216   : > { %15469 = vmatpush3.msk.msra.mxu1 %vm358_vm0, %v14118_v10  ;;  %15470 = vmatprep.mubr.msk.f32.mxu1 %vm351_vm1, %v17001_v20 }
 0x217   : > { %15466 = vmatmul.mubr.msk.f32.vlgmr.msra.gmra.mxu0 %vm351_vm1, %v14129_v6  ;;  %15471 = vmatmul.mubr.msk.f32.vlgmr.msra.gmra.mxu1 %vm351_vm1, %v14135_v25 }
 0x218   : > { %15473 = vmatprep.subr.msk.mxu0 %vm358_vm0, %v14124_v2  ;;  %15478 = vmatprep.subr.msk.mxu1 %vm358_vm0, %v14130_v4 }
 0x219   : > { %15474 = vmatpush3.msk.msra.mxu0 %vm358_vm0, %v14124_v2  ;;  %15475 = vmatprep.mubr.msk.f32.mxu0 %vm351_vm1, %v17017_v8 }
 0x21a   : > { %15479 = vmatpush3.msk.msra.mxu1 %vm358_vm0, %v14130_v4  ;;  %15480 = vmatprep.mubr.msk.f32.mxu1 %vm351_vm1, %v17055_v27 }
 0x21b   : > { %15476 = vmatmul.mubr.msk.f32.vlgmr.msra.gmra.mxu0 %vm351_vm1, %v14141_v9  ;;  %15481 = vmatmul.mubr.msk.f32.vlgmr.msra.gmra.mxu1 %vm351_vm1, %v14165_v30 }
 0x21c   : > { %15483 = vmatprep.subr.msk.mxu0 %vm358_vm0, %v14136_v21  ;;  %15488 = vmatprep.subr.msk.mxu1 %vm358_vm0, %v14142_v7 }
 0x21d   : > { %15484 = vmatpush3.msk.msra.mxu0 %vm358_vm0, %v14136_v21  ;;  %15485 = vmatprep.mubr.msk.f32.mxu0 %vm351_vm1, %v17067_v17 }
 0x21e   : > { %15489 = vmatpush3.msk.msra.mxu1 %vm358_vm0, %v14142_v7  ;;  %15490 = vmatprep.mubr.msk.f32.mxu1 %vm351_vm1, %v17072_v12 }
 0x21f   : > { %15486 = vmatmul.mubr.msk.f32.vlgmr.msra.gmra.mxu0 %vm351_vm1, %v14170_v13  ;;  %15491 = vmatmul.mubr.msk.f32.vlgmr.msra.gmra.mxu1 %vm351_vm1, %v14175_v14 }
 0x220   : > { %15493 = vmatprep.subr.mxu0 %v18511_v33  ;;  %15500 = vmatprep.subr.mxu1 %v18511_v33 }
 0x221   : > { %15497 = vmatprep.mubr.msk.f32.mxu0 %vm16451_vm2, %v18511_v33  ;;  %15504 = vmatprep.mubr.msk.f32.mxu1 %vm16451_vm2, %v18511_v33 }
 0x2bb   : > { %v3628_v16 = vpop.f32.mrf.mxu0  ;;  %v3698_v29 = vpop.f32.mrf.mxu1 }
 0x2bc   : > { %v3702_v18 = vmax.f32 %v3628_v16, %v3698_v29 }
 0x2bd   : > { %v15395_v19 = vpop.f32.mrf.mxu0  ;;  %v15402_v22 = vpop.f32.mrf.mxu1 }
 0x2be   : > { %3704 = vst.msk [vmem:[#allocation2 + $0x8] sm:$0x7f] %vm2035_vm7, %v3702_v18 }
 0x2bf   : > { %v15407_v23 = vpop.f32.mrf.mxu0  ;;  %v15412_v24 = vpop.f32.mrf.mxu1 }
 0x2c0   : > { %v3876_v34 = vadd.f32 %v15412_v24, %v15407_v23 }
 0x2c1   : > { %v3786_v26 = vpop.f32.mrf.mxu0  ;;  %v3870_v28 = vpop.f32.mrf.mxu1 }
 0x2c2   : > { %v3871_v38 = vadd.f32 %v3870_v28, %v3786_v26 }
 0x2c3   : > { %v15417_v31 = vpop.f32.mrf.mxu0  ;;  %v15422_v32 = vpop.f32.mrf.mxu1 }
 0x2c4   : > { %v3967_v39 = vadd.f32 %v15417_v31, %v3876_v34 }
 0x2c5   : > { %v3957_v35 = vpop.f32.mrf.mxu0  ;;  %v4046_v36 = vpop.f32.mrf.mxu1 }
 0x2c6   : > { %v3966_v42 = vadd.f32 %v3957_v35, %v3871_v38  ;;  %v4056_v45 = vadd.f32 %v15422_v32, %v3967_v39 }
 0x2c7   : > { %v15427_v40 = vpop.f32.mrf.mxu0  ;;  %v15432_v41 = vpop.f32.mrf.mxu1 }
 0x2c8   : > { %v4055_v48 = vadd.f32 %v4046_v36, %v3966_v42  ;;  %v4145_v51 = vadd.f32 %v15427_v40, %v4056_v45 }
 0x2c9   : > { %v4135_v43 = vpop.f32.mrf.mxu0  ;;  %v4224_v44 = vpop.f32.mrf.mxu1 }
 0x2ca   : > { %v4144_v54 = vadd.f32 %v4135_v43, %v4055_v48  ;;  %v4234_v57 = vadd.f32 %v15432_v41, %v4145_v51 }
 0x2cb   : > { %v15437_v46 = vpop.f32.mrf.mxu0  ;;  %v15442_v47 = vpop.f32.mrf.mxu1 }
 0x2cc   : > { %v4233_v60 = vadd.f32 %v4224_v44, %v4144_v54  ;;  %v4324_v1 = vadd.f32 %v15437_v46, %v4234_v57  ;;  %v14186_v54 = vld [vmem:[%s16588_s21 + $0x69] sm:$0x3f] }
 0x2cd   : > { %v4314_v49 = vpop.f32.mrf.mxu0  ;;  %v4403_v50 = vpop.f32.mrf.mxu1  ;;  %v14202_v57 = vld [vmem:[%s18502_s1 + $0xc] sm:$0x7] }
 0x2ce   : > { %v4323_v4 = vadd.f32 %v4314_v49, %v4233_v60  ;;  %v4413_v9 = vadd.f32 %v15442_v47, %v4324_v1  ;;  %v14213_v60 = vld [vmem:[%s16588_s21 + $0x7a] sm:$0x3f]  ;;  %v17173_v1 = vld [vmem:[%s16588_s21 + $0x81] sm:$0xff] }
 0x2cf   : > { %v15447_v52 = vpop.f32.mrf.mxu0  ;;  %v15452_v53 = vpop.f32.mrf.mxu1 }
 0x2d0   : > { %v4412_v29 = vadd.f32 %v4403_v50, %v4323_v4  ;;  %v4502_v24 = vadd.f32 %v15447_v52, %v4413_v9  ;;  %v14231_v4 = vld [vmem:[%s16588_s21 + $0x8a] sm:$0x3f] }
 0x2d1   : > { %v4492_v55 = vpop.f32.mrf.mxu0  ;;  %v4573_v56 = vpop.f32.mrf.mxu1 }
 0x2d2   : > { %v4501_v34 = vadd.f32 %v4492_v55, %v4412_v29  ;;  %v4504_v39 = vadd.f32 %v16741_v37, %v4502_v24  ;;  %v14184_v55 = vld [vmem:[%s16588_s21 + $0x68] sm:$0x3f] }
 0x2d3   : > { %v15457_v58 = vpop.f32.mrf.mxu0  ;;  %v15462_v59 = vpop.f32.mrf.mxu1 }
 0x2d4   : > { %v4654_v63 = vadd.f32 %v15457_v58, %v15452_v53  ;;  %v4503_v43 = vadd.f32 %v16741_v37, %v4501_v34  ;;  %v4506_v46 = vmax.f32 %v4504_v39, 0.0  ;;  %v14187_v53 = vld [vmem:[%s18502_s1 + $0x4] sm:$0x7]  ;;  %v14201_v58 = vld [vmem:[%s16588_s21 + $0x78] sm:$0x3f] }
 0x2d5   : > { %v4648_v0 = vpop.f32.mrf.mxu0  ;;  %v4723_v11 = vpop.f32.mrf.mxu1 }
 0x2d6   : > { %v4733_v10 = vadd.f32 %v15462_v59, %v4654_v63  ;;  %v4649_v2 = vadd.f32 %v4648_v0, %v4573_v56  ;;  %v4505_v49 = vmax.f32 %v4503_v43, 0.0  ;;  %v14196_v56 = vld [vmem:[%s18502_s1 + $0x8] sm:$0x7]  ;;  %v14214_v59 = vld [vmem:[%s18502_s1 + $0x14] sm:$0x7] }
 0x2d7   : > { %v15467_v15 = vpop.f32.mrf.mxu0  ;;  %v15472_v3 = vpop.f32.mrf.mxu1  ;;  %v14220_v63 = vld [vmem:[%s18502_s1 + $0x18] sm:$0x7]  ;;  %v14226_v0 = vld [vmem:[%s18502_s1 + $0x1c] sm:$0x7] }
 0x2d8   : > { %v4732_v21 = vadd.f32 %v4723_v11, %v4649_v2  ;;  %v4810_v6 = vadd.f32 %v15467_v15, %v4733_v10  ;;  %v17168_v11 = vld [vmem:[%s16588_s21 + $0x80] sm:$0xff]  ;;  %v14219_v10 = vld [vmem:[%s16588_s21 + $0x88] sm:$0x3f] }
 0x2d9   : > { %v4800_v25 = vpop.f32.mrf.mxu0  ;;  %v4877_v7 = vpop.f32.mrf.mxu1  ;;  %v14225_v2 = vld [vmem:[%s16588_s21 + $0x89] sm:$0x3f]  ;;  %v14232_v15 = vld [vmem:[%s18502_s1 + $0x20] sm:$0x7] }
 0x2da   : > { %v4887_v30 = vadd.f32 %v15472_v3, %v4810_v6  ;;  %v4809_v13 = vadd.f32 %v4800_v25, %v4732_v21  ;;  %v17189_v3 = vld [vmem:[%s16588_s21 + $0x82] sm:$0xff]  ;;  %v17244_v21 = vld [vmem:[%s16588_s21 + $0x92] sm:$0xff]  ;;  %v14265_v25 = vld [vmem:[%s16588_s21 + $0x9a] sm:$0x3f] }
 0x2db   : > { %v15477_v14 = vpop.f32.mrf.mxu0  ;;  %v15482_v16 = vpop.f32.mrf.mxu1  ;;  %v14260_v6 = vld [vmem:[%s16588_s21 + $0x99] sm:$0x3f] }
 0x2dc   : > { %v4886_v18 = vadd.f32 %v4877_v7, %v4809_v13  ;;  %v4964_v19 = vadd.f32 %v15477_v14, %v4887_v30 }
 0x2dd   : > { %v4954_v22 = vpop.f32.mrf.mxu0  ;;  %v5040_v23 = vpop.f32.mrf.mxu1 }
 0x2de   : > { %v5050_v26 = vadd.f32 %v15482_v16, %v4964_v19  ;;  %v4963_v28 = vadd.f32 %v4954_v22, %v4886_v18 }
 0x2df   : > { %v15487_v31 = vpop.f32.mrf.mxu0  ;;  %v15492_v32 = vpop.f32.mrf.mxu1 }
 0x2e0   : > { %v5049_v35 = vadd.f32 %v5040_v23, %v4963_v28  ;;  %v5135_v36 = vadd.f32 %v15487_v31, %v5050_v26 }
 0x2e1   : > { %v5125_v38 = vpop.f32.mrf.mxu0  ;;  %v5210_v42 = vpop.f32.mrf.mxu1 }
 0x2e2   : > { %v5220_v40 = vadd.f32 %v15492_v32, %v5135_v36  ;;  %v5134_v41 = vadd.f32 %v5125_v38, %v5049_v35 }
 0x2e4   : > { %v5222_v44 = vadd.f32 %v16741_v37, %v5220_v40  ;;  %v5219_v45 = vadd.f32 %v5210_v42, %v5134_v41 }
 0x2e6   : > { %v5224_v47 = vmax.f32 %v5222_v44, 0.0  ;;  %v5221_v48 = vadd.f32 %v16741_v37, %v5219_v45  ;;  %v17107_v37 = vld [vmem:[%s18502_s1] sm:$0x7] }
 0x2e8   : > { %v5226_v50 = vmax.f32 %v4506_v46, %v5224_v47  ;;  %v5223_v51 = vmax.f32 %v5221_v48, 0.0 }
 0x2ea   : > { %v5225_v52 = vmax.f32 %v4505_v49, %v5223_v51  ;;  %15494 = vmatpush3.msk.msra.mxu0 %vm1887_vm3, %v5226_v50  ;;  %15501 = vmatpush3.msk.msra.mxu1 %vm1887_vm3, %v5226_v50 }
 0x2eb   : > { %15495 = vmatprep.subr.mxu0 %v18511_v33  ;;  %15502 = vmatprep.subr.mxu1 %v18511_v33 }
 0x2ec   : > { %15496 = vmatpush3.msra.mxu0 %v5225_v52  ;;  %15503 = vmatpush3.msra.mxu1 %v5225_v52 }
 0x2ed   : > { %15498 = vmatmul.mubr.msk.f32.vlgmr.msra.gmra.mxu0 %vm1883_vm6, %v16750_v61  ;;  %15505 = vmatmul.mubr.msk.f32.vlgmr.msra.gmra.mxu1 %vm1883_vm6, %v16753_v62 }
 0x2ee   : > { %15507 = vmatprep.subr.msk.mxu0 %vm358_vm0, %v14187_v53  ;;  %15512 = vmatprep.subr.msk.mxu1 %vm358_vm0, %v17107_v37 }
 0x2ef   : > { %15508 = vmatpush3.msk.msra.mxu0 %vm358_vm0, %v14187_v53  ;;  %15509 = vmatprep.mubr.msk.f32.mxu0 %vm351_vm1, %v17001_v20  ;;  %v14195_v20 = vld [vmem:[%s16588_s21 + $0x6a] sm:$0x3f] }
 0x2f0   : > { %15513 = vmatpush3.msk.msra.mxu1 %vm358_vm0, %v17107_v37  ;;  %15514 = vmatprep.mubr.msk.f32.mxu1 %vm351_vm1, %v16996_v5  ;;  %v14208_v5 = vld [vmem:[%s18502_s1 + $0x10] sm:$0x7] }
 0x2f1   : > { %15510 = vmatmul.mubr.msk.f32.vlgmr.msra.gmra.mxu0 %vm351_vm1, %v14186_v54  ;;  %15515 = vmatmul.mubr.msk.f32.vlgmr.msra.gmra.mxu1 %vm351_vm1, %v14184_v55 }
 0x2f2   : > { %15517 = vmatprep.subr.msk.mxu0 %vm358_vm0, %v14196_v56  ;;  %15522 = vmatprep.subr.msk.mxu1 %vm358_vm0, %v14202_v57 }
 0x2f3   : > { %15518 = vmatpush3.msk.msra.mxu0 %vm358_vm0, %v14196_v56  ;;  %15519 = vmatprep.mubr.msk.f32.mxu0 %vm351_vm1, %v17017_v8  ;;  %v14207_v8 = vld [vmem:[%s16588_s21 + $0x79] sm:$0x3f] }
 0x2f4   : > { %15523 = vmatpush3.msk.msra.mxu1 %vm358_vm0, %v14202_v57  ;;  %15524 = vmatprep.mubr.msk.f32.mxu1 %vm351_vm1, %v17055_v27 }
 0x2f5   : > { %15520 = vmatmul.mubr.msk.f32.vlgmr.msra.gmra.mxu0 %vm351_vm1, %v14195_v20  ;;  %15525 = vmatmul.mubr.msk.f32.vlgmr.msra.gmra.mxu1 %vm351_vm1, %v14201_v58 }
 0x2f6   : > { %15527 = vmatprep.subr.msk.mxu0 %vm358_vm0, %v14208_v5  ;;  %15532 = vmatprep.subr.msk.mxu1 %vm358_vm0, %v14214_v59 }
 0x2f7   : > { %15528 = vmatpush3.msk.msra.mxu0 %vm358_vm0, %v14208_v5  ;;  %15529 = vmatprep.mubr.msk.f32.mxu0 %vm351_vm1, %v17067_v17 }
 0x2f8   : > { %15533 = vmatpush3.msk.msra.mxu1 %vm358_vm0, %v14214_v59  ;;  %15534 = vmatprep.mubr.msk.f32.mxu1 %vm351_vm1, %v17072_v12 }
 0x2f9   : > { %15530 = vmatmul.mubr.msk.f32.vlgmr.msra.gmra.mxu0 %vm351_vm1, %v14207_v8  ;;  %15535 = vmatmul.mubr.msk.f32.vlgmr.msra.gmra.mxu1 %vm351_vm1, %v14213_v60 }
 0x2fa   : > { %15537 = vmatprep.subr.msk.mxu0 %vm358_vm0, %v14220_v63  ;;  %15542 = vmatprep.subr.msk.mxu1 %vm358_vm0, %v14226_v0 }
 0x2fb   : > { %15538 = vmatpush3.msk.msra.mxu0 %vm358_vm0, %v14220_v63  ;;  %15539 = vmatprep.mubr.msk.f32.mxu0 %vm351_vm1, %v17168_v11 }
 0x2fc   : > { %15543 = vmatpush3.msk.msra.mxu1 %vm358_vm0, %v14226_v0  ;;  %15544 = vmatprep.mubr.msk.f32.mxu1 %vm351_vm1, %v17173_v1 }
 0x2fd   : > { %15540 = vmatmul.mubr.msk.f32.vlgmr.msra.gmra.mxu0 %vm351_vm1, %v14219_v10  ;;  %15545 = vmatmul.mubr.msk.f32.vlgmr.msra.gmra.mxu1 %vm351_vm1, %v14225_v2 }
 0x2fe   : > { %15547 = vmatprep.subr.msk.mxu0 %vm358_vm0, %v14232_v15  ;;  %15552 = vmatprep.subr.msk.mxu1 %vm358_vm0, %v14187_v53 }
 0x2ff   : > { %15548 = vmatpush3.msk.msra.mxu0 %vm358_vm0, %v14232_v15  ;;  %15549 = vmatprep.mubr.msk.f32.mxu0 %vm351_vm1, %v17189_v3 }
 0x300   : > { %15553 = vmatpush3.msk.msra.mxu1 %vm358_vm0, %v14187_v53  ;;  %15554 = vmatprep.mubr.msk.f32.mxu1 %vm351_vm1, %v17067_v17  ;;  %v14255_v17 = vld [vmem:[%s16588_s21 + $0x98] sm:$0x3f] }
 0x301   : > { %15550 = vmatmul.mubr.msk.f32.vlgmr.msra.gmra.mxu0 %vm351_vm1, %v14231_v4  ;;  %15555 = vmatmul.mubr.msk.f32.vlgmr.msra.gmra.mxu1 %vm351_vm1, %v14207_v8 }
 0x302   : > { %15557 = vmatprep.subr.msk.mxu0 %vm358_vm0, %v17107_v37  ;;  %15562 = vmatprep.subr.msk.mxu1 %vm358_vm0, %v14196_v56 }
 0x303   : > { %15558 = vmatpush3.msk.msra.mxu0 %vm358_vm0, %v17107_v37  ;;  %15559 = vmatprep.mubr.msk.f32.mxu0 %vm351_vm1, %v17055_v27  ;;  %v17227_v27 = vld [vmem:[%s16588_s21 + $0x90] sm:$0xff] }
 0x304   : > { %15563 = vmatpush3.msk.msra.mxu1 %vm358_vm0, %v14196_v56  ;;  %15564 = vmatprep.mubr.msk.f32.mxu1 %vm351_vm1, %v17072_v12  ;;  %v17239_v12 = vld [vmem:[%s16588_s21 + $0x91] sm:$0xff] }
 0x305   : > { %15560 = vmatmul.mubr.msk.f32.vlgmr.msra.gmra.mxu0 %vm351_vm1, %v14201_v58  ;;  %15565 = vmatmul.mubr.msk.f32.vlgmr.msra.gmra.mxu1 %vm351_vm1, %v14213_v60 }
 0x306   : > { %15567 = vmatprep.subr.msk.mxu0 %vm358_vm0, %v14202_v57  ;;  %15572 = vmatprep.subr.msk.mxu1 %vm358_vm0, %v14208_v5 }
 0x307   : > { %15568 = vmatpush3.msk.msra.mxu0 %vm358_vm0, %v14202_v57  ;;  %15569 = vmatprep.mubr.msk.f32.mxu0 %vm351_vm1, %v17168_v11 }
 0x308   : > { %15573 = vmatpush3.msk.msra.mxu1 %vm358_vm0, %v14208_v5  ;;  %15574 = vmatprep.mubr.msk.f32.mxu1 %vm351_vm1, %v17173_v1 }
 0x309   : > { %15570 = vmatmul.mubr.msk.f32.vlgmr.msra.gmra.mxu0 %vm351_vm1, %v14219_v10  ;;  %15575 = vmatmul.mubr.msk.f32.vlgmr.msra.gmra.mxu1 %vm351_vm1, %v14225_v2 }
 0x30a   : > { %15577 = vmatprep.subr.msk.mxu0 %vm358_vm0, %v14214_v59  ;;  %15582 = vmatprep.subr.msk.mxu1 %vm358_vm0, %v14220_v63 }
 0x30b   : > { %15578 = vmatpush3.msk.msra.mxu0 %vm358_vm0, %v14214_v59  ;;  %15579 = vmatprep.mubr.msk.f32.mxu0 %vm351_vm1, %v17189_v3 }
 0x30c   : > { %15583 = vmatpush3.msk.msra.mxu1 %vm358_vm0, %v14220_v63  ;;  %15584 = vmatprep.mubr.msk.f32.mxu1 %vm351_vm1, %v17227_v27 }
 0x30d   : > { %15580 = vmatmul.mubr.msk.f32.vlgmr.msra.gmra.mxu0 %vm351_vm1, %v14231_v4  ;;  %15585 = vmatmul.mubr.msk.f32.vlgmr.msra.gmra.mxu1 %vm351_vm1, %v14255_v17 }
 0x30e   : > { %15587 = vmatprep.subr.msk.mxu0 %vm358_vm0, %v14226_v0  ;;  %15592 = vmatprep.subr.msk.mxu1 %vm358_vm0, %v14232_v15 }
 0x30f   : > { %15588 = vmatpush3.msk.msra.mxu0 %vm358_vm0, %v14226_v0  ;;  %15589 = vmatprep.mubr.msk.f32.mxu0 %vm351_vm1, %v17239_v12 }
 0x310   : > { %15593 = vmatpush3.msk.msra.mxu1 %vm358_vm0, %v14232_v15  ;;  %15594 = vmatprep.mubr.msk.f32.mxu1 %vm351_vm1, %v17244_v21 }
 0x311   : > { %15590 = vmatmul.mubr.msk.f32.vlgmr.msra.gmra.mxu0 %vm351_vm1, %v14260_v6  ;;  %15595 = vmatmul.mubr.msk.f32.vlgmr.msra.gmra.mxu1 %vm351_vm1, %v14265_v25 }
 0x312   : > { %15597 = vmatprep.subr.mxu0 %v18511_v33  ;;  %15604 = vmatprep.subr.mxu1 %v18511_v33 }
 0x313   : > { %15601 = vmatprep.mubr.msk.f32.mxu0 %vm16451_vm2, %v18511_v33  ;;  %15608 = vmatprep.mubr.msk.f32.mxu1 %vm16451_vm2, %v18511_v33 }
 0x3ad   : > { %v5296_v7 = vpop.f32.mrf.mxu0  ;;  %v5366_v9 = vpop.f32.mrf.mxu1 }
 0x3ae   : > { %v5370_v30 = vmax.f32 %v5296_v7, %v5366_v9 }
 0x3af   : > { %v15499_v13 = vpop.f32.mrf.mxu0  ;;  %v15506_v14 = vpop.f32.mrf.mxu1 }
 0x3b0   : > { %5372 = vst.msk [vmem:[#allocation2 + $0x10] sm:$0x7f] %vm2035_vm7, %v5370_v30 }
 0x3b1   : > { %v15511_v16 = vpop.f32.mrf.mxu0  ;;  %v15516_v29 = vpop.f32.mrf.mxu1 }
 0x3b2   : > { %v5544_v24 = vadd.f32 %v15516_v29, %v15511_v16 }
 0x3b3   : > { %v5454_v18 = vpop.f32.mrf.mxu0  ;;  %v5538_v19 = vpop.f32.mrf.mxu1 }
 0x3b4   : > { %v5539_v31 = vadd.f32 %v5538_v19, %v5454_v18 }
 0x3b5   : > { %v15521_v22 = vpop.f32.mrf.mxu0  ;;  %v15526_v23 = vpop.f32.mrf.mxu1 }
 0x3b6   : > { %v5635_v32 = vadd.f32 %v15521_v22, %v5544_v24 }
 0x3b7   : > { %v5625_v26 = vpop.f32.mrf.mxu0  ;;  %v5714_v28 = vpop.f32.mrf.mxu1 }
 0x3b8   : > { %v5634_v36 = vadd.f32 %v5625_v26, %v5539_v31  ;;  %v5724_v40 = vadd.f32 %v15526_v23, %v5635_v32  ;;  %v17268_v31 = vld [vmem:[%s18503_s2] ss:$0 sm:$0xff] }
 0x3b9   : > { %v15531_v34 = vpop.f32.mrf.mxu0  ;;  %v15536_v35 = vpop.f32.mrf.mxu1 }
 0x3ba   : > { %v5723_v43 = vadd.f32 %v5714_v28, %v5634_v36  ;;  %v5813_v46 = vadd.f32 %v15531_v34, %v5724_v40 }
 0x3bb   : > { %v5803_v38 = vpop.f32.mrf.mxu0  ;;  %v5892_v39 = vpop.f32.mrf.mxu1 }
 0x3bc   : > { %v5812_v49 = vadd.f32 %v5803_v38, %v5723_v43  ;;  %v5902_v52 = vadd.f32 %v15536_v35, %v5813_v46 }
 0x3bd   : > { %v15541_v41 = vpop.f32.mrf.mxu0  ;;  %v15546_v42 = vpop.f32.mrf.mxu1 }
 0x3be   : > { %v5901_v54 = vadd.f32 %v5892_v39, %v5812_v49  ;;  %v5992_v20 = vadd.f32 %v15541_v41, %v5902_v52  ;;  %v17284_v49 = vld [vmem:[%s18502_s1] sm:$0x7]  ;;  %v14286_v52 = vld [vmem:[%s18502_s1 + $0x8] sm:$0x7] }
 0x3bf   : > { %v5982_v44 = vpop.f32.mrf.mxu0  ;;  %v6071_v45 = vpop.f32.mrf.mxu1 }
 0x3c0   : > { %v5991_v60 = vadd.f32 %v5982_v44, %v5901_v54  ;;  %v6081_v15 = vadd.f32 %v15546_v42, %v5992_v20  ;;  %v14304_v54 = vld [vmem:[%s18502_s1 + $0x14] sm:$0x7]  ;;  %v17345_v20 = vld [vmem:[%s16588_s21 + $0xa0] sm:$0xff] }
 0x3c1   : > { %v15551_v47 = vpop.f32.mrf.mxu0  ;;  %v15556_v48 = vpop.f32.mrf.mxu1 }
 0x3c2   : > { %v6080_v7 = vadd.f32 %v6071_v45, %v5991_v60  ;;  %v6170_v16 = vadd.f32 %v15551_v47, %v6081_v15  ;;  %v17366_v60 = vld [vmem:[%s16588_s21 + $0xa2] sm:$0xff] }
 0x3c3   : > { %v6160_v50 = vpop.f32.mrf.mxu0  ;;  %v6241_v51 = vpop.f32.mrf.mxu1 }
 0x3c4   : > { %v6169_v23 = vadd.f32 %v6160_v50, %v6080_v7  ;;  %v6172_v32 = vadd.f32 %v17268_v31, %v6170_v16  ;;  %v14276_v50 = vld [vmem:[%s16588_s21 + $0x89] sm:$0x3f] }
 0x3c5   : > { %v15561_v53 = vpop.f32.mrf.mxu0  ;;  %v15566_v37 = vpop.f32.mrf.mxu1 }
 0x3c6   : > { %v6322_v55 = vadd.f32 %v15561_v53, %v15556_v48  ;;  %v6171_v38 = vadd.f32 %v17268_v31, %v6169_v23  ;;  %v6174_v41 = vmax.f32 %v6172_v32, 0.0  ;;  %v14277_v48 = vld [vmem:[%s18502_s1 + $0x4] sm:$0x7]  ;;  %v14292_v53 = vld [vmem:[%s18502_s1 + $0xc] sm:$0x7] }
 0x3c7   : > { %v6316_v56 = vpop.f32.mrf.mxu0  ;;  %v6391_v57 = vpop.f32.mrf.mxu1 }
 0x3c8   : > { %v6401_v58 = vadd.f32 %v15566_v37, %v6322_v55  ;;  %v6317_v5 = vadd.f32 %v6316_v56, %v6241_v51  ;;  %v6173_v44 = vmax.f32 %v6171_v38, 0.0  ;;  %v14274_v51 = vld [vmem:[%s16588_s21 + $0x88] sm:$0x3f]  ;;  %v14291_v37 = vld [vmem:[%s16588_s21 + $0x98] sm:$0x3f] }
 0x3c9   : > { %v15571_v59 = vpop.f32.mrf.mxu0  ;;  %v15576_v8 = vpop.f32.mrf.mxu1  ;;  %v14303_v55 = vld [vmem:[%s16588_s21 + $0x9a] sm:$0x3f] }
 0x3ca   : > { %v6400_v63 = vadd.f32 %v6391_v57, %v6317_v5  ;;  %v6478_v0 = vadd.f32 %v15571_v59, %v6401_v58  ;;  %v14310_v56 = vld [vmem:[%s18502_s1 + $0x18] sm:$0x7]  ;;  %v14316_v57 = vld [vmem:[%s18502_s1 + $0x1c] sm:$0x7]  ;;  %v17350_v58 = vld [vmem:[%s16588_s21 + $0xa1] sm:$0xff] }
 0x3cb   : > { %v6468_v10 = vpop.f32.mrf.mxu0  ;;  %v6545_v2 = vpop.f32.mrf.mxu1  ;;  %v14309_v5 = vld [vmem:[%s16588_s21 + $0xa8] sm:$0x3f] }
 0x3cc   : > { %v6555_v4 = vadd.f32 %v15576_v8, %v6478_v0  ;;  %v6477_v17 = vadd.f32 %v6468_v10, %v6400_v63  ;;  %v14315_v59 = vld [vmem:[%s16588_s21 + $0xa9] sm:$0x3f]  ;;  %v14322_v8 = vld [vmem:[%s18502_s1 + $0x20] sm:$0x7]  ;;  %v17421_v0 = vld [vmem:[%s16588_s21 + $0xb2] sm:$0xff] }
 0x3cd   : > { %v15581_v6 = vpop.f32.mrf.mxu0  ;;  %v15586_v25 = vpop.f32.mrf.mxu1  ;;  %v14321_v63 = vld [vmem:[%s16588_s21 + $0xaa] sm:$0x3f]  ;;  %v14350_v10 = vld [vmem:[%s16588_s21 + $0xb9] sm:$0x3f] }
 0x3ce   : > { %v6554_v9 = vadd.f32 %v6545_v2, %v6477_v17  ;;  %v6632_v30 = vadd.f32 %v15581_v6, %v6555_v4  ;;  %v14355_v2 = vld [vmem:[%s16588_s21 + $0xba] sm:$0x3f] }
 0x3cf   : > { %v6622_v13 = vpop.f32.mrf.mxu0  ;;  %v6708_v14 = vpop.f32.mrf.mxu1 }
 0x3d0   : > { %v6718_v29 = vadd.f32 %v15586_v25, %v6632_v30  ;;  %v6631_v18 = vadd.f32 %v6622_v13, %v6554_v9 }
 0x3d1   : > { %v15591_v19 = vpop.f32.mrf.mxu0  ;;  %v15596_v22 = vpop.f32.mrf.mxu1 }
 0x3d2   : > { %v6717_v24 = vadd.f32 %v6708_v14, %v6631_v18  ;;  %v6803_v26 = vadd.f32 %v15591_v19, %v6718_v29 }
 0x3d3   : > { %v6793_v28 = vpop.f32.mrf.mxu0  ;;  %v6878_v36 = vpop.f32.mrf.mxu1 }
 0x3d4   : > { %v6888_v34 = vadd.f32 %v15596_v22, %v6803_v26  ;;  %v6802_v35 = vadd.f32 %v6793_v28, %v6717_v24 }
 0x3d6   : > { %v6890_v39 = vadd.f32 %v17268_v31, %v6888_v34  ;;  %v6887_v40 = vadd.f32 %v6878_v36, %v6802_v35 }
 0x3d8   : > { %v6892_v42 = vmax.f32 %v6890_v39, 0.0  ;;  %v6889_v43 = vadd.f32 %v17268_v31, %v6887_v40 }
 0x3da   : > { %v6894_v45 = vmax.f32 %v6174_v41, %v6892_v42  ;;  %v6891_v46 = vmax.f32 %v6889_v43, 0.0 }
 0x3dc   : > { %v6893_v47 = vmax.f32 %v6173_v44, %v6891_v46  ;;  %15598 = vmatpush3.msk.msra.mxu0 %vm1887_vm3, %v6894_v45  ;;  %15605 = vmatpush3.msk.msra.mxu1 %vm1887_vm3, %v6894_v45 }
 0x3dd   : > { %15599 = vmatprep.subr.mxu0 %v18511_v33  ;;  %15606 = vmatprep.subr.mxu1 %v18511_v33 }
 0x3de   : > { %15600 = vmatpush3.msra.mxu0 %v6893_v47  ;;  %15607 = vmatpush3.msra.mxu1 %v6893_v47 }
 0x3df   : > { %15602 = vmatmul.mubr.msk.f32.vlgmr.msra.gmra.mxu0 %vm1883_vm6, %v16750_v61  ;;  %15609 = vmatmul.mubr.msk.f32.vlgmr.msra.gmra.mxu1 %vm1883_vm6, %v16753_v62 }
 0x3e0   : > { %15611 = vmatprep.subr.msk.mxu0 %vm358_vm0, %v14277_v48  ;;  %15616 = vmatprep.subr.msk.mxu1 %vm358_vm0, %v17284_v49 }
 0x3e1   : > { %15612 = vmatpush3.msk.msra.mxu0 %vm358_vm0, %v14277_v48  ;;  %15613 = vmatprep.mubr.msk.f32.mxu0 %vm351_vm1, %v17173_v1  ;;  %v14285_v1 = vld [vmem:[%s16588_s21 + $0x8a] sm:$0x3f] }
 0x3e2   : > { %15617 = vmatpush3.msk.msra.mxu1 %vm358_vm0, %v17284_v49  ;;  %15618 = vmatprep.mubr.msk.f32.mxu1 %vm351_vm1, %v17168_v11  ;;  %v14298_v11 = vld [vmem:[%s18502_s1 + $0x10] sm:$0x7] }
 0x3e3   : > { %15614 = vmatmul.mubr.msk.f32.vlgmr.msra.gmra.mxu0 %vm351_vm1, %v14276_v50  ;;  %15619 = vmatmul.mubr.msk.f32.vlgmr.msra.gmra.mxu1 %vm351_vm1, %v14274_v51 }
 0x3e4   : > { %15621 = vmatprep.subr.msk.mxu0 %vm358_vm0, %v14286_v52  ;;  %15626 = vmatprep.subr.msk.mxu1 %vm358_vm0, %v14292_v53 }
 0x3e5   : > { %15622 = vmatpush3.msk.msra.mxu0 %vm358_vm0, %v14286_v52  ;;  %15623 = vmatprep.mubr.msk.f32.mxu0 %vm351_vm1, %v17189_v3  ;;  %v14297_v3 = vld [vmem:[%s16588_s21 + $0x99] sm:$0x3f] }
 0x3e6   : > { %15627 = vmatpush3.msk.msra.mxu1 %vm358_vm0, %v14292_v53  ;;  %15628 = vmatprep.mubr.msk.f32.mxu1 %vm351_vm1, %v17227_v27 }
 0x3e7   : > { %15624 = vmatmul.mubr.msk.f32.vlgmr.msra.gmra.mxu0 %vm351_vm1, %v14285_v1  ;;  %15629 = vmatmul.mubr.msk.f32.vlgmr.msra.gmra.mxu1 %vm351_vm1, %v14291_v37 }
 0x3e8   : > { %15631 = vmatprep.subr.msk.mxu0 %vm358_vm0, %v14298_v11  ;;  %15636 = vmatprep.subr.msk.mxu1 %vm358_vm0, %v14304_v54 }
 0x3e9   : > { %15632 = vmatpush3.msk.msra.mxu0 %vm358_vm0, %v14298_v11  ;;  %15633 = vmatprep.mubr.msk.f32.mxu0 %vm351_vm1, %v17239_v12 }
 0x3ea   : > { %15637 = vmatpush3.msk.msra.mxu1 %vm358_vm0, %v14304_v54  ;;  %15638 = vmatprep.mubr.msk.f32.mxu1 %vm351_vm1, %v17244_v21 }
 0x3eb   : > { %15634 = vmatmul.mubr.msk.f32.vlgmr.msra.gmra.mxu0 %vm351_vm1, %v14297_v3  ;;  %15639 = vmatmul.mubr.msk.f32.vlgmr.msra.gmra.mxu1 %vm351_vm1, %v14303_v55 }
 0x3ec   : > { %15641 = vmatprep.subr.msk.mxu0 %vm358_vm0, %v14310_v56  ;;  %15646 = vmatprep.subr.msk.mxu1 %vm358_vm0, %v14316_v57 }
 0x3ed   : > { %15642 = vmatpush3.msk.msra.mxu0 %vm358_vm0, %v14310_v56  ;;  %15643 = vmatprep.mubr.msk.f32.mxu0 %vm351_vm1, %v17345_v20 }
 0x3ee   : > { %15647 = vmatpush3.msk.msra.mxu1 %vm358_vm0, %v14316_v57  ;;  %15648 = vmatprep.mubr.msk.f32.mxu1 %vm351_vm1, %v17350_v58 }
 0x3ef   : > { %15644 = vmatmul.mubr.msk.f32.vlgmr.msra.gmra.mxu0 %vm351_vm1, %v14309_v5  ;;  %15649 = vmatmul.mubr.msk.f32.vlgmr.msra.gmra.mxu1 %vm351_vm1, %v14315_v59 }
 0x3f0   : > { %15651 = vmatprep.subr.msk.mxu0 %vm358_vm0, %v14322_v8  ;;  %15656 = vmatprep.subr.msk.mxu1 %vm358_vm0, %v14277_v48 }
 0x3f1   : > { %15652 = vmatpush3.msk.msra.mxu0 %vm358_vm0, %v14322_v8  ;;  %15653 = vmatprep.mubr.msk.f32.mxu0 %vm351_vm1, %v17366_v60 }
 0x3f2   : > { %15657 = vmatpush3.msk.msra.mxu1 %vm358_vm0, %v14277_v48  ;;  %15658 = vmatprep.mubr.msk.f32.mxu1 %vm351_vm1, %v17239_v12  ;;  %v14345_v12 = vld [vmem:[%s16588_s21 + $0xb8] sm:$0x3f] }
 0x3f3   : > { %15654 = vmatmul.mubr.msk.f32.vlgmr.msra.gmra.mxu0 %vm351_vm1, %v14321_v63  ;;  %15659 = vmatmul.mubr.msk.f32.vlgmr.msra.gmra.mxu1 %vm351_vm1, %v14297_v3 }
 0x3f4   : > { %15661 = vmatprep.subr.msk.mxu0 %vm358_vm0, %v17284_v49  ;;  %15666 = vmatprep.subr.msk.mxu1 %vm358_vm0, %v14286_v52 }
 0x3f5   : > { %15662 = vmatpush3.msk.msra.mxu0 %vm358_vm0, %v17284_v49  ;;  %15663 = vmatprep.mubr.msk.f32.mxu0 %vm351_vm1, %v17227_v27  ;;  %v17404_v27 = vld [vmem:[%s16588_s21 + $0xb0] sm:$0xff] }
 0x3f6   : > { %15667 = vmatpush3.msk.msra.mxu1 %vm358_vm0, %v14286_v52  ;;  %15668 = vmatprep.mubr.msk.f32.mxu1 %vm351_vm1, %v17244_v21  ;;  %v17416_v21 = vld [vmem:[%s16588_s21 + $0xb1] sm:$0xff] }
 0x3f7   : > { %15664 = vmatmul.mubr.msk.f32.vlgmr.msra.gmra.mxu0 %vm351_vm1, %v14291_v37  ;;  %15669 = vmatmul.mubr.msk.f32.vlgmr.msra.gmra.mxu1 %vm351_vm1, %v14303_v55 }
 0x3f8   : > { %15671 = vmatprep.subr.msk.mxu0 %vm358_vm0, %v14292_v53  ;;  %15676 = vmatprep.subr.msk.mxu1 %vm358_vm0, %v14298_v11 }
 0x3f9   : > { %15672 = vmatpush3.msk.msra.mxu0 %vm358_vm0, %v14292_v53  ;;  %15673 = vmatprep.mubr.msk.f32.mxu0 %vm351_vm1, %v17345_v20 }
 0x3fa   : > { %15677 = vmatpush3.msk.msra.mxu1 %vm358_vm0, %v14298_v11  ;;  %15678 = vmatprep.mubr.msk.f32.mxu1 %vm351_vm1, %v17350_v58 }
 0x3fb   : > { %15674 = vmatmul.mubr.msk.f32.vlgmr.msra.gmra.mxu0 %vm351_vm1, %v14309_v5  ;;  %15679 = vmatmul.mubr.msk.f32.vlgmr.msra.gmra.mxu1 %vm351_vm1, %v14315_v59 }
 0x3fc   : > { %15681 = vmatprep.subr.msk.mxu0 %vm358_vm0, %v14304_v54  ;;  %15686 = vmatprep.subr.msk.mxu1 %vm358_vm0, %v14310_v56 }
 0x3fd   : > { %15682 = vmatpush3.msk.msra.mxu0 %vm358_vm0, %v14304_v54  ;;  %15683 = vmatprep.mubr.msk.f32.mxu0 %vm351_vm1, %v17366_v60 }
 0x3fe   : > { %15687 = vmatpush3.msk.msra.mxu1 %vm358_vm0, %v14310_v56  ;;  %15688 = vmatprep.mubr.msk.f32.mxu1 %vm351_vm1, %v17404_v27 }
 0x3ff   : > { %15684 = vmatmul.mubr.msk.f32.vlgmr.msra.gmra.mxu0 %vm351_vm1, %v14321_v63  ;;  %15689 = vmatmul.mubr.msk.f32.vlgmr.msra.gmra.mxu1 %vm351_vm1, %v14345_v12 }
 0x400   : > { %15691 = vmatprep.subr.msk.mxu0 %vm358_vm0, %v14316_v57  ;;  %15696 = vmatprep.subr.msk.mxu1 %vm358_vm0, %v14322_v8 }
 0x401   : > { %15692 = vmatpush3.msk.msra.mxu0 %vm358_vm0, %v14316_v57  ;;  %15693 = vmatprep.mubr.msk.f32.mxu0 %vm351_vm1, %v17416_v21 }
 0x402   : > { %15697 = vmatpush3.msk.msra.mxu1 %vm358_vm0, %v14322_v8  ;;  %15698 = vmatprep.mubr.msk.f32.mxu1 %vm351_vm1, %v17421_v0 }
 0x403   : > { %15694 = vmatmul.mubr.msk.f32.vlgmr.msra.gmra.mxu0 %vm351_vm1, %v14350_v10  ;;  %15699 = vmatmul.mubr.msk.f32.vlgmr.msra.gmra.mxu1 %vm351_vm1, %v14355_v2 }
 0x404   : > { %15701 = vmatprep.subr.mxu0 %v18511_v33  ;;  %15708 = vmatprep.subr.mxu1 %v18511_v33 }
 0x405   : > { %15705 = vmatprep.mubr.msk.f32.mxu0 %vm16451_vm2, %v18511_v33  ;;  %15712 = vmatprep.mubr.msk.f32.mxu1 %vm16451_vm2, %v18511_v33 }
 0x49f   : > { %v6964_v15 = vpop.f32.mrf.mxu0  ;;  %v7034_v4 = vpop.f32.mrf.mxu1 }
 0x4a0   : > { %v7038_v17 = vmax.f32 %v6964_v15, %v7034_v4 }
 0x4a1   : > { %v15603_v6 = vpop.f32.mrf.mxu0  ;;  %v15610_v25 = vpop.f32.mrf.mxu1 }
 0x4a2   : > { %7040 = vst.msk [vmem:[#allocation2 + $0x18] sm:$0x7f] %vm2035_vm7, %v7038_v17 }
 0x4a3   : > { %v15615_v7 = vpop.f32.mrf.mxu0  ;;  %v15620_v9 = vpop.f32.mrf.mxu1 }
 0x4a4   : > { %v7212_v29 = vadd.f32 %v15620_v9, %v15615_v7 }
 0x4a5   : > { %v7122_v30 = vpop.f32.mrf.mxu0  ;;  %v7206_v13 = vpop.f32.mrf.mxu1 }
 0x4a6   : > { %v7207_v22 = vadd.f32 %v7206_v13, %v7122_v30 }
 0x4a7   : > { %v15625_v14 = vpop.f32.mrf.mxu0  ;;  %v15630_v16 = vpop.f32.mrf.mxu1 }
 0x4a8   : > { %v7303_v23 = vadd.f32 %v15625_v14, %v7212_v29 }
 0x4a9   : > { %v7293_v18 = vpop.f32.mrf.mxu0  ;;  %v7382_v19 = vpop.f32.mrf.mxu1 }
 0x4aa   : > { %v7302_v28 = vadd.f32 %v7293_v18, %v7207_v22  ;;  %v7392_v35 = vadd.f32 %v15630_v16, %v7303_v23 }
 0x4ab   : > { %v15635_v24 = vpop.f32.mrf.mxu0  ;;  %v15640_v26 = vpop.f32.mrf.mxu1 }
 0x4ac   : > { %v7391_v39 = vadd.f32 %v7382_v19, %v7302_v28  ;;  %v7481_v42 = vadd.f32 %v15635_v24, %v7392_v35 }
 0x4ad   : > { %v7471_v32 = vpop.f32.mrf.mxu0  ;;  %v7560_v34 = vpop.f32.mrf.mxu1 }
 0x4ae   : > { %v7480_v45 = vadd.f32 %v7471_v32, %v7391_v39  ;;  %v7570_v48 = vadd.f32 %v15640_v26, %v7481_v42 }
 0x4af   : > { %v15645_v36 = vpop.f32.mrf.mxu0  ;;  %v15650_v38 = vpop.f32.mrf.mxu1 }
 0x4b0   : > { %v7569_v51 = vadd.f32 %v7560_v34, %v7480_v45  ;;  %v7660_v37 = vadd.f32 %v15645_v36, %v7570_v48  ;;  %v17456_v45 = vld [vmem:[%s18502_s1] sm:$0x7]  ;;  %v14376_v48 = vld [vmem:[%s18502_s1 + $0x8] sm:$0x7] }
 0x4b1   : > { %v7650_v40 = vpop.f32.mrf.mxu0  ;;  %v7739_v41 = vpop.f32.mrf.mxu1 }
 0x4b2   : > { %v7659_v56 = vadd.f32 %v7650_v40, %v7569_v51  ;;  %v7749_v63 = vadd.f32 %v15650_v38, %v7660_v37  ;;  %v14394_v51 = vld [vmem:[%s18502_s1 + $0x14] sm:$0x7]  ;;  %v14398_v37 = vld [vmem:[%s16588_s21 + $0xc0] sm:$0xff] }
 0x4b3   : > { %v15655_v43 = vpop.f32.mrf.mxu0  ;;  %v15660_v44 = vpop.f32.mrf.mxu1 }
 0x4b4   : > { %v7748_v4 = vadd.f32 %v7739_v41, %v7659_v56  ;;  %v7838_v9 = vadd.f32 %v15655_v43, %v7749_v63  ;;  %v14410_v56 = vld [vmem:[%s16588_s21 + $0xc2] sm:$0xff] }
 0x4b5   : > { %v7828_v46 = vpop.f32.mrf.mxu0  ;;  %v7909_v47 = vpop.f32.mrf.mxu1 }
 0x4b6   : > { %v7837_v29 = vadd.f32 %v7828_v46, %v7748_v4  ;;  %v7840_v23 = vadd.f32 %v17268_v31, %v7838_v9  ;;  %v14366_v46 = vld [vmem:[%s16588_s21 + $0xa9] sm:$0x3f] }
 0x4b7   : > { %v15665_v49 = vpop.f32.mrf.mxu0  ;;  %v15670_v50 = vpop.f32.mrf.mxu1 }
 0x4b8   : > { %v7990_v52 = vadd.f32 %v15665_v49, %v15660_v44  ;;  %v7839_v32 = vadd.f32 %v17268_v31, %v7837_v29  ;;  %v7842_v36 = vmax.f32 %v7840_v23, 0.0  ;;  %v14367_v44 = vld [vmem:[%s18502_s1 + $0x4] sm:$0x7]  ;;  %v14382_v49 = vld [vmem:[%s18502_s1 + $0xc] sm:$0x7] }
 0x4b9   : > { %v7984_v53 = vpop.f32.mrf.mxu0  ;;  %v8059_v1 = vpop.f32.mrf.mxu1 }
 0x4ba   : > { %v8069_v11 = vadd.f32 %v15670_v50, %v7990_v52  ;;  %v7985_v54 = vadd.f32 %v7984_v53, %v7909_v47  ;;  %v7841_v40 = vmax.f32 %v7839_v32, 0.0  ;;  %v14364_v47 = vld [vmem:[%s16588_s21 + $0xa8] sm:$0x3f]  ;;  %v14381_v50 = vld [vmem:[%s16588_s21 + $0xb8] sm:$0x3f] }
 0x4bb   : > { %v15675_v3 = vpop.f32.mrf.mxu0  ;;  %v15680_v55 = vpop.f32.mrf.mxu1  ;;  %v14393_v52 = vld [vmem:[%s16588_s21 + $0xba] sm:$0x3f] }
 0x4bc   : > { %v8068_v57 = vadd.f32 %v8059_v1, %v7985_v54  ;;  %v8146_v5 = vadd.f32 %v15675_v3, %v8069_v11  ;;  %v14400_v53 = vld [vmem:[%s18502_s1 + $0x18] sm:$0x7]  ;;  %v14406_v1 = vld [vmem:[%s18502_s1 + $0x1c] sm:$0x7]  ;;  %v14404_v11 = vld [vmem:[%s16588_s21 + $0xc1] sm:$0xff] }
 0x4bd   : > { %v8136_v59 = vpop.f32.mrf.mxu0  ;;  %v8213_v8 = vpop.f32.mrf.mxu1  ;;  %v14399_v54 = vld [vmem:[%s16588_s21 + $0xc8] sm:$0x3f] }
 0x4be   : > { %v8223_v12 = vadd.f32 %v15680_v55, %v8146_v5  ;;  %v8145_v10 = vadd.f32 %v8136_v59, %v8068_v57  ;;  %v14405_v3 = vld [vmem:[%s16588_s21 + $0xc9] sm:$0x3f]  ;;  %v14412_v55 = vld [vmem:[%s18502_s1 + $0x20] sm:$0x7]  ;;  %v14444_v5 = vld [vmem:[%s16588_s21 + $0xd2] sm:$0xff] }
 0x4bf   : > { %v15685_v2 = vpop.f32.mrf.mxu0  ;;  %v15690_v15 = vpop.f32.mrf.mxu1  ;;  %v14411_v57 = vld [vmem:[%s16588_s21 + $0xca] sm:$0x3f]  ;;  %v14440_v59 = vld [vmem:[%s16588_s21 + $0xd9] sm:$0x3f] }
 0x4c0   : > { %v8222_v17 = vadd.f32 %v8213_v8, %v8145_v10  ;;  %v8300_v6 = vadd.f32 %v15685_v2, %v8223_v12  ;;  %v14445_v8 = vld [vmem:[%s16588_s21 + $0xda] sm:$0x3f] }
 0x4c1   : > { %v8290_v25 = vpop.f32.mrf.mxu0  ;;  %v8376_v7 = vpop.f32.mrf.mxu1 }
 0x4c2   : > { %v8386_v30 = vadd.f32 %v15690_v15, %v8300_v6  ;;  %v8299_v13 = vadd.f32 %v8290_v25, %v8222_v17 }
 0x4c3   : > { %v15695_v14 = vpop.f32.mrf.mxu0  ;;  %v15700_v16 = vpop.f32.mrf.mxu1 }
 0x4c4   : > { %v8385_v18 = vadd.f32 %v8376_v7, %v8299_v13  ;;  %v8471_v19 = vadd.f32 %v15695_v14, %v8386_v30 }
 0x4c5   : > { %v8461_v22 = vpop.f32.mrf.mxu0  ;;  %v8546_v28 = vpop.f32.mrf.mxu1 }
 0x4c6   : > { %v8556_v24 = vadd.f32 %v15700_v16, %v8471_v19  ;;  %v8470_v26 = vadd.f32 %v8461_v22, %v8385_v18 }
 0x4c8   : > { %v8558_v34 = vadd.f32 %v17268_v31, %v8556_v24  ;;  %v8555_v35 = vadd.f32 %v8546_v28, %v8470_v26 }
 0x4ca   : > { %v8560_v38 = vmax.f32 %v8558_v34, 0.0  ;;  %v8557_v39 = vadd.f32 %v17268_v31, %v8555_v35 }
 0x4cc   : > { %v8562_v41 = vmax.f32 %v7842_v36, %v8560_v38  ;;  %v8559_v42 = vmax.f32 %v8557_v39, 0.0 }
 0x4ce   : > { %v8561_v43 = vmax.f32 %v7841_v40, %v8559_v42  ;;  %15702 = vmatpush3.msk.msra.mxu0 %vm1887_vm3, %v8562_v41  ;;  %15709 = vmatpush3.msk.msra.mxu1 %vm1887_vm3, %v8562_v41 }
 0x4cf   : > { %15703 = vmatprep.subr.mxu0 %v18511_v33  ;;  %15710 = vmatprep.subr.mxu1 %v18511_v33 }
 0x4d0   : > { %15704 = vmatpush3.msra.mxu0 %v8561_v43  ;;  %15711 = vmatpush3.msra.mxu1 %v8561_v43 }
 0x4d1   : > { %15706 = vmatmul.mubr.msk.f32.vlgmr.msra.gmra.mxu0 %vm1883_vm6, %v16750_v61  ;;  %15713 = vmatmul.mubr.msk.f32.vlgmr.msra.gmra.mxu1 %vm1883_vm6, %v16753_v62 }
 0x4d2   : > { %15715 = vmatprep.subr.msk.mxu0 %vm358_vm0, %v14367_v44  ;;  %15720 = vmatprep.subr.msk.mxu1 %vm358_vm0, %v17456_v45 }
 0x4d3   : > { %15716 = vmatpush3.msk.msra.mxu0 %vm358_vm0, %v14367_v44  ;;  %15717 = vmatprep.mubr.msk.f32.mxu0 %vm351_vm1, %v17350_v58  ;;  %v14375_v58 = vld [vmem:[%s16588_s21 + $0xaa] sm:$0x3f] }
 0x4d4   : > { %15721 = vmatpush3.msk.msra.mxu1 %vm358_vm0, %v17456_v45  ;;  %15722 = vmatprep.mubr.msk.f32.mxu1 %vm351_vm1, %v17345_v20  ;;  %v14388_v20 = vld [vmem:[%s18502_s1 + $0x10] sm:$0x7] }
 0x4d5   : > { %15718 = vmatmul.mubr.msk.f32.vlgmr.msra.gmra.mxu0 %vm351_vm1, %v14366_v46  ;;  %15723 = vmatmul.mubr.msk.f32.vlgmr.msra.gmra.mxu1 %vm351_vm1, %v14364_v47 }
 0x4d6   : > { %15725 = vmatprep.subr.msk.mxu0 %vm358_vm0, %v14376_v48  ;;  %15730 = vmatprep.subr.msk.mxu1 %vm358_vm0, %v14382_v49 }
 0x4d7   : > { %15726 = vmatpush3.msk.msra.mxu0 %vm358_vm0, %v14376_v48  ;;  %15727 = vmatprep.mubr.msk.f32.mxu0 %vm351_vm1, %v17366_v60  ;;  %v14387_v60 = vld [vmem:[%s16588_s21 + $0xb9] sm:$0x3f] }
 0x4d8   : > { %15731 = vmatpush3.msk.msra.mxu1 %vm358_vm0, %v14382_v49  ;;  %15732 = vmatprep.mubr.msk.f32.mxu1 %vm351_vm1, %v17404_v27 }
 0x4d9   : > { %15728 = vmatmul.mubr.msk.f32.vlgmr.msra.gmra.mxu0 %vm351_vm1, %v14375_v58  ;;  %15733 = vmatmul.mubr.msk.f32.vlgmr.msra.gmra.mxu1 %vm351_vm1, %v14381_v50 }
 0x4da   : > { %15735 = vmatprep.subr.msk.mxu0 %vm358_vm0, %v14388_v20  ;;  %15740 = vmatprep.subr.msk.mxu1 %vm358_vm0, %v14394_v51 }
 0x4db   : > { %15736 = vmatpush3.msk.msra.mxu0 %vm358_vm0, %v14388_v20  ;;  %15737 = vmatprep.mubr.msk.f32.mxu0 %vm351_vm1, %v17416_v21 }
 0x4dc   : > { %15741 = vmatpush3.msk.msra.mxu1 %vm358_vm0, %v14394_v51  ;;  %15742 = vmatprep.mubr.msk.f32.mxu1 %vm351_vm1, %v17421_v0 }
 0x4dd   : > { %15738 = vmatmul.mubr.msk.f32.vlgmr.msra.gmra.mxu0 %vm351_vm1, %v14387_v60  ;;  %15743 = vmatmul.mubr.msk.f32.vlgmr.msra.gmra.mxu1 %vm351_vm1, %v14393_v52 }
 0x4de   : > { %15745 = vmatprep.subr.msk.mxu0 %vm358_vm0, %v14400_v53  ;;  %15750 = vmatprep.subr.msk.mxu1 %vm358_vm0, %v14406_v1 }
 0x4df   : > { %15746 = vmatpush3.msk.msra.mxu0 %vm358_vm0, %v14400_v53  ;;  %15747 = vmatprep.mubr.msk.f32.mxu0 %vm351_vm1, %v14398_v37 }
 0x4e0   : > { %15751 = vmatpush3.msk.msra.mxu1 %vm358_vm0, %v14406_v1  ;;  %15752 = vmatprep.mubr.msk.f32.mxu1 %vm351_vm1, %v14404_v11 }
 0x4e1   : > { %15748 = vmatmul.mubr.msk.f32.vlgmr.msra.gmra.mxu0 %vm351_vm1, %v14399_v54  ;;  %15753 = vmatmul.mubr.msk.f32.vlgmr.msra.gmra.mxu1 %vm351_vm1, %v14405_v3 }
 0x4e2   : > { %15755 = vmatprep.subr.msk.mxu0 %vm358_vm0, %v14412_v55  ;;  %15760 = vmatprep.subr.msk.mxu1 %vm358_vm0, %v14367_v44 }
 0x4e3   : > { %15756 = vmatpush3.msk.msra.mxu0 %vm358_vm0, %v14412_v55  ;;  %15757 = vmatprep.mubr.msk.f32.mxu0 %vm351_vm1, %v14410_v56 }
 0x4e4   : > { %15761 = vmatpush3.msk.msra.mxu1 %vm358_vm0, %v14367_v44  ;;  %15762 = vmatprep.mubr.msk.f32.mxu1 %vm351_vm1, %v17416_v21  ;;  %v14435_v21 = vld [vmem:[%s16588_s21 + $0xd8] sm:$0x3f] }
 0x4e5   : > { %15758 = vmatmul.mubr.msk.f32.vlgmr.msra.gmra.mxu0 %vm351_vm1, %v14411_v57  ;;  %15763 = vmatmul.mubr.msk.f32.vlgmr.msra.gmra.mxu1 %vm351_vm1, %v14387_v60 }
 0x4e6   : > { %15765 = vmatprep.subr.msk.mxu0 %vm358_vm0, %v17456_v45  ;;  %15770 = vmatprep.subr.msk.mxu1 %vm358_vm0, %v14376_v48 }
 0x4e7   : > { %15766 = vmatpush3.msk.msra.mxu0 %vm358_vm0, %v17456_v45  ;;  %15767 = vmatprep.mubr.msk.f32.mxu0 %vm351_vm1, %v17404_v27  ;;  %v14434_v27 = vld [vmem:[%s16588_s21 + $0xd0] sm:$0xff] }
 0x4e8   : > { %15771 = vmatpush3.msk.msra.mxu1 %vm358_vm0, %v14376_v48  ;;  %15772 = vmatprep.mubr.msk.f32.mxu1 %vm351_vm1, %v17421_v0  ;;  %v14439_v0 = vld [vmem:[%s16588_s21 + $0xd1] sm:$0xff]  ;;  %s18466_s21 = scalar_lea.hbm %s18510_s9, %s14590_s22 }
 0x4e9   : > { %15768 = vmatmul.mubr.msk.f32.vlgmr.msra.gmra.mxu0 %vm351_vm1, %v14381_v50  ;;  %15773 = vmatmul.mubr.msk.f32.vlgmr.msra.gmra.mxu1 %vm351_vm1, %v14393_v52 }
 0x4ea   : > { %15775 = vmatprep.subr.msk.mxu0 %vm358_vm0, %v14382_v49  ;;  %15780 = vmatprep.subr.msk.mxu1 %vm358_vm0, %v14388_v20 }
 0x4eb   : > { %15776 = vmatpush3.msk.msra.mxu0 %vm358_vm0, %v14382_v49  ;;  %15777 = vmatprep.mubr.msk.f32.mxu0 %vm351_vm1, %v14398_v37 }
 0x4ec   : > { %15781 = vmatpush3.msk.msra.mxu1 %vm358_vm0, %v14388_v20  ;;  %15782 = vmatprep.mubr.msk.f32.mxu1 %vm351_vm1, %v14404_v11 }
 0x4ed   : > { %15778 = vmatmul.mubr.msk.f32.vlgmr.msra.gmra.mxu0 %vm351_vm1, %v14399_v54  ;;  %15783 = vmatmul.mubr.msk.f32.vlgmr.msra.gmra.mxu1 %vm351_vm1, %v14405_v3 }
 0x4ee   : > { %15785 = vmatprep.subr.msk.mxu0 %vm358_vm0, %v14394_v51  ;;  %15790 = vmatprep.subr.msk.mxu1 %vm358_vm0, %v14400_v53 }
 0x4ef   : > { %15786 = vmatpush3.msk.msra.mxu0 %vm358_vm0, %v14394_v51  ;;  %15787 = vmatprep.mubr.msk.f32.mxu0 %vm351_vm1, %v14410_v56 }
 0x4f0   : > { %15791 = vmatpush3.msk.msra.mxu1 %vm358_vm0, %v14400_v53  ;;  %15792 = vmatprep.mubr.msk.f32.mxu1 %vm351_vm1, %v14434_v27 }
 0x4f1   : > { %15788 = vmatmul.mubr.msk.f32.vlgmr.msra.gmra.mxu0 %vm351_vm1, %v14411_v57  ;;  %15793 = vmatmul.mubr.msk.f32.vlgmr.msra.gmra.mxu1 %vm351_vm1, %v14435_v21 }
 0x4f2   : > { %15795 = vmatprep.subr.msk.mxu0 %vm358_vm0, %v14406_v1  ;;  %15800 = vmatprep.subr.msk.mxu1 %vm358_vm0, %v14412_v55 }
 0x4f3   : > { %15796 = vmatpush3.msk.msra.mxu0 %vm358_vm0, %v14406_v1  ;;  %15797 = vmatprep.mubr.msk.f32.mxu0 %vm351_vm1, %v14439_v0 }
 0x4f4   : > { %15801 = vmatpush3.msk.msra.mxu1 %vm358_vm0, %v14412_v55  ;;  %15802 = vmatprep.mubr.msk.f32.mxu1 %vm351_vm1, %v14444_v5 }
 0x4f5   : > { %15798 = vmatmul.mubr.msk.f32.vlgmr.msra.gmra.mxu0 %vm351_vm1, %v14440_v59  ;;  %15803 = vmatmul.mubr.msk.f32.vlgmr.msra.gmra.mxu1 %vm351_vm1, %v14445_v8 }
 0x4f6   : > { %15805 = vmatprep.subr.mxu0 %v18511_v33  ;;  %15812 = vmatprep.subr.mxu1 %v18511_v33 }
 0x4f7   : > { %15809 = vmatprep.mubr.msk.f32.mxu0 %vm16451_vm2, %v18511_v33  ;;  %15816 = vmatprep.mubr.msk.f32.mxu1 %vm16451_vm2, %v18511_v33 }
 0x591   : > { %v8632_v63 = vpop.f32.mrf.mxu0  ;;  %v8702_v12 = vpop.f32.mrf.mxu1 }
 0x592   : > { %v8706_v10 = vmax.f32 %v8632_v63, %v8702_v12 }
 0x593   : > { %v15707_v2 = vpop.f32.mrf.mxu0  ;;  %v15714_v15 = vpop.f32.mrf.mxu1 }
 0x594   : > { %8708 = vst.msk [vmem:[#allocation2 + $0x20] sm:$0x7f] %vm2035_vm7, %v8706_v10 }
 0x595   : > { %v15719_v4 = vpop.f32.mrf.mxu0  ;;  %v15724_v17 = vpop.f32.mrf.mxu1 }
 0x596   : > { %v8880_v30 = vadd.f32 %v15724_v17, %v15719_v4 }
 0x597   : > { %v8790_v6 = vpop.f32.mrf.mxu0  ;;  %v8874_v25 = vpop.f32.mrf.mxu1 }
 0x598   : > { %v8875_v16 = vadd.f32 %v8874_v25, %v8790_v6 }
 0x599   : > { %v15729_v7 = vpop.f32.mrf.mxu0  ;;  %v15734_v9 = vpop.f32.mrf.mxu1 }
 0x59a   : > { %v8971_v29 = vadd.f32 %v15729_v7, %v8880_v30 }
 0x59b   : > { %v8961_v13 = vpop.f32.mrf.mxu0  ;;  %v9050_v14 = vpop.f32.mrf.mxu1 }
 0x59c   : > { %v8970_v22 = vadd.f32 %v8961_v13, %v8875_v16  ;;  %v9060_v26 = vadd.f32 %v15734_v9, %v8971_v29 }
 0x59d   : > { %v15739_v18 = vpop.f32.mrf.mxu0  ;;  %v15744_v19 = vpop.f32.mrf.mxu1 }
 0x59e   : > { %v9059_v34 = vadd.f32 %v9050_v14, %v8970_v22  ;;  %v9149_v38 = vadd.f32 %v15739_v18, %v9060_v26 }
 0x59f   : > { %v9139_v23 = vpop.f32.mrf.mxu0  ;;  %v9228_v24 = vpop.f32.mrf.mxu1 }
 0x5a0   : > { %v9148_v41 = vadd.f32 %v9139_v23, %v9059_v34  ;;  %v9238_v44 = vadd.f32 %v15744_v19, %v9149_v38  ;;  %v17620_v34 = vld [vmem:[%s18504_s3 + $0x30] sm:$0xff]  ;;  %v17639_v38 = vld [vmem:[%s18504_s3 + $0x8] sm:$0xff] }
 0x5a1   : > { %v15749_v28 = vpop.f32.mrf.mxu0  ;;  %v15754_v32 = vpop.f32.mrf.mxu1 }
 0x5a2   : > { %v9237_v47 = vadd.f32 %v9228_v24, %v9148_v41  ;;  %v9328_v50 = vadd.f32 %v15749_v28, %v9238_v44  ;;  %v10382_v41 = vld [vmem:[#allocation2 + $0x1] sm:$0x1f]  ;;  %v17673_v44 = vld [vmem:[%s18504_s3 + $0x78] sm:$0xff] }
 0x5a3   : > { %v9318_v35 = vpop.f32.mrf.mxu0  ;;  %v9407_v36 = vpop.f32.mrf.mxu1 }
 0x5a4   : > { %v9327_v53 = vadd.f32 %v9318_v35, %v9237_v47  ;;  %v9417_v3 = vadd.f32 %v15754_v32, %v9328_v50  ;;  %v17604_v32 = vld [vmem:[%s18504_s3 + $0x38] sm:$0xff]  ;;  %v17625_v35 = vld [vmem:[%s18504_s3 + $0x10] sm:$0xff]  ;;  %v17696_v47 = vld [vmem:[%s18504_s3 + $0x48] sm:$0xff] }
 0x5a5   : > { %v15759_v39 = vpop.f32.mrf.mxu0  ;;  %v15764_v40 = vpop.f32.mrf.mxu1  ;;  %v10535_v50 = vld [vmem:[#allocation2 + $0x2] sm:$0x1f] }
 0x5a6   : > { %v9416_v21 = vadd.f32 %v9407_v36, %v9327_v53  ;;  %v9506_v63 = vadd.f32 %v15759_v39, %v9417_v3  ;;  %v17634_v36 = vld [vmem:[%s18504_s3 + $0x28] sm:$0xff]  ;;  %v17648_v39 = vld [vmem:[%s18504_s3 + $0x20] sm:$0xff]  ;;  %v17752_v53 = vld [vmem:[%s18504_s3 + $0xb0] sm:$0xff] }
 0x5a7   : > { %v9496_v42 = vpop.f32.mrf.mxu0  ;;  %v9577_v43 = vpop.f32.mrf.mxu1  ;;  %v10695_v3 = vld [vmem:[#allocation2 + $0x9] sm:$0x1f] }
 0x5a8   : > { %v9505_v4 = vadd.f32 %v9496_v42, %v9416_v21  ;;  %v9508_v7 = vadd.f32 %v17268_v31, %v9506_v63  ;;  %v10377_v42 = vld [vmem:[#allocation2] sm:$0x1f]  ;;  %v17817_v21 = vld [vmem:[%s18504_s3 + $0xf0] sm:$0xff] }
 0x5a9   : > { %v15769_v45 = vpop.f32.mrf.mxu0  ;;  %v15774_v46 = vpop.f32.mrf.mxu1  ;;  %v17857_v63 = vld [vmem:[#allocation2 + $0x10] sm:$0x1f] }
 0x5aa   : > { %v9658_v48 = vadd.f32 %v15769_v45, %v15764_v40  ;;  %v9507_v14 = vadd.f32 %v17268_v31, %v9505_v4  ;;  %v9510_v18 = vmax.f32 %v9508_v7, 0.0  ;;  %v17655_v40 = vld [vmem:[%s18504_s3] sm:$0xff]  ;;  %v17682_v45 = vld [vmem:[%s18504_s3 + $0x50] sm:$0xff]  ;;  %v11677_v7 = vld [vmem:[#allocation2 + $0x1a] sm:$0x1f] }
 0x5ab   : > { %v9652_v49 = vpop.f32.mrf.mxu0  ;;  %v9727_v58 = vpop.f32.mrf.mxu1  ;;  %v17893_v4 = vld [vmem:[%s18504_s3 + $0x100] sm:$0xff] }
 0x5ac   : > { %v9737_v20 = vadd.f32 %v15774_v46, %v9658_v48  ;;  %v9653_v51 = vadd.f32 %v9652_v49, %v9577_v43  ;;  %v9509_v23 = vmax.f32 %v9507_v14, 0.0  ;;  %v17668_v43 = vld [vmem:[%s18504_s3 + $0x58] sm:$0xff]  ;;  %v17687_v46 = vld [vmem:[%s18504_s3 + $0x70] sm:$0xff]  ;;  %v17701_v48 = vld [vmem:[%s18504_s3 + $0x68] sm:$0xff]  ;;  %18532 = vst [vmem:[#allocation12_spill] sm:$0xff] %v17893_v4 }
 0x5ad   : > { %v15779_v60 = vpop.f32.mrf.mxu0  ;;  %v15784_v52 = vpop.f32.mrf.mxu1  ;;  %v17710_v49 = vld [vmem:[%s18504_s3 + $0x40] sm:$0xff] }
 0x5ae   : > { %v9736_v1 = vadd.f32 %v9727_v58, %v9653_v51  ;;  %v9814_v37 = vadd.f32 %v15779_v60, %v9737_v20  ;;  %v17717_v58 = vld [vmem:[%s18504_s3 + $0x60] sm:$0xff]  ;;  %v17727_v20 = vld [vmem:[#allocation2 + $0x8] sm:$0x1f]  ;;  %v17732_v51 = vld [vmem:[%s18504_s3 + $0x98] sm:$0xff] }
 0x5af   : > { %v9804_v11 = vpop.f32.mrf.mxu0  ;;  %v9881_v54 = vpop.f32.mrf.mxu1  ;;  %v17737_v60 = vld [vmem:[%s18504_s3 + $0xb8] sm:$0xff] }
 0x5b0   : > { %v9891_v55 = vadd.f32 %v15784_v52, %v9814_v37  ;;  %v9813_v56 = vadd.f32 %v9804_v11, %v9736_v1  ;;  %v17747_v52 = vld [vmem:[%s18504_s3 + $0x90] sm:$0xff]  ;;  %v17761_v1 = vld [vmem:[%s18504_s3 + $0x88] sm:$0xff]  ;;  %v17775_v11 = vld [vmem:[%s18504_s3 + $0x80] sm:$0xff] }
 0x5b1   : > { %v15789_v57 = vpop.f32.mrf.mxu0  ;;  %v15794_v27 = vpop.f32.mrf.mxu1  ;;  %v17766_v37 = vld [vmem:[%s18504_s3 + $0xa8] sm:$0xff] }
 0x5b2   : > { %v9890_v0 = vadd.f32 %v9881_v54, %v9813_v56  ;;  %v9968_v5 = vadd.f32 %v15789_v57, %v9891_v55  ;;  %v17782_v54 = vld [vmem:[%s18504_s3 + $0xa0] sm:$0xff]  ;;  %v17792_v55 = vld [vmem:[#allocation2 + $0xa] sm:$0x1f]  ;;  %v17797_v56 = vld [vmem:[%s18504_s3 + $0xd8] sm:$0xff] }
 0x5b3   : > { %v9958_v59 = vpop.f32.mrf.mxu0  ;;  %v10044_v8 = vpop.f32.mrf.mxu1  ;;  %v17802_v57 = vld [vmem:[%s18504_s3 + $0xf8] sm:$0xff] }
 0x5b4   : > { %v10054_v12 = vadd.f32 %v15794_v27, %v9968_v5  ;;  %v9967_v10 = vadd.f32 %v9958_v59, %v9890_v0  ;;  %v17812_v27 = vld [vmem:[%s18504_s3 + $0xd0] sm:$0xff]  ;;  %v17826_v0 = vld [vmem:[%s18504_s3 + $0xc8] sm:$0xff]  ;;  %v17840_v59 = vld [vmem:[%s18504_s3 + $0xc0] sm:$0xff] }
 0x5b5   : > { %v15799_v2 = vpop.f32.mrf.mxu0  ;;  %v15804_v15 = vpop.f32.mrf.mxu1  ;;  %v17831_v5 = vld [vmem:[%s18504_s3 + $0xe8] sm:$0xff]  ;;  %18527 = vst [vmem:[#allocation7_spill] sm:$0xff] %v17840_v59 }
 0x5b6   : > { %v10053_v17 = vadd.f32 %v10044_v8, %v9967_v10  ;;  %v10139_v6 = vadd.f32 %v15799_v2, %v10054_v12  ;;  %v17847_v8 = vld [vmem:[%s18504_s3 + $0xe0] sm:$0xff]  ;;  %v17859_v12 = vld [vmem:[#allocation2 + $0x11] sm:$0x1f]  ;;  %v17864_v10 = vld [vmem:[%s18504_s3 + $0x118] sm:$0xff] }
 0x5b7   : > { %v10129_v25 = vpop.f32.mrf.mxu0  ;;  %v10214_v13 = vpop.f32.mrf.mxu1  ;;  %18528 = vst [vmem:[#allocation8_spill] sm:$0xff] %v17847_v8  ;;  %18529 = vst [vmem:[#allocation9_spill] sm:$0xff] %v17864_v10  ;;  %v17875_v2 = vld [vmem:[%s18504_s3 + $0x110] sm:$0xff] }
 0x5b8   : > { %v10224_v9 = vadd.f32 %v15804_v15, %v10139_v6  ;;  %v10138_v30 = vadd.f32 %v10129_v25, %v10053_v17  ;;  %18530 = vst [vmem:[#allocation10_spill] sm:$0xff] %v17875_v2  ;;  %v17884_v15 = vld [vmem:[%s18504_s3 + $0x108] sm:$0xff]  ;;  %v11015_v17 = vld [vmem:[#allocation2 + $0x12] sm:$0x1f]  ;;  %v11527_v6 = vld [vmem:[#allocation2 + $0x18] sm:$0x1f] }
 0x5b9   : > { %18531 = vst [vmem:[#allocation11_spill] sm:$0xff] %v17884_v15  ;;  %v11602_v25 = vld [vmem:[#allocation2 + $0x19] sm:$0x1f] }
 0x5ba   : > { %v10226_v16 = vadd.f32 %v17268_v31, %v10224_v9  ;;  %v10223_v29 = vadd.f32 %v10214_v13, %v10138_v30 }
 0x5bc   : > { %v10228_v19 = vmax.f32 %v10226_v16, 0.0  ;;  %v10225_v22 = vadd.f32 %v17268_v31, %v10223_v29  ;;  %v17609_v31 = vld [vmem:[%s18504_s3 + $0x18] sm:$0xff] }
 0x5be   : > { %v10230_v24 = vmax.f32 %v9510_v18, %v10228_v19  ;;  %v10227_v26 = vmax.f32 %v10225_v22, 0.0 }
 0x5c0   : > { %v10229_v28 = vmax.f32 %v9509_v23, %v10227_v26  ;;  %15806 = vmatpush3.msk.msra.mxu0 %vm1887_vm3, %v10230_v24  ;;  %15813 = vmatpush3.msk.msra.mxu1 %vm1887_vm3, %v10230_v24 }
 0x5c1   : > { %15807 = vmatprep.subr.mxu0 %v18511_v33  ;;  %15814 = vmatprep.subr.mxu1 %v18511_v33 }
 0x5c2   : > { %15808 = vmatpush3.msra.mxu0 %v10229_v28  ;;  %15815 = vmatpush3.msra.mxu1 %v10229_v28 }
 0x5c3   : > { %15810 = vmatmul.mubr.msk.f32.vlgmr.msra.gmra.mxu0 %vm1883_vm6, %v16750_v61  ;;  %15819 = vmatprep.subr.mxu0 %v18511_v33 }
 0x5c4   : > { %15830 = vmatprep.subr.mxu1 %v18511_v33  ;;  %15817 = vmatmul.mubr.msk.f32.vlgmr.msra.gmra.mxu1 %vm1883_vm6, %v16753_v62 }
 0x5c5   : > { %15820 = vmatpush3.msra.mxu0 %v17604_v32  ;;  %15831 = vmatpush3.msra.mxu1 %v17609_v31 }
 0x5c6   : > { %15821 = vmatprep.subr.mxu0 %v18511_v33  ;;  %15832 = vmatprep.subr.mxu1 %v18511_v33 }
 0x5c7   : > { %15822 = vmatpush3.msra.mxu0 %v17620_v34  ;;  %15833 = vmatpush3.msra.mxu1 %v17625_v35 }
 0x5c8   : > { %15823 = vmatprep.subr.mxu0 %v18511_v33  ;;  %15834 = vmatprep.subr.mxu1 %v18511_v33 }
 0x5c9   : > { %15824 = vmatpush3.msra.mxu0 %v17634_v36  ;;  %15835 = vmatpush3.msra.mxu1 %v17639_v38 }
 0x5ca   : > { %15825 = vmatprep.subr.mxu0 %v18511_v33  ;;  %15836 = vmatprep.subr.mxu1 %v18511_v33 }
 0x5cb   : > { %15826 = vmatpush3.msra.mxu0 %v17648_v39  ;;  %15827 = vmatprep.mubr.msk.f32.mxu0 %vm16451_vm2, %v18511_v33 }
 0x5cc   : > { %15837 = vmatpush3.msra.mxu1 %v17655_v40  ;;  %15838 = vmatprep.mubr.msk.f32.mxu1 %vm16451_vm2, %v18511_v33 }
 0x5cd   : > { %15828 = vmatmul.mubr.msk.f32.vlgmr.msra.gmra.mxu0 %vm10388_vm8, %v10382_v41  ;;  %15839 = vmatmul.mubr.msk.f32.vlgmr.msra.gmra.mxu1 %vm10388_vm8, %v10377_v42 }
 0x5ce   : > { %15841 = vmatprep.subr.mxu0 %v18511_v33  ;;  %15852 = vmatprep.subr.mxu1 %v18511_v33 }
 0x5cf   : > { %15842 = vmatpush3.msra.mxu0 %v17668_v43  ;;  %15853 = vmatpush3.msra.mxu1 %v17673_v44 }
 0x5d0   : > { %15843 = vmatprep.subr.mxu0 %v18511_v33  ;;  %15854 = vmatprep.subr.mxu1 %v18511_v33 }
 0x5d1   : > { %15844 = vmatpush3.msra.mxu0 %v17682_v45  ;;  %15855 = vmatpush3.msra.mxu1 %v17687_v46 }
 0x5d2   : > { %15845 = vmatprep.subr.mxu0 %v18511_v33  ;;  %15856 = vmatprep.subr.mxu1 %v18511_v33 }
 0x5d3   : > { %15846 = vmatpush3.msra.mxu0 %v17696_v47  ;;  %15857 = vmatpush3.msra.mxu1 %v17701_v48 }
 0x5d4   : > { %15847 = vmatprep.subr.mxu0 %v18511_v33  ;;  %15858 = vmatprep.subr.mxu1 %v18511_v33 }
 0x5d5   : > { %15848 = vmatpush3.msra.mxu0 %v17710_v49  ;;  %15849 = vmatprep.mubr.msk.f32.mxu0 %vm16451_vm2, %v18511_v33 }
 0x5d6   : > { %15859 = vmatpush3.msra.mxu1 %v17717_v58  ;;  %15860 = vmatprep.mubr.msk.f32.mxu1 %vm16451_vm2, %v18511_v33 }
 0x5d7   : > { %15850 = vmatmul.mubr.msk.f32.vlgmr.msra.gmra.mxu0 %vm10388_vm8, %v10535_v50  ;;  %15861 = vmatmul.mubr.msk.f32.vlgmr.msra.gmra.mxu1 %vm10388_vm8, %v17727_v20 }
 0x5d8   : > { %15863 = vmatprep.subr.mxu0 %v18511_v33  ;;  %15874 = vmatprep.subr.mxu1 %v18511_v33 }
 0x5d9   : > { %15864 = vmatpush3.msra.mxu0 %v17732_v51  ;;  %15875 = vmatpush3.msra.mxu1 %v17737_v60 }
 0x5da   : > { %15865 = vmatprep.subr.mxu0 %v18511_v33  ;;  %15876 = vmatprep.subr.mxu1 %v18511_v33 }
 0x5db   : > { %15866 = vmatpush3.msra.mxu0 %v17747_v52  ;;  %15877 = vmatpush3.msra.mxu1 %v17752_v53 }
 0x5dc   : > { %15867 = vmatprep.subr.mxu0 %v18511_v33  ;;  %15878 = vmatprep.subr.mxu1 %v18511_v33 }
 0x5dd   : > { %15868 = vmatpush3.msra.mxu0 %v17761_v1  ;;  %15879 = vmatpush3.msra.mxu1 %v17766_v37 }
 0x5de   : > { %15869 = vmatprep.subr.mxu0 %v18511_v33  ;;  %15880 = vmatprep.subr.mxu1 %v18511_v33 }
 0x5df   : > { %15870 = vmatpush3.msra.mxu0 %v17775_v11  ;;  %15871 = vmatprep.mubr.msk.f32.mxu0 %vm16451_vm2, %v18511_v33 }
 0x5e0   : > { %15881 = vmatpush3.msra.mxu1 %v17782_v54  ;;  %15882 = vmatprep.mubr.msk.f32.mxu1 %vm16451_vm2, %v18511_v33 }
 0x5e1   : > { %15872 = vmatmul.mubr.msk.f32.vlgmr.msra.gmra.mxu0 %vm10388_vm8, %v10695_v3  ;;  %15883 = vmatmul.mubr.msk.f32.vlgmr.msra.gmra.mxu1 %vm10388_vm8, %v17792_v55 }
 0x5e2   : > { %15885 = vmatprep.subr.mxu0 %v18511_v33  ;;  %15896 = vmatprep.subr.mxu1 %v18511_v33 }
 0x5e3   : > { %15886 = vmatpush3.msra.mxu0 %v17797_v56  ;;  %15897 = vmatpush3.msra.mxu1 %v17802_v57 }
 0x5e4   : > { %15887 = vmatprep.subr.mxu0 %v18511_v33  ;;  %15898 = vmatprep.subr.mxu1 %v18511_v33 }
 0x5e5   : > { %15888 = vmatpush3.msra.mxu0 %v17812_v27  ;;  %15899 = vmatpush3.msra.mxu1 %v17817_v21 }
 0x5e6   : > { %15889 = vmatprep.subr.mxu0 %v18511_v33  ;;  %15900 = vmatprep.subr.mxu1 %v18511_v33 }
 0x5e7   : > { %15890 = vmatpush3.msra.mxu0 %v17826_v0  ;;  %15901 = vmatpush3.msra.mxu1 %v17831_v5 }
 0x5e8   : > { %15891 = vmatprep.subr.mxu0 %v18511_v33  ;;  %15902 = vmatprep.subr.mxu1 %v18511_v33 }
 0x5e9   : > { %15892 = vmatpush3.msra.mxu0 %v17840_v59  ;;  %15893 = vmatprep.mubr.msk.f32.mxu0 %vm16451_vm2, %v18511_v33 }
 0x5ea   : > { %15903 = vmatpush3.msra.mxu1 %v17847_v8  ;;  %15904 = vmatprep.mubr.msk.f32.mxu1 %vm16451_vm2, %v18511_v33 }
 0x5eb   : > { %15894 = vmatmul.mubr.msk.f32.vlgmr.msra.gmra.mxu0 %vm10388_vm8, %v17857_v63  ;;  %15905 = vmatmul.mubr.msk.f32.vlgmr.msra.gmra.mxu1 %vm10388_vm8, %v17859_v12 }
 0x5ec   : > { %15907 = vmatprep.subr.mxu0 %v18511_v33  ;;  %15918 = vmatprep.subr.mxu1 %v18511_v33 }
 0x5ed   : > { %15908 = vmatpush3.msra.mxu0 %v17864_v10  ;;  %15919 = vmatpush3.msra.mxu1 %v17604_v32 }
 0x5ee   : > { %15909 = vmatprep.subr.mxu0 %v18511_v33  ;;  %15920 = vmatprep.subr.mxu1 %v18511_v33 }
 0x5ef   : > { %15910 = vmatpush3.msra.mxu0 %v17875_v2  ;;  %15921 = vmatpush3.msra.mxu1 %v17620_v34 }
 0x5f0   : > { %15911 = vmatprep.subr.mxu0 %v18511_v33  ;;  %15922 = vmatprep.subr.mxu1 %v18511_v33 }
 0x5f1   : > { %15912 = vmatpush3.msra.mxu0 %v17884_v15  ;;  %15923 = vmatpush3.msra.mxu1 %v17634_v36 }
 0x5f2   : > { %15913 = vmatprep.subr.mxu0 %v18511_v33  ;;  %15924 = vmatprep.subr.mxu1 %v18511_v33 }
 0x5f3   : > { %15914 = vmatpush3.msra.mxu0 %v17893_v4  ;;  %15915 = vmatprep.mubr.msk.f32.mxu0 %vm16451_vm2, %v18511_v33 }
 0x5f4   : > { %15925 = vmatpush3.msra.mxu1 %v17648_v39  ;;  %15926 = vmatprep.mubr.msk.f32.mxu1 %vm16451_vm2, %v18511_v33 }
 0x5f5   : > { %15916 = vmatmul.mubr.msk.f32.vlgmr.msra.gmra.mxu0 %vm10388_vm8, %v11015_v17  ;;  %15927 = vmatmul.mubr.msk.f32.vlgmr.msra.gmra.mxu1 %vm10388_vm8, %v10695_v3 }
 0x5f6   : > { %15929 = vmatprep.subr.mxu0 %v18511_v33  ;;  %15940 = vmatprep.subr.mxu1 %v18511_v33 }
 0x5f7   : > { %15930 = vmatpush3.msra.mxu0 %v17609_v31  ;;  %15941 = vmatpush3.msra.mxu1 %v17668_v43 }
 0x5f8   : > { %15931 = vmatprep.subr.mxu0 %v18511_v33  ;;  %15942 = vmatprep.subr.mxu1 %v18511_v33 }
 0x5f9   : > { %15932 = vmatpush3.msra.mxu0 %v17625_v35  ;;  %15943 = vmatpush3.msra.mxu1 %v17682_v45 }
 0x5fa   : > { %15933 = vmatprep.subr.mxu0 %v18511_v33  ;;  %15944 = vmatprep.subr.mxu1 %v18511_v33 }
 0x5fb   : > { %15934 = vmatpush3.msra.mxu0 %v17639_v38  ;;  %15945 = vmatpush3.msra.mxu1 %v17696_v47 }
 0x5fc   : > { %15935 = vmatprep.subr.mxu0 %v18511_v33  ;;  %15946 = vmatprep.subr.mxu1 %v18511_v33 }
 0x5fd   : > { %15936 = vmatpush3.msra.mxu0 %v17655_v40  ;;  %15937 = vmatprep.mubr.msk.f32.mxu0 %vm16451_vm2, %v18511_v33 }
 0x5fe   : > { %15947 = vmatpush3.msra.mxu1 %v17710_v49  ;;  %15948 = vmatprep.mubr.msk.f32.mxu1 %vm16451_vm2, %v18511_v33 }
 0x5ff   : > { %15938 = vmatmul.mubr.msk.f32.vlgmr.msra.gmra.mxu0 %vm10388_vm8, %v17727_v20  ;;  %15949 = vmatmul.mubr.msk.f32.vlgmr.msra.gmra.mxu1 %vm10388_vm8, %v17792_v55 }
 0x600   : > { %15951 = vmatprep.subr.mxu0 %v18511_v33  ;;  %15962 = vmatprep.subr.mxu1 %v18511_v33 }
 0x601   : > { %15952 = vmatpush3.msra.mxu0 %v17673_v44  ;;  %15963 = vmatpush3.msra.mxu1 %v17732_v51 }
 0x602   : > { %15953 = vmatprep.subr.mxu0 %v18511_v33  ;;  %15964 = vmatprep.subr.mxu1 %v18511_v33 }
 0x603   : > { %15954 = vmatpush3.msra.mxu0 %v17687_v46  ;;  %15965 = vmatpush3.msra.mxu1 %v17747_v52 }
 0x604   : > { %15955 = vmatprep.subr.mxu0 %v18511_v33  ;;  %15966 = vmatprep.subr.mxu1 %v18511_v33 }
 0x605   : > { %15956 = vmatpush3.msra.mxu0 %v17701_v48  ;;  %15967 = vmatpush3.msra.mxu1 %v17761_v1 }
 0x606   : > { %15957 = vmatprep.subr.mxu0 %v18511_v33  ;;  %15968 = vmatprep.subr.mxu1 %v18511_v33 }
 0x607   : > { %15958 = vmatpush3.msra.mxu0 %v17717_v58  ;;  %15959 = vmatprep.mubr.msk.f32.mxu0 %vm16451_vm2, %v18511_v33 }
 0x608   : > { %15969 = vmatpush3.msra.mxu1 %v17775_v11  ;;  %15970 = vmatprep.mubr.msk.f32.mxu1 %vm16451_vm2, %v18511_v33 }
 0x609   : > { %15960 = vmatmul.mubr.msk.f32.vlgmr.msra.gmra.mxu0 %vm10388_vm8, %v17857_v63  ;;  %15971 = vmatmul.mubr.msk.f32.vlgmr.msra.gmra.mxu1 %vm10388_vm8, %v17859_v12 }
 0x60a   : > { %15973 = vmatprep.subr.mxu0 %v18511_v33  ;;  %15984 = vmatprep.subr.mxu1 %v18511_v33 }
 0x60b   : > { %15974 = vmatpush3.msra.mxu0 %v17737_v60  ;;  %15985 = vmatpush3.msra.mxu1 %v17797_v56 }
 0x60c   : > { %15975 = vmatprep.subr.mxu0 %v18511_v33  ;;  %15986 = vmatprep.subr.mxu1 %v18511_v33 }
 0x60d   : > { %15976 = vmatpush3.msra.mxu0 %v17752_v53  ;;  %15987 = vmatpush3.msra.mxu1 %v17812_v27 }
 0x60e   : > { %15977 = vmatprep.subr.mxu0 %v18511_v33  ;;  %15988 = vmatprep.subr.mxu1 %v18511_v33 }
 0x60f   : > { %15978 = vmatpush3.msra.mxu0 %v17766_v37  ;;  %15989 = vmatpush3.msra.mxu1 %v17826_v0 }
 0x610   : > { %15979 = vmatprep.subr.mxu0 %v18511_v33  ;;  %15990 = vmatprep.subr.mxu1 %v18511_v33 }
 0x611   : > { %15980 = vmatpush3.msra.mxu0 %v17782_v54  ;;  %15981 = vmatprep.mubr.msk.f32.mxu0 %vm16451_vm2, %v18511_v33 }
 0x612   : > { %15991 = vmatpush3.msra.mxu1 %v17840_v59  ;;  %15992 = vmatprep.mubr.msk.f32.mxu1 %vm16451_vm2, %v18511_v33 }
 0x613   : > { %15982 = vmatmul.mubr.msk.f32.vlgmr.msra.gmra.mxu0 %vm10388_vm8, %v11015_v17  ;;  %15993 = vmatmul.mubr.msk.f32.vlgmr.msra.gmra.mxu1 %vm10388_vm8, %v11527_v6 }
 0x614   : > { %15995 = vmatprep.subr.mxu0 %v18511_v33  ;;  %16006 = vmatprep.subr.mxu1 %v18511_v33 }
 0x615   : > { %15996 = vmatpush3.msra.mxu0 %v17802_v57  ;;  %16007 = vmatpush3.msra.mxu1 %v17864_v10 }
 0x616   : > { %15997 = vmatprep.subr.mxu0 %v18511_v33  ;;  %16008 = vmatprep.subr.mxu1 %v18511_v33 }
 0x617   : > { %15998 = vmatpush3.msra.mxu0 %v17817_v21  ;;  %16009 = vmatpush3.msra.mxu1 %v17875_v2 }
 0x618   : > { %15999 = vmatprep.subr.mxu0 %v18511_v33  ;;  %16010 = vmatprep.subr.mxu1 %v18511_v33 }
 0x619   : > { %16000 = vmatpush3.msra.mxu0 %v17831_v5  ;;  %16011 = vmatpush3.msra.mxu1 %v17884_v15 }
 0x61a   : > { %16001 = vmatprep.subr.mxu0 %v18511_v33  ;;  %16012 = vmatprep.subr.mxu1 %v18511_v33 }
 0x61b   : > { %16002 = vmatpush3.msra.mxu0 %v17847_v8  ;;  %16003 = vmatprep.mubr.msk.f32.mxu0 %vm16451_vm2, %v18511_v33 }
 0x61c   : > { %16013 = vmatpush3.msra.mxu1 %v17893_v4  ;;  %16014 = vmatprep.mubr.msk.f32.mxu1 %vm16451_vm2, %v18511_v33 }
 0x61d   : > { %16004 = vmatmul.mubr.msk.f32.vlgmr.msra.gmra.mxu0 %vm10388_vm8, %v11602_v25  ;;  %16015 = vmatmul.mubr.msk.f32.vlgmr.msra.gmra.mxu1 %vm10388_vm8, %v11677_v7 }
 0x61e   : > { %16017 = vmatprep.subr.mxu0 %v18511_v33  ;;  %16022 = vmatprep.subr.mxu1 %v18511_v33 }
 0x61f   : > { %16019 = vmatprep.mubr.msk.f32.mxu0 %vm16451_vm2, %v18511_v33  ;;  %16024 = vmatprep.mubr.msk.f32.mxu1 %vm16451_vm2, %v18511_v33 }
 0x683   : > { %v10300_v9 = vpop.f32.mrf.mxu0 }
 0x684   : > { %v10370_v30 = vpop.f32.mrf.mxu1 }
 0x685   : > { %v10374_v13 = vmax.f32 %v10300_v9, %v10370_v30  ;;  %v15811_v14 = vpop.f32.mrf.mxu0 }
 0x686   : > { %v15818_v16 = vpop.f32.mrf.mxu1 }
 0x687   : > { %10376 = vst.msk [vmem:[#allocation2 + $0x28] sm:$0x7f] %vm2035_vm7, %v10374_v13 }
 0x68d   : > { %v10458_v29 = vpop.f32.mrf.mxu0  ;;  %v10531_v18 = vpop.f32.mrf.mxu1 }
 0x68e   : > { %v10532_v19 = vadd.f32 %v10531_v18, %v10458_v29 }
 0x68f   : > { %v15829_v22 = vpop.f32.mrf.mxu0  ;;  %v15840_v23 = vpop.f32.mrf.mxu1 }
 0x697   : > { %v10610_v24 = vpop.f32.mrf.mxu0  ;;  %v10690_v26 = vpop.f32.mrf.mxu1 }
 0x698   : > { %v10614_v22 = vadd.f32 %v10610_v24, %v10532_v19  ;;  %v18009_v19 = vld [vmem:[%s18505_s4] ss:$0 sm:$0xff] }
 0x699   : > { %v15851_v28 = vpop.f32.mrf.mxu0  ;;  %v15862_v41 = vpop.f32.mrf.mxu1 }
 0x6a1   : > { %v10770_v42 = vpop.f32.mrf.mxu0  ;;  %v10850_v50 = vpop.f32.mrf.mxu1 }
 0x6a3   : > { %v15873_v20 = vpop.f32.mrf.mxu0  ;;  %v15884_v3 = vpop.f32.mrf.mxu1 }
 0x6a4   : > { %v10694_v20 = vadd.f32 %v10690_v26, %v10614_v22  ;;  %v18535_v22 = vld [vmem:[#allocation8_spill] sm:$0xff] }
 0x6a6   : > { %v10774_v3 = vadd.f32 %v10770_v42, %v10694_v20  ;;  %v18537_v20 = vld [vmem:[#allocation10_spill] sm:$0xff] }
 0x6a8   : > { %v10854_v15 = vadd.f32 %v10850_v50, %v10774_v3  ;;  %v18538_v3 = vld [vmem:[#allocation11_spill] sm:$0xff] }
 0x6ab   : > { %v10930_v55 = vpop.f32.mrf.mxu0  ;;  %v11010_v63 = vpop.f32.mrf.mxu1 }
 0x6ad   : > { %v15895_v12 = vpop.f32.mrf.mxu0  ;;  %v15906_v17 = vpop.f32.mrf.mxu1 }
 0x6b5   : > { %v11090_v6 = vpop.f32.mrf.mxu0  ;;  %v11169_v25 = vpop.f32.mrf.mxu1 }
 0x6b7   : > { %v15917_v7 = vpop.f32.mrf.mxu0  ;;  %v15928_v9 = vpop.f32.mrf.mxu1 }
 0x6b8   : > { %v10934_v9 = vadd.f32 %v10930_v55, %v10854_v15 }
 0x6bf   : > { %v11239_v30 = vpop.f32.mrf.mxu0  ;;  %v11309_v13 = vpop.f32.mrf.mxu1 }
 0x6c0   : > { %v11240_v41 = vadd.f32 %v11239_v30, %v11169_v25  ;;  %v18061_v30 = vld [vmem:[#allocation2 + $0x18] sm:$0x1f] }
 0x6c1   : > { %v15939_v14 = vpop.f32.mrf.mxu0  ;;  %v15950_v16 = vpop.f32.mrf.mxu1 }
 0x6c2   : > { %v11313_v33 = vadd.f32 %v11309_v13, %v11240_v41  ;;  %v11014_v14 = vadd.f32 %v11010_v63, %v10934_v9  ;;  %v11907_v63 = vld [vmem:[#allocation2 + $0x10] sm:$0x1f]  ;;  %v12221_v13 = vld [vmem:[#allocation2 + $0x19] sm:$0x1f]  ;;  %v18536_v41 = vld [vmem:[#allocation9_spill] sm:$0xff] }
 0x6c4   : > { %v11094_v16 = vadd.f32 %v11090_v6, %v11014_v14  ;;  %v12063_v6 = vld [vmem:[#allocation2 + $0x12] sm:$0x1f] }
 0x6c6   : > { %v11101_v50 = vadd.f32 %v18009_v19, %v11094_v16 }
 0x6c9   : > { %v11380_v29 = vpop.f32.mrf.mxu0  ;;  %v11451_v18 = vpop.f32.mrf.mxu1 }
 0x6ca   : > { %v11384_v4 = vadd.f32 %v11380_v29, %v11313_v33  ;;  %v18086_v29 = vld [vmem:[#allocation2 + $0x1a] sm:$0x1f] }
 0x6cb   : > { %v15961_v23 = vpop.f32.mrf.mxu0  ;;  %v15972_v28 = vpop.f32.mrf.mxu1 }
 0x6cc   : > { %v11455_v10 = vadd.f32 %v11451_v18, %v11384_v4  ;;  %v11102_v4 = vmax.f32 %v11101_v50, 0.0  ;;  %v18534_v18 = vld [vmem:[#allocation7_spill] sm:$0xff]  ;;  %v18111_v23 = vld [vmem:[#allocation2 + $0x20] sm:$0x1f] }
 0x6cd   : > { %v18113_v28 = vld [vmem:[#allocation2 + $0x21] sm:$0x1f] }
 0x6d3   : > { %v11522_v12 = vpop.f32.mrf.mxu0  ;;  %v11597_v17 = vpop.f32.mrf.mxu1 }
 0x6d4   : > { %v11526_v8 = vadd.f32 %v11522_v12, %v11455_v10 }
 0x6d5   : > { %v15983_v2 = vpop.f32.mrf.mxu0  ;;  %v15994_v7 = vpop.f32.mrf.mxu1 }
 0x6d6   : > { %v11601_v59 = vadd.f32 %v11597_v17, %v11526_v8  ;;  %v11912_v8 = vld [vmem:[#allocation2 + $0x11] sm:$0x1f] }
 0x6dd   : > { %v11672_v24 = vpop.f32.mrf.mxu0  ;;  %v11747_v26 = vpop.f32.mrf.mxu1 }
 0x6de   : > { %v11676_v42 = vadd.f32 %v11672_v24, %v11601_v59  ;;  %v18533_v59 = vmov 0.0  }
 0x6df   : > { %v16005_v33 = vpop.f32.mrf.mxu0  ;;  %v16016_v25 = vpop.f32.mrf.mxu1 }
 0x6e0   : > { %v11751_v2 = vadd.f32 %v11747_v26, %v11676_v42 }
 0x6e2   : > { %v11752_v15 = vadd.f32 %v18009_v19, %v11751_v2 }
 0x6e4   : > { %v11753_v10 = vmax.f32 %v11752_v15, 0.0 }
 0x6e6   : > { %v11754_v55 = vmax.f32 %v11102_v4, %v11753_v10 }
 0x6e8   : > { %16018 = vmatpush3.msk.msra.mxu0 %vm11758_vm9, %v11754_v55  ;;  %16023 = vmatpush3.msk.msra.mxu1 %vm11758_vm9, %v11754_v55 }
 0x6e9   : > { %16020 = vmatmul.mubr.msk.f32.vlgmr.msra.gmra.mxu0 %vm11755_vm10, %v16750_v61  ;;  %16027 = vmatprep.subr.mxu0 %v18533_v59 }
 0x6ea   : > { %16038 = vmatprep.subr.mxu1 %v18533_v59  ;;  %16025 = vmatmul.mubr.msk.f32.vlgmr.msra.gmra.mxu1 %vm11755_vm10, %v16753_v62 }
 0x6eb   : > { %16028 = vmatpush3.msra.mxu0 %v17604_v32  ;;  %16039 = vmatpush3.msra.mxu1 %v17609_v31 }
 0x6ec   : > { %16029 = vmatprep.subr.mxu0 %v18533_v59  ;;  %16040 = vmatprep.subr.mxu1 %v18533_v59 }
 0x6ed   : > { %16030 = vmatpush3.msra.mxu0 %v17620_v34  ;;  %16041 = vmatpush3.msra.mxu1 %v17625_v35 }
 0x6ee   : > { %16031 = vmatprep.subr.mxu0 %v18533_v59  ;;  %16042 = vmatprep.subr.mxu1 %v18533_v59 }
 0x6ef   : > { %16032 = vmatpush3.msra.mxu0 %v17634_v36  ;;  %16043 = vmatpush3.msra.mxu1 %v17639_v38 }
 0x6f0   : > { %16033 = vmatprep.subr.mxu0 %v18533_v59  ;;  %16044 = vmatprep.subr.mxu1 %v18533_v59 }
 0x6f1   : > { %16034 = vmatpush3.msra.mxu0 %v17648_v39  ;;  %16035 = vmatprep.mubr.msk.f32.mxu0 %vm16451_vm2, %v18533_v59 }
 0x6f2   : > { %16045 = vmatpush3.msra.mxu1 %v17655_v40  ;;  %16046 = vmatprep.mubr.msk.f32.mxu1 %vm16451_vm2, %v18533_v59 }
 0x6f3   : > { %16036 = vmatmul.mubr.msk.f32.vlgmr.msra.gmra.mxu0 %vm10388_vm8, %v11912_v8  ;;  %16047 = vmatmul.mubr.msk.f32.vlgmr.msra.gmra.mxu1 %vm10388_vm8, %v11907_v63 }
 0x6f4   : > { %16049 = vmatprep.subr.mxu0 %v18533_v59  ;;  %16060 = vmatprep.subr.mxu1 %v18533_v59 }
 0x6f5   : > { %16050 = vmatpush3.msra.mxu0 %v17668_v43  ;;  %16061 = vmatpush3.msra.mxu1 %v17673_v44 }
 0x6f6   : > { %16051 = vmatprep.subr.mxu0 %v18533_v59  ;;  %16062 = vmatprep.subr.mxu1 %v18533_v59 }
 0x6f7   : > { %16052 = vmatpush3.msra.mxu0 %v17682_v45  ;;  %16063 = vmatpush3.msra.mxu1 %v17687_v46 }
 0x6f8   : > { %16053 = vmatprep.subr.mxu0 %v18533_v59  ;;  %16064 = vmatprep.subr.mxu1 %v18533_v59 }
 0x6f9   : > { %16054 = vmatpush3.msra.mxu0 %v17696_v47  ;;  %16065 = vmatpush3.msra.mxu1 %v17701_v48 }
 0x6fa   : > { %16055 = vmatprep.subr.mxu0 %v18533_v59  ;;  %16066 = vmatprep.subr.mxu1 %v18533_v59 }
 0x6fb   : > { %16056 = vmatpush3.msra.mxu0 %v17710_v49  ;;  %16057 = vmatprep.mubr.msk.f32.mxu0 %vm16451_vm2, %v18533_v59 }
 0x6fc   : > { %16067 = vmatpush3.msra.mxu1 %v17717_v58  ;;  %16068 = vmatprep.mubr.msk.f32.mxu1 %vm16451_vm2, %v18533_v59 }
 0x6fd   : > { %16058 = vmatmul.mubr.msk.f32.vlgmr.msra.gmra.mxu0 %vm10388_vm8, %v12063_v6  ;;  %16069 = vmatmul.mubr.msk.f32.vlgmr.msra.gmra.mxu1 %vm10388_vm8, %v18061_v30 }
 0x6fe   : > { %16071 = vmatprep.subr.mxu0 %v18533_v59  ;;  %16082 = vmatprep.subr.mxu1 %v18533_v59 }
 0x6ff   : > { %16072 = vmatpush3.msra.mxu0 %v17732_v51  ;;  %16083 = vmatpush3.msra.mxu1 %v17737_v60 }
 0x700   : > { %16073 = vmatprep.subr.mxu0 %v18533_v59  ;;  %16084 = vmatprep.subr.mxu1 %v18533_v59 }
 0x701   : > { %16074 = vmatpush3.msra.mxu0 %v17747_v52  ;;  %16085 = vmatpush3.msra.mxu1 %v17752_v53 }
 0x702   : > { %16075 = vmatprep.subr.mxu0 %v18533_v59  ;;  %16086 = vmatprep.subr.mxu1 %v18533_v59 }
 0x703   : > { %16076 = vmatpush3.msra.mxu0 %v17761_v1  ;;  %16087 = vmatpush3.msra.mxu1 %v17766_v37 }
 0x704   : > { %16077 = vmatprep.subr.mxu0 %v18533_v59  ;;  %16088 = vmatprep.subr.mxu1 %v18533_v59 }
 0x705   : > { %16078 = vmatpush3.msra.mxu0 %v17775_v11  ;;  %16079 = vmatprep.mubr.msk.f32.mxu0 %vm16451_vm2, %v18533_v59 }
 0x706   : > { %16089 = vmatpush3.msra.mxu1 %v17782_v54  ;;  %16090 = vmatprep.mubr.msk.f32.mxu1 %vm16451_vm2, %v18533_v59 }
 0x707   : > { %16080 = vmatmul.mubr.msk.f32.vlgmr.msra.gmra.mxu0 %vm10388_vm8, %v12221_v13  ;;  %16091 = vmatmul.mubr.msk.f32.vlgmr.msra.gmra.mxu1 %vm10388_vm8, %v18086_v29 }
 0x708   : > { %16093 = vmatprep.subr.mxu0 %v18533_v59  ;;  %16104 = vmatprep.subr.mxu1 %v18533_v59 }
 0x709   : > { %16094 = vmatpush3.msra.mxu0 %v17797_v56  ;;  %16105 = vmatpush3.msra.mxu1 %v17802_v57 }
 0x70a   : > { %16095 = vmatprep.subr.mxu0 %v18533_v59  ;;  %16106 = vmatprep.subr.mxu1 %v18533_v59 }
 0x70b   : > { %16096 = vmatpush3.msra.mxu0 %v17812_v27  ;;  %16107 = vmatpush3.msra.mxu1 %v17817_v21 }
 0x70c   : > { %16097 = vmatprep.subr.mxu0 %v18533_v59  ;;  %16108 = vmatprep.subr.mxu1 %v18533_v59 }
 0x70d   : > { %16098 = vmatpush3.msra.mxu0 %v17826_v0  ;;  %16109 = vmatpush3.msra.mxu1 %v17831_v5 }
 0x70e   : > { %16099 = vmatprep.subr.mxu0 %v18533_v59  ;;  %16110 = vmatprep.subr.mxu1 %v18533_v59 }
 0x70f   : > { %16100 = vmatpush3.msra.mxu0 %v18534_v18  ;;  %16101 = vmatprep.mubr.msk.f32.mxu0 %vm16451_vm2, %v18533_v59 }
 0x710   : > { %16111 = vmatpush3.msra.mxu1 %v18535_v22  ;;  %16112 = vmatprep.mubr.msk.f32.mxu1 %vm16451_vm2, %v18533_v59 }
 0x711   : > { %16102 = vmatmul.mubr.msk.f32.vlgmr.msra.gmra.mxu0 %vm10388_vm8, %v18111_v23  ;;  %16113 = vmatmul.mubr.msk.f32.vlgmr.msra.gmra.mxu1 %vm10388_vm8, %v18113_v28 }
 0x712   : > { %16115 = vmatprep.subr.mxu0 %v18533_v59  ;;  %16126 = vmatprep.subr.mxu1 %v18533_v59 }
 0x713   : > { %16116 = vmatpush3.msra.mxu0 %v18536_v41  ;;  %16127 = vmatpush3.msra.mxu1 %v17604_v32  ;;  %v18539_v32 = vld [vmem:[#allocation12_spill] sm:$0xff] }
 0x714   : > { %16117 = vmatprep.subr.mxu0 %v18533_v59  ;;  %16128 = vmatprep.subr.mxu1 %v18533_v59 }
 0x715   : > { %16118 = vmatpush3.msra.mxu0 %v18537_v20  ;;  %16129 = vmatpush3.msra.mxu1 %v17620_v34  ;;  %v12537_v34 = vld [vmem:[#allocation2 + $0x22] sm:$0x1f] }
 0x716   : > { %16119 = vmatprep.subr.mxu0 %v18533_v59  ;;  %16130 = vmatprep.subr.mxu1 %v18533_v59 }
 0x717   : > { %16120 = vmatpush3.msra.mxu0 %v18538_v3  ;;  %16131 = vmatpush3.msra.mxu1 %v17634_v36  ;;  %v13192_v36 = vld [vmem:[#allocation2 + $0x2a] sm:$0x1f] }
 0x718   : > { %16121 = vmatprep.subr.mxu0 %v18533_v59  ;;  %16132 = vmatprep.subr.mxu1 %v18533_v59 }
 0x719   : > { %16122 = vmatpush3.msra.mxu0 %v18539_v32  ;;  %16123 = vmatprep.mubr.msk.f32.mxu0 %vm16451_vm2, %v18533_v59 }
 0x71a   : > { %16133 = vmatpush3.msra.mxu1 %v17648_v39  ;;  %16134 = vmatprep.mubr.msk.f32.mxu1 %vm16451_vm2, %v18533_v59 }
 0x71b   : > { %16124 = vmatmul.mubr.msk.f32.vlgmr.msra.gmra.mxu0 %vm10388_vm8, %v12537_v34  ;;  %16135 = vmatmul.mubr.msk.f32.vlgmr.msra.gmra.mxu1 %vm10388_vm8, %v12221_v13 }
 0x71c   : > { %16137 = vmatprep.subr.mxu0 %v18533_v59  ;;  %16148 = vmatprep.subr.mxu1 %v18533_v59 }
 0x71d   : > { %16138 = vmatpush3.msra.mxu0 %v17609_v31  ;;  %16149 = vmatpush3.msra.mxu1 %v17668_v43  ;;  %v13042_v31 = vld [vmem:[#allocation2 + $0x28] sm:$0x1f] }
 0x71e   : > { %16139 = vmatprep.subr.mxu0 %v18533_v59  ;;  %16150 = vmatprep.subr.mxu1 %v18533_v59 }
 0x71f   : > { %16140 = vmatpush3.msra.mxu0 %v17625_v35  ;;  %16151 = vmatpush3.msra.mxu1 %v17682_v45  ;;  %v13117_v35 = vld [vmem:[#allocation2 + $0x29] sm:$0x1f] }
 0x720   : > { %16141 = vmatprep.subr.mxu0 %v18533_v59  ;;  %16152 = vmatprep.subr.mxu1 %v18533_v59 }
 0x721   : > { %16142 = vmatpush3.msra.mxu0 %v17639_v38  ;;  %16153 = vmatpush3.msra.mxu1 %v17696_v47 }
 0x722   : > { %16143 = vmatprep.subr.mxu0 %v18533_v59  ;;  %16154 = vmatprep.subr.mxu1 %v18533_v59 }
 0x723   : > { %16144 = vmatpush3.msra.mxu0 %v17655_v40  ;;  %16145 = vmatprep.mubr.msk.f32.mxu0 %vm16451_vm2, %v18533_v59 }
 0x724   : > { %16155 = vmatpush3.msra.mxu1 %v17710_v49  ;;  %16156 = vmatprep.mubr.msk.f32.mxu1 %vm16451_vm2, %v18533_v59 }
 0x725   : > { %16146 = vmatmul.mubr.msk.f32.vlgmr.msra.gmra.mxu0 %vm10388_vm8, %v18061_v30  ;;  %16157 = vmatmul.mubr.msk.f32.vlgmr.msra.gmra.mxu1 %vm10388_vm8, %v18086_v29 }
 0x726   : > { %16159 = vmatprep.subr.mxu0 %v18533_v59  ;;  %16170 = vmatprep.subr.mxu1 %v18533_v59 }
 0x727   : > { %16160 = vmatpush3.msra.mxu0 %v17673_v44  ;;  %16171 = vmatpush3.msra.mxu1 %v17732_v51 }
 0x728   : > { %16161 = vmatprep.subr.mxu0 %v18533_v59  ;;  %16172 = vmatprep.subr.mxu1 %v18533_v59 }
 0x729   : > { %16162 = vmatpush3.msra.mxu0 %v17687_v46  ;;  %16173 = vmatpush3.msra.mxu1 %v17747_v52 }
 0x72a   : > { %16163 = vmatprep.subr.mxu0 %v18533_v59  ;;  %16174 = vmatprep.subr.mxu1 %v18533_v59 }
 0x72b   : > { %16164 = vmatpush3.msra.mxu0 %v17701_v48  ;;  %16175 = vmatpush3.msra.mxu1 %v17761_v1 }
 0x72c   : > { %16165 = vmatprep.subr.mxu0 %v18533_v59  ;;  %16176 = vmatprep.subr.mxu1 %v18533_v59 }
 0x72d   : > { %16166 = vmatpush3.msra.mxu0 %v17717_v58  ;;  %16167 = vmatprep.mubr.msk.f32.mxu0 %vm16451_vm2, %v18533_v59 }
 0x72e   : > { %16177 = vmatpush3.msra.mxu1 %v17775_v11  ;;  %16178 = vmatprep.mubr.msk.f32.mxu1 %vm16451_vm2, %v18533_v59 }
 0x72f   : > { %16168 = vmatmul.mubr.msk.f32.vlgmr.msra.gmra.mxu0 %vm10388_vm8, %v18111_v23  ;;  %16179 = vmatmul.mubr.msk.f32.vlgmr.msra.gmra.mxu1 %vm10388_vm8, %v18113_v28 }
 0x730   : > { %16181 = vmatprep.subr.mxu0 %v18533_v59  ;;  %16192 = vmatprep.subr.mxu1 %v18533_v59 }
 0x731   : > { %16182 = vmatpush3.msra.mxu0 %v17737_v60  ;;  %16193 = vmatpush3.msra.mxu1 %v17797_v56 }
 0x732   : > { %16183 = vmatprep.subr.mxu0 %v18533_v59  ;;  %16194 = vmatprep.subr.mxu1 %v18533_v59 }
 0x733   : > { %16184 = vmatpush3.msra.mxu0 %v17752_v53  ;;  %16195 = vmatpush3.msra.mxu1 %v17812_v27 }
 0x734   : > { %16185 = vmatprep.subr.mxu0 %v18533_v59  ;;  %16196 = vmatprep.subr.mxu1 %v18533_v59 }
 0x735   : > { %16186 = vmatpush3.msra.mxu0 %v17766_v37  ;;  %16197 = vmatpush3.msra.mxu1 %v17826_v0 }
 0x736   : > { %16187 = vmatprep.subr.mxu0 %v18533_v59  ;;  %16198 = vmatprep.subr.mxu1 %v18533_v59 }
 0x737   : > { %16188 = vmatpush3.msra.mxu0 %v17782_v54  ;;  %16189 = vmatprep.mubr.msk.f32.mxu0 %vm16451_vm2, %v18533_v59 }
 0x738   : > { %16199 = vmatpush3.msra.mxu1 %v18534_v18  ;;  %16200 = vmatprep.mubr.msk.f32.mxu1 %vm16451_vm2, %v18533_v59 }
 0x739   : > { %16190 = vmatmul.mubr.msk.f32.vlgmr.msra.gmra.mxu0 %vm10388_vm8, %v12537_v34  ;;  %16201 = vmatmul.mubr.msk.f32.vlgmr.msra.gmra.mxu1 %vm10388_vm8, %v13042_v31 }
 0x73a   : > { %16203 = vmatprep.subr.mxu0 %v18533_v59  ;;  %16214 = vmatprep.subr.mxu1 %v18533_v59 }
 0x73b   : > { %16204 = vmatpush3.msra.mxu0 %v17802_v57  ;;  %16215 = vmatpush3.msra.mxu1 %v18536_v41 }
 0x73c   : > { %16205 = vmatprep.subr.mxu0 %v18533_v59  ;;  %16216 = vmatprep.subr.mxu1 %v18533_v59 }
 0x73d   : > { %16206 = vmatpush3.msra.mxu0 %v17817_v21  ;;  %16217 = vmatpush3.msra.mxu1 %v18537_v20 }
 0x73e   : > { %16207 = vmatprep.subr.mxu0 %v18533_v59  ;;  %16218 = vmatprep.subr.mxu1 %v18533_v59 }
 0x73f   : > { %16208 = vmatpush3.msra.mxu0 %v17831_v5  ;;  %16219 = vmatpush3.msra.mxu1 %v18538_v3 }
 0x740   : > { %16209 = vmatprep.subr.mxu0 %v18533_v59  ;;  %16220 = vmatprep.subr.mxu1 %v18533_v59 }
 0x741   : > { %16210 = vmatpush3.msra.mxu0 %v18535_v22  ;;  %16211 = vmatprep.mubr.msk.f32.mxu0 %vm16451_vm2, %v18533_v59 }
 0x742   : > { %16221 = vmatpush3.msra.mxu1 %v18539_v32  ;;  %16222 = vmatprep.mubr.msk.f32.mxu1 %vm16451_vm2, %v18533_v59 }
 0x743   : > { %16212 = vmatmul.mubr.msk.f32.vlgmr.msra.gmra.mxu0 %vm10388_vm8, %v13117_v35  ;;  %16223 = vmatmul.mubr.msk.f32.vlgmr.msra.gmra.mxu1 %vm10388_vm8, %v13192_v36 }
 0x744   : > { %16225 = vmatprep.subr.mxu0 %v18533_v59  ;;  %16230 = vmatprep.subr.mxu1 %v18533_v59 }
 0x745   : > { %16227 = vmatprep.mubr.msk.f32.mxu0 %vm16451_vm2, %v18533_v59  ;;  %16232 = vmatprep.mubr.msk.f32.mxu1 %vm16451_vm2, %v18533_v59 }
 0x7a9   : > { %v11828_v38 = vpop.f32.mrf.mxu0 }
 0x7aa   : > { %v11900_v39 = vpop.f32.mrf.mxu1 }
 0x7ab   : > { %v11904_v40 = vmax.f32 %v11828_v38, %v11900_v39  ;;  %v16021_v43 = vpop.f32.mrf.mxu0 }
 0x7ac   : > { %v16026_v44 = vpop.f32.mrf.mxu1  ;;  %v14568_v43 = vld [vmem:[%s18506_s5 + $0x70] sm:$0xff] }
 0x7ad   : > { %11906 = vst.msk [vmem:[#allocation3] sm:$0x3] %vm11905_vm11, %v11904_v40  ;;  %v14569_v40 = vld [vmem:[%s18506_s5 + $0x78] sm:$0xff]  ;;  %v14566_v44 = vld [vmem:[%s18506_s5 + $0x60] sm:$0xff] }
 0x7b3   : > { %v11986_v45 = vpop.f32.mrf.mxu0  ;;  %v12059_v46 = vpop.f32.mrf.mxu1 }
 0x7b4   : > { %v12060_v47 = vadd.f32 %v12059_v46, %v11986_v45  ;;  %v14565_v45 = vld [vmem:[%s18506_s5 + $0x58] sm:$0xff]  ;;  %v14564_v46 = vld [vmem:[%s18506_s5 + $0x50] sm:$0xff] }
 0x7b5   : > { %v16037_v48 = vpop.f32.mrf.mxu0  ;;  %v16048_v49 = vpop.f32.mrf.mxu1 }
 0x7b6   : > { %v14562_v48 = vld [vmem:[%s18506_s5 + $0x40] sm:$0xff]  ;;  %v13424_v49 = vld [vmem:[%s18506_s5 + $0x38] sm:$0xff] }
 0x7bd   : > { %v12137_v58 = vpop.f32.mrf.mxu0  ;;  %v12216_v51 = vpop.f32.mrf.mxu1 }
 0x7be   : > { %v12141_v26 = vadd.f32 %v12137_v58, %v12060_v47  ;;  %v14563_v47 = vld [vmem:[%s18506_s5 + $0x48] sm:$0xff]  ;;  %v13425_v58 = vld [vmem:[#allocation3 + $0x1] sm:$0x1] }
 0x7bf   : > { %v16059_v60 = vpop.f32.mrf.mxu0  ;;  %v16070_v52 = vpop.f32.mrf.mxu1 }
 0x7c0   : > { %v12220_v50 = vadd.f32 %v12216_v51, %v12141_v26  ;;  %v13423_v51 = vld [vmem:[%s18506_s5 + $0x30] sm:$0xff]  ;;  %v13422_v60 = vld [vmem:[%s18506_s5 + $0x28] sm:$0xff]  ;;  %v13421_v52 = vld [vmem:[%s18506_s5 + $0x20] sm:$0xff] }
 0x7c1   : > { %v14581_v26 = vld [vmem:[%s18506_s5 + $0xc0] sm:$0xff] }
 0x7c7   : > { %v12295_v53 = vpop.f32.mrf.mxu0  ;;  %v12374_v1 = vpop.f32.mrf.mxu1 }
 0x7c8   : > { %v12299_v2 = vadd.f32 %v12295_v53, %v12220_v50  ;;  %v13420_v53 = vld [vmem:[%s18506_s5 + $0x18] sm:$0xff] }
 0x7c9   : > { %v16081_v37 = vpop.f32.mrf.mxu0  ;;  %v16092_v11 = vpop.f32.mrf.mxu1 }
 0x7ca   : > { %v12378_v8 = vadd.f32 %v12374_v1, %v12299_v2  ;;  %v13419_v1 = vld [vmem:[%s18506_s5 + $0x10] sm:$0xff]  ;;  %v13418_v37 = vld [vmem:[%s18506_s5 + $0x8] sm:$0xff]  ;;  %v13417_v11 = vld [vmem:[%s18506_s5] sm:$0xff] }
 0x7d1   : > { %v12453_v54 = vpop.f32.mrf.mxu0  ;;  %v12532_v56 = vpop.f32.mrf.mxu1 }
 0x7d2   : > { %v12457_v30 = vadd.f32 %v12453_v54, %v12378_v8  ;;  %v14588_v54 = vld [vmem:[%s18506_s5 + $0xf8] sm:$0xff]  ;;  %v13766_v8 = vld [vmem:[%s18508_s7 + $0x68] sm:$0xff] }
 0x7d3   : > { %v16103_v57 = vpop.f32.mrf.mxu0  ;;  %v16114_v27 = vpop.f32.mrf.mxu1 }
 0x7d4   : > { %v12536_v18 = vadd.f32 %v12532_v56, %v12457_v30  ;;  %v13416_v56 = vld [vmem:[#allocation3] sm:$0x1]  ;;  %v14577_v27 = vld [vmem:[%s18506_s5 + $0xa8] sm:$0xff]  ;;  %v13764_v30 = vld [vmem:[%s18508_s7 + $0x58] sm:$0xff] }
 0x7d5   : > { %v14587_v57 = vld [vmem:[%s18506_s5 + $0xf0] sm:$0xff] }
 0x7db   : > { %v12611_v21 = vpop.f32.mrf.mxu0  ;;  %v12684_v0 = vpop.f32.mrf.mxu1 }
 0x7dc   : > { %v12615_v22 = vadd.f32 %v12611_v21, %v12536_v18  ;;  %v14586_v21 = vld [vmem:[%s18506_s5 + $0xe8] sm:$0xff] }
 0x7dd   : > { %v16125_v5 = vpop.f32.mrf.mxu0  ;;  %v16136_v12 = vpop.f32.mrf.mxu1  ;;  %v13762_v18 = vld [vmem:[%s18508_s7 + $0x48] sm:$0xff] }
 0x7de   : > { %v12616_v34 = vadd.f32 %v18009_v19, %v12615_v22  ;;  %v14585_v5 = vld [vmem:[%s18506_s5 + $0xe0] sm:$0xff]  ;;  %v14575_v12 = vld [vmem:[%s18506_s5 + $0x98] sm:$0xff] }
 0x7df   : > { %v13761_v22 = vld [vmem:[%s18508_s7 + $0x40] sm:$0xff] }
 0x7e0   : > { %v12617_v36 = vmax.f32 %v12616_v34, 0.0  ;;  %v13757_v34 = vld [vmem:[%s18508_s7 + $0x20] sm:$0xff] }
 0x7e5   : > { %v12754_v17 = vpop.f32.mrf.mxu0  ;;  %v12824_v7 = vpop.f32.mrf.mxu1 }
 0x7e6   : > { %v12755_v25 = vadd.f32 %v12754_v17, %v12684_v0  ;;  %v14576_v0 = vld [vmem:[%s18506_s5 + $0xa0] sm:$0xff]  ;;  %v14584_v17 = vld [vmem:[%s18506_s5 + $0xd8] sm:$0xff] }
 0x7e7   : > { %v16147_v9 = vpop.f32.mrf.mxu0  ;;  %v16158_v14 = vpop.f32.mrf.mxu1 }
 0x7e8   : > { %v12828_v15 = vadd.f32 %v12824_v7, %v12755_v25  ;;  %v14574_v7 = vld [vmem:[%s18506_s5 + $0x90] sm:$0xff]  ;;  %v14573_v14 = vld [vmem:[%s18506_s5 + $0x88] sm:$0xff] }
 0x7e9   : > { %v14583_v9 = vld [vmem:[%s18506_s5 + $0xd0] sm:$0xff] }
 0x7ef   : > { %v12895_v16 = vpop.f32.mrf.mxu0  ;;  %v12966_v24 = vpop.f32.mrf.mxu1 }
 0x7f0   : > { %v12899_v4 = vadd.f32 %v12895_v16, %v12828_v15  ;;  %v14582_v16 = vld [vmem:[%s18506_s5 + $0xc8] sm:$0xff]  ;;  %v13768_v15 = vld [vmem:[%s18508_s7 + $0x78] sm:$0xff] }
 0x7f1   : > { %v16169_v42 = vpop.f32.mrf.mxu0  ;;  %v16180_v33 = vpop.f32.mrf.mxu1 }
 0x7f2   : > { %v12970_v13 = vadd.f32 %v12966_v24, %v12899_v4  ;;  %v14572_v24 = vld [vmem:[%s18506_s5 + $0x80] sm:$0xff] }
 0x7f9   : > { %v13037_v10 = vpop.f32.mrf.mxu0  ;;  %v13112_v55 = vpop.f32.mrf.mxu1 }
 0x7fa   : > { %v13041_v29 = vadd.f32 %v13037_v10, %v12970_v13 }
 0x7fb   : > { %v16191_v63 = vpop.f32.mrf.mxu0  ;;  %v16202_v6 = vpop.f32.mrf.mxu1 }
 0x7fc   : > { %v13116_v23 = vadd.f32 %v13112_v55, %v13041_v29  ;;  %v13767_v55 = vld [vmem:[%s18508_s7 + $0x70] sm:$0xff]  ;;  %v13765_v63 = vld [vmem:[%s18508_s7 + $0x60] sm:$0xff] }
 0x7fd   : > { %v13763_v29 = vld [vmem:[%s18508_s7 + $0x50] sm:$0xff] }
 0x803   : > { %v13187_v28 = vpop.f32.mrf.mxu0  ;;  %v13262_v41 = vpop.f32.mrf.mxu1 }
 0x804   : > { %v13191_v20 = vadd.f32 %v13187_v28, %v13116_v23  ;;  %v13760_v23 = vld [vmem:[%s18508_s7 + $0x38] sm:$0xff]  ;;  %v13759_v28 = vld [vmem:[%s18508_s7 + $0x30] sm:$0xff] }
 0x805   : > { %v16213_v3 = vpop.f32.mrf.mxu0  ;;  %v16224_v32 = vpop.f32.mrf.mxu1 }
 0x806   : > { %v13266_v31 = vadd.f32 %v13262_v41, %v13191_v20  ;;  %v13758_v41 = vld [vmem:[%s18508_s7 + $0x28] sm:$0xff] }
 0x808   : > { %v13267_v35 = vadd.f32 %v18009_v19, %v13266_v31  ;;  %v14579_v19 = vld [vmem:[%s18506_s5 + $0xb8] sm:$0xff] }
 0x809   : > { %v13756_v31 = vld [vmem:[%s18508_s7 + $0x18] sm:$0xff] }
 0x80a   : > { %v13268_v38 = vmax.f32 %v13267_v35, 0.0  ;;  %v13755_v35 = vld [vmem:[%s18508_s7 + $0x10] sm:$0xff] }
 0x80c   : > { %v13269_v39 = vmax.f32 %v12617_v36, %v13268_v38  ;;  %v13754_v36 = vld [vmem:[%s18508_s7 + $0x8] sm:$0xff]  ;;  %v13753_v38 = vld [vmem:[%s18508_s7] sm:$0xff] }
 0x80e   : > { %16226 = vmatpush3.msk.msra.mxu0 %vm11758_vm9, %v13269_v39  ;;  %16231 = vmatpush3.msk.msra.mxu1 %vm11758_vm9, %v13269_v39 }
 0x80f   : > { %16228 = vmatmul.mubr.msk.f32.vlgmr.msra.gmra.mxu0 %vm11755_vm10, %v16750_v61  ;;  %16233 = vmatmul.mubr.msk.f32.vlgmr.msra.gmra.mxu1 %vm11755_vm10, %v16753_v62  ;;  %v14578_v61 = vld [vmem:[%s18506_s5 + $0xb0] sm:$0xff]  ;;  %v14567_v62 = vld [vmem:[%s18506_s5 + $0x68] sm:$0xff] }
 0x810   : > { %16235 = vmatprep.subr.mxu1 %v18533_v59  ;;  %16251 = vmatprep.mubr.msk.f32.mxu1 %vm16451_vm2, %v18533_v59 }
 0x811   : > { %16236 = vmatpush3.msra.mxu1 %v14569_v40  ;;  %16273 = vmatprep.subr.mxu0 %v18533_v59 }
 0x812   : > { %16237 = vmatprep.subr.mxu1 %v18533_v59  ;;  %16274 = vmatpush3.msra.mxu0 %v14579_v19 }
 0x813   : > { %16238 = vmatpush3.msra.mxu1 %v14568_v43  ;;  %16275 = vmatprep.subr.mxu0 %v18533_v59  ;;  %v13750_v43 = vld [vmem:[%s18507_s6] sm:$0x1] }
 0x814   : > { %16239 = vmatprep.subr.mxu1 %v18533_v59  ;;  %16276 = vmatpush3.msra.mxu0 %v14578_v61 }
 0x815   : > { %16240 = vmatpush3.msra.mxu1 %v14567_v62  ;;  %16277 = vmatprep.subr.mxu0 %v18533_v59 }
 0x816   : > { %16241 = vmatprep.subr.mxu1 %v18533_v59  ;;  %16289 = vmatprep.mubr.msk.f32.mxu0 %vm16451_vm2, %v18533_v59 }
 0x817   : > { %16242 = vmatpush3.msra.mxu1 %v14566_v44  ;;  %16278 = vmatpush3.msra.mxu0 %v14577_v27 }
 0x818   : > { %16243 = vmatprep.subr.mxu1 %v18533_v59  ;;  %16279 = vmatprep.subr.mxu0 %v18533_v59 }
 0x819   : > { %16244 = vmatpush3.msra.mxu1 %v14565_v45  ;;  %16280 = vmatpush3.msra.mxu0 %v14576_v0 }
 0x81a   : > { %16245 = vmatprep.subr.mxu1 %v18533_v59  ;;  %16281 = vmatprep.subr.mxu0 %v18533_v59 }
 0x81b   : > { %16246 = vmatpush3.msra.mxu1 %v14564_v46  ;;  %16282 = vmatpush3.msra.mxu0 %v14575_v12 }
 0x81c   : > { %16247 = vmatprep.subr.mxu1 %v18533_v59  ;;  %16283 = vmatprep.subr.mxu0 %v18533_v59 }
 0x81d   : > { %16248 = vmatpush3.msra.mxu1 %v14563_v47  ;;  %16284 = vmatpush3.msra.mxu0 %v14574_v7 }
 0x81e   : > { %16249 = vmatprep.subr.mxu1 %v18533_v59  ;;  %16285 = vmatprep.subr.mxu0 %v18533_v59 }
 0x81f   : > { %16250 = vmatpush3.msra.mxu1 %v14562_v48  ;;  %16286 = vmatpush3.msra.mxu0 %v14573_v14 }
 0x820   : > { %16252 = vmatmul.mubr.msk.f32.vlgmr.msra.gmra.mxu1 %vm13435_vm12, %v13425_v58  ;;  %16254 = vmatprep.subr.mxu1 %v18533_v59 }
 0x821   : > { %16255 = vmatpush3.msra.mxu1 %v13424_v49  ;;  %16270 = vmatprep.mubr.msk.f32.mxu1 %vm16451_vm2, %v18533_v59 }
 0x822   : > { %16256 = vmatprep.subr.mxu1 %v18533_v59  ;;  %16287 = vmatprep.subr.mxu0 %v18533_v59 }
 0x823   : > { %16257 = vmatpush3.msra.mxu1 %v13423_v51  ;;  %16288 = vmatpush3.msra.mxu0 %v14572_v24 }
 0x824   : > { %16258 = vmatprep.subr.mxu1 %v18533_v59  ;;  %16311 = vmatprep.subr.mxu0 %v18533_v59 }
 0x825   : > { %16259 = vmatpush3.msra.mxu1 %v13422_v60 }
 0x826   : > { %16260 = vmatprep.subr.mxu1 %v18533_v59 }
 0x827   : > { %16261 = vmatpush3.msra.mxu1 %v13421_v52 }
 0x828   : > { %16262 = vmatprep.subr.mxu1 %v18533_v59 }
 0x829   : > { %16263 = vmatpush3.msra.mxu1 %v13420_v53 }
 0x82a   : > { %16264 = vmatprep.subr.mxu1 %v18533_v59 }
 0x82b   : > { %16265 = vmatpush3.msra.mxu1 %v13419_v1 }
 0x82c   : > { %16266 = vmatprep.subr.mxu1 %v18533_v59 }
 0x82d   : > { %16267 = vmatpush3.msra.mxu1 %v13418_v37 }
 0x82e   : > { %16268 = vmatprep.subr.mxu1 %v18533_v59 }
 0x82f   : > { %16269 = vmatpush3.msra.mxu1 %v13417_v11 }
 0x830   : > { %16271 = vmatmul.mubr.msk.f32.vlgmr.msra.gmra.mxu1 %vm13435_vm12, %v13416_v56  ;;  %16292 = vmatprep.subr.mxu1 %v18533_v59 }
 0x831   : > { %16293 = vmatpush3.msra.mxu1 %v14588_v54  ;;  %16308 = vmatprep.mubr.msk.f32.mxu1 %vm16451_vm2, %v18533_v59 }
 0x832   : > { %16294 = vmatprep.subr.mxu1 %v18533_v59 }
 0x833   : > { %16295 = vmatpush3.msra.mxu1 %v14587_v57 }
 0x834   : > { %16296 = vmatprep.subr.mxu1 %v18533_v59 }
 0x835   : > { %16297 = vmatpush3.msra.mxu1 %v14586_v21 }
 0x836   : > { %16298 = vmatprep.subr.mxu1 %v18533_v59 }
 0x837   : > { %16299 = vmatpush3.msra.mxu1 %v14585_v5 }
 0x838   : > { %16300 = vmatprep.subr.mxu1 %v18533_v59 }
 0x839   : > { %16301 = vmatpush3.msra.mxu1 %v14584_v17 }
 0x83a   : > { %16302 = vmatprep.subr.mxu1 %v18533_v59 }
 0x83b   : > { %16303 = vmatpush3.msra.mxu1 %v14583_v9 }
 0x83c   : > { %16304 = vmatprep.subr.mxu1 %v18533_v59 }
 0x83d   : > { %16305 = vmatpush3.msra.mxu1 %v14582_v16 }
 0x83e   : > { %16306 = vmatprep.subr.mxu1 %v18533_v59 }
 0x83f   : > { %16307 = vmatpush3.msra.mxu1 %v14581_v26 }
 0x8cf   : > { %v13339_v42 = vpop.f32.mrf.mxu0  ;;  %v13409_v33 = vpop.f32.mrf.mxu1 }
 0x8d0   : > { %v13413_v25 = vmax.f32 %v13339_v42, %v13409_v33 }
 0x8d1   : > { %v16229_v50 = vpop.f32.mrf.mxu0  ;;  %v16234_v2 = vpop.f32.mrf.mxu1 }
 0x8d2   : > { %13415 = vst.msk [vmem:[#allocation3 + $0x2] sm:$0x3] %vm11905_vm11, %v13413_v25 }
 0x8d9   : > { %v13582_v4 = vld [vmem:[#allocation3 + $0x2] sm:$0x1]  ;;  %v13666_v10 = vld [vmem:[#allocation3 + $0x3] sm:$0x1] }
 0x8da   : > { %16290 = vmatmul.mubr.msk.f32.vlgmr.msra.gmra.mxu0 %vm13435_vm12, %v13582_v4  ;;  %16309 = vmatmul.mubr.msk.f32.vlgmr.msra.gmra.mxu1 %vm13435_vm12, %v13666_v10 }
 0x8db   : > { %16312 = vmatpush3.msra.mxu0 %v13768_v15  ;;  %16343 = vmatprep.mubr.msk.f32.mxu0 %vm16451_vm2, %v18533_v59 }
 0x8dc   : > { %16313 = vmatprep.subr.mxu0 %v18533_v59 }
 0x8dd   : > { %16314 = vmatpush3.msra.mxu0 %v13767_v55 }
 0x8de   : > { %16315 = vmatprep.subr.mxu0 %v18533_v59 }
 0x8df   : > { %16316 = vmatpush3.msra.mxu0 %v13766_v8 }
 0x8e0   : > { %v13505_v6 = vpop.f32.mrf.mxu1  ;;  %16317 = vmatprep.subr.mxu0 %v18533_v59 }
 0x8e1   : > { %16318 = vmatpush3.msra.mxu0 %v13765_v63 }
 0x8e2   : > { %v16253_v13 = vpop.f32.mrf.mxu1  ;;  %16319 = vmatprep.subr.mxu0 %v18533_v59 }
 0x8e3   : > { %16320 = vmatpush3.msra.mxu0 %v13764_v30 }
 0x8e4   : > { %16321 = vmatprep.subr.mxu0 %v18533_v59 }
 0x8e5   : > { %16322 = vmatpush3.msra.mxu0 %v13763_v29 }
 0x8e6   : > { %16323 = vmatprep.subr.mxu0 %v18533_v59 }
 0x8e7   : > { %16324 = vmatpush3.msra.mxu0 %v13762_v18 }
 0x8e8   : > { %16325 = vmatprep.subr.mxu0 %v18533_v59 }
 0x8e9   : > { %16326 = vmatpush3.msra.mxu0 %v13761_v22 }
 0x8ea   : > { %16327 = vmatprep.subr.mxu0 %v18533_v59 }
 0x8eb   : > { %16328 = vmatpush3.msra.mxu0 %v13760_v23 }
 0x8ec   : > { %16329 = vmatprep.subr.mxu0 %v18533_v59 }
 0x8ed   : > { %16330 = vmatpush3.msra.mxu0 %v13759_v28 }
 0x8ee   : > { %16331 = vmatprep.subr.mxu0 %v18533_v59 }
 0x8ef   : > { %16332 = vmatpush3.msra.mxu0 %v13758_v41 }
 0x8f0   : > { %v13578_v20 = vpop.f32.mrf.mxu1  ;;  %16333 = vmatprep.subr.mxu0 %v18533_v59 }
 0x8f1   : > { %v13579_v3 = vadd.f32 %v13578_v20, %v13505_v6  ;;  %16334 = vmatpush3.msra.mxu0 %v13757_v34 }
 0x8f2   : > { %v16272_v32 = vpop.f32.mrf.mxu1  ;;  %16335 = vmatprep.subr.mxu0 %v18533_v59 }
 0x8f3   : > { %16336 = vmatpush3.msra.mxu0 %v13756_v31 }
 0x8f4   : > { %16337 = vmatprep.subr.mxu0 %v18533_v59 }
 0x8f5   : > { %16338 = vmatpush3.msra.mxu0 %v13755_v35 }
 0x8f6   : > { %16339 = vmatprep.subr.mxu0 %v18533_v59 }
 0x8f7   : > { %16340 = vmatpush3.msra.mxu0 %v13754_v36 }
 0x8f8   : > { %16341 = vmatprep.subr.mxu0 %v18533_v59  ;;  %v13769_v59 = vld [vmem:[%s18509_s8] sm:$0x1] }
 0x8f9   : > { %16342 = vmatpush3.msra.mxu0 %v13753_v38 }
 0x99a   : > { %v13661_v39 = vpop.f32.mrf.mxu0  ;;  %v13745_v40 = vpop.f32.mrf.mxu1 }
 0x99b   : > { %v13665_v19 = vadd.f32 %v13661_v39, %v13579_v3 }
 0x99c   : > { %v16291_v61 = vpop.f32.mrf.mxu0  ;;  %v16310_v62 = vpop.f32.mrf.mxu1 }
 0x99d   : > { %v13749_v44 = vadd.f32 %v13745_v40, %v13665_v19 }
 0x99f   : > { %v13751_v45 = vadd.f32 %v13750_v43, %v13749_v44 }
 0x9a1   : > { %v13752_v46 = vmax.f32 %v13751_v45, 0.0 }
 0x9a3   : > { %16344 = vmatmul.mubr.f32.vlgmr.msra.gmra.mxu0 %v13752_v46 }
 0xa63   : > { %v13836_v47 = vpop.f32.mrf.mxu0 }
 0xa64   : > { %v13837_v48 = vadd.f32 %v13836_v47, %v13769_v59 }
 0xa65   : > { %v16345_v49 = vpop.f32.mrf.mxu0 }
 0xa66   : > { %13841 = vst.msk [vmem:[%s324_s23] sm:$0x1] %vm13840_vm13, %v13837_v48 }
 0xa67   : > { %16401 = shalt.err (!%p16398_p3)
}
 0xa68   : > { %s16402_s17 = scalar_lea.hbm %s18466_s21, 16  ;;  %s16406_s23 = scalar_lea.hbm %s18510_s9, 32 }
 0xa69   : > { %p16403_p4 = scmp.ne.s32.totalorder %s18466_s21, %s16402_s17  ;;  %p16407_p9 = scmp.lt.s32.totalorder %s18466_s21, %s18510_s9 }
 0xa6a   : > { %p16408_p10 = scmp.lt.s32.totalorder %s16406_s23, %s16402_s17 }
 0xa6b   : > { %p16404_p7 = pnand %p16403_p4, %p16541_p5 }
 0xa6c   : > { %p16409_p11 = por %p16408_p10, %p16407_p9 }
 0xa6d   : > { %p16405_p8 = pneg %p16404_p7 }
 0xa6f   : > { %p16410_p12 = pnand %p16409_p11, %p16405_p8 }
 0xa71   : > { %16413 = shalt.err (!%p16410_p12)
}
 0xa72   : > { %16346 = dma.vmem_to_hbm [thread:$0]  (%p16541_p5), %s13856_s24, 16, %s18466_s21, %s13843_s27  }
 0xa73 PF: > { %p16352_p13 = scmp.ge.s32.totalorder %s16448_s12, 2  ;;  %s13867_s28 = sand.u32 1, %s16436_s30  }
 0xa74   : > { %s13868_s13 = scalar_lea.sflag [#allocation5], %s13867_s28 }
 0xa75   : > { %p16349_p0 = pnand %p16352_p13, %p16545_p6 }
 0xa77   : > { %p16350_p1 = pneg %p16349_p0 }
 0xa79   : > { %16431 = dma.done.wait (%p16350_p1), %s13868_s13, 16  }
 0xa7a   : > { %16433 = vsyncadd (%p16350_p1), %s13868_s13, 4294967280  ;;  %p19_p2 = scmp.ge.s32.totalorder %s16528_s15, 4   ;;  %s18540_s30 = smov %s16440_s10 }
 0xa7b   : > { %s18541_s10 = smov %s16444_s11  ;;  %s18542_s11 = smov %s16539_s18 }
 0xa7c   : > { %s18543_s12 = smov %s16528_s15  ;;  %21 = sbr.rel (!%p19_p2) target bundleno = 3 (0x3), region = 129 }
 0xa81   :  { %13872 = vsyncpa [#allocation5], 1 }
 0xa82   :  { %13874 = vsyncpa [#allocation5 + $0x1], 1 }

</bundles_post_ra>
